<compile_context>
chip_gen: v6e
topology: v6e:2x2x1
jax: 0.10.0
libtpu: 0.0.40
codegen_flags: <defaults>
</compile_context>

<pallas_src>
import functools
import math

import jax
import jax.numpy as jnp
from jax.experimental import pallas as pl
from jax.experimental.pallas import tpu as pltpu


# ----------------------------------------------------------------------------
# Pallas kernels
# ----------------------------------------------------------------------------
def _fused_mm_kernel(*refs, relu, has_res):
    # Tiled: acc[tm,tn] += x[tm,tk] @ w[tk,tn]; epilogue (BN scale/bias
    # [+residual] [+ReLU]) only on the last K step.
    if has_res:
        x_ref, w_ref, s_ref, b_ref, r_ref, o_ref, acc_ref = refs
    else:
        x_ref, w_ref, s_ref, b_ref, o_ref, acc_ref = refs

    @pl.when(pl.program_id(2) == 0)
    def _():
        acc_ref[...] = jnp.zeros_like(acc_ref)

    acc_ref[...] += jnp.dot(
        x_ref[...], w_ref[...], preferred_element_type=jnp.float32
    )

    @pl.when(pl.program_id(2) == pl.num_programs(2) - 1)
    def _():
        y = acc_ref[...] * s_ref[...] + b_ref[...]
        if has_res:
            y = y + r_ref[...]
        if relu:
            y = jnp.maximum(y, 0.0)
        o_ref[...] = y.astype(o_ref.dtype)


def _max_axis0_kernel(p_ref, o_ref):
    # reduce max over the (small) leading patch axis
    o_ref[...] = jnp.max(p_ref[...], axis=0)


def _global_max_kernel(x_ref, o_ref):
    # adaptive_max_pool2d(output_size=1): max over the spatial (H*W) axis
    o_ref[...] = jnp.max(x_ref[...], axis=1)


# ----------------------------------------------------------------------------
# Tiling helpers
# ----------------------------------------------------------------------------
def _round_up(x, m):
    return ((x + m - 1) // m) * m


def _choose_tile(dim, align, max_tile):
    """Return (padded_dim, tile) with padded_dim % tile == 0, tile % align == 0."""
    dp = _round_up(dim, align)
    if dp <= max_tile:
        return dp, dp
    best = None
    t = align
    while t <= max_tile:
        if dp % t == 0:
            best = t
        t += align
    if best is not None:
        return dp, best
    return _round_up(dim, max_tile), max_tile


# ----------------------------------------------------------------------------
# Pallas wrappers
# ----------------------------------------------------------------------------
def fused_matmul(x, w, scale, bias, *, relu=True, residual=None):
    """Y = act((X @ W) * scale + bias [+ residual]); bf16 MXU, f32 accumulate."""
    M, K = x.shape
    Kw, N = w.shape
    assert K == Kw

    Mp, tm = _choose_tile(M, 16, 256)     # bf16 sublane pack = 16
    Kp, tk = _choose_tile(K, 128, 1024)
    Np, tn = _choose_tile(N, 128, 256)    # lane-dense (>=128) output stores

    xp = jnp.pad(x, ((0, Mp - M), (0, Kp - K))).astype(jnp.bfloat16)
    wp = jnp.pad(w, ((0, Kp - K), (0, Np - N))).astype(jnp.bfloat16)
    sp = jnp.pad(scale.astype(jnp.float32), (0, Np - N)).reshape(1, Np)
    bp = jnp.pad(bias.astype(jnp.float32), (0, Np - N)).reshape(1, Np)

    has_res = residual is not None
    args = [xp, wp, sp, bp]
    in_specs = [
        pl.BlockSpec((tm, tk), lambda i, j, k: (i, k)),
        pl.BlockSpec((tk, tn), lambda i, j, k: (k, j)),
        pl.BlockSpec((1, tn), lambda i, j, k: (0, j)),
        pl.BlockSpec((1, tn), lambda i, j, k: (0, j)),
    ]
    if has_res:
        rp = jnp.pad(
            residual.astype(jnp.float32), ((0, Mp - M), (0, Np - N))
        )
        args.append(rp)
        in_specs.append(pl.BlockSpec((tm, tn), lambda i, j, k: (i, j)))

    kern = functools.partial(_fused_mm_kernel, relu=relu, has_res=has_res)
    out = pl.pallas_call(
        kern,
        out_shape=jax.ShapeDtypeStruct((Mp, Np), jnp.float32),
        grid=(Mp // tm, Np // tn, Kp // tk),
        in_specs=in_specs,
        out_specs=pl.BlockSpec((tm, tn), lambda i, j, k: (i, j)),
        scratch_shapes=[pltpu.VMEM((tm, tn), jnp.float32)],
        compiler_params=pltpu.CompilerParams(
            dimension_semantics=("parallel", "parallel", "arbitrary")
        ),
    )(*args)
    if Mp != M or Np != N:
        out = out[:M, :N]
    return out


def max_over_patches(patches):
    # patches: [P, M, C] -> [M, C]
    P, M, C = patches.shape
    return pl.pallas_call(
        _max_axis0_kernel,
        out_shape=jax.ShapeDtypeStruct((M, C), jnp.float32),
        grid=(1,),
        in_specs=[pl.BlockSpec((P, M, C), lambda i: (0, 0, 0))],
        out_specs=pl.BlockSpec((M, C), lambda i: (0, 0)),
        compiler_params=pltpu.CompilerParams(dimension_semantics=("arbitrary",)),
    )(patches)


def global_max_pool(x_nhwc):
    # F.adaptive_max_pool2d(out, 1) + flatten: [B, H, W, C] -> [B, C]
    B, H, W, C = x_nhwc.shape
    xr = x_nhwc.reshape(B, H * W, C)
    return pl.pallas_call(
        _global_max_kernel,
        out_shape=jax.ShapeDtypeStruct((B, C), jnp.float32),
        grid=(1,),
        in_specs=[pl.BlockSpec((B, H * W, C), lambda i: (0, 0, 0))],
        out_specs=pl.BlockSpec((B, C), lambda i: (0, 0)),
        compiler_params=pltpu.CompilerParams(dimension_semantics=("arbitrary",)),
    )(xr)


# ----------------------------------------------------------------------------
# Glue: im2col, conv+BN, max-pool, BasicBlock, fused fc heads
# ----------------------------------------------------------------------------
def _im2col(x_nhwc, kh, kw, stride, pad, pad_value=0.0):
    B, H, W, C = x_nhwc.shape
    xp = jnp.pad(
        x_nhwc, ((0, 0), (pad, pad), (pad, pad), (0, 0)), constant_values=pad_value
    )
    Ho = (H + 2 * pad - kh) // stride + 1
    Wo = (W + 2 * pad - kw) // stride + 1
    cols = []
    for dy in range(kh):
        for dx in range(kw):
            cols.append(
                xp[
                    :,
                    dy : dy + stride * (Ho - 1) + 1 : stride,
                    dx : dx + stride * (Wo - 1) + 1 : stride,
                    :,
                ]
            )
    patches = jnp.stack(cols, axis=3)  # [B, Ho, Wo, kh*kw, C]
    return patches.reshape(B * Ho * Wo, kh * kw * C), Ho, Wo


def conv_bn(x_nhwc, w_oihw, bn, stride, pad, relu=True, residual=None):
    """conv2d (no bias) + folded BN (+ optional residual) + optional ReLU."""
    B = x_nhwc.shape[0]
    Cout, Cin, kh, kw = w_oihw.shape
    patches, Ho, Wo = _im2col(x_nhwc, kh, kw, stride, pad)
    wm = jnp.transpose(w_oihw, (2, 3, 1, 0)).reshape(kh * kw * Cin, Cout)
    scale, bias = bn
    res = None if residual is None else residual.reshape(B * Ho * Wo, Cout)
    y = fused_matmul(patches, wm, scale, bias, relu=relu, residual=res)
    return y.reshape(B, Ho, Wo, Cout)


def max_pool2d_3x3_s2_p1(x_nhwc):
    B, H, W, C = x_nhwc.shape
    k, s, pad = 3, 2, 1
    xp = jnp.pad(
        x_nhwc, ((0, 0), (pad, pad), (pad, pad), (0, 0)), constant_values=-jnp.inf
    )
    Ho = (H + 2 * pad - k) // s + 1
    Wo = (W + 2 * pad - k) // s + 1
    cols = []
    for dy in range(k):
        for dx in range(k):
            cols.append(
                xp[:, dy : dy + s * (Ho - 1) + 1 : s, dx : dx + s * (Wo - 1) + 1 : s, :]
            )
    patches = jnp.stack(cols, axis=0).reshape(k * k, B * Ho * Wo, C)
    out = max_over_patches(patches)
    return out.reshape(B, Ho, Wo, C)


def basic_block(x_nhwc, bp, stride):
    if "ds_w" in bp:
        shortcut = conv_bn(
            x_nhwc, bp["ds_w"], bp["ds_bn"], stride=stride, pad=0, relu=False
        )
    else:
        shortcut = x_nhwc
    out = conv_bn(x_nhwc, bp["w1"], bp["bn1"], stride=stride, pad=1, relu=True)
    out = conv_bn(
        out, bp["w2"], bp["bn2"], stride=1, pad=1, relu=True, residual=shortcut
    )
    return out


def fc_heads(flat2, flat3, flat4, params):
    """fc2(flat2) + fc3(flat3) + fc4(flat4), fused into 2 GEMMs:
       stage 1: block-diagonal Linear+BN+ReLU over concat(flats)
       stage 2: concatenated second Linear with summed bias."""
    heads = (params["fc2"], params["fc3"], params["fc4"])
    cins = [p["w1"].shape[1] for p in heads]     # 128, 256, 512
    K = sum(cins)
    H = 512 * len(heads)

    w1 = jnp.zeros((K, H), jnp.float32)
    ko = 0
    scales, biases = [], []
    for idx, p in enumerate(heads):
        cin = p["w1"].shape[1]
        w1 = w1.at[ko : ko + cin, idx * 512 : (idx + 1) * 512].set(p["w1"].T)
        scales.append(p["bn"][0])
        biases.append(p["bn"][1])
        ko += cin
    scale = jnp.concatenate(scales)
    bias = jnp.concatenate(biases)
    w2 = jnp.concatenate([p["w2"].T for p in heads], axis=0)     # [1536, nc]
    b2 = heads[0]["b2"] + heads[1]["b2"] + heads[2]["b2"]
    nc = w2.shape[1]

    x = jnp.concatenate([flat2, flat3, flat4], axis=1)            # [B, 896]
    h = fused_matmul(x, w1, scale, bias, relu=True)               # [B, 1536]
    return fused_matmul(h, w2, jnp.ones((nc,), jnp.float32), b2, relu=False)


# ----------------------------------------------------------------------------
# Parameters (deterministic, in-script)
# ----------------------------------------------------------------------------
def _bn_fold(gamma, beta, mean, var, eps=1e-5):
    scale = gamma / jnp.sqrt(var + eps)
    return scale, beta - mean * scale


def _bn_identity(c):
    ones = jnp.ones((c,), jnp.float32)
    zeros = jnp.zeros((c,), jnp.float32)
    return _bn_fold(ones, zeros, zeros, ones)


def _conv_init(key, cout, cin, kh, kw):
    n = kh * kw * cout
    return jax.random.normal(key, (cout, cin, kh, kw), jnp.float32) * math.sqrt(2.0 / n)


def init_params(key, n_bands, num_classes, layers=(1, 1, 1, 1)):
    keys = iter(jax.random.split(key, 64))
    params = {
        "conv1": _conv_init(next(keys), 64, n_bands, 7, 7),
        "bn1": _bn_identity(64),
    }
    inplanes = 64
    for li, (planes, nblocks, stride) in enumerate(
        zip((64, 128, 256, 512), layers, (1, 2, 2, 2)), start=1
    ):
        blocks = []
        for bi in range(nblocks):
            s = stride if bi == 0 else 1
            bp = {}
            if s != 1 or inplanes != planes:  # downsample branch (1x1 conv + BN)
                bp["ds_w"] = _conv_init(next(keys), planes, inplanes, 1, 1)
                bp["ds_bn"] = _bn_identity(planes)
            bp["w1"] = _conv_init(next(keys), planes, inplanes, 3, 3)
            bp["bn1"] = _bn_identity(planes)
            bp["w2"] = _conv_init(next(keys), planes, planes, 3, 3)
            bp["bn2"] = _bn_identity(planes)
            blocks.append(bp)
            inplanes = planes
        params[f"layer{li}"] = blocks

    def fc_init(k, cin):
        k1, k2, k3 = jax.random.split(k, 3)
        return {
            "w1": jax.random.normal(k1, (512, cin), jnp.float32) * 0.05,
            "bn": _bn_identity(512),
            "w2": jax.random.normal(k2, (num_classes, 512), jnp.float32) * 0.05,
            "b2": jax.random.normal(k3, (num_classes,), jnp.float32) * 0.05,
        }

    params["fc2"] = fc_init(next(keys), 128)
    params["fc3"] = fc_init(next(keys), 256)
    params["fc4"] = fc_init(next(keys), 512)
    return params


# ----------------------------------------------------------------------------
# Forward pass (mirrors PyResNet.forward)
# ----------------------------------------------------------------------------
def pyresnet_forward(params, x):
    # x: [B, 1, n_bands, H, W]  (forward does x.squeeze(1))
    x = jnp.squeeze(x, axis=1)            # NCHW
    x = jnp.transpose(x, (0, 2, 3, 1))    # -> NHWC (channels on the lane axis)
    x = conv_bn(x, params["conv1"], params["bn1"], stride=2, pad=3, relu=True)
    x = max_pool2d_3x3_s2_p1(x)

    first_strides = (1, 2, 2, 2)
    flat2 = flat3 = flat4 = None
    for li, fs in enumerate(first_strides, start=1):
        for bi, bp in enumerate(params[f"layer{li}"]):
            x = basic_block(x, bp, fs if bi == 0 else 1)
        if li == 2:
            flat2 = global_max_pool(x)
        elif li == 3:
            flat3 = global_max_pool(x)
        elif li == 4:
            flat4 = global_max_pool(x)

    return fc_heads(flat2, flat3, flat4, params)


# ----------------------------------------------------------------------------
# Main
# ----------------------------------------------------------------------------
if __name__ == "__main__":
    B, n_bands, H, W = 2, 4, 16, 16
    num_classes = 10

    key = jax.random.PRNGKey(0)
    kx, kp = jax.random.split(key)
    x = jax.random.normal(kx, (B, 1, n_bands, H, W), jnp.float32)
    params = init_params(kp, n_bands, num_classes, layers=(1, 1, 1, 1))

    fwd = jax.jit(pyresnet_forward)
    logits = jax.block_until_ready(fwd(params, x))
    assert logits.shape == (B, num_classes), logits.shape
    assert bool(jnp.all(jnp.isfinite(logits)))
    print("KERNEL_OK")
</pallas_src>

<mosaic_0001>
module attributes {stable_mosaic.version = 11 : i64} {
  func.func @_fused_mm_kernel(%arg0: i32, %arg1: i32, %arg2: i32, %arg3: memref<128x256xbf16, #tpu.memory_space<vmem>>, %arg4: memref<256x128xbf16, #tpu.memory_space<vmem>>, %arg5: memref<1x128xf32, #tpu.memory_space<vmem>>, %arg6: memref<1x128xf32, #tpu.memory_space<vmem>>, %arg7: memref<128x128xf32, #tpu.memory_space<vmem>>, %arg8: memref<128x128xf32, #tpu.memory_space<vmem>>) attributes {dimension_semantics = [#tpu.dimension_semantics<parallel>, #tpu.dimension_semantics<parallel>, #tpu.dimension_semantics<arbitrary>], iteration_bounds = array<i64: 1, 1, 1>, scalar_prefetch = 0 : i64, scratch_operands = 1 : i64, tpu.core_type = #tpu.core_type<tc>, window_params = [{transform_indices = @transform_0, window_bounds = array<i64: 128, 256>}, {transform_indices = @transform_1, window_bounds = array<i64: 256, 128>}, {transform_indices = @transform_2, window_bounds = array<i64: 1, 128>}, {transform_indices = @transform_3, window_bounds = array<i64: 1, 128>}, {transform_indices = @transform_4, window_bounds = array<i64: 128, 128>}]} {
    %c0_i32 = arith.constant 0 : i32
    %0 = arith.cmpi eq, %arg2, %c0_i32 : i32
    %1 = arith.extui %0 : i1 to i32
    %c0_i32_0 = arith.constant 0 : i32
    %2 = arith.cmpi ne, %1, %c0_i32_0 : i32
    scf.if %2 {
      %cst_10 = arith.constant 0.000000e+00 : f32
      %12 = vector.broadcast %cst_10 : f32 to vector<128x128xf32>
      %c0_11 = arith.constant 0 : index
      %c0_12 = arith.constant 0 : index
      %13 = vector.load %arg8[%c0_11, %c0_12] : memref<128x128xf32, #tpu.memory_space<vmem>>, vector<128x128xf32>
      tpu.vector_store %arg8[%c0_11, %c0_12], %12 {strides = array<i32>} : memref<128x128xf32, #tpu.memory_space<vmem>>, vector<128x128xf32>,
    } else {
    }
    %c0 = arith.constant 0 : index
    %c0_1 = arith.constant 0 : index
    %3 = vector.load %arg8[%c0, %c0_1] : memref<128x128xf32, #tpu.memory_space<vmem>>, vector<128x128xf32>
    %c0_2 = arith.constant 0 : index
    %c0_3 = arith.constant 0 : index
    %4 = vector.load %arg3[%c0_2, %c0_3] : memref<128x256xbf16, #tpu.memory_space<vmem>>, vector<128x256xbf16>
    %c0_4 = arith.constant 0 : index
    %c0_5 = arith.constant 0 : index
    %5 = vector.load %arg4[%c0_4, %c0_5] : memref<256x128xbf16, #tpu.memory_space<vmem>>, vector<256x128xbf16>
    %cst = arith.constant dense<0.000000e+00> : vector<128x128xf32>
    %6 = tpu.matmul %4, %5, %cst {dimension_numbers = #tpu.dot_dimension_numbers<[1], [0], [0], [1], [0, 0, 1, 1], [], []>} : vector<128x256xbf16>, vector<256x128xbf16>, vector<128x128xf32> -> vector<128x128xf32>
    %7 = arith.addf %3, %6 : vector<128x128xf32>
    %c0_6 = arith.constant 0 : index
    %c0_7 = arith.constant 0 : index
    %8 = vector.load %arg8[%c0_6, %c0_7] : memref<128x128xf32, #tpu.memory_space<vmem>>, vector<128x128xf32>
    tpu.vector_store %arg8[%c0_6, %c0_7], %7 {strides = array<i32>} : memref<128x128xf32, #tpu.memory_space<vmem>>, vector<128x128xf32>,
    %c0_i32_8 = arith.constant 0 : i32
    %9 = arith.cmpi eq, %arg2, %c0_i32_8 : i32
    %10 = arith.extui %9 : i1 to i32
    %c0_i32_9 = arith.constant 0 : i32
    %11 = arith.cmpi ne, %10, %c0_i32_9 : i32
    scf.if %11 {
      %c0_10 = arith.constant 0 : index
      %c0_11 = arith.constant 0 : index
      %12 = vector.load %arg8[%c0_10, %c0_11] : memref<128x128xf32, #tpu.memory_space<vmem>>, vector<128x128xf32>
      %c0_12 = arith.constant 0 : index
      %c0_13 = arith.constant 0 : index
      %13 = vector.load %arg5[%c0_12, %c0_13] : memref<1x128xf32, #tpu.memory_space<vmem>>, vector<1x128xf32>
      %14 = vector.broadcast %13 : vector<1x128xf32> to vector<128x128xf32>
      %15 = arith.mulf %12, %14 : vector<128x128xf32>
      %c0_14 = arith.constant 0 : index
      %c0_15 = arith.constant 0 : index
      %16 = vector.load %arg6[%c0_14, %c0_15] : memref<1x128xf32, #tpu.memory_space<vmem>>, vector<1x128xf32>
      %17 = vector.broadcast %16 : vector<1x128xf32> to vector<128x128xf32>
      %18 = arith.addf %15, %17 : vector<128x128xf32>
      %cst_16 = arith.constant 0.000000e+00 : f32
      %19 = vector.broadcast %cst_16 : f32 to vector<128x128xf32>
      %20 = arith.maximumf %18, %19 : vector<128x128xf32>
      %c0_17 = arith.constant 0 : index
      %c0_18 = arith.constant 0 : index
      %21 = vector.load %arg7[%c0_17, %c0_18] : memref<128x128xf32, #tpu.memory_space<vmem>>, vector<128x128xf32>
      tpu.vector_store %arg7[%c0_17, %c0_18], %20 {strides = array<i32>} : memref<128x128xf32, #tpu.memory_space<vmem>>, vector<128x128xf32>,
    } else {
    }
    return
  }
  func.func @transform_0(%arg0: i32, %arg1: i32, %arg2: i32) -> (i32, i32) {
    %c0_i32 = arith.constant 0 : i32
    return %arg0, %arg2 : i32, i32
  }
  func.func @transform_1(%arg0: i32, %arg1: i32, %arg2: i32) -> (i32, i32) {
    %c0_i32 = arith.constant 0 : i32
    return %arg2, %arg1 : i32, i32
  }
  func.func @transform_2(%arg0: i32, %arg1: i32, %arg2: i32) -> (i32, i32) {
    %c0_i32 = arith.constant 0 : i32
    %c0_i32_0 = arith.constant 0 : i32
    return %c0_i32, %arg1 : i32, i32
  }
  func.func @transform_3(%arg0: i32, %arg1: i32, %arg2: i32) -> (i32, i32) {
    %c0_i32 = arith.constant 0 : i32
    %c0_i32_0 = arith.constant 0 : i32
    return %c0_i32, %arg1 : i32, i32
  }
  func.func @transform_4(%arg0: i32, %arg1: i32, %arg2: i32) -> (i32, i32) {
    %c0_i32 = arith.constant 0 : i32
    return %arg0, %arg1 : i32, i32
  }
}

module attributes {stable_mosaic.version = 11 : i64} {
  func.func @_max_axis0_kernel(%arg0: i32, %arg1: memref<9x32x64xf32, #tpu.memory_space<vmem>>, %arg2: memref<32x64xf32, #tpu.memory_space<vmem>>) attributes {dimension_semantics = [#tpu.dimension_semantics<arbitrary>], iteration_bounds = array<i64: 1>, scalar_prefetch = 0 : i64, scratch_operands = 0 : i64, tpu.core_type = #tpu.core_type<tc>, window_params = [{pipeline_mode = #tpu.pipeline_mode<synchronous>, transform_indices = @transform_0, window_bounds = array<i64: 9, 32, 64>}, {pipeline_mode = #tpu.pipeline_mode<synchronous>, transform_indices = @transform_1, window_bounds = array<i64: 32, 64>}]} {
    %c0 = arith.constant 0 : index
    %c0_0 = arith.constant 0 : index
    %c0_1 = arith.constant 0 : index
    %0 = vector.load %arg1[%c0, %c0_0, %c0_1] : memref<9x32x64xf32, #tpu.memory_space<vmem>>, vector<9x32x64xf32>
    %cst = arith.constant dense<0xFF800000> : vector<32x64xf32>
    %1 = vector.multi_reduction <maximumf>, %0, %cst [0] : vector<9x32x64xf32> to vector<32x64xf32>
    %c0_2 = arith.constant 0 : index
    %c0_3 = arith.constant 0 : index
    %2 = vector.load %arg2[%c0_2, %c0_3] : memref<32x64xf32, #tpu.memory_space<vmem>>, vector<32x64xf32>
    tpu.vector_store %arg2[%c0_2, %c0_3], %1 {strides = array<i32>} : memref<32x64xf32, #tpu.memory_space<vmem>>, vector<32x64xf32>,
    return
  }
  func.func @transform_0(%arg0: i32) -> (i32, i32, i32) {
    %c0_i32 = arith.constant 0 : i32
    %c0_i32_0 = arith.constant 0 : i32
    %c0_i32_1 = arith.constant 0 : i32
    %c0_i32_2 = arith.constant 0 : i32
    return %c0_i32, %c0_i32_0, %c0_i32_1 : i32, i32, i32
  }
  func.func @transform_1(%arg0: i32) -> (i32, i32) {
    %c0_i32 = arith.constant 0 : i32
    %c0_i32_0 = arith.constant 0 : i32
    %c0_i32_1 = arith.constant 0 : i32
    return %c0_i32, %c0_i32_0 : i32, i32
  }
}

module attributes {stable_mosaic.version = 11 : i64} {
  func.func @_fused_mm_kernel(%arg0: i32, %arg1: i32, %arg2: i32, %arg3: memref<32x640xbf16, #tpu.memory_space<vmem>>, %arg4: memref<640x128xbf16, #tpu.memory_space<vmem>>, %arg5: memref<1x128xf32, #tpu.memory_space<vmem>>, %arg6: memref<1x128xf32, #tpu.memory_space<vmem>>, %arg7: memref<32x128xf32, #tpu.memory_space<vmem>>, %arg8: memref<32x128xf32, #tpu.memory_space<vmem>>) attributes {dimension_semantics = [#tpu.dimension_semantics<parallel>, #tpu.dimension_semantics<parallel>, #tpu.dimension_semantics<arbitrary>], iteration_bounds = array<i64: 1, 1, 1>, scalar_prefetch = 0 : i64, scratch_operands = 1 : i64, tpu.core_type = #tpu.core_type<tc>, window_params = [{transform_indices = @transform_0, window_bounds = array<i64: 32, 640>}, {transform_indices = @transform_1, window_bounds = array<i64: 640, 128>}, {transform_indices = @transform_2, window_bounds = array<i64: 1, 128>}, {transform_indices = @transform_3, window_bounds = array<i64: 1, 128>}, {transform_indices = @transform_4, window_bounds = array<i64: 32, 128>}]} {
    %c0_i32 = arith.constant 0 : i32
    %0 = arith.cmpi eq, %arg2, %c0_i32 : i32
    %1 = arith.extui %0 : i1 to i32
    %c0_i32_0 = arith.constant 0 : i32
    %2 = arith.cmpi ne, %1, %c0_i32_0 : i32
    scf.if %2 {
      %cst_10 = arith.constant 0.000000e+00 : f32
      %12 = vector.broadcast %cst_10 : f32 to vector<32x128xf32>
      %c0_11 = arith.constant 0 : index
      %c0_12 = arith.constant 0 : index
      %13 = vector.load %arg8[%c0_11, %c0_12] : memref<32x128xf32, #tpu.memory_space<vmem>>, vector<32x128xf32>
      tpu.vector_store %arg8[%c0_11, %c0_12], %12 {strides = array<i32>} : memref<32x128xf32, #tpu.memory_space<vmem>>, vector<32x128xf32>,
    } else {
    }
    %c0 = arith.constant 0 : index
    %c0_1 = arith.constant 0 : index
    %3 = vector.load %arg8[%c0, %c0_1] : memref<32x128xf32, #tpu.memory_space<vmem>>, vector<32x128xf32>
    %c0_2 = arith.constant 0 : index
    %c0_3 = arith.constant 0 : index
    %4 = vector.load %arg3[%c0_2, %c0_3] : memref<32x640xbf16, #tpu.memory_space<vmem>>, vector<32x640xbf16>
    %c0_4 = arith.constant 0 : index
    %c0_5 = arith.constant 0 : index
    %5 = vector.load %arg4[%c0_4, %c0_5] : memref<640x128xbf16, #tpu.memory_space<vmem>>, vector<640x128xbf16>
    %cst = arith.constant dense<0.000000e+00> : vector<32x128xf32>
    %6 = tpu.matmul %4, %5, %cst {dimension_numbers = #tpu.dot_dimension_numbers<[1], [0], [0], [1], [0, 0, 1, 1], [], []>} : vector<32x640xbf16>, vector<640x128xbf16>, vector<32x128xf32> -> vector<32x128xf32>
    %7 = arith.addf %3, %6 : vector<32x128xf32>
    %c0_6 = arith.constant 0 : index
    %c0_7 = arith.constant 0 : index
    %8 = vector.load %arg8[%c0_6, %c0_7] : memref<32x128xf32, #tpu.memory_space<vmem>>, vector<32x128xf32>
    tpu.vector_store %arg8[%c0_6, %c0_7], %7 {strides = array<i32>} : memref<32x128xf32, #tpu.memory_space<vmem>>, vector<32x128xf32>,
    %c0_i32_8 = arith.constant 0 : i32
    %9 = arith.cmpi eq, %arg2, %c0_i32_8 : i32
    %10 = arith.extui %9 : i1 to i32
    %c0_i32_9 = arith.constant 0 : i32
    %11 = arith.cmpi ne, %10, %c0_i32_9 : i32
    scf.if %11 {
      %c0_10 = arith.constant 0 : index
      %c0_11 = arith.constant 0 : index
      %12 = vector.load %arg8[%c0_10, %c0_11] : memref<32x128xf32, #tpu.memory_space<vmem>>, vector<32x128xf32>
      %c0_12 = arith.constant 0 : index
      %c0_13 = arith.constant 0 : index
      %13 = vector.load %arg5[%c0_12, %c0_13] : memref<1x128xf32, #tpu.memory_space<vmem>>, vector<1x128xf32>
      %14 = vector.broadcast %13 : vector<1x128xf32> to vector<32x128xf32>
      %15 = arith.mulf %12, %14 : vector<32x128xf32>
      %c0_14 = arith.constant 0 : index
      %c0_15 = arith.constant 0 : index
      %16 = vector.load %arg6[%c0_14, %c0_15] : memref<1x128xf32, #tpu.memory_space<vmem>>, vector<1x128xf32>
      %17 = vector.broadcast %16 : vector<1x128xf32> to vector<32x128xf32>
      %18 = arith.addf %15, %17 : vector<32x128xf32>
      %cst_16 = arith.constant 0.000000e+00 : f32
      %19 = vector.broadcast %cst_16 : f32 to vector<32x128xf32>
      %20 = arith.maximumf %18, %19 : vector<32x128xf32>
      %c0_17 = arith.constant 0 : index
      %c0_18 = arith.constant 0 : index
      %21 = vector.load %arg7[%c0_17, %c0_18] : memref<32x128xf32, #tpu.memory_space<vmem>>, vector<32x128xf32>
      tpu.vector_store %arg7[%c0_17, %c0_18], %20 {strides = array<i32>} : memref<32x128xf32, #tpu.memory_space<vmem>>, vector<32x128xf32>,
    } else {
    }
    return
  }
  func.func @transform_0(%arg0: i32, %arg1: i32, %arg2: i32) -> (i32, i32) {
    %c0_i32 = arith.constant 0 : i32
    return %arg0, %arg2 : i32, i32
  }
  func.func @transform_1(%arg0: i32, %arg1: i32, %arg2: i32) -> (i32, i32) {
    %c0_i32 = arith.constant 0 : i32
    return %arg2, %arg1 : i32, i32
  }
  func.func @transform_2(%arg0: i32, %arg1: i32, %arg2: i32) -> (i32, i32) {
    %c0_i32 = arith.constant 0 : i32
    %c0_i32_0 = arith.constant 0 : i32
    return %c0_i32, %arg1 : i32, i32
  }
  func.func @transform_3(%arg0: i32, %arg1: i32, %arg2: i32) -> (i32, i32) {
    %c0_i32 = arith.constant 0 : i32
    %c0_i32_0 = arith.constant 0 : i32
    return %c0_i32, %arg1 : i32, i32
  }
  func.func @transform_4(%arg0: i32, %arg1: i32, %arg2: i32) -> (i32, i32) {
    %c0_i32 = arith.constant 0 : i32
    return %arg0, %arg1 : i32, i32
  }
}

module attributes {stable_mosaic.version = 11 : i64} {
  func.func @_fused_mm_kernel(%arg0: i32, %arg1: i32, %arg2: i32, %arg3: memref<32x640xbf16, #tpu.memory_space<vmem>>, %arg4: memref<640x128xbf16, #tpu.memory_space<vmem>>, %arg5: memref<1x128xf32, #tpu.memory_space<vmem>>, %arg6: memref<1x128xf32, #tpu.memory_space<vmem>>, %arg7: memref<32x128xf32, #tpu.memory_space<vmem>>, %arg8: memref<32x128xf32, #tpu.memory_space<vmem>>, %arg9: memref<32x128xf32, #tpu.memory_space<vmem>>) attributes {dimension_semantics = [#tpu.dimension_semantics<parallel>, #tpu.dimension_semantics<parallel>, #tpu.dimension_semantics<arbitrary>], iteration_bounds = array<i64: 1, 1, 1>, scalar_prefetch = 0 : i64, scratch_operands = 1 : i64, tpu.core_type = #tpu.core_type<tc>, window_params = [{transform_indices = @transform_0, window_bounds = array<i64: 32, 640>}, {transform_indices = @transform_1, window_bounds = array<i64: 640, 128>}, {transform_indices = @transform_2, window_bounds = array<i64: 1, 128>}, {transform_indices = @transform_3, window_bounds = array<i64: 1, 128>}, {transform_indices = @transform_4, window_bounds = array<i64: 32, 128>}, {transform_indices = @transform_5, window_bounds = array<i64: 32, 128>}]} {
    %c0_i32 = arith.constant 0 : i32
    %0 = arith.cmpi eq, %arg2, %c0_i32 : i32
    %1 = arith.extui %0 : i1 to i32
    %c0_i32_0 = arith.constant 0 : i32
    %2 = arith.cmpi ne, %1, %c0_i32_0 : i32
    scf.if %2 {
      %cst_10 = arith.constant 0.000000e+00 : f32
      %12 = vector.broadcast %cst_10 : f32 to vector<32x128xf32>
      %c0_11 = arith.constant 0 : index
      %c0_12 = arith.constant 0 : index
      %13 = vector.load %arg9[%c0_11, %c0_12] : memref<32x128xf32, #tpu.memory_space<vmem>>, vector<32x128xf32>
      tpu.vector_store %arg9[%c0_11, %c0_12], %12 {strides = array<i32>} : memref<32x128xf32, #tpu.memory_space<vmem>>, vector<32x128xf32>,
    } else {
    }
    %c0 = arith.constant 0 : index
    %c0_1 = arith.constant 0 : index
    %3 = vector.load %arg9[%c0, %c0_1] : memref<32x128xf32, #tpu.memory_space<vmem>>, vector<32x128xf32>
    %c0_2 = arith.constant 0 : index
    %c0_3 = arith.constant 0 : index
    %4 = vector.load %arg3[%c0_2, %c0_3] : memref<32x640xbf16, #tpu.memory_space<vmem>>, vector<32x640xbf16>
    %c0_4 = arith.constant 0 : index
    %c0_5 = arith.constant 0 : index
    %5 = vector.load %arg4[%c0_4, %c0_5] : memref<640x128xbf16, #tpu.memory_space<vmem>>, vector<640x128xbf16>
    %cst = arith.constant dense<0.000000e+00> : vector<32x128xf32>
    %6 = tpu.matmul %4, %5, %cst {dimension_numbers = #tpu.dot_dimension_numbers<[1], [0], [0], [1], [0, 0, 1, 1], [], []>} : vector<32x640xbf16>, vector<640x128xbf16>, vector<32x128xf32> -> vector<32x128xf32>
    %7 = arith.addf %3, %6 : vector<32x128xf32>
    %c0_6 = arith.constant 0 : index
    %c0_7 = arith.constant 0 : index
    %8 = vector.load %arg9[%c0_6, %c0_7] : memref<32x128xf32, #tpu.memory_space<vmem>>, vector<32x128xf32>
    tpu.vector_store %arg9[%c0_6, %c0_7], %7 {strides = array<i32>} : memref<32x128xf32, #tpu.memory_space<vmem>>, vector<32x128xf32>,
    %c0_i32_8 = arith.constant 0 : i32
    %9 = arith.cmpi eq, %arg2, %c0_i32_8 : i32
    %10 = arith.extui %9 : i1 to i32
    %c0_i32_9 = arith.constant 0 : i32
    %11 = arith.cmpi ne, %10, %c0_i32_9 : i32
    scf.if %11 {
      %c0_10 = arith.constant 0 : index
      %c0_11 = arith.constant 0 : index
      %12 = vector.load %arg9[%c0_10, %c0_11] : memref<32x128xf32, #tpu.memory_space<vmem>>, vector<32x128xf32>
      %c0_12 = arith.constant 0 : index
      %c0_13 = arith.constant 0 : index
      %13 = vector.load %arg5[%c0_12, %c0_13] : memref<1x128xf32, #tpu.memory_space<vmem>>, vector<1x128xf32>
      %14 = vector.broadcast %13 : vector<1x128xf32> to vector<32x128xf32>
      %15 = arith.mulf %12, %14 : vector<32x128xf32>
      %c0_14 = arith.constant 0 : index
      %c0_15 = arith.constant 0 : index
      %16 = vector.load %arg6[%c0_14, %c0_15] : memref<1x128xf32, #tpu.memory_space<vmem>>, vector<1x128xf32>
      %17 = vector.broadcast %16 : vector<1x128xf32> to vector<32x128xf32>
      %18 = arith.addf %15, %17 : vector<32x128xf32>
      %c0_16 = arith.constant 0 : index
      %c0_17 = arith.constant 0 : index
      %19 = vector.load %arg7[%c0_16, %c0_17] : memref<32x128xf32, #tpu.memory_space<vmem>>, vector<32x128xf32>
      %20 = arith.addf %18, %19 : vector<32x128xf32>
      %cst_18 = arith.constant 0.000000e+00 : f32
      %21 = vector.broadcast %cst_18 : f32 to vector<32x128xf32>
      %22 = arith.maximumf %20, %21 : vector<32x128xf32>
      %c0_19 = arith.constant 0 : index
      %c0_20 = arith.constant 0 : index
      %23 = vector.load %arg8[%c0_19, %c0_20] : memref<32x128xf32, #tpu.memory_space<vmem>>, vector<32x128xf32>
      tpu.vector_store %arg8[%c0_19, %c0_20], %22 {strides = array<i32>} : memref<32x128xf32, #tpu.memory_space<vmem>>, vector<32x128xf32>,
    } else {
    }
    return
  }
  func.func @transform_0(%arg0: i32, %arg1: i32, %arg2: i32) -> (i32, i32) {
    %c0_i32 = arith.constant 0 : i32
    return %arg0, %arg2 : i32, i32
  }
  func.func @transform_1(%arg0: i32, %arg1: i32, %arg2: i32) -> (i32, i32) {
    %c0_i32 = arith.constant 0 : i32
    return %arg2, %arg1 : i32, i32
  }
  func.func @transform_2(%arg0: i32, %arg1: i32, %arg2: i32) -> (i32, i32) {
    %c0_i32 = arith.constant 0 : i32
    %c0_i32_0 = arith.constant 0 : i32
    return %c0_i32, %arg1 : i32, i32
  }
  func.func @transform_3(%arg0: i32, %arg1: i32, %arg2: i32) -> (i32, i32) {
    %c0_i32 = arith.constant 0 : i32
    %c0_i32_0 = arith.constant 0 : i32
    return %c0_i32, %arg1 : i32, i32
  }
  func.func @transform_4(%arg0: i32, %arg1: i32, %arg2: i32) -> (i32, i32) {
    %c0_i32 = arith.constant 0 : i32
    return %arg0, %arg1 : i32, i32
  }
  func.func @transform_5(%arg0: i32, %arg1: i32, %arg2: i32) -> (i32, i32) {
    %c0_i32 = arith.constant 0 : i32
    return %arg0, %arg1 : i32, i32
  }
}

module attributes {stable_mosaic.version = 11 : i64} {
  func.func @_fused_mm_kernel(%arg0: i32, %arg1: i32, %arg2: i32, %arg3: memref<16x640xbf16, #tpu.memory_space<vmem>>, %arg4: memref<640x128xbf16, #tpu.memory_space<vmem>>, %arg5: memref<1x128xf32, #tpu.memory_space<vmem>>, %arg6: memref<1x128xf32, #tpu.memory_space<vmem>>, %arg7: memref<16x128xf32, #tpu.memory_space<vmem>>, %arg8: memref<16x128xf32, #tpu.memory_space<vmem>>) attributes {dimension_semantics = [#tpu.dimension_semantics<parallel>, #tpu.dimension_semantics<parallel>, #tpu.dimension_semantics<arbitrary>], iteration_bounds = array<i64: 1, 1, 1>, scalar_prefetch = 0 : i64, scratch_operands = 1 : i64, tpu.core_type = #tpu.core_type<tc>, window_params = [{transform_indices = @transform_0, window_bounds = array<i64: 16, 640>}, {transform_indices = @transform_1, window_bounds = array<i64: 640, 128>}, {transform_indices = @transform_2, window_bounds = array<i64: 1, 128>}, {transform_indices = @transform_3, window_bounds = array<i64: 1, 128>}, {transform_indices = @transform_4, window_bounds = array<i64: 16, 128>}]} {
    %c0_i32 = arith.constant 0 : i32
    %0 = arith.cmpi eq, %arg2, %c0_i32 : i32
    %1 = arith.extui %0 : i1 to i32
    %c0_i32_0 = arith.constant 0 : i32
    %2 = arith.cmpi ne, %1, %c0_i32_0 : i32
    scf.if %2 {
      %cst_10 = arith.constant 0.000000e+00 : f32
      %12 = vector.broadcast %cst_10 : f32 to vector<16x128xf32>
      %c0_11 = arith.constant 0 : index
      %c0_12 = arith.constant 0 : index
      %13 = vector.load %arg8[%c0_11, %c0_12] : memref<16x128xf32, #tpu.memory_space<vmem>>, vector<16x128xf32>
      tpu.vector_store %arg8[%c0_11, %c0_12], %12 {strides = array<i32>} : memref<16x128xf32, #tpu.memory_space<vmem>>, vector<16x128xf32>,
    } else {
    }
    %c0 = arith.constant 0 : index
    %c0_1 = arith.constant 0 : index
    %3 = vector.load %arg8[%c0, %c0_1] : memref<16x128xf32, #tpu.memory_space<vmem>>, vector<16x128xf32>
    %c0_2 = arith.constant 0 : index
    %c0_3 = arith.constant 0 : index
    %4 = vector.load %arg3[%c0_2, %c0_3] : memref<16x640xbf16, #tpu.memory_space<vmem>>, vector<16x640xbf16>
    %c0_4 = arith.constant 0 : index
    %c0_5 = arith.constant 0 : index
    %5 = vector.load %arg4[%c0_4, %c0_5] : memref<640x128xbf16, #tpu.memory_space<vmem>>, vector<640x128xbf16>
    %cst = arith.constant dense<0.000000e+00> : vector<16x128xf32>
    %6 = tpu.matmul %4, %5, %cst {dimension_numbers = #tpu.dot_dimension_numbers<[1], [0], [0], [1], [0, 0, 1, 1], [], []>} : vector<16x640xbf16>, vector<640x128xbf16>, vector<16x128xf32> -> vector<16x128xf32>
    %7 = arith.addf %3, %6 : vector<16x128xf32>
    %c0_6 = arith.constant 0 : index
    %c0_7 = arith.constant 0 : index
    %8 = vector.load %arg8[%c0_6, %c0_7] : memref<16x128xf32, #tpu.memory_space<vmem>>, vector<16x128xf32>
    tpu.vector_store %arg8[%c0_6, %c0_7], %7 {strides = array<i32>} : memref<16x128xf32, #tpu.memory_space<vmem>>, vector<16x128xf32>,
    %c0_i32_8 = arith.constant 0 : i32
    %9 = arith.cmpi eq, %arg2, %c0_i32_8 : i32
    %10 = arith.extui %9 : i1 to i32
    %c0_i32_9 = arith.constant 0 : i32
    %11 = arith.cmpi ne, %10, %c0_i32_9 : i32
    scf.if %11 {
      %c0_10 = arith.constant 0 : index
      %c0_11 = arith.constant 0 : index
      %12 = vector.load %arg8[%c0_10, %c0_11] : memref<16x128xf32, #tpu.memory_space<vmem>>, vector<16x128xf32>
      %c0_12 = arith.constant 0 : index
      %c0_13 = arith.constant 0 : index
      %13 = vector.load %arg5[%c0_12, %c0_13] : memref<1x128xf32, #tpu.memory_space<vmem>>, vector<1x128xf32>
      %14 = vector.broadcast %13 : vector<1x128xf32> to vector<16x128xf32>
      %15 = arith.mulf %12, %14 : vector<16x128xf32>
      %c0_14 = arith.constant 0 : index
      %c0_15 = arith.constant 0 : index
      %16 = vector.load %arg6[%c0_14, %c0_15] : memref<1x128xf32, #tpu.memory_space<vmem>>, vector<1x128xf32>
      %17 = vector.broadcast %16 : vector<1x128xf32> to vector<16x128xf32>
      %18 = arith.addf %15, %17 : vector<16x128xf32>
      %cst_16 = arith.constant 0.000000e+00 : f32
      %19 = vector.broadcast %cst_16 : f32 to vector<16x128xf32>
      %20 = arith.maximumf %18, %19 : vector<16x128xf32>
      %c0_17 = arith.constant 0 : index
      %c0_18 = arith.constant 0 : index
      %21 = vector.load %arg7[%c0_17, %c0_18] : memref<16x128xf32, #tpu.memory_space<vmem>>, vector<16x128xf32>
      tpu.vector_store %arg7[%c0_17, %c0_18], %20 {strides = array<i32>} : memref<16x128xf32, #tpu.memory_space<vmem>>, vector<16x128xf32>,
    } else {
    }
    return
  }
  func.func @transform_0(%arg0: i32, %arg1: i32, %arg2: i32) -> (i32, i32) {
    %c0_i32 = arith.constant 0 : i32
    return %arg0, %arg2 : i32, i32
  }
  func.func @transform_1(%arg0: i32, %arg1: i32, %arg2: i32) -> (i32, i32) {
    %c0_i32 = arith.constant 0 : i32
    return %arg2, %arg1 : i32, i32
  }
  func.func @transform_2(%arg0: i32, %arg1: i32, %arg2: i32) -> (i32, i32) {
    %c0_i32 = arith.constant 0 : i32
    %c0_i32_0 = arith.constant 0 : i32
    return %c0_i32, %arg1 : i32, i32
  }
  func.func @transform_3(%arg0: i32, %arg1: i32, %arg2: i32) -> (i32, i32) {
    %c0_i32 = arith.constant 0 : i32
    %c0_i32_0 = arith.constant 0 : i32
    return %c0_i32, %arg1 : i32, i32
  }
  func.func @transform_4(%arg0: i32, %arg1: i32, %arg2: i32) -> (i32, i32) {
    %c0_i32 = arith.constant 0 : i32
    return %arg0, %arg1 : i32, i32
  }
}

module attributes {stable_mosaic.version = 11 : i64} {
  func.func @_fused_mm_kernel(%arg0: i32, %arg1: i32, %arg2: i32, %arg3: memref<16x384xbf16, #tpu.memory_space<vmem>>, %arg4: memref<384x128xbf16, #tpu.memory_space<vmem>>, %arg5: memref<1x128xf32, #tpu.memory_space<vmem>>, %arg6: memref<1x128xf32, #tpu.memory_space<vmem>>, %arg7: memref<16x128xf32, #tpu.memory_space<vmem>>, %arg8: memref<16x128xf32, #tpu.memory_space<vmem>>, %arg9: memref<16x128xf32, #tpu.memory_space<vmem>>) attributes {dimension_semantics = [#tpu.dimension_semantics<parallel>, #tpu.dimension_semantics<parallel>, #tpu.dimension_semantics<arbitrary>], iteration_bounds = array<i64: 1, 1, 3>, scalar_prefetch = 0 : i64, scratch_operands = 1 : i64, tpu.core_type = #tpu.core_type<tc>, window_params = [{transform_indices = @transform_0, window_bounds = array<i64: 16, 384>}, {transform_indices = @transform_1, window_bounds = array<i64: 384, 128>}, {transform_indices = @transform_2, window_bounds = array<i64: 1, 128>}, {transform_indices = @transform_3, window_bounds = array<i64: 1, 128>}, {transform_indices = @transform_4, window_bounds = array<i64: 16, 128>}, {transform_indices = @transform_5, window_bounds = array<i64: 16, 128>}]} {
    %c0_i32 = arith.constant 0 : i32
    %0 = arith.cmpi eq, %arg2, %c0_i32 : i32
    %1 = arith.extui %0 : i1 to i32
    %c0_i32_0 = arith.constant 0 : i32
    %2 = arith.cmpi ne, %1, %c0_i32_0 : i32
    scf.if %2 {
      %cst_9 = arith.constant 0.000000e+00 : f32
      %12 = vector.broadcast %cst_9 : f32 to vector<16x128xf32>
      %c0_10 = arith.constant 0 : index
      %c0_11 = arith.constant 0 : index
      %13 = vector.load %arg9[%c0_10, %c0_11] : memref<16x128xf32, #tpu.memory_space<vmem>>, vector<16x128xf32>
      tpu.vector_store %arg9[%c0_10, %c0_11], %12 {strides = array<i32>} : memref<16x128xf32, #tpu.memory_space<vmem>>, vector<16x128xf32>,
    } else {
    }
    %c0 = arith.constant 0 : index
    %c0_1 = arith.constant 0 : index
    %3 = vector.load %arg9[%c0, %c0_1] : memref<16x128xf32, #tpu.memory_space<vmem>>, vector<16x128xf32>
    %c0_2 = arith.constant 0 : index
    %c0_3 = arith.constant 0 : index
    %4 = vector.load %arg3[%c0_2, %c0_3] : memref<16x384xbf16, #tpu.memory_space<vmem>>, vector<16x384xbf16>
    %c0_4 = arith.constant 0 : index
    %c0_5 = arith.constant 0 : index
    %5 = vector.load %arg4[%c0_4, %c0_5] : memref<384x128xbf16, #tpu.memory_space<vmem>>, vector<384x128xbf16>
    %cst = arith.constant dense<0.000000e+00> : vector<16x128xf32>
    %6 = tpu.matmul %4, %5, %cst {dimension_numbers = #tpu.dot_dimension_numbers<[1], [0], [0], [1], [0, 0, 1, 1], [], []>} : vector<16x384xbf16>, vector<384x128xbf16>, vector<16x128xf32> -> vector<16x128xf32>
    %7 = arith.addf %3, %6 : vector<16x128xf32>
    %c0_6 = arith.constant 0 : index
    %c0_7 = arith.constant 0 : index
    %8 = vector.load %arg9[%c0_6, %c0_7] : memref<16x128xf32, #tpu.memory_space<vmem>>, vector<16x128xf32>
    tpu.vector_store %arg9[%c0_6, %c0_7], %7 {strides = array<i32>} : memref<16x128xf32, #tpu.memory_space<vmem>>, vector<16x128xf32>,
    %c2_i32 = arith.constant 2 : i32
    %9 = arith.cmpi eq, %arg2, %c2_i32 : i32
    %10 = arith.extui %9 : i1 to i32
    %c0_i32_8 = arith.constant 0 : i32
    %11 = arith.cmpi ne, %10, %c0_i32_8 : i32
    scf.if %11 {
      %c0_9 = arith.constant 0 : index
      %c0_10 = arith.constant 0 : index
      %12 = vector.load %arg9[%c0_9, %c0_10] : memref<16x128xf32, #tpu.memory_space<vmem>>, vector<16x128xf32>
      %c0_11 = arith.constant 0 : index
      %c0_12 = arith.constant 0 : index
      %13 = vector.load %arg5[%c0_11, %c0_12] : memref<1x128xf32, #tpu.memory_space<vmem>>, vector<1x128xf32>
      %14 = vector.broadcast %13 : vector<1x128xf32> to vector<16x128xf32>
      %15 = arith.mulf %12, %14 : vector<16x128xf32>
      %c0_13 = arith.constant 0 : index
      %c0_14 = arith.constant 0 : index
      %16 = vector.load %arg6[%c0_13, %c0_14] : memref<1x128xf32, #tpu.memory_space<vmem>>, vector<1x128xf32>
      %17 = vector.broadcast %16 : vector<1x128xf32> to vector<16x128xf32>
      %18 = arith.addf %15, %17 : vector<16x128xf32>
      %c0_15 = arith.constant 0 : index
      %c0_16 = arith.constant 0 : index
      %19 = vector.load %arg7[%c0_15, %c0_16] : memref<16x128xf32, #tpu.memory_space<vmem>>, vector<16x128xf32>
      %20 = arith.addf %18, %19 : vector<16x128xf32>
      %cst_17 = arith.constant 0.000000e+00 : f32
      %21 = vector.broadcast %cst_17 : f32 to vector<16x128xf32>
      %22 = arith.maximumf %20, %21 : vector<16x128xf32>
      %c0_18 = arith.constant 0 : index
      %c0_19 = arith.constant 0 : index
      %23 = vector.load %arg8[%c0_18, %c0_19] : memref<16x128xf32, #tpu.memory_space<vmem>>, vector<16x128xf32>
      tpu.vector_store %arg8[%c0_18, %c0_19], %22 {strides = array<i32>} : memref<16x128xf32, #tpu.memory_space<vmem>>, vector<16x128xf32>,
    } else {
    }
    return
  }
  func.func @transform_0(%arg0: i32, %arg1: i32, %arg2: i32) -> (i32, i32) {
    %c0_i32 = arith.constant 0 : i32
    return %arg0, %arg2 : i32, i32
  }
  func.func @transform_1(%arg0: i32, %arg1: i32, %arg2: i32) -> (i32, i32) {
    %c0_i32 = arith.constant 0 : i32
    return %arg2, %arg1 : i32, i32
  }
  func.func @transform_2(%arg0: i32, %arg1: i32, %arg2: i32) -> (i32, i32) {
    %c0_i32 = arith.constant 0 : i32
    %c0_i32_0 = arith.constant 0 : i32
    return %c0_i32, %arg1 : i32, i32
  }
  func.func @transform_3(%arg0: i32, %arg1: i32, %arg2: i32) -> (i32, i32) {
    %c0_i32 = arith.constant 0 : i32
    %c0_i32_0 = arith.constant 0 : i32
    return %c0_i32, %arg1 : i32, i32
  }
  func.func @transform_4(%arg0: i32, %arg1: i32, %arg2: i32) -> (i32, i32) {
    %c0_i32 = arith.constant 0 : i32
    return %arg0, %arg1 : i32, i32
  }
  func.func @transform_5(%arg0: i32, %arg1: i32, %arg2: i32) -> (i32, i32) {
    %c0_i32 = arith.constant 0 : i32
    return %arg0, %arg1 : i32, i32
  }
}

module attributes {stable_mosaic.version = 11 : i64} {
  func.func @_fused_mm_kernel(%arg0: i32, %arg1: i32, %arg2: i32, %arg3: memref<16x128xbf16, #tpu.memory_space<vmem>>, %arg4: memref<128x128xbf16, #tpu.memory_space<vmem>>, %arg5: memref<1x128xf32, #tpu.memory_space<vmem>>, %arg6: memref<1x128xf32, #tpu.memory_space<vmem>>, %arg7: memref<16x128xf32, #tpu.memory_space<vmem>>, %arg8: memref<16x128xf32, #tpu.memory_space<vmem>>) attributes {dimension_semantics = [#tpu.dimension_semantics<parallel>, #tpu.dimension_semantics<parallel>, #tpu.dimension_semantics<arbitrary>], iteration_bounds = array<i64: 1, 1, 1>, scalar_prefetch = 0 : i64, scratch_operands = 1 : i64, tpu.core_type = #tpu.core_type<tc>, window_params = [{transform_indices = @transform_0, window_bounds = array<i64: 16, 128>}, {transform_indices = @transform_1, window_bounds = array<i64: 128, 128>}, {transform_indices = @transform_2, window_bounds = array<i64: 1, 128>}, {transform_indices = @transform_3, window_bounds = array<i64: 1, 128>}, {transform_indices = @transform_4, window_bounds = array<i64: 16, 128>}]} {
    %c0_i32 = arith.constant 0 : i32
    %0 = arith.cmpi eq, %arg2, %c0_i32 : i32
    %1 = arith.extui %0 : i1 to i32
    %c0_i32_0 = arith.constant 0 : i32
    %2 = arith.cmpi ne, %1, %c0_i32_0 : i32
    scf.if %2 {
      %cst_10 = arith.constant 0.000000e+00 : f32
      %12 = vector.broadcast %cst_10 : f32 to vector<16x128xf32>
      %c0_11 = arith.constant 0 : index
      %c0_12 = arith.constant 0 : index
      %13 = vector.load %arg8[%c0_11, %c0_12] : memref<16x128xf32, #tpu.memory_space<vmem>>, vector<16x128xf32>
      tpu.vector_store %arg8[%c0_11, %c0_12], %12 {strides = array<i32>} : memref<16x128xf32, #tpu.memory_space<vmem>>, vector<16x128xf32>,
    } else {
    }
    %c0 = arith.constant 0 : index
    %c0_1 = arith.constant 0 : index
    %3 = vector.load %arg8[%c0, %c0_1] : memref<16x128xf32, #tpu.memory_space<vmem>>, vector<16x128xf32>
    %c0_2 = arith.constant 0 : index
    %c0_3 = arith.constant 0 : index
    %4 = vector.load %arg3[%c0_2, %c0_3] : memref<16x128xbf16, #tpu.memory_space<vmem>>, vector<16x128xbf16>
    %c0_4 = arith.constant 0 : index
    %c0_5 = arith.constant 0 : index
    %5 = vector.load %arg4[%c0_4, %c0_5] : memref<128x128xbf16, #tpu.memory_space<vmem>>, vector<128x128xbf16>
    %cst = arith.constant dense<0.000000e+00> : vector<16x128xf32>
    %6 = tpu.matmul %4, %5, %cst {dimension_numbers = #tpu.dot_dimension_numbers<[1], [0], [0], [1], [0, 0, 1, 1], [], []>} : vector<16x128xbf16>, vector<128x128xbf16>, vector<16x128xf32> -> vector<16x128xf32>
    %7 = arith.addf %3, %6 : vector<16x128xf32>
    %c0_6 = arith.constant 0 : index
    %c0_7 = arith.constant 0 : index
    %8 = vector.load %arg8[%c0_6, %c0_7] : memref<16x128xf32, #tpu.memory_space<vmem>>, vector<16x128xf32>
    tpu.vector_store %arg8[%c0_6, %c0_7], %7 {strides = array<i32>} : memref<16x128xf32, #tpu.memory_space<vmem>>, vector<16x128xf32>,
    %c0_i32_8 = arith.constant 0 : i32
    %9 = arith.cmpi eq, %arg2, %c0_i32_8 : i32
    %10 = arith.extui %9 : i1 to i32
    %c0_i32_9 = arith.constant 0 : i32
    %11 = arith.cmpi ne, %10, %c0_i32_9 : i32
    scf.if %11 {
      %c0_10 = arith.constant 0 : index
      %c0_11 = arith.constant 0 : index
      %12 = vector.load %arg8[%c0_10, %c0_11] : memref<16x128xf32, #tpu.memory_space<vmem>>, vector<16x128xf32>
      %c0_12 = arith.constant 0 : index
      %c0_13 = arith.constant 0 : index
      %13 = vector.load %arg5[%c0_12, %c0_13] : memref<1x128xf32, #tpu.memory_space<vmem>>, vector<1x128xf32>
      %14 = vector.broadcast %13 : vector<1x128xf32> to vector<16x128xf32>
      %15 = arith.mulf %12, %14 : vector<16x128xf32>
      %c0_14 = arith.constant 0 : index
      %c0_15 = arith.constant 0 : index
      %16 = vector.load %arg6[%c0_14, %c0_15] : memref<1x128xf32, #tpu.memory_space<vmem>>, vector<1x128xf32>
      %17 = vector.broadcast %16 : vector<1x128xf32> to vector<16x128xf32>
      %18 = arith.addf %15, %17 : vector<16x128xf32>
      %c0_16 = arith.constant 0 : index
      %c0_17 = arith.constant 0 : index
      %19 = vector.load %arg7[%c0_16, %c0_17] : memref<16x128xf32, #tpu.memory_space<vmem>>, vector<16x128xf32>
      tpu.vector_store %arg7[%c0_16, %c0_17], %18 {strides = array<i32>} : memref<16x128xf32, #tpu.memory_space<vmem>>, vector<16x128xf32>,
    } else {
    }
    return
  }
  func.func @transform_0(%arg0: i32, %arg1: i32, %arg2: i32) -> (i32, i32) {
    %c0_i32 = arith.constant 0 : i32
    return %arg0, %arg2 : i32, i32
  }
  func.func @transform_1(%arg0: i32, %arg1: i32, %arg2: i32) -> (i32, i32) {
    %c0_i32 = arith.constant 0 : i32
    return %arg2, %arg1 : i32, i32
  }
  func.func @transform_2(%arg0: i32, %arg1: i32, %arg2: i32) -> (i32, i32) {
    %c0_i32 = arith.constant 0 : i32
    %c0_i32_0 = arith.constant 0 : i32
    return %c0_i32, %arg1 : i32, i32
  }
  func.func @transform_3(%arg0: i32, %arg1: i32, %arg2: i32) -> (i32, i32) {
    %c0_i32 = arith.constant 0 : i32
    %c0_i32_0 = arith.constant 0 : i32
    return %c0_i32, %arg1 : i32, i32
  }
  func.func @transform_4(%arg0: i32, %arg1: i32, %arg2: i32) -> (i32, i32) {
    %c0_i32 = arith.constant 0 : i32
    return %arg0, %arg1 : i32, i32
  }
}

module attributes {stable_mosaic.version = 11 : i64} {
  func.func @_fused_mm_kernel(%arg0: i32, %arg1: i32, %arg2: i32, %arg3: memref<16x384xbf16, #tpu.memory_space<vmem>>, %arg4: memref<384x256xbf16, #tpu.memory_space<vmem>>, %arg5: memref<1x256xf32, #tpu.memory_space<vmem>>, %arg6: memref<1x256xf32, #tpu.memory_space<vmem>>, %arg7: memref<16x256xf32, #tpu.memory_space<vmem>>, %arg8: memref<16x256xf32, #tpu.memory_space<vmem>>) attributes {dimension_semantics = [#tpu.dimension_semantics<parallel>, #tpu.dimension_semantics<parallel>, #tpu.dimension_semantics<arbitrary>], iteration_bounds = array<i64: 1, 1, 3>, scalar_prefetch = 0 : i64, scratch_operands = 1 : i64, tpu.core_type = #tpu.core_type<tc>, window_params = [{transform_indices = @transform_0, window_bounds = array<i64: 16, 384>}, {transform_indices = @transform_1, window_bounds = array<i64: 384, 256>}, {transform_indices = @transform_2, window_bounds = array<i64: 1, 256>}, {transform_indices = @transform_3, window_bounds = array<i64: 1, 256>}, {transform_indices = @transform_4, window_bounds = array<i64: 16, 256>}]} {
    %c0_i32 = arith.constant 0 : i32
    %0 = arith.cmpi eq, %arg2, %c0_i32 : i32
    %1 = arith.extui %0 : i1 to i32
    %c0_i32_0 = arith.constant 0 : i32
    %2 = arith.cmpi ne, %1, %c0_i32_0 : i32
    scf.if %2 {
      %cst_9 = arith.constant 0.000000e+00 : f32
      %12 = vector.broadcast %cst_9 : f32 to vector<16x256xf32>
      %c0_10 = arith.constant 0 : index
      %c0_11 = arith.constant 0 : index
      %13 = vector.load %arg8[%c0_10, %c0_11] : memref<16x256xf32, #tpu.memory_space<vmem>>, vector<16x256xf32>
      tpu.vector_store %arg8[%c0_10, %c0_11], %12 {strides = array<i32>} : memref<16x256xf32, #tpu.memory_space<vmem>>, vector<16x256xf32>,
    } else {
    }
    %c0 = arith.constant 0 : index
    %c0_1 = arith.constant 0 : index
    %3 = vector.load %arg8[%c0, %c0_1] : memref<16x256xf32, #tpu.memory_space<vmem>>, vector<16x256xf32>
    %c0_2 = arith.constant 0 : index
    %c0_3 = arith.constant 0 : index
    %4 = vector.load %arg3[%c0_2, %c0_3] : memref<16x384xbf16, #tpu.memory_space<vmem>>, vector<16x384xbf16>
    %c0_4 = arith.constant 0 : index
    %c0_5 = arith.constant 0 : index
    %5 = vector.load %arg4[%c0_4, %c0_5] : memref<384x256xbf16, #tpu.memory_space<vmem>>, vector<384x256xbf16>
    %cst = arith.constant dense<0.000000e+00> : vector<16x256xf32>
    %6 = tpu.matmul %4, %5, %cst {dimension_numbers = #tpu.dot_dimension_numbers<[1], [0], [0], [1], [0, 0, 1, 1], [], []>} : vector<16x384xbf16>, vector<384x256xbf16>, vector<16x256xf32> -> vector<16x256xf32>
    %7 = arith.addf %3, %6 : vector<16x256xf32>
    %c0_6 = arith.constant 0 : index
    %c0_7 = arith.constant 0 : index
    %8 = vector.load %arg8[%c0_6, %c0_7] : memref<16x256xf32, #tpu.memory_space<vmem>>, vector<16x256xf32>
    tpu.vector_store %arg8[%c0_6, %c0_7], %7 {strides = array<i32>} : memref<16x256xf32, #tpu.memory_space<vmem>>, vector<16x256xf32>,
    %c2_i32 = arith.constant 2 : i32
    %9 = arith.cmpi eq, %arg2, %c2_i32 : i32
    %10 = arith.extui %9 : i1 to i32
    %c0_i32_8 = arith.constant 0 : i32
    %11 = arith.cmpi ne, %10, %c0_i32_8 : i32
    scf.if %11 {
      %c0_9 = arith.constant 0 : index
      %c0_10 = arith.constant 0 : index
      %12 = vector.load %arg8[%c0_9, %c0_10] : memref<16x256xf32, #tpu.memory_space<vmem>>, vector<16x256xf32>
      %c0_11 = arith.constant 0 : index
      %c0_12 = arith.constant 0 : index
      %13 = vector.load %arg5[%c0_11, %c0_12] : memref<1x256xf32, #tpu.memory_space<vmem>>, vector<1x256xf32>
      %14 = vector.broadcast %13 : vector<1x256xf32> to vector<16x256xf32>
      %15 = arith.mulf %12, %14 : vector<16x256xf32>
      %c0_13 = arith.constant 0 : index
      %c0_14 = arith.constant 0 : index
      %16 = vector.load %arg6[%c0_13, %c0_14] : memref<1x256xf32, #tpu.memory_space<vmem>>, vector<1x256xf32>
      %17 = vector.broadcast %16 : vector<1x256xf32> to vector<16x256xf32>
      %18 = arith.addf %15, %17 : vector<16x256xf32>
      %cst_15 = arith.constant 0.000000e+00 : f32
      %19 = vector.broadcast %cst_15 : f32 to vector<16x256xf32>
      %20 = arith.maximumf %18, %19 : vector<16x256xf32>
      %c0_16 = arith.constant 0 : index
      %c0_17 = arith.constant 0 : index
      %21 = vector.load %arg7[%c0_16, %c0_17] : memref<16x256xf32, #tpu.memory_space<vmem>>, vector<16x256xf32>
      tpu.vector_store %arg7[%c0_16, %c0_17], %20 {strides = array<i32>} : memref<16x256xf32, #tpu.memory_space<vmem>>, vector<16x256xf32>,
    } else {
    }
    return
  }
  func.func @transform_0(%arg0: i32, %arg1: i32, %arg2: i32) -> (i32, i32) {
    %c0_i32 = arith.constant 0 : i32
    return %arg0, %arg2 : i32, i32
  }
  func.func @transform_1(%arg0: i32, %arg1: i32, %arg2: i32) -> (i32, i32) {
    %c0_i32 = arith.constant 0 : i32
    return %arg2, %arg1 : i32, i32
  }
  func.func @transform_2(%arg0: i32, %arg1: i32, %arg2: i32) -> (i32, i32) {
    %c0_i32 = arith.constant 0 : i32
    %c0_i32_0 = arith.constant 0 : i32
    return %c0_i32, %arg1 : i32, i32
  }
  func.func @transform_3(%arg0: i32, %arg1: i32, %arg2: i32) -> (i32, i32) {
    %c0_i32 = arith.constant 0 : i32
    %c0_i32_0 = arith.constant 0 : i32
    return %c0_i32, %arg1 : i32, i32
  }
  func.func @transform_4(%arg0: i32, %arg1: i32, %arg2: i32) -> (i32, i32) {
    %c0_i32 = arith.constant 0 : i32
    return %arg0, %arg1 : i32, i32
  }
}

module attributes {stable_mosaic.version = 11 : i64} {
  func.func @_fused_mm_kernel(%arg0: i32, %arg1: i32, %arg2: i32, %arg3: memref<16x128xbf16, #tpu.memory_space<vmem>>, %arg4: memref<128x256xbf16, #tpu.memory_space<vmem>>, %arg5: memref<1x256xf32, #tpu.memory_space<vmem>>, %arg6: memref<1x256xf32, #tpu.memory_space<vmem>>, %arg7: memref<16x256xf32, #tpu.memory_space<vmem>>, %arg8: memref<16x256xf32, #tpu.memory_space<vmem>>) attributes {dimension_semantics = [#tpu.dimension_semantics<parallel>, #tpu.dimension_semantics<parallel>, #tpu.dimension_semantics<arbitrary>], iteration_bounds = array<i64: 1, 1, 1>, scalar_prefetch = 0 : i64, scratch_operands = 1 : i64, tpu.core_type = #tpu.core_type<tc>, window_params = [{transform_indices = @transform_0, window_bounds = array<i64: 16, 128>}, {transform_indices = @transform_1, window_bounds = array<i64: 128, 256>}, {transform_indices = @transform_2, window_bounds = array<i64: 1, 256>}, {transform_indices = @transform_3, window_bounds = array<i64: 1, 256>}, {transform_indices = @transform_4, window_bounds = array<i64: 16, 256>}]} {
    %c0_i32 = arith.constant 0 : i32
    %0 = arith.cmpi eq, %arg2, %c0_i32 : i32
    %1 = arith.extui %0 : i1 to i32
    %c0_i32_0 = arith.constant 0 : i32
    %2 = arith.cmpi ne, %1, %c0_i32_0 : i32
    scf.if %2 {
      %cst_10 = arith.constant 0.000000e+00 : f32
      %12 = vector.broadcast %cst_10 : f32 to vector<16x256xf32>
      %c0_11 = arith.constant 0 : index
      %c0_12 = arith.constant 0 : index
      %13 = vector.load %arg8[%c0_11, %c0_12] : memref<16x256xf32, #tpu.memory_space<vmem>>, vector<16x256xf32>
      tpu.vector_store %arg8[%c0_11, %c0_12], %12 {strides = array<i32>} : memref<16x256xf32, #tpu.memory_space<vmem>>, vector<16x256xf32>,
    } else {
    }
    %c0 = arith.constant 0 : index
    %c0_1 = arith.constant 0 : index
    %3 = vector.load %arg8[%c0, %c0_1] : memref<16x256xf32, #tpu.memory_space<vmem>>, vector<16x256xf32>
    %c0_2 = arith.constant 0 : index
    %c0_3 = arith.constant 0 : index
    %4 = vector.load %arg3[%c0_2, %c0_3] : memref<16x128xbf16, #tpu.memory_space<vmem>>, vector<16x128xbf16>
    %c0_4 = arith.constant 0 : index
    %c0_5 = arith.constant 0 : index
    %5 = vector.load %arg4[%c0_4, %c0_5] : memref<128x256xbf16, #tpu.memory_space<vmem>>, vector<128x256xbf16>
    %cst = arith.constant dense<0.000000e+00> : vector<16x256xf32>
    %6 = tpu.matmul %4, %5, %cst {dimension_numbers = #tpu.dot_dimension_numbers<[1], [0], [0], [1], [0, 0, 1, 1], [], []>} : vector<16x128xbf16>, vector<128x256xbf16>, vector<16x256xf32> -> vector<16x256xf32>
    %7 = arith.addf %3, %6 : vector<16x256xf32>
    %c0_6 = arith.constant 0 : index
    %c0_7 = arith.constant 0 : index
    %8 = vector.load %arg8[%c0_6, %c0_7] : memref<16x256xf32, #tpu.memory_space<vmem>>, vector<16x256xf32>
    tpu.vector_store %arg8[%c0_6, %c0_7], %7 {strides = array<i32>} : memref<16x256xf32, #tpu.memory_space<vmem>>, vector<16x256xf32>,
    %c0_i32_8 = arith.constant 0 : i32
    %9 = arith.cmpi eq, %arg2, %c0_i32_8 : i32
    %10 = arith.extui %9 : i1 to i32
    %c0_i32_9 = arith.constant 0 : i32
    %11 = arith.cmpi ne, %10, %c0_i32_9 : i32
    scf.if %11 {
      %c0_10 = arith.constant 0 : index
      %c0_11 = arith.constant 0 : index
      %12 = vector.load %arg8[%c0_10, %c0_11] : memref<16x256xf32, #tpu.memory_space<vmem>>, vector<16x256xf32>
      %c0_12 = arith.constant 0 : index
      %c0_13 = arith.constant 0 : index
      %13 = vector.load %arg5[%c0_12, %c0_13] : memref<1x256xf32, #tpu.memory_space<vmem>>, vector<1x256xf32>
      %14 = vector.broadcast %13 : vector<1x256xf32> to vector<16x256xf32>
      %15 = arith.mulf %12, %14 : vector<16x256xf32>
      %c0_14 = arith.constant 0 : index
      %c0_15 = arith.constant 0 : index
      %16 = vector.load %arg6[%c0_14, %c0_15] : memref<1x256xf32, #tpu.memory_space<vmem>>, vector<1x256xf32>
      %17 = vector.broadcast %16 : vector<1x256xf32> to vector<16x256xf32>
      %18 = arith.addf %15, %17 : vector<16x256xf32>
      %c0_16 = arith.constant 0 : index
      %c0_17 = arith.constant 0 : index
      %19 = vector.load %arg7[%c0_16, %c0_17] : memref<16x256xf32, #tpu.memory_space<vmem>>, vector<16x256xf32>
      tpu.vector_store %arg7[%c0_16, %c0_17], %18 {strides = array<i32>} : memref<16x256xf32, #tpu.memory_space<vmem>>, vector<16x256xf32>,
    } else {
    }
    return
  }
  func.func @transform_0(%arg0: i32, %arg1: i32, %arg2: i32) -> (i32, i32) {
    %c0_i32 = arith.constant 0 : i32
    return %arg0, %arg2 : i32, i32
  }
  func.func @transform_1(%arg0: i32, %arg1: i32, %arg2: i32) -> (i32, i32) {
    %c0_i32 = arith.constant 0 : i32
    return %arg2, %arg1 : i32, i32
  }
  func.func @transform_2(%arg0: i32, %arg1: i32, %arg2: i32) -> (i32, i32) {
    %c0_i32 = arith.constant 0 : i32
    %c0_i32_0 = arith.constant 0 : i32
    return %c0_i32, %arg1 : i32, i32
  }
  func.func @transform_3(%arg0: i32, %arg1: i32, %arg2: i32) -> (i32, i32) {
    %c0_i32 = arith.constant 0 : i32
    %c0_i32_0 = arith.constant 0 : i32
    return %c0_i32, %arg1 : i32, i32
  }
  func.func @transform_4(%arg0: i32, %arg1: i32, %arg2: i32) -> (i32, i32) {
    %c0_i32 = arith.constant 0 : i32
    return %arg0, %arg1 : i32, i32
  }
}

module attributes {stable_mosaic.version = 11 : i64} {
  func.func @_fused_mm_kernel(%arg0: i32, %arg1: i32, %arg2: i32, %arg3: memref<16x768xbf16, #tpu.memory_space<vmem>>, %arg4: memref<768x256xbf16, #tpu.memory_space<vmem>>, %arg5: memref<1x256xf32, #tpu.memory_space<vmem>>, %arg6: memref<1x256xf32, #tpu.memory_space<vmem>>, %arg7: memref<16x256xf32, #tpu.memory_space<vmem>>, %arg8: memref<16x256xf32, #tpu.memory_space<vmem>>, %arg9: memref<16x256xf32, #tpu.memory_space<vmem>>) attributes {dimension_semantics = [#tpu.dimension_semantics<parallel>, #tpu.dimension_semantics<parallel>, #tpu.dimension_semantics<arbitrary>], iteration_bounds = array<i64: 1, 1, 3>, scalar_prefetch = 0 : i64, scratch_operands = 1 : i64, tpu.core_type = #tpu.core_type<tc>, window_params = [{transform_indices = @transform_0, window_bounds = array<i64: 16, 768>}, {transform_indices = @transform_1, window_bounds = array<i64: 768, 256>}, {transform_indices = @transform_2, window_bounds = array<i64: 1, 256>}, {transform_indices = @transform_3, window_bounds = array<i64: 1, 256>}, {transform_indices = @transform_4, window_bounds = array<i64: 16, 256>}, {transform_indices = @transform_5, window_bounds = array<i64: 16, 256>}]} {
    %c0_i32 = arith.constant 0 : i32
    %0 = arith.cmpi eq, %arg2, %c0_i32 : i32
    %1 = arith.extui %0 : i1 to i32
    %c0_i32_0 = arith.constant 0 : i32
    %2 = arith.cmpi ne, %1, %c0_i32_0 : i32
    scf.if %2 {
      %cst_9 = arith.constant 0.000000e+00 : f32
      %12 = vector.broadcast %cst_9 : f32 to vector<16x256xf32>
      %c0_10 = arith.constant 0 : index
      %c0_11 = arith.constant 0 : index
      %13 = vector.load %arg9[%c0_10, %c0_11] : memref<16x256xf32, #tpu.memory_space<vmem>>, vector<16x256xf32>
      tpu.vector_store %arg9[%c0_10, %c0_11], %12 {strides = array<i32>} : memref<16x256xf32, #tpu.memory_space<vmem>>, vector<16x256xf32>,
    } else {
    }
    %c0 = arith.constant 0 : index
    %c0_1 = arith.constant 0 : index
    %3 = vector.load %arg9[%c0, %c0_1] : memref<16x256xf32, #tpu.memory_space<vmem>>, vector<16x256xf32>
    %c0_2 = arith.constant 0 : index
    %c0_3 = arith.constant 0 : index
    %4 = vector.load %arg3[%c0_2, %c0_3] : memref<16x768xbf16, #tpu.memory_space<vmem>>, vector<16x768xbf16>
    %c0_4 = arith.constant 0 : index
    %c0_5 = arith.constant 0 : index
    %5 = vector.load %arg4[%c0_4, %c0_5] : memref<768x256xbf16, #tpu.memory_space<vmem>>, vector<768x256xbf16>
    %cst = arith.constant dense<0.000000e+00> : vector<16x256xf32>
    %6 = tpu.matmul %4, %5, %cst {dimension_numbers = #tpu.dot_dimension_numbers<[1], [0], [0], [1], [0, 0, 1, 1], [], []>} : vector<16x768xbf16>, vector<768x256xbf16>, vector<16x256xf32> -> vector<16x256xf32>
    %7 = arith.addf %3, %6 : vector<16x256xf32>
    %c0_6 = arith.constant 0 : index
    %c0_7 = arith.constant 0 : index
    %8 = vector.load %arg9[%c0_6, %c0_7] : memref<16x256xf32, #tpu.memory_space<vmem>>, vector<16x256xf32>
    tpu.vector_store %arg9[%c0_6, %c0_7], %7 {strides = array<i32>} : memref<16x256xf32, #tpu.memory_space<vmem>>, vector<16x256xf32>,
    %c2_i32 = arith.constant 2 : i32
    %9 = arith.cmpi eq, %arg2, %c2_i32 : i32
    %10 = arith.extui %9 : i1 to i32
    %c0_i32_8 = arith.constant 0 : i32
    %11 = arith.cmpi ne, %10, %c0_i32_8 : i32
    scf.if %11 {
      %c0_9 = arith.constant 0 : index
      %c0_10 = arith.constant 0 : index
      %12 = vector.load %arg9[%c0_9, %c0_10] : memref<16x256xf32, #tpu.memory_space<vmem>>, vector<16x256xf32>
      %c0_11 = arith.constant 0 : index
      %c0_12 = arith.constant 0 : index
      %13 = vector.load %arg5[%c0_11, %c0_12] : memref<1x256xf32, #tpu.memory_space<vmem>>, vector<1x256xf32>
      %14 = vector.broadcast %13 : vector<1x256xf32> to vector<16x256xf32>
      %15 = arith.mulf %12, %14 : vector<16x256xf32>
      %c0_13 = arith.constant 0 : index
      %c0_14 = arith.constant 0 : index
      %16 = vector.load %arg6[%c0_13, %c0_14] : memref<1x256xf32, #tpu.memory_space<vmem>>, vector<1x256xf32>
      %17 = vector.broadcast %16 : vector<1x256xf32> to vector<16x256xf32>
      %18 = arith.addf %15, %17 : vector<16x256xf32>
      %c0_15 = arith.constant 0 : index
      %c0_16 = arith.constant 0 : index
      %19 = vector.load %arg7[%c0_15, %c0_16] : memref<16x256xf32, #tpu.memory_space<vmem>>, vector<16x256xf32>
      %20 = arith.addf %18, %19 : vector<16x256xf32>
      %cst_17 = arith.constant 0.000000e+00 : f32
      %21 = vector.broadcast %cst_17 : f32 to vector<16x256xf32>
      %22 = arith.maximumf %20, %21 : vector<16x256xf32>
      %c0_18 = arith.constant 0 : index
      %c0_19 = arith.constant 0 : index
      %23 = vector.load %arg8[%c0_18, %c0_19] : memref<16x256xf32, #tpu.memory_space<vmem>>, vector<16x256xf32>
      tpu.vector_store %arg8[%c0_18, %c0_19], %22 {strides = array<i32>} : memref<16x256xf32, #tpu.memory_space<vmem>>, vector<16x256xf32>,
    } else {
    }
    return
  }
  func.func @transform_0(%arg0: i32, %arg1: i32, %arg2: i32) -> (i32, i32) {
    %c0_i32 = arith.constant 0 : i32
    return %arg0, %arg2 : i32, i32
  }
  func.func @transform_1(%arg0: i32, %arg1: i32, %arg2: i32) -> (i32, i32) {
    %c0_i32 = arith.constant 0 : i32
    return %arg2, %arg1 : i32, i32
  }
  func.func @transform_2(%arg0: i32, %arg1: i32, %arg2: i32) -> (i32, i32) {
    %c0_i32 = arith.constant 0 : i32
    %c0_i32_0 = arith.constant 0 : i32
    return %c0_i32, %arg1 : i32, i32
  }
  func.func @transform_3(%arg0: i32, %arg1: i32, %arg2: i32) -> (i32, i32) {
    %c0_i32 = arith.constant 0 : i32
    %c0_i32_0 = arith.constant 0 : i32
    return %c0_i32, %arg1 : i32, i32
  }
  func.func @transform_4(%arg0: i32, %arg1: i32, %arg2: i32) -> (i32, i32) {
    %c0_i32 = arith.constant 0 : i32
    return %arg0, %arg1 : i32, i32
  }
  func.func @transform_5(%arg0: i32, %arg1: i32, %arg2: i32) -> (i32, i32) {
    %c0_i32 = arith.constant 0 : i32
    return %arg0, %arg1 : i32, i32
  }
}

module attributes {stable_mosaic.version = 11 : i64} {
  func.func @_fused_mm_kernel(%arg0: i32, %arg1: i32, %arg2: i32, %arg3: memref<16x768xbf16, #tpu.memory_space<vmem>>, %arg4: memref<768x256xbf16, #tpu.memory_space<vmem>>, %arg5: memref<1x256xf32, #tpu.memory_space<vmem>>, %arg6: memref<1x256xf32, #tpu.memory_space<vmem>>, %arg7: memref<16x256xf32, #tpu.memory_space<vmem>>, %arg8: memref<16x256xf32, #tpu.memory_space<vmem>>) attributes {dimension_semantics = [#tpu.dimension_semantics<parallel>, #tpu.dimension_semantics<parallel>, #tpu.dimension_semantics<arbitrary>], iteration_bounds = array<i64: 1, 2, 3>, scalar_prefetch = 0 : i64, scratch_operands = 1 : i64, tpu.core_type = #tpu.core_type<tc>, window_params = [{transform_indices = @transform_0, window_bounds = array<i64: 16, 768>}, {transform_indices = @transform_1, window_bounds = array<i64: 768, 256>}, {transform_indices = @transform_2, window_bounds = array<i64: 1, 256>}, {transform_indices = @transform_3, window_bounds = array<i64: 1, 256>}, {transform_indices = @transform_4, window_bounds = array<i64: 16, 256>}]} {
    %c0_i32 = arith.constant 0 : i32
    %0 = arith.cmpi eq, %arg2, %c0_i32 : i32
    %1 = arith.extui %0 : i1 to i32
    %c0_i32_0 = arith.constant 0 : i32
    %2 = arith.cmpi ne, %1, %c0_i32_0 : i32
    scf.if %2 {
      %cst_9 = arith.constant 0.000000e+00 : f32
      %12 = vector.broadcast %cst_9 : f32 to vector<16x256xf32>
      %c0_10 = arith.constant 0 : index
      %c0_11 = arith.constant 0 : index
      %13 = vector.load %arg8[%c0_10, %c0_11] : memref<16x256xf32, #tpu.memory_space<vmem>>, vector<16x256xf32>
      tpu.vector_store %arg8[%c0_10, %c0_11], %12 {strides = array<i32>} : memref<16x256xf32, #tpu.memory_space<vmem>>, vector<16x256xf32>,
    } else {
    }
    %c0 = arith.constant 0 : index
    %c0_1 = arith.constant 0 : index
    %3 = vector.load %arg8[%c0, %c0_1] : memref<16x256xf32, #tpu.memory_space<vmem>>, vector<16x256xf32>
    %c0_2 = arith.constant 0 : index
    %c0_3 = arith.constant 0 : index
    %4 = vector.load %arg3[%c0_2, %c0_3] : memref<16x768xbf16, #tpu.memory_space<vmem>>, vector<16x768xbf16>
    %c0_4 = arith.constant 0 : index
    %c0_5 = arith.constant 0 : index
    %5 = vector.load %arg4[%c0_4, %c0_5] : memref<768x256xbf16, #tpu.memory_space<vmem>>, vector<768x256xbf16>
    %cst = arith.constant dense<0.000000e+00> : vector<16x256xf32>
    %6 = tpu.matmul %4, %5, %cst {dimension_numbers = #tpu.dot_dimension_numbers<[1], [0], [0], [1], [0, 0, 1, 1], [], []>} : vector<16x768xbf16>, vector<768x256xbf16>, vector<16x256xf32> -> vector<16x256xf32>
    %7 = arith.addf %3, %6 : vector<16x256xf32>
    %c0_6 = arith.constant 0 : index
    %c0_7 = arith.constant 0 : index
    %8 = vector.load %arg8[%c0_6, %c0_7] : memref<16x256xf32, #tpu.memory_space<vmem>>, vector<16x256xf32>
    tpu.vector_store %arg8[%c0_6, %c0_7], %7 {strides = array<i32>} : memref<16x256xf32, #tpu.memory_space<vmem>>, vector<16x256xf32>,
    %c2_i32 = arith.constant 2 : i32
    %9 = arith.cmpi eq, %arg2, %c2_i32 : i32
    %10 = arith.extui %9 : i1 to i32
    %c0_i32_8 = arith.constant 0 : i32
    %11 = arith.cmpi ne, %10, %c0_i32_8 : i32
    scf.if %11 {
      %c0_9 = arith.constant 0 : index
      %c0_10 = arith.constant 0 : index
      %12 = vector.load %arg8[%c0_9, %c0_10] : memref<16x256xf32, #tpu.memory_space<vmem>>, vector<16x256xf32>
      %c0_11 = arith.constant 0 : index
      %c0_12 = arith.constant 0 : index
      %13 = vector.load %arg5[%c0_11, %c0_12] : memref<1x256xf32, #tpu.memory_space<vmem>>, vector<1x256xf32>
      %14 = vector.broadcast %13 : vector<1x256xf32> to vector<16x256xf32>
      %15 = arith.mulf %12, %14 : vector<16x256xf32>
      %c0_13 = arith.constant 0 : index
      %c0_14 = arith.constant 0 : index
      %16 = vector.load %arg6[%c0_13, %c0_14] : memref<1x256xf32, #tpu.memory_space<vmem>>, vector<1x256xf32>
      %17 = vector.broadcast %16 : vector<1x256xf32> to vector<16x256xf32>
      %18 = arith.addf %15, %17 : vector<16x256xf32>
      %cst_15 = arith.constant 0.000000e+00 : f32
      %19 = vector.broadcast %cst_15 : f32 to vector<16x256xf32>
      %20 = arith.maximumf %18, %19 : vector<16x256xf32>
      %c0_16 = arith.constant 0 : index
      %c0_17 = arith.constant 0 : index
      %21 = vector.load %arg7[%c0_16, %c0_17] : memref<16x256xf32, #tpu.memory_space<vmem>>, vector<16x256xf32>
      tpu.vector_store %arg7[%c0_16, %c0_17], %20 {strides = array<i32>} : memref<16x256xf32, #tpu.memory_space<vmem>>, vector<16x256xf32>,
    } else {
    }
    return
  }
  func.func @transform_0(%arg0: i32, %arg1: i32, %arg2: i32) -> (i32, i32) {
    %c0_i32 = arith.constant 0 : i32
    return %arg0, %arg2 : i32, i32
  }
  func.func @transform_1(%arg0: i32, %arg1: i32, %arg2: i32) -> (i32, i32) {
    %c0_i32 = arith.constant 0 : i32
    return %arg2, %arg1 : i32, i32
  }
  func.func @transform_2(%arg0: i32, %arg1: i32, %arg2: i32) -> (i32, i32) {
    %c0_i32 = arith.constant 0 : i32
    %c0_i32_0 = arith.constant 0 : i32
    return %c0_i32, %arg1 : i32, i32
  }
  func.func @transform_3(%arg0: i32, %arg1: i32, %arg2: i32) -> (i32, i32) {
    %c0_i32 = arith.constant 0 : i32
    %c0_i32_0 = arith.constant 0 : i32
    return %c0_i32, %arg1 : i32, i32
  }
  func.func @transform_4(%arg0: i32, %arg1: i32, %arg2: i32) -> (i32, i32) {
    %c0_i32 = arith.constant 0 : i32
    return %arg0, %arg1 : i32, i32
  }
}

module attributes {stable_mosaic.version = 11 : i64} {
  func.func @_fused_mm_kernel(%arg0: i32, %arg1: i32, %arg2: i32, %arg3: memref<16x256xbf16, #tpu.memory_space<vmem>>, %arg4: memref<256x256xbf16, #tpu.memory_space<vmem>>, %arg5: memref<1x256xf32, #tpu.memory_space<vmem>>, %arg6: memref<1x256xf32, #tpu.memory_space<vmem>>, %arg7: memref<16x256xf32, #tpu.memory_space<vmem>>, %arg8: memref<16x256xf32, #tpu.memory_space<vmem>>) attributes {dimension_semantics = [#tpu.dimension_semantics<parallel>, #tpu.dimension_semantics<parallel>, #tpu.dimension_semantics<arbitrary>], iteration_bounds = array<i64: 1, 2, 1>, scalar_prefetch = 0 : i64, scratch_operands = 1 : i64, tpu.core_type = #tpu.core_type<tc>, window_params = [{transform_indices = @transform_0, window_bounds = array<i64: 16, 256>}, {transform_indices = @transform_1, window_bounds = array<i64: 256, 256>}, {transform_indices = @transform_2, window_bounds = array<i64: 1, 256>}, {transform_indices = @transform_3, window_bounds = array<i64: 1, 256>}, {transform_indices = @transform_4, window_bounds = array<i64: 16, 256>}]} {
    %c0_i32 = arith.constant 0 : i32
    %0 = arith.cmpi eq, %arg2, %c0_i32 : i32
    %1 = arith.extui %0 : i1 to i32
    %c0_i32_0 = arith.constant 0 : i32
    %2 = arith.cmpi ne, %1, %c0_i32_0 : i32
    scf.if %2 {
      %cst_10 = arith.constant 0.000000e+00 : f32
      %12 = vector.broadcast %cst_10 : f32 to vector<16x256xf32>
      %c0_11 = arith.constant 0 : index
      %c0_12 = arith.constant 0 : index
      %13 = vector.load %arg8[%c0_11, %c0_12] : memref<16x256xf32, #tpu.memory_space<vmem>>, vector<16x256xf32>
      tpu.vector_store %arg8[%c0_11, %c0_12], %12 {strides = array<i32>} : memref<16x256xf32, #tpu.memory_space<vmem>>, vector<16x256xf32>,
    } else {
    }
    %c0 = arith.constant 0 : index
    %c0_1 = arith.constant 0 : index
    %3 = vector.load %arg8[%c0, %c0_1] : memref<16x256xf32, #tpu.memory_space<vmem>>, vector<16x256xf32>
    %c0_2 = arith.constant 0 : index
    %c0_3 = arith.constant 0 : index
    %4 = vector.load %arg3[%c0_2, %c0_3] : memref<16x256xbf16, #tpu.memory_space<vmem>>, vector<16x256xbf16>
    %c0_4 = arith.constant 0 : index
    %c0_5 = arith.constant 0 : index
    %5 = vector.load %arg4[%c0_4, %c0_5] : memref<256x256xbf16, #tpu.memory_space<vmem>>, vector<256x256xbf16>
    %cst = arith.constant dense<0.000000e+00> : vector<16x256xf32>
    %6 = tpu.matmul %4, %5, %cst {dimension_numbers = #tpu.dot_dimension_numbers<[1], [0], [0], [1], [0, 0, 1, 1], [], []>} : vector<16x256xbf16>, vector<256x256xbf16>, vector<16x256xf32> -> vector<16x256xf32>
    %7 = arith.addf %3, %6 : vector<16x256xf32>
    %c0_6 = arith.constant 0 : index
    %c0_7 = arith.constant 0 : index
    %8 = vector.load %arg8[%c0_6, %c0_7] : memref<16x256xf32, #tpu.memory_space<vmem>>, vector<16x256xf32>
    tpu.vector_store %arg8[%c0_6, %c0_7], %7 {strides = array<i32>} : memref<16x256xf32, #tpu.memory_space<vmem>>, vector<16x256xf32>,
    %c0_i32_8 = arith.constant 0 : i32
    %9 = arith.cmpi eq, %arg2, %c0_i32_8 : i32
    %10 = arith.extui %9 : i1 to i32
    %c0_i32_9 = arith.constant 0 : i32
    %11 = arith.cmpi ne, %10, %c0_i32_9 : i32
    scf.if %11 {
      %c0_10 = arith.constant 0 : index
      %c0_11 = arith.constant 0 : index
      %12 = vector.load %arg8[%c0_10, %c0_11] : memref<16x256xf32, #tpu.memory_space<vmem>>, vector<16x256xf32>
      %c0_12 = arith.constant 0 : index
      %c0_13 = arith.constant 0 : index
      %13 = vector.load %arg5[%c0_12, %c0_13] : memref<1x256xf32, #tpu.memory_space<vmem>>, vector<1x256xf32>
      %14 = vector.broadcast %13 : vector<1x256xf32> to vector<16x256xf32>
      %15 = arith.mulf %12, %14 : vector<16x256xf32>
      %c0_14 = arith.constant 0 : index
      %c0_15 = arith.constant 0 : index
      %16 = vector.load %arg6[%c0_14, %c0_15] : memref<1x256xf32, #tpu.memory_space<vmem>>, vector<1x256xf32>
      %17 = vector.broadcast %16 : vector<1x256xf32> to vector<16x256xf32>
      %18 = arith.addf %15, %17 : vector<16x256xf32>
      %c0_16 = arith.constant 0 : index
      %c0_17 = arith.constant 0 : index
      %19 = vector.load %arg7[%c0_16, %c0_17] : memref<16x256xf32, #tpu.memory_space<vmem>>, vector<16x256xf32>
      tpu.vector_store %arg7[%c0_16, %c0_17], %18 {strides = array<i32>} : memref<16x256xf32, #tpu.memory_space<vmem>>, vector<16x256xf32>,
    } else {
    }
    return
  }
  func.func @transform_0(%arg0: i32, %arg1: i32, %arg2: i32) -> (i32, i32) {
    %c0_i32 = arith.constant 0 : i32
    return %arg0, %arg2 : i32, i32
  }
  func.func @transform_1(%arg0: i32, %arg1: i32, %arg2: i32) -> (i32, i32) {
    %c0_i32 = arith.constant 0 : i32
    return %arg2, %arg1 : i32, i32
  }
  func.func @transform_2(%arg0: i32, %arg1: i32, %arg2: i32) -> (i32, i32) {
    %c0_i32 = arith.constant 0 : i32
    %c0_i32_0 = arith.constant 0 : i32
    return %c0_i32, %arg1 : i32, i32
  }
  func.func @transform_3(%arg0: i32, %arg1: i32, %arg2: i32) -> (i32, i32) {
    %c0_i32 = arith.constant 0 : i32
    %c0_i32_0 = arith.constant 0 : i32
    return %c0_i32, %arg1 : i32, i32
  }
  func.func @transform_4(%arg0: i32, %arg1: i32, %arg2: i32) -> (i32, i32) {
    %c0_i32 = arith.constant 0 : i32
    return %arg0, %arg1 : i32, i32
  }
}

module attributes {stable_mosaic.version = 11 : i64} {
  func.func @_fused_mm_kernel(%arg0: i32, %arg1: i32, %arg2: i32, %arg3: memref<16x768xbf16, #tpu.memory_space<vmem>>, %arg4: memref<768x256xbf16, #tpu.memory_space<vmem>>, %arg5: memref<1x256xf32, #tpu.memory_space<vmem>>, %arg6: memref<1x256xf32, #tpu.memory_space<vmem>>, %arg7: memref<16x256xf32, #tpu.memory_space<vmem>>, %arg8: memref<16x256xf32, #tpu.memory_space<vmem>>, %arg9: memref<16x256xf32, #tpu.memory_space<vmem>>) attributes {dimension_semantics = [#tpu.dimension_semantics<parallel>, #tpu.dimension_semantics<parallel>, #tpu.dimension_semantics<arbitrary>], iteration_bounds = array<i64: 1, 2, 6>, scalar_prefetch = 0 : i64, scratch_operands = 1 : i64, tpu.core_type = #tpu.core_type<tc>, window_params = [{transform_indices = @transform_0, window_bounds = array<i64: 16, 768>}, {transform_indices = @transform_1, window_bounds = array<i64: 768, 256>}, {transform_indices = @transform_2, window_bounds = array<i64: 1, 256>}, {transform_indices = @transform_3, window_bounds = array<i64: 1, 256>}, {transform_indices = @transform_4, window_bounds = array<i64: 16, 256>}, {transform_indices = @transform_5, window_bounds = array<i64: 16, 256>}]} {
    %c0_i32 = arith.constant 0 : i32
    %0 = arith.cmpi eq, %arg2, %c0_i32 : i32
    %1 = arith.extui %0 : i1 to i32
    %c0_i32_0 = arith.constant 0 : i32
    %2 = arith.cmpi ne, %1, %c0_i32_0 : i32
    scf.if %2 {
      %cst_9 = arith.constant 0.000000e+00 : f32
      %12 = vector.broadcast %cst_9 : f32 to vector<16x256xf32>
      %c0_10 = arith.constant 0 : index
      %c0_11 = arith.constant 0 : index
      %13 = vector.load %arg9[%c0_10, %c0_11] : memref<16x256xf32, #tpu.memory_space<vmem>>, vector<16x256xf32>
      tpu.vector_store %arg9[%c0_10, %c0_11], %12 {strides = array<i32>} : memref<16x256xf32, #tpu.memory_space<vmem>>, vector<16x256xf32>,
    } else {
    }
    %c0 = arith.constant 0 : index
    %c0_1 = arith.constant 0 : index
    %3 = vector.load %arg9[%c0, %c0_1] : memref<16x256xf32, #tpu.memory_space<vmem>>, vector<16x256xf32>
    %c0_2 = arith.constant 0 : index
    %c0_3 = arith.constant 0 : index
    %4 = vector.load %arg3[%c0_2, %c0_3] : memref<16x768xbf16, #tpu.memory_space<vmem>>, vector<16x768xbf16>
    %c0_4 = arith.constant 0 : index
    %c0_5 = arith.constant 0 : index
    %5 = vector.load %arg4[%c0_4, %c0_5] : memref<768x256xbf16, #tpu.memory_space<vmem>>, vector<768x256xbf16>
    %cst = arith.constant dense<0.000000e+00> : vector<16x256xf32>
    %6 = tpu.matmul %4, %5, %cst {dimension_numbers = #tpu.dot_dimension_numbers<[1], [0], [0], [1], [0, 0, 1, 1], [], []>} : vector<16x768xbf16>, vector<768x256xbf16>, vector<16x256xf32> -> vector<16x256xf32>
    %7 = arith.addf %3, %6 : vector<16x256xf32>
    %c0_6 = arith.constant 0 : index
    %c0_7 = arith.constant 0 : index
    %8 = vector.load %arg9[%c0_6, %c0_7] : memref<16x256xf32, #tpu.memory_space<vmem>>, vector<16x256xf32>
    tpu.vector_store %arg9[%c0_6, %c0_7], %7 {strides = array<i32>} : memref<16x256xf32, #tpu.memory_space<vmem>>, vector<16x256xf32>,
    %c5_i32 = arith.constant 5 : i32
    %9 = arith.cmpi eq, %arg2, %c5_i32 : i32
    %10 = arith.extui %9 : i1 to i32
    %c0_i32_8 = arith.constant 0 : i32
    %11 = arith.cmpi ne, %10, %c0_i32_8 : i32
    scf.if %11 {
      %c0_9 = arith.constant 0 : index
      %c0_10 = arith.constant 0 : index
      %12 = vector.load %arg9[%c0_9, %c0_10] : memref<16x256xf32, #tpu.memory_space<vmem>>, vector<16x256xf32>
      %c0_11 = arith.constant 0 : index
      %c0_12 = arith.constant 0 : index
      %13 = vector.load %arg5[%c0_11, %c0_12] : memref<1x256xf32, #tpu.memory_space<vmem>>, vector<1x256xf32>
      %14 = vector.broadcast %13 : vector<1x256xf32> to vector<16x256xf32>
      %15 = arith.mulf %12, %14 : vector<16x256xf32>
      %c0_13 = arith.constant 0 : index
      %c0_14 = arith.constant 0 : index
      %16 = vector.load %arg6[%c0_13, %c0_14] : memref<1x256xf32, #tpu.memory_space<vmem>>, vector<1x256xf32>
      %17 = vector.broadcast %16 : vector<1x256xf32> to vector<16x256xf32>
      %18 = arith.addf %15, %17 : vector<16x256xf32>
      %c0_15 = arith.constant 0 : index
      %c0_16 = arith.constant 0 : index
      %19 = vector.load %arg7[%c0_15, %c0_16] : memref<16x256xf32, #tpu.memory_space<vmem>>, vector<16x256xf32>
      %20 = arith.addf %18, %19 : vector<16x256xf32>
      %cst_17 = arith.constant 0.000000e+00 : f32
      %21 = vector.broadcast %cst_17 : f32 to vector<16x256xf32>
      %22 = arith.maximumf %20, %21 : vector<16x256xf32>
      %c0_18 = arith.constant 0 : index
      %c0_19 = arith.constant 0 : index
      %23 = vector.load %arg8[%c0_18, %c0_19] : memref<16x256xf32, #tpu.memory_space<vmem>>, vector<16x256xf32>
      tpu.vector_store %arg8[%c0_18, %c0_19], %22 {strides = array<i32>} : memref<16x256xf32, #tpu.memory_space<vmem>>, vector<16x256xf32>,
    } else {
    }
    return
  }
  func.func @transform_0(%arg0: i32, %arg1: i32, %arg2: i32) -> (i32, i32) {
    %c0_i32 = arith.constant 0 : i32
    return %arg0, %arg2 : i32, i32
  }
  func.func @transform_1(%arg0: i32, %arg1: i32, %arg2: i32) -> (i32, i32) {
    %c0_i32 = arith.constant 0 : i32
    return %arg2, %arg1 : i32, i32
  }
  func.func @transform_2(%arg0: i32, %arg1: i32, %arg2: i32) -> (i32, i32) {
    %c0_i32 = arith.constant 0 : i32
    %c0_i32_0 = arith.constant 0 : i32
    return %c0_i32, %arg1 : i32, i32
  }
  func.func @transform_3(%arg0: i32, %arg1: i32, %arg2: i32) -> (i32, i32) {
    %c0_i32 = arith.constant 0 : i32
    %c0_i32_0 = arith.constant 0 : i32
    return %c0_i32, %arg1 : i32, i32
  }
  func.func @transform_4(%arg0: i32, %arg1: i32, %arg2: i32) -> (i32, i32) {
    %c0_i32 = arith.constant 0 : i32
    return %arg0, %arg1 : i32, i32
  }
  func.func @transform_5(%arg0: i32, %arg1: i32, %arg2: i32) -> (i32, i32) {
    %c0_i32 = arith.constant 0 : i32
    return %arg0, %arg1 : i32, i32
  }
}

module attributes {stable_mosaic.version = 11 : i64} {
  func.func @_global_max_kernel(%arg0: i32, %arg1: memref<2x1x512xf32, #tpu.memory_space<vmem>>, %arg2: memref<2x512xf32, #tpu.memory_space<vmem>>) attributes {dimension_semantics = [#tpu.dimension_semantics<arbitrary>], iteration_bounds = array<i64: 1>, scalar_prefetch = 0 : i64, scratch_operands = 0 : i64, tpu.core_type = #tpu.core_type<tc>, window_params = [{pipeline_mode = #tpu.pipeline_mode<synchronous>, transform_indices = @transform_0, window_bounds = array<i64: 2, 1, 512>}, {pipeline_mode = #tpu.pipeline_mode<synchronous>, transform_indices = @transform_1, window_bounds = array<i64: 2, 512>}]} {
    %c0 = arith.constant 0 : index
    %c0_0 = arith.constant 0 : index
    %c0_1 = arith.constant 0 : index
    %0 = vector.load %arg1[%c0, %c0_0, %c0_1] : memref<2x1x512xf32, #tpu.memory_space<vmem>>, vector<2x1x512xf32>
    %cst = arith.constant dense<0xFF800000> : vector<2x512xf32>
    %1 = vector.multi_reduction <maximumf>, %0, %cst [1] : vector<2x1x512xf32> to vector<2x512xf32>
    %c0_2 = arith.constant 0 : index
    %c0_3 = arith.constant 0 : index
    %2 = vector.load %arg2[%c0_2, %c0_3] : memref<2x512xf32, #tpu.memory_space<vmem>>, vector<2x512xf32>
    tpu.vector_store %arg2[%c0_2, %c0_3], %1 {strides = array<i32>} : memref<2x512xf32, #tpu.memory_space<vmem>>, vector<2x512xf32>,
    return
  }
  func.func @transform_0(%arg0: i32) -> (i32, i32, i32) {
    %c0_i32 = arith.constant 0 : i32
    %c0_i32_0 = arith.constant 0 : i32
    %c0_i32_1 = arith.constant 0 : i32
    %c0_i32_2 = arith.constant 0 : i32
    return %c0_i32, %c0_i32_0, %c0_i32_1 : i32, i32, i32
  }
  func.func @transform_1(%arg0: i32) -> (i32, i32) {
    %c0_i32 = arith.constant 0 : i32
    %c0_i32_0 = arith.constant 0 : i32
    %c0_i32_1 = arith.constant 0 : i32
    return %c0_i32, %c0_i32_0 : i32, i32
  }
}

module attributes {stable_mosaic.version = 11 : i64} {
  func.func @_global_max_kernel(%arg0: i32, %arg1: memref<2x1x256xf32, #tpu.memory_space<vmem>>, %arg2: memref<2x256xf32, #tpu.memory_space<vmem>>) attributes {dimension_semantics = [#tpu.dimension_semantics<arbitrary>], iteration_bounds = array<i64: 1>, scalar_prefetch = 0 : i64, scratch_operands = 0 : i64, tpu.core_type = #tpu.core_type<tc>, window_params = [{pipeline_mode = #tpu.pipeline_mode<synchronous>, transform_indices = @transform_0, window_bounds = array<i64: 2, 1, 256>}, {pipeline_mode = #tpu.pipeline_mode<synchronous>, transform_indices = @transform_1, window_bounds = array<i64: 2, 256>}]} {
    %c0 = arith.constant 0 : index
    %c0_0 = arith.constant 0 : index
    %c0_1 = arith.constant 0 : index
    %0 = vector.load %arg1[%c0, %c0_0, %c0_1] : memref<2x1x256xf32, #tpu.memory_space<vmem>>, vector<2x1x256xf32>
    %cst = arith.constant dense<0xFF800000> : vector<2x256xf32>
    %1 = vector.multi_reduction <maximumf>, %0, %cst [1] : vector<2x1x256xf32> to vector<2x256xf32>
    %c0_2 = arith.constant 0 : index
    %c0_3 = arith.constant 0 : index
    %2 = vector.load %arg2[%c0_2, %c0_3] : memref<2x256xf32, #tpu.memory_space<vmem>>, vector<2x256xf32>
    tpu.vector_store %arg2[%c0_2, %c0_3], %1 {strides = array<i32>} : memref<2x256xf32, #tpu.memory_space<vmem>>, vector<2x256xf32>,
    return
  }
  func.func @transform_0(%arg0: i32) -> (i32, i32, i32) {
    %c0_i32 = arith.constant 0 : i32
    %c0_i32_0 = arith.constant 0 : i32
    %c0_i32_1 = arith.constant 0 : i32
    %c0_i32_2 = arith.constant 0 : i32
    return %c0_i32, %c0_i32_0, %c0_i32_1 : i32, i32, i32
  }
  func.func @transform_1(%arg0: i32) -> (i32, i32) {
    %c0_i32 = arith.constant 0 : i32
    %c0_i32_0 = arith.constant 0 : i32
    %c0_i32_1 = arith.constant 0 : i32
    return %c0_i32, %c0_i32_0 : i32, i32
  }
}

module attributes {stable_mosaic.version = 11 : i64} {
  func.func @_global_max_kernel(%arg0: i32, %arg1: memref<2x4x128xf32, #tpu.memory_space<vmem>>, %arg2: memref<2x128xf32, #tpu.memory_space<vmem>>) attributes {dimension_semantics = [#tpu.dimension_semantics<arbitrary>], iteration_bounds = array<i64: 1>, scalar_prefetch = 0 : i64, scratch_operands = 0 : i64, tpu.core_type = #tpu.core_type<tc>, window_params = [{pipeline_mode = #tpu.pipeline_mode<synchronous>, transform_indices = @transform_0, window_bounds = array<i64: 2, 4, 128>}, {pipeline_mode = #tpu.pipeline_mode<synchronous>, transform_indices = @transform_1, window_bounds = array<i64: 2, 128>}]} {
    %c0 = arith.constant 0 : index
    %c0_0 = arith.constant 0 : index
    %c0_1 = arith.constant 0 : index
    %0 = vector.load %arg1[%c0, %c0_0, %c0_1] : memref<2x4x128xf32, #tpu.memory_space<vmem>>, vector<2x4x128xf32>
    %cst = arith.constant dense<0xFF800000> : vector<2x128xf32>
    %1 = vector.multi_reduction <maximumf>, %0, %cst [1] : vector<2x4x128xf32> to vector<2x128xf32>
    %c0_2 = arith.constant 0 : index
    %c0_3 = arith.constant 0 : index
    %2 = vector.load %arg2[%c0_2, %c0_3] : memref<2x128xf32, #tpu.memory_space<vmem>>, vector<2x128xf32>
    tpu.vector_store %arg2[%c0_2, %c0_3], %1 {strides = array<i32>} : memref<2x128xf32, #tpu.memory_space<vmem>>, vector<2x128xf32>,
    return
  }
  func.func @transform_0(%arg0: i32) -> (i32, i32, i32) {
    %c0_i32 = arith.constant 0 : i32
    %c0_i32_0 = arith.constant 0 : i32
    %c0_i32_1 = arith.constant 0 : i32
    %c0_i32_2 = arith.constant 0 : i32
    return %c0_i32, %c0_i32_0, %c0_i32_1 : i32, i32, i32
  }
  func.func @transform_1(%arg0: i32) -> (i32, i32) {
    %c0_i32 = arith.constant 0 : i32
    %c0_i32_0 = arith.constant 0 : i32
    %c0_i32_1 = arith.constant 0 : i32
    return %c0_i32, %c0_i32_0 : i32, i32
  }
}

module attributes {stable_mosaic.version = 11 : i64} {
  func.func @_fused_mm_kernel(%arg0: i32, %arg1: i32, %arg2: i32, %arg3: memref<16x896xbf16, #tpu.memory_space<vmem>>, %arg4: memref<896x256xbf16, #tpu.memory_space<vmem>>, %arg5: memref<1x256xf32, #tpu.memory_space<vmem>>, %arg6: memref<1x256xf32, #tpu.memory_space<vmem>>, %arg7: memref<16x256xf32, #tpu.memory_space<vmem>>, %arg8: memref<16x256xf32, #tpu.memory_space<vmem>>) attributes {dimension_semantics = [#tpu.dimension_semantics<parallel>, #tpu.dimension_semantics<parallel>, #tpu.dimension_semantics<arbitrary>], iteration_bounds = array<i64: 1, 6, 1>, scalar_prefetch = 0 : i64, scratch_operands = 1 : i64, tpu.core_type = #tpu.core_type<tc>, window_params = [{transform_indices = @transform_0, window_bounds = array<i64: 16, 896>}, {transform_indices = @transform_1, window_bounds = array<i64: 896, 256>}, {transform_indices = @transform_2, window_bounds = array<i64: 1, 256>}, {transform_indices = @transform_3, window_bounds = array<i64: 1, 256>}, {transform_indices = @transform_4, window_bounds = array<i64: 16, 256>}]} {
    %c0_i32 = arith.constant 0 : i32
    %0 = arith.cmpi eq, %arg2, %c0_i32 : i32
    %1 = arith.extui %0 : i1 to i32
    %c0_i32_0 = arith.constant 0 : i32
    %2 = arith.cmpi ne, %1, %c0_i32_0 : i32
    scf.if %2 {
      %cst_10 = arith.constant 0.000000e+00 : f32
      %12 = vector.broadcast %cst_10 : f32 to vector<16x256xf32>
      %c0_11 = arith.constant 0 : index
      %c0_12 = arith.constant 0 : index
      %13 = vector.load %arg8[%c0_11, %c0_12] : memref<16x256xf32, #tpu.memory_space<vmem>>, vector<16x256xf32>
      tpu.vector_store %arg8[%c0_11, %c0_12], %12 {strides = array<i32>} : memref<16x256xf32, #tpu.memory_space<vmem>>, vector<16x256xf32>,
    } else {
    }
    %c0 = arith.constant 0 : index
    %c0_1 = arith.constant 0 : index
    %3 = vector.load %arg8[%c0, %c0_1] : memref<16x256xf32, #tpu.memory_space<vmem>>, vector<16x256xf32>
    %c0_2 = arith.constant 0 : index
    %c0_3 = arith.constant 0 : index
    %4 = vector.load %arg3[%c0_2, %c0_3] : memref<16x896xbf16, #tpu.memory_space<vmem>>, vector<16x896xbf16>
    %c0_4 = arith.constant 0 : index
    %c0_5 = arith.constant 0 : index
    %5 = vector.load %arg4[%c0_4, %c0_5] : memref<896x256xbf16, #tpu.memory_space<vmem>>, vector<896x256xbf16>
    %cst = arith.constant dense<0.000000e+00> : vector<16x256xf32>
    %6 = tpu.matmul %4, %5, %cst {dimension_numbers = #tpu.dot_dimension_numbers<[1], [0], [0], [1], [0, 0, 1, 1], [], []>} : vector<16x896xbf16>, vector<896x256xbf16>, vector<16x256xf32> -> vector<16x256xf32>
    %7 = arith.addf %3, %6 : vector<16x256xf32>
    %c0_6 = arith.constant 0 : index
    %c0_7 = arith.constant 0 : index
    %8 = vector.load %arg8[%c0_6, %c0_7] : memref<16x256xf32, #tpu.memory_space<vmem>>, vector<16x256xf32>
    tpu.vector_store %arg8[%c0_6, %c0_7], %7 {strides = array<i32>} : memref<16x256xf32, #tpu.memory_space<vmem>>, vector<16x256xf32>,
    %c0_i32_8 = arith.constant 0 : i32
    %9 = arith.cmpi eq, %arg2, %c0_i32_8 : i32
    %10 = arith.extui %9 : i1 to i32
    %c0_i32_9 = arith.constant 0 : i32
    %11 = arith.cmpi ne, %10, %c0_i32_9 : i32
    scf.if %11 {
      %c0_10 = arith.constant 0 : index
      %c0_11 = arith.constant 0 : index
      %12 = vector.load %arg8[%c0_10, %c0_11] : memref<16x256xf32, #tpu.memory_space<vmem>>, vector<16x256xf32>
      %c0_12 = arith.constant 0 : index
      %c0_13 = arith.constant 0 : index
      %13 = vector.load %arg5[%c0_12, %c0_13] : memref<1x256xf32, #tpu.memory_space<vmem>>, vector<1x256xf32>
      %14 = vector.broadcast %13 : vector<1x256xf32> to vector<16x256xf32>
      %15 = arith.mulf %12, %14 : vector<16x256xf32>
      %c0_14 = arith.constant 0 : index
      %c0_15 = arith.constant 0 : index
      %16 = vector.load %arg6[%c0_14, %c0_15] : memref<1x256xf32, #tpu.memory_space<vmem>>, vector<1x256xf32>
      %17 = vector.broadcast %16 : vector<1x256xf32> to vector<16x256xf32>
      %18 = arith.addf %15, %17 : vector<16x256xf32>
      %cst_16 = arith.constant 0.000000e+00 : f32
      %19 = vector.broadcast %cst_16 : f32 to vector<16x256xf32>
      %20 = arith.maximumf %18, %19 : vector<16x256xf32>
      %c0_17 = arith.constant 0 : index
      %c0_18 = arith.constant 0 : index
      %21 = vector.load %arg7[%c0_17, %c0_18] : memref<16x256xf32, #tpu.memory_space<vmem>>, vector<16x256xf32>
      tpu.vector_store %arg7[%c0_17, %c0_18], %20 {strides = array<i32>} : memref<16x256xf32, #tpu.memory_space<vmem>>, vector<16x256xf32>,
    } else {
    }
    return
  }
  func.func @transform_0(%arg0: i32, %arg1: i32, %arg2: i32) -> (i32, i32) {
    %c0_i32 = arith.constant 0 : i32
    return %arg0, %arg2 : i32, i32
  }
  func.func @transform_1(%arg0: i32, %arg1: i32, %arg2: i32) -> (i32, i32) {
    %c0_i32 = arith.constant 0 : i32
    return %arg2, %arg1 : i32, i32
  }
  func.func @transform_2(%arg0: i32, %arg1: i32, %arg2: i32) -> (i32, i32) {
    %c0_i32 = arith.constant 0 : i32
    %c0_i32_0 = arith.constant 0 : i32
    return %c0_i32, %arg1 : i32, i32
  }
  func.func @transform_3(%arg0: i32, %arg1: i32, %arg2: i32) -> (i32, i32) {
    %c0_i32 = arith.constant 0 : i32
    %c0_i32_0 = arith.constant 0 : i32
    return %c0_i32, %arg1 : i32, i32
  }
  func.func @transform_4(%arg0: i32, %arg1: i32, %arg2: i32) -> (i32, i32) {
    %c0_i32 = arith.constant 0 : i32
    return %arg0, %arg1 : i32, i32
  }
}

module attributes {stable_mosaic.version = 11 : i64} {
  func.func @_fused_mm_kernel(%arg0: i32, %arg1: i32, %arg2: i32, %arg3: memref<16x768xbf16, #tpu.memory_space<vmem>>, %arg4: memref<768x128xbf16, #tpu.memory_space<vmem>>, %arg5: memref<1x128xf32, #tpu.memory_space<vmem>>, %arg6: memref<1x128xf32, #tpu.memory_space<vmem>>, %arg7: memref<16x128xf32, #tpu.memory_space<vmem>>, %arg8: memref<16x128xf32, #tpu.memory_space<vmem>>) attributes {dimension_semantics = [#tpu.dimension_semantics<parallel>, #tpu.dimension_semantics<parallel>, #tpu.dimension_semantics<arbitrary>], iteration_bounds = array<i64: 1, 1, 2>, scalar_prefetch = 0 : i64, scratch_operands = 1 : i64, tpu.core_type = #tpu.core_type<tc>, window_params = [{transform_indices = @transform_0, window_bounds = array<i64: 16, 768>}, {transform_indices = @transform_1, window_bounds = array<i64: 768, 128>}, {transform_indices = @transform_2, window_bounds = array<i64: 1, 128>}, {transform_indices = @transform_3, window_bounds = array<i64: 1, 128>}, {transform_indices = @transform_4, window_bounds = array<i64: 16, 128>}]} {
    %c0_i32 = arith.constant 0 : i32
    %0 = arith.cmpi eq, %arg2, %c0_i32 : i32
    %1 = arith.extui %0 : i1 to i32
    %c0_i32_0 = arith.constant 0 : i32
    %2 = arith.cmpi ne, %1, %c0_i32_0 : i32
    scf.if %2 {
      %cst_9 = arith.constant 0.000000e+00 : f32
      %12 = vector.broadcast %cst_9 : f32 to vector<16x128xf32>
      %c0_10 = arith.constant 0 : index
      %c0_11 = arith.constant 0 : index
      %13 = vector.load %arg8[%c0_10, %c0_11] : memref<16x128xf32, #tpu.memory_space<vmem>>, vector<16x128xf32>
      tpu.vector_store %arg8[%c0_10, %c0_11], %12 {strides = array<i32>} : memref<16x128xf32, #tpu.memory_space<vmem>>, vector<16x128xf32>,
    } else {
    }
    %c0 = arith.constant 0 : index
    %c0_1 = arith.constant 0 : index
    %3 = vector.load %arg8[%c0, %c0_1] : memref<16x128xf32, #tpu.memory_space<vmem>>, vector<16x128xf32>
    %c0_2 = arith.constant 0 : index
    %c0_3 = arith.constant 0 : index
    %4 = vector.load %arg3[%c0_2, %c0_3] : memref<16x768xbf16, #tpu.memory_space<vmem>>, vector<16x768xbf16>
    %c0_4 = arith.constant 0 : index
    %c0_5 = arith.constant 0 : index
    %5 = vector.load %arg4[%c0_4, %c0_5] : memref<768x128xbf16, #tpu.memory_space<vmem>>, vector<768x128xbf16>
    %cst = arith.constant dense<0.000000e+00> : vector<16x128xf32>
    %6 = tpu.matmul %4, %5, %cst {dimension_numbers = #tpu.dot_dimension_numbers<[1], [0], [0], [1], [0, 0, 1, 1], [], []>} : vector<16x768xbf16>, vector<768x128xbf16>, vector<16x128xf32> -> vector<16x128xf32>
    %7 = arith.addf %3, %6 : vector<16x128xf32>
    %c0_6 = arith.constant 0 : index
    %c0_7 = arith.constant 0 : index
    %8 = vector.load %arg8[%c0_6, %c0_7] : memref<16x128xf32, #tpu.memory_space<vmem>>, vector<16x128xf32>
    tpu.vector_store %arg8[%c0_6, %c0_7], %7 {strides = array<i32>} : memref<16x128xf32, #tpu.memory_space<vmem>>, vector<16x128xf32>,
    %c1_i32 = arith.constant 1 : i32
    %9 = arith.cmpi eq, %arg2, %c1_i32 : i32
    %10 = arith.extui %9 : i1 to i32
    %c0_i32_8 = arith.constant 0 : i32
    %11 = arith.cmpi ne, %10, %c0_i32_8 : i32
    scf.if %11 {
      %c0_9 = arith.constant 0 : index
      %c0_10 = arith.constant 0 : index
      %12 = vector.load %arg8[%c0_9, %c0_10] : memref<16x128xf32, #tpu.memory_space<vmem>>, vector<16x128xf32>
      %c0_11 = arith.constant 0 : index
      %c0_12 = arith.constant 0 : index
      %13 = vector.load %arg5[%c0_11, %c0_12] : memref<1x128xf32, #tpu.memory_space<vmem>>, vector<1x128xf32>
      %14 = vector.broadcast %13 : vector<1x128xf32> to vector<16x128xf32>
      %15 = arith.mulf %12, %14 : vector<16x128xf32>
      %c0_13 = arith.constant 0 : index
      %c0_14 = arith.constant 0 : index
      %16 = vector.load %arg6[%c0_13, %c0_14] : memref<1x128xf32, #tpu.memory_space<vmem>>, vector<1x128xf32>
      %17 = vector.broadcast %16 : vector<1x128xf32> to vector<16x128xf32>
      %18 = arith.addf %15, %17 : vector<16x128xf32>
      %c0_15 = arith.constant 0 : index
      %c0_16 = arith.constant 0 : index
      %19 = vector.load %arg7[%c0_15, %c0_16] : memref<16x128xf32, #tpu.memory_space<vmem>>, vector<16x128xf32>
      tpu.vector_store %arg7[%c0_15, %c0_16], %18 {strides = array<i32>} : memref<16x128xf32, #tpu.memory_space<vmem>>, vector<16x128xf32>,
    } else {
    }
    return
  }
  func.func @transform_0(%arg0: i32, %arg1: i32, %arg2: i32) -> (i32, i32) {
    %c0_i32 = arith.constant 0 : i32
    return %arg0, %arg2 : i32, i32
  }
  func.func @transform_1(%arg0: i32, %arg1: i32, %arg2: i32) -> (i32, i32) {
    %c0_i32 = arith.constant 0 : i32
    return %arg2, %arg1 : i32, i32
  }
  func.func @transform_2(%arg0: i32, %arg1: i32, %arg2: i32) -> (i32, i32) {
    %c0_i32 = arith.constant 0 : i32
    %c0_i32_0 = arith.constant 0 : i32
    return %c0_i32, %arg1 : i32, i32
  }
  func.func @transform_3(%arg0: i32, %arg1: i32, %arg2: i32) -> (i32, i32) {
    %c0_i32 = arith.constant 0 : i32
    %c0_i32_0 = arith.constant 0 : i32
    return %c0_i32, %arg1 : i32, i32
  }
  func.func @transform_4(%arg0: i32, %arg1: i32, %arg2: i32) -> (i32, i32) {
    %c0_i32 = arith.constant 0 : i32
    return %arg0, %arg1 : i32, i32
  }
}

</mosaic_0001>

<bundles_post_ra>
// kernel: pyresnet_forward.18
= control target key start
LH: loop header
LB: loop body
LE: loop exit
PB: predicated region body
PF: predicated region fallthrough
CT: control target
= control target key end

     0   :  { %s873_s1 = inlined_call_operand.vmem [shape: bf16[256,128], index: 1, kind: input, shape index: {}]   ;;  %s874_s0 = inlined_call_operand.vmem [shape: bf16[128,256], index: 0, kind: input, shape index: {}]   ;;  %s875_s2 = inlined_call_operand.vmem [shape: f32[1,128], index: 2, kind: input, shape index: {}]   ;;  %s876_s3 = inlined_call_operand.vmem [shape: f32[1,128], index: 3, kind: input, shape index: {}]   ;;  %s877_s4 = inlined_call_operand.vmem [shape: f32[128,128], index: 4, kind: output, shape index: {}]  }
   0x1   :  { %v622_v0 = vld [vmem:[%s873_s1 + $0x78] sm:$0xff]   ;;  %v624_v2 = vld [vmem:[%s873_s1 + $0x70] sm:$0xff]   ;;  %v626_v4 = vld [vmem:[%s873_s1 + $0x68] sm:$0xff]  }
   0x2   :  { %v623_v1 = vld [vmem:[%s873_s1 + $0x38] sm:$0xff]   ;;  %542 = vmatprep.subr.bf16.mxu0 %v622_v0  ;;  %606 = vmatprep.subr.bf16.mxu1 %v622_v0  ;;  %v625_v3 = vld [vmem:[%s873_s1 + $0x30] sm:$0xff]   ;;  %v627_v5 = vld [vmem:[%s873_s1 + $0x28] sm:$0xff]  }
   0x3   :  { %543 = vmatpush3.bf16.msra.mxu0 %v623_v1  ;;  %614 = vmatpush3.bf16.msra.mxu1 %v623_v1  ;;  %v628_v6 = vld [vmem:[%s873_s1 + $0x60] sm:$0xff]   ;;  %v630_v8 = vld [vmem:[%s873_s1 + $0x58] sm:$0xff]   ;;  %v632_v10 = vld [vmem:[%s873_s1 + $0x50] sm:$0xff]  }
   0x4   :  { %544 = vmatprep.subr.bf16.mxu0 %v624_v2  ;;  %607 = vmatprep.subr.bf16.mxu1 %v624_v2  ;;  %v629_v7 = vld [vmem:[%s873_s1 + $0x20] sm:$0xff]   ;;  %v631_v9 = vld [vmem:[%s873_s1 + $0x18] sm:$0xff]   ;;  %v633_v13 = vld [vmem:[%s873_s1 + $0x10] sm:$0xff]  }
   0x5   :  { %v640_v11 = vld [vmem:[%s874_s0 + $0x4] ss:$8 sps:$4 sm:$0xff]   ;;  %v638_v18 = vld [vmem:[%s874_s0] ss:$8 sps:$4 sm:$0xff]   ;;  %v644_v20 = vld [vmem:[%s874_s0 + $0x14] ss:$8 sps:$4 sm:$0xff]  }
   0x6   :  { %v643_v12 = vld [vmem:[%s874_s0 + $0x44] ss:$8 sps:$4 sm:$0xff]   ;;  %310 = vmatprep.mubr.bf16.mxu0 %v640_v11  ;;  %v641_v19 = vld [vmem:[%s874_s0 + $0x40] ss:$8 sps:$4 sm:$0xff]   ;;  %v646_v21 = vld [vmem:[%s874_s0 + $0x54] ss:$8 sps:$4 sm:$0xff]  }
   0x7   :  { %545 = vmatpush3.bf16.msra.mxu0 %v625_v3  ;;  %615 = vmatpush3.bf16.msra.mxu1 %v625_v3  ;;  %v634_v14 = vld [vmem:[%s873_s1 + $0x48] sm:$0xff]   ;;  %v636_v16 = vld [vmem:[%s873_s1 + $0x40] sm:$0xff]   ;;  %v648_v22 = vld [vmem:[%s874_s0 + $0x10] ss:$8 sps:$4 sm:$0xff]  }
   0x8   :  { %546 = vmatprep.subr.bf16.mxu0 %v626_v4  ;;  %608 = vmatprep.subr.bf16.mxu1 %v626_v4  ;;  %v635_v15 = vld [vmem:[%s873_s1 + $0x8] sm:$0xff]   ;;  %v637_v17 = vld [vmem:[%s873_s1] sm:$0xff]   ;;  %v649_v23 = vld [vmem:[%s874_s0 + $0x50] ss:$8 sps:$4 sm:$0xff]  }
   0x9   :  { %342 = vmatprep.mubr.bf16.mxu1 %v643_v12  ;;  %v650_v24 = vld [vmem:[%s874_s0 + $0x24] ss:$8 sps:$4 sm:$0xff]   ;;  %v654_v26 = vld [vmem:[%s874_s0 + $0x20] ss:$8 sps:$4 sm:$0xff]   ;;  %v656_v28 = vld [vmem:[%s874_s0 + $0x34] ss:$8 sps:$4 sm:$0xff]  }
   0xa   :  { %v652_v25 = vld [vmem:[%s874_s0 + $0x64] ss:$8 sps:$4 sm:$0xff]   ;;  %v655_v27 = vld [vmem:[%s874_s0 + $0x60] ss:$8 sps:$4 sm:$0xff]   ;;  %v658_v29 = vld [vmem:[%s874_s0 + $0x74] ss:$8 sps:$4 sm:$0xff]  }
   0xb   :  { %547 = vmatpush3.bf16.msra.mxu0 %v627_v5  ;;  %616 = vmatpush3.bf16.msra.mxu1 %v627_v5  ;;  %v660_v30 = vld [vmem:[%s874_s0 + $0x30] ss:$8 sps:$4 sm:$0xff]   ;;  %v786_v35 = vld [vmem:[%s875_s2] ss:$0 sm:$0xff] }
   0xc   :  { %548 = vmatprep.subr.bf16.mxu0 %v628_v6  ;;  %609 = vmatprep.subr.bf16.mxu1 %v628_v6  ;;  %v661_v31 = vld [vmem:[%s874_s0 + $0x70] ss:$8 sps:$4 sm:$0xff]   ;;  %v791_v39 = vld [vmem:[%s876_s3] ss:$0 sm:$0xff] }
   0xf   :  { %549 = vmatpush3.bf16.msra.mxu0 %v629_v7  ;;  %617 = vmatpush3.bf16.msra.mxu1 %v629_v7 }
  0x10   :  { %550 = vmatprep.subr.bf16.mxu0 %v630_v8  ;;  %610 = vmatprep.subr.bf16.mxu1 %v630_v8 }
  0x13   :  { %551 = vmatpush3.bf16.msra.mxu0 %v631_v9  ;;  %618 = vmatpush3.bf16.msra.mxu1 %v631_v9 }
  0x14   :  { %552 = vmatprep.subr.bf16.mxu0 %v632_v10  ;;  %611 = vmatprep.subr.bf16.mxu1 %v632_v10 }
  0x17   :  { %553 = vmatpush3.bf16.msra.mxu0 %v633_v13  ;;  %619 = vmatpush3.bf16.msra.mxu1 %v633_v13 }
  0x18   :  { %554 = vmatprep.subr.bf16.mxu0 %v634_v14  ;;  %612 = vmatprep.subr.bf16.mxu1 %v634_v14 }
  0x1b   :  { %555 = vmatpush3.bf16.msra.mxu0 %v635_v15  ;;  %620 = vmatpush3.bf16.msra.mxu1 %v635_v15 }
  0x1c   :  { %556 = vmatprep.subr.bf16.mxu0 %v636_v16  ;;  %613 = vmatprep.subr.bf16.mxu1 %v636_v16 }
  0x1f   :  { %557 = vmatpush3.bf16.msra.mxu0 %v637_v17  ;;  %621 = vmatpush3.bf16.msra.mxu1 %v637_v17 }
  0x22   :  { %311 = vmatmul.mubr.bf16.vlgmr.msra.gmra.mxu0 %v638_v18  ;;  %343 = vmatmul.mubr.bf16.vlgmr.msra.gmra.mxu1 %v641_v19 }
  0x23   :  { %318 = vmatprep.mubr.bf16.mxu0 %v644_v20  ;;  %350 = vmatprep.mubr.bf16.mxu1 %v646_v21 }
  0x2a   :  { %319 = vmatmul.mubr.bf16.gmra.mxu0 %v648_v22  ;;  %351 = vmatmul.mubr.bf16.gmra.mxu1 %v649_v23 }
  0x2b   :  { %326 = vmatprep.mubr.bf16.mxu0 %v650_v24  ;;  %358 = vmatprep.mubr.bf16.mxu1 %v652_v25 }
  0x32   :  { %327 = vmatmul.mubr.bf16.gmra.mxu0 %v654_v26  ;;  %359 = vmatmul.mubr.bf16.gmra.mxu1 %v655_v27 }
  0x33   :  { %334 = vmatprep.mubr.bf16.mxu0 %v656_v28  ;;  %366 = vmatprep.mubr.bf16.mxu1 %v658_v29 }
  0x3a   :  { %335 = vmatmul.mubr.bf16.gmra.mxu0 %v660_v30  ;;  %367 = vmatmul.mubr.bf16.gmra.mxu1 %v661_v31 }
  0xe2   :  { %v558_v32 = vpop.f32.mrf.mxu0  ;;  %v582_v33 = vpop.f32.mrf.mxu1 }
  0xe4   :  { %v559_v34 = vpop.f32.mrf.mxu0  ;;  %v583_v36 = vpop.f32.mrf.mxu1 }
  0xe5   :  { %v560_v37 = vadd.f32 %v559_v34, %v558_v32  ;;  %v584_v38 = vadd.f32 %v583_v36, %v582_v33 }
  0xe6   :  { %v561_v40 = vpop.f32.mrf.mxu0  ;;  %v585_v41 = vpop.f32.mrf.mxu1 }
  0xe7   :  { %v433_v42 = vmul.f32 %v560_v37, %v786_v35  ;;  %v441_v43 = vmul.f32 %v584_v38, %v786_v35 }
  0xe8   :  { %v562_v44 = vpop.f32.mrf.mxu0  ;;  %v586_v45 = vpop.f32.mrf.mxu1 }
  0xe9   :  { %v456_v46 = vadd.f32 %v791_v39, %v433_v42  ;;  %v464_v47 = vadd.f32 %v791_v39, %v441_v43  ;;  %v563_v48 = vadd.f32 %v562_v44, %v561_v40  ;;  %v587_v49 = vadd.f32 %v586_v45, %v585_v41 }
  0xea   :  { %v564_v50 = vpop.f32.mrf.mxu0  ;;  %v588_v51 = vpop.f32.mrf.mxu1 }
  0xeb   :  { %v472_v52 = vmax.f32 %v456_v46, 0.0  ;;  %v480_v53 = vmax.f32 %v464_v47, 0.0  ;;  %v434_v54 = vmul.f32 %v563_v48, %v786_v35  ;;  %v442_v55 = vmul.f32 %v587_v49, %v786_v35 }
  0xec   :  { %v565_v56 = vpop.f32.mrf.mxu0  ;;  %v589_v57 = vpop.f32.mrf.mxu1 }
  0xed   :  { %488 = vst [vmem:[%s877_s4] sm:$0xff] %v472_v52  ;;  %496 = vst [vmem:[%s877_s4 + $0x40] sm:$0xff] %v480_v53  ;;  %v457_v58 = vadd.f32 %v791_v39, %v434_v54  ;;  %v465_v59 = vadd.f32 %v791_v39, %v442_v55  ;;  %v566_v60 = vadd.f32 %v565_v56, %v564_v50 }
  0xee   :  { %v590_v61 = vadd.f32 %v589_v57, %v588_v51  ;;  %v567_v62 = vpop.f32.mrf.mxu0  ;;  %v591_v63 = vpop.f32.mrf.mxu1 }
  0xef   :  { %v473_v0 = vmax.f32 %v457_v58, 0.0  ;;  %v481_v1 = vmax.f32 %v465_v59, 0.0  ;;  %v435_v2 = vmul.f32 %v566_v60, %v786_v35 }
  0xf0   :  { %v443_v3 = vmul.f32 %v590_v61, %v786_v35  ;;  %v568_v4 = vpop.f32.mrf.mxu0  ;;  %v592_v5 = vpop.f32.mrf.mxu1 }
  0xf1   :  { %489 = vst [vmem:[%s877_s4 + $0x8] sm:$0xff] %v473_v0  ;;  %497 = vst [vmem:[%s877_s4 + $0x48] sm:$0xff] %v481_v1  ;;  %v458_v6 = vadd.f32 %v791_v39, %v435_v2  ;;  %v569_v8 = vadd.f32 %v568_v4, %v567_v62  ;;  %v593_v9 = vadd.f32 %v592_v5, %v591_v63 }
  0xf2   :  { %v466_v7 = vadd.f32 %v791_v39, %v443_v3  ;;  %v570_v10 = vpop.f32.mrf.mxu0  ;;  %v594_v11 = vpop.f32.mrf.mxu1 }
  0xf3   :  { %v474_v12 = vmax.f32 %v458_v6, 0.0  ;;  %v436_v14 = vmul.f32 %v569_v8, %v786_v35  ;;  %v444_v15 = vmul.f32 %v593_v9, %v786_v35 }
  0xf4   :  { %v482_v13 = vmax.f32 %v466_v7, 0.0  ;;  %v571_v16 = vpop.f32.mrf.mxu0  ;;  %v595_v17 = vpop.f32.mrf.mxu1 }
  0xf5   :  { %490 = vst [vmem:[%s877_s4 + $0x10] sm:$0xff] %v474_v12  ;;  %v459_v18 = vadd.f32 %v791_v39, %v436_v14  ;;  %v467_v19 = vadd.f32 %v791_v39, %v444_v15  ;;  %v572_v20 = vadd.f32 %v571_v16, %v570_v10  ;;  %v596_v21 = vadd.f32 %v595_v17, %v594_v11 }
  0xf6   :  { %498 = vst [vmem:[%s877_s4 + $0x50] sm:$0xff] %v482_v13  ;;  %v573_v22 = vpop.f32.mrf.mxu0  ;;  %v597_v23 = vpop.f32.mrf.mxu1 }
  0xf7   :  { %v475_v24 = vmax.f32 %v459_v18, 0.0  ;;  %v483_v25 = vmax.f32 %v467_v19, 0.0  ;;  %v437_v26 = vmul.f32 %v572_v20, %v786_v35  ;;  %v445_v27 = vmul.f32 %v596_v21, %v786_v35 }
  0xf8   :  { %v574_v28 = vpop.f32.mrf.mxu0  ;;  %v598_v29 = vpop.f32.mrf.mxu1 }
  0xf9   :  { %491 = vst [vmem:[%s877_s4 + $0x18] sm:$0xff] %v475_v24  ;;  %499 = vst [vmem:[%s877_s4 + $0x58] sm:$0xff] %v483_v25  ;;  %v460_v30 = vadd.f32 %v791_v39, %v437_v26  ;;  %v468_v31 = vadd.f32 %v791_v39, %v445_v27  ;;  %v575_v32 = vadd.f32 %v574_v28, %v573_v22 }
  0xfa   :  { %v599_v33 = vadd.f32 %v598_v29, %v597_v23  ;;  %v576_v34 = vpop.f32.mrf.mxu0  ;;  %v600_v36 = vpop.f32.mrf.mxu1 }
  0xfb   :  { %v476_v37 = vmax.f32 %v460_v30, 0.0  ;;  %v484_v38 = vmax.f32 %v468_v31, 0.0  ;;  %v438_v40 = vmul.f32 %v575_v32, %v786_v35 }
  0xfc   :  { %v446_v41 = vmul.f32 %v599_v33, %v786_v35  ;;  %v577_v42 = vpop.f32.mrf.mxu0  ;;  %v601_v43 = vpop.f32.mrf.mxu1 }
  0xfd   :  { %492 = vst [vmem:[%s877_s4 + $0x20] sm:$0xff] %v476_v37  ;;  %500 = vst [vmem:[%s877_s4 + $0x60] sm:$0xff] %v484_v38  ;;  %v461_v44 = vadd.f32 %v791_v39, %v438_v40  ;;  %v578_v46 = vadd.f32 %v577_v42, %v576_v34  ;;  %v602_v47 = vadd.f32 %v601_v43, %v600_v36 }
  0xfe   :  { %v469_v45 = vadd.f32 %v791_v39, %v446_v41  ;;  %v579_v48 = vpop.f32.mrf.mxu0  ;;  %v603_v49 = vpop.f32.mrf.mxu1 }
  0xff   :  { %v477_v50 = vmax.f32 %v461_v44, 0.0  ;;  %v439_v52 = vmul.f32 %v578_v46, %v786_v35  ;;  %v447_v53 = vmul.f32 %v602_v47, %v786_v35 }
 0x100   :  { %v485_v51 = vmax.f32 %v469_v45, 0.0  ;;  %v580_v54 = vpop.f32.mrf.mxu0  ;;  %v604_v55 = vpop.f32.mrf.mxu1 }
 0x101   :  { %493 = vst [vmem:[%s877_s4 + $0x28] sm:$0xff] %v477_v50  ;;  %v462_v56 = vadd.f32 %v791_v39, %v439_v52  ;;  %v470_v57 = vadd.f32 %v791_v39, %v447_v53  ;;  %v581_v58 = vadd.f32 %v580_v54, %v579_v48  ;;  %v605_v59 = vadd.f32 %v604_v55, %v603_v49 }
 0x102   :  { %501 = vst [vmem:[%s877_s4 + $0x68] sm:$0xff] %v485_v51 }
 0x103   :  { %v478_v60 = vmax.f32 %v462_v56, 0.0  ;;  %v486_v61 = vmax.f32 %v470_v57, 0.0  ;;  %v440_v62 = vmul.f32 %v581_v58, %v786_v35  ;;  %v448_v63 = vmul.f32 %v605_v59, %v786_v35 }
 0x105   :  { %494 = vst [vmem:[%s877_s4 + $0x30] sm:$0xff] %v478_v60  ;;  %502 = vst [vmem:[%s877_s4 + $0x70] sm:$0xff] %v486_v61  ;;  %v463_v0 = vadd.f32 %v791_v39, %v440_v62  ;;  %v471_v1 = vadd.f32 %v791_v39, %v448_v63 }
 0x107   :  { %v479_v2 = vmax.f32 %v463_v0, 0.0  ;;  %v487_v3 = vmax.f32 %v471_v1, 0.0 }
 0x109   :  { %495 = vst [vmem:[%s877_s4 + $0x38] sm:$0xff] %v479_v2  ;;  %503 = vst [vmem:[%s877_s4 + $0x78] sm:$0xff] %v487_v3 }

// kernel: pyresnet_forward.19
= control target key start
LH: loop header
LB: loop body
LE: loop exit
PB: predicated region body
PF: predicated region fallthrough
CT: control target
= control target key end

     0   :  { %vm44_vm0 = vcmask 523264   ;;  %s291_s0 = inlined_call_operand.vmem [shape: f32[9,32,64], index: 0, kind: input, shape index: {}]   ;;  %s292_s1 = inlined_call_operand.vmem [shape: f32[32,64], index: 1, kind: output, shape index: {}]  }
   0x1   :  { %v8_v0 = vld [vmem:[%s291_s0] sm:$0xff]  ;;  %v9_v11 = vld [vmem:[%s291_s0 + $0x8] sm:$0xff]  ;;  %v10_v27 = vld [vmem:[%s291_s0 + $0x10] sm:$0xff] }
   0x2   :  { %v12_v1 = vld [vmem:[%s291_s0 + $0x20] sm:$0xff]  ;;  %v45_v4 = vsel %vm44_vm0, %v8_v0, -inf  ;;  %v13_v12 = vld [vmem:[%s291_s0 + $0x28] sm:$0xff]  ;;  %v62_v16 = vsel %vm44_vm0, %v9_v11, -inf  ;;  %v14_v28 = vld [vmem:[%s291_s0 + $0x30] sm:$0xff]  ;;  %v79_v33 = vsel %vm44_vm0, %v10_v27, -inf }
   0x3   :  { %v16_v2 = vld [vmem:[%s291_s0 + $0x40] sm:$0xff]  ;;  %v46_v5 = vsel %vm44_vm0, %v12_v1, -inf  ;;  %v17_v13 = vld [vmem:[%s291_s0 + $0x48] sm:$0xff]  ;;  %v63_v17 = vsel %vm44_vm0, %v13_v12, -inf  ;;  %v18_v29 = vld [vmem:[%s291_s0 + $0x50] sm:$0xff]  ;;  %v80_v34 = vsel %vm44_vm0, %v14_v28, -inf }
   0x4   :  { %v20_v3 = vld [vmem:[%s291_s0 + $0x60] sm:$0xff]  ;;  %v48_v6 = vsel %vm44_vm0, %v16_v2, -inf  ;;  %v47_v9 = vmax.f32 %v45_v4, %v46_v5  ;;  %v21_v15 = vld [vmem:[%s291_s0 + $0x68] sm:$0xff]  ;;  %v65_v18 = vsel %vm44_vm0, %v17_v13, -inf  ;;  %v64_v23 = vmax.f32 %v62_v16, %v63_v17  ;;  %v22_v32 = vld [vmem:[%s291_s0 + $0x70] sm:$0xff] }
   0x5   :  { %v24_v7 = vld [vmem:[%s291_s0 + $0x80] sm:$0xff]  ;;  %v50_v10 = vsel %vm44_vm0, %v20_v3, -inf  ;;  %v25_v22 = vld [vmem:[%s291_s0 + $0x88] sm:$0xff]  ;;  %v67_v26 = vsel %vm44_vm0, %v21_v15, -inf  ;;  %v82_v35 = vsel %vm44_vm0, %v18_v29, -inf  ;;  %v26_v39 = vld [vmem:[%s291_s0 + $0x90] sm:$0xff]  ;;  %v81_v40 = vmax.f32 %v79_v33, %v80_v34 }
   0x6   :  { %v28_v8 = vld [vmem:[%s291_s0 + $0xa0] sm:$0xff]  ;;  %v49_v14 = vmax.f32 %v47_v9, %v48_v6  ;;  %v52_v21 = vsel %vm44_vm0, %v24_v7, -inf  ;;  %v29_v30 = vld [vmem:[%s291_s0 + $0xa8] sm:$0xff]  ;;  %v66_v31 = vmax.f32 %v64_v23, %v65_v18  ;;  %v69_v38 = vsel %vm44_vm0, %v25_v22, -inf  ;;  %v11_v45 = vld [vmem:[%s291_s0 + $0x18] sm:$0xff] }
   0x7   :  { %v32_v19 = vld [vmem:[%s291_s0 + $0xc0] sm:$0xff]  ;;  %v54_v25 = vsel %vm44_vm0, %v28_v8, -inf  ;;  %v33_v37 = vld [vmem:[%s291_s0 + $0xc8] sm:$0xff]  ;;  %v84_v44 = vsel %vm44_vm0, %v22_v32, -inf  ;;  %v15_v46 = vld [vmem:[%s291_s0 + $0x38] sm:$0xff]  ;;  %v71_v50 = vsel %vm44_vm0, %v29_v30, -inf  ;;  %v83_v52 = vmax.f32 %v81_v40, %v82_v35 }
   0x8   :  { %v36_v20 = vld [vmem:[%s291_s0 + $0xe0] sm:$0xff]  ;;  %v51_v24 = vmax.f32 %v49_v14, %v50_v10  ;;  %v56_v41 = vsel %vm44_vm0, %v32_v19, -inf  ;;  %v68_v43 = vmax.f32 %v66_v31, %v67_v26  ;;  %v19_v47 = vld [vmem:[%s291_s0 + $0x58] sm:$0xff]  ;;  %v30_v51 = vld [vmem:[%s291_s0 + $0xb0] sm:$0xff]  ;;  %v96_v54 = vsel %vm44_vm0, %v11_v45, -inf }
   0x9   :  { %v58_v42 = vsel %vm44_vm0, %v36_v20, -inf  ;;  %v40_v48 = vld [vmem:[%s291_s0 + $0x100] sm:$0xff]  ;;  %v23_v53 = vld [vmem:[%s291_s0 + $0x78] sm:$0xff]  ;;  %v37_v55 = vld [vmem:[%s291_s0 + $0xe8] sm:$0xff]  ;;  %v86_v57 = vsel %vm44_vm0, %v26_v39, -inf  ;;  %v97_v58 = vsel %vm44_vm0, %v15_v46, -inf  ;;  %v85_v63 = vmax.f32 %v83_v52, %v84_v44 }
   0xa   :  { %v53_v36 = vmax.f32 %v51_v24, %v52_v21  ;;  %v70_v56 = vmax.f32 %v68_v43, %v69_v38  ;;  %v99_v59 = vsel %vm44_vm0, %v19_v47, -inf  ;;  %v73_v61 = vsel %vm44_vm0, %v33_v37, -inf  ;;  %v34_v62 = vld [vmem:[%s291_s0 + $0xd0] sm:$0xff]  ;;  %v27_v0 = vld [vmem:[%s291_s0 + $0x98] sm:$0xff]  ;;  %v41_v3 = vld [vmem:[%s291_s0 + $0x108] sm:$0xff] }
   0xb   :  { %v98_v1 = vmax.f32 %v96_v54, %v97_v58  ;;  %v60_v2 = vsel %vm44_vm0, %v40_v48, -inf  ;;  %v88_v5 = vsel %vm44_vm0, %v30_v51, -inf  ;;  %v101_v6 = vsel %vm44_vm0, %v23_v53, -inf  ;;  %v38_v9 = vld [vmem:[%s291_s0 + $0xf0] sm:$0xff]  ;;  %v31_v11 = vld [vmem:[%s291_s0 + $0xb8] sm:$0xff] }
   0xc   :  { %v55_v49 = vmax.f32 %v53_v36, %v54_v25  ;;  %v72_v4 = vmax.f32 %v70_v56, %v71_v50  ;;  %v75_v8 = vsel %vm44_vm0, %v37_v55, -inf  ;;  %v87_v10 = vmax.f32 %v85_v63, %v86_v57  ;;  %v42_v18 = vld [vmem:[%s291_s0 + $0x110] sm:$0xff]  ;;  %v35_v20 = vld [vmem:[%s291_s0 + $0xd8] sm:$0xff] }
   0xd   :  { %v100_v12 = vmax.f32 %v98_v1, %v99_v59  ;;  %v90_v14 = vsel %vm44_vm0, %v34_v62, -inf  ;;  %v103_v15 = vsel %vm44_vm0, %v27_v0, -inf  ;;  %v77_v17 = vsel %vm44_vm0, %v41_v3, -inf  ;;  %v39_v26 = vld [vmem:[%s291_s0 + $0xf8] sm:$0xff] }
   0xe   :  { %v57_v60 = vmax.f32 %v55_v49, %v56_v41  ;;  %v74_v13 = vmax.f32 %v72_v4, %v73_v61  ;;  %v89_v19 = vmax.f32 %v87_v10, %v88_v5  ;;  %v92_v23 = vsel %vm44_vm0, %v38_v9, -inf  ;;  %v43_v32 = vld [vmem:[%s291_s0 + $0x118] sm:$0xff] }
   0xf   :  { %v102_v21 = vmax.f32 %v100_v12, %v101_v6  ;;  %v105_v24 = vsel %vm44_vm0, %v31_v11, -inf  ;;  %v94_v29 = vsel %vm44_vm0, %v42_v18, -inf  ;;  %v107_v30 = vsel %vm44_vm0, %v35_v20, -inf }
  0x10   :  { %v59_v7 = vmax.f32 %v57_v60, %v58_v42  ;;  %v76_v22 = vmax.f32 %v74_v13, %v75_v8  ;;  %v91_v25 = vmax.f32 %v89_v19, %v90_v14  ;;  %v109_v34 = vsel %vm44_vm0, %v39_v26, -inf }
  0x11   :  { %v104_v27 = vmax.f32 %v102_v21, %v103_v15  ;;  %v111_v37 = vsel %vm44_vm0, %v43_v32, -inf }
  0x12   :  { %v61_v16 = vmax.f32 %v59_v7, %v60_v2  ;;  %v78_v28 = vmax.f32 %v76_v22, %v77_v17  ;;  %v93_v31 = vmax.f32 %v91_v25, %v92_v23 }
  0x13   :  { %v106_v33 = vmax.f32 %v104_v27, %v105_v24 }
  0x14   :  { %113 = vst.msk [vmem:[%s292_s1] sm:$0xff] %vm44_vm0, %v61_v16  ;;  %114 = vst.msk [vmem:[%s292_s1 + $0x8] sm:$0xff] %vm44_vm0, %v78_v28  ;;  %v95_v35 = vmax.f32 %v93_v31, %v94_v29 }
  0x15   :  { %v108_v36 = vmax.f32 %v106_v33, %v107_v30 }
  0x16   :  { %115 = vst.msk [vmem:[%s292_s1 + $0x10] sm:$0xff] %vm44_vm0, %v95_v35 }
  0x17   :  { %v110_v38 = vmax.f32 %v108_v36, %v109_v34 }
  0x19   :  { %v112_v39 = vmax.f32 %v110_v38, %v111_v37 }
  0x1b   :  { %116 = vst.msk [vmem:[%s292_s1 + $0x18] sm:$0xff] %vm44_vm0, %v112_v39 }

// kernel: pyresnet_forward.20
= control target key start
LH: loop header
LB: loop body
LE: loop exit
PB: predicated region body
PF: predicated region fallthrough
CT: control target
= control target key end

     0   :  { %s995_s1 = inlined_call_operand.vmem [shape: bf16[640,128], index: 1, kind: input, shape index: {}]   ;;  %s996_s0 = inlined_call_operand.vmem [shape: bf16[32,640], index: 0, kind: input, shape index: {}]   ;;  %s997_s2 = inlined_call_operand.vmem [shape: f32[1,128], index: 2, kind: input, shape index: {}]   ;;  %s998_s3 = inlined_call_operand.vmem [shape: f32[1,128], index: 3, kind: input, shape index: {}]   ;;  %s999_s4 = inlined_call_operand.vmem [shape: f32[32,128], index: 4, kind: output, shape index: {}]  }
   0x1   :  { %v748_v0 = vld [vmem:[%s995_s1 + $0x78] sm:$0xff]   ;;  %v752_v4 = vld [vmem:[%s995_s1 + $0x70] sm:$0xff]   ;;  %v756_v8 = vld [vmem:[%s995_s1 + $0x68] sm:$0xff]  }
   0x2   :  { %v749_v1 = vld [vmem:[%s995_s1 + $0xf8] sm:$0xff]   ;;  %662 = vmatprep.subr.bf16.mxu0 %v748_v0  ;;  %v753_v5 = vld [vmem:[%s995_s1 + $0xf0] sm:$0xff]   ;;  %v757_v9 = vld [vmem:[%s995_s1 + $0xe8] sm:$0xff]  }
   0x3   :  { %v750_v2 = vld [vmem:[%s995_s1 + $0x38] sm:$0xff]   ;;  %690 = vmatprep.subr.bf16.mxu1 %v749_v1  ;;  %v754_v6 = vld [vmem:[%s995_s1 + $0x30] sm:$0xff]   ;;  %v758_v10 = vld [vmem:[%s995_s1 + $0x28] sm:$0xff]  }
   0x4   :  { %v751_v3 = vld [vmem:[%s995_s1 + $0xb8] sm:$0xff]   ;;  %663 = vmatpush3.bf16.msra.mxu0 %v750_v2  ;;  %v755_v7 = vld [vmem:[%s995_s1 + $0xb0] sm:$0xff]   ;;  %v759_v11 = vld [vmem:[%s995_s1 + $0xa8] sm:$0xff]  }
   0x5   :  { %691 = vmatpush3.bf16.msra.mxu1 %v751_v3  ;;  %664 = vmatprep.subr.bf16.mxu0 %v752_v4  ;;  %v760_v12 = vld [vmem:[%s995_s1 + $0x60] sm:$0xff]   ;;  %v764_v16 = vld [vmem:[%s995_s1 + $0x58] sm:$0xff]   ;;  %v768_v20 = vld [vmem:[%s995_s1 + $0x50] sm:$0xff]  }
   0x6   :  { %692 = vmatprep.subr.bf16.mxu1 %v753_v5  ;;  %v761_v13 = vld [vmem:[%s995_s1 + $0xe0] sm:$0xff]   ;;  %v765_v17 = vld [vmem:[%s995_s1 + $0xd8] sm:$0xff]   ;;  %v769_v21 = vld [vmem:[%s995_s1 + $0xd0] sm:$0xff]  }
   0x7   :  { %v762_v14 = vld [vmem:[%s995_s1 + $0x20] sm:$0xff]   ;;  %v766_v18 = vld [vmem:[%s995_s1 + $0x18] sm:$0xff]   ;;  %v770_v22 = vld [vmem:[%s995_s1 + $0x10] sm:$0xff]  }
   0x8   :  { %665 = vmatpush3.bf16.msra.mxu0 %v754_v6  ;;  %v763_v15 = vld [vmem:[%s995_s1 + $0xa0] sm:$0xff]   ;;  %v767_v19 = vld [vmem:[%s995_s1 + $0x98] sm:$0xff]   ;;  %v771_v23 = vld [vmem:[%s995_s1 + $0x90] sm:$0xff]  }
   0x9   :  { %693 = vmatpush3.bf16.msra.mxu1 %v755_v7  ;;  %666 = vmatprep.subr.bf16.mxu0 %v756_v8  ;;  %v772_v24 = vld [vmem:[%s995_s1 + $0x48] sm:$0xff]   ;;  %v776_v28 = vld [vmem:[%s995_s1 + $0x40] sm:$0xff]   ;;  %v786_v36 = vld [vmem:[%s995_s1 + $0x138] sm:$0xff]  }
   0xa   :  { %694 = vmatprep.subr.bf16.mxu1 %v757_v9  ;;  %v773_v25 = vld [vmem:[%s995_s1 + $0xc8] sm:$0xff]   ;;  %v777_v29 = vld [vmem:[%s995_s1 + $0xc0] sm:$0xff]   ;;  %v787_v37 = vld [vmem:[%s995_s1 + $0x130] sm:$0xff]  }
   0xb   :  { %v774_v26 = vld [vmem:[%s995_s1 + $0x8] sm:$0xff]   ;;  %v778_v30 = vld [vmem:[%s995_s1] sm:$0xff]   ;;  %v790_v45 = vld [vmem:[%s995_s1 + $0x118] sm:$0xff]  }
   0xc   :  { %667 = vmatpush3.bf16.msra.mxu0 %v758_v10  ;;  %v775_v27 = vld [vmem:[%s995_s1 + $0x88] sm:$0xff]   ;;  %v779_v31 = vld [vmem:[%s995_s1 + $0x80] sm:$0xff]   ;;  %v797_v46 = vld [vmem:[%s995_s1 + $0x110] sm:$0xff]  }
   0xd   :  { %695 = vmatpush3.bf16.msra.mxu1 %v759_v11  ;;  %668 = vmatprep.subr.bf16.mxu0 %v760_v12  ;;  %v780_v32 = vld [vmem:[%s996_s0] ss:$20 sps:$4 sm:$0xff]   ;;  %v782_v33 = vld [vmem:[%s996_s0 + $0x4] ss:$20 sps:$4 sm:$0xff]   ;;  %v783_v34 = vld [vmem:[%s996_s0 + $0x8] ss:$20 sps:$4 sm:$0xff]  }
   0xe   :  { %696 = vmatprep.subr.bf16.mxu1 %v761_v13  ;;  %v785_v35 = vld [vmem:[%s996_s0 + $0xc] ss:$20 sps:$4 sm:$0xff]   ;;  %446 = vmatprep.mubr.bf16.mxu0 %v782_v33  ;;  %v793_v40 = vld [vmem:[%s996_s0 + $0x34] ss:$20 sps:$4 sm:$0xff]   ;;  %v796_v42 = vld [vmem:[%s996_s0 + $0x30] ss:$20 sps:$4 sm:$0xff]  }
   0xf   :  { %495 = vmatprep.mubr.bf16.mxu1 %v785_v35  ;;  %v788_v38 = vld [vmem:[%s995_s1 + $0x128] sm:$0xff]   ;;  %v789_v43 = vld [vmem:[%s995_s1 + $0x120] sm:$0xff]  }
  0x10   :  { %669 = vmatpush3.bf16.msra.mxu0 %v762_v14  ;;  %v791_v39 = vld [vmem:[%s996_s0 + $0x2c] ss:$20 sps:$4 sm:$0xff]   ;;  %v795_v41 = vld [vmem:[%s996_s0 + $0x28] ss:$20 sps:$4 sm:$0xff]   ;;  %v800_v44 = vld [vmem:[%s996_s0 + $0x10] ss:$20 sps:$4 sm:$0xff]  }
  0x11   :  { %697 = vmatpush3.bf16.msra.mxu1 %v763_v15  ;;  %670 = vmatprep.subr.bf16.mxu0 %v764_v16  ;;  %v798_v47 = vld [vmem:[%s995_s1 + $0x108] sm:$0xff]   ;;  %v799_v48 = vld [vmem:[%s995_s1 + $0x100] sm:$0xff]  }
  0x12   :  { %698 = vmatprep.subr.bf16.mxu1 %v765_v17  ;;  %v801_v49 = vld [vmem:[%s996_s0 + $0x38] ss:$20 sps:$4 sm:$0xff]   ;;  %v660_v10 = vld [vmem:[%s997_s2] ss:$0 sm:$0xff] }
  0x13   :  { %v661_v15 = vld [vmem:[%s998_s3] ss:$0 sm:$0xff] }
  0x14   :  { %671 = vmatpush3.bf16.msra.mxu0 %v766_v18 }
  0x15   :  { %699 = vmatpush3.bf16.msra.mxu1 %v767_v19  ;;  %672 = vmatprep.subr.bf16.mxu0 %v768_v20 }
  0x16   :  { %700 = vmatprep.subr.bf16.mxu1 %v769_v21 }
  0x18   :  { %673 = vmatpush3.bf16.msra.mxu0 %v770_v22 }
  0x19   :  { %701 = vmatpush3.bf16.msra.mxu1 %v771_v23  ;;  %674 = vmatprep.subr.bf16.mxu0 %v772_v24 }
  0x1a   :  { %702 = vmatprep.subr.bf16.mxu1 %v773_v25 }
  0x1c   :  { %675 = vmatpush3.bf16.msra.mxu0 %v774_v26 }
  0x1d   :  { %703 = vmatpush3.bf16.msra.mxu1 %v775_v27  ;;  %676 = vmatprep.subr.bf16.mxu0 %v776_v28 }
  0x1e   :  { %704 = vmatprep.subr.bf16.mxu1 %v777_v29 }
  0x20   :  { %677 = vmatpush3.bf16.msra.mxu0 %v778_v30 }
  0x21   :  { %705 = vmatpush3.bf16.msra.mxu1 %v779_v31  ;;  %728 = vmatprep.subr.bf16.mxu0 %v786_v36 }
  0x23   :  { %447 = vmatmul.mubr.bf16.vlgmr.msra.gmra.mxu0 %v780_v32 }
  0x24   :  { %496 = vmatmul.mubr.bf16.vlgmr.msra.gmra.mxu1 %v783_v34  ;;  %729 = vmatpush3.bf16.msra.mxu0 %v786_v36 }
  0x25   :  { %730 = vmatprep.subr.bf16.mxu0 %v787_v37  ;;  %454 = vmatprep.mubr.bf16.mxu0 %v791_v39 }
  0x26   :  { %503 = vmatprep.mubr.bf16.mxu1 %v793_v40 }
  0x28   :  { %731 = vmatpush3.bf16.msra.mxu0 %v787_v37 }
  0x29   :  { %732 = vmatprep.subr.bf16.mxu0 %v788_v38 }
  0x2b   :  { %455 = vmatmul.mubr.bf16.gmra.mxu0 %v795_v41 }
  0x2c   :  { %504 = vmatmul.mubr.bf16.gmra.mxu1 %v796_v42  ;;  %733 = vmatpush3.bf16.msra.mxu0 %v788_v38 }
  0x2d   :  { %734 = vmatprep.subr.bf16.mxu0 %v789_v43  ;;  %744 = vmatprep.mubr.bf16.mxu0 %v800_v44 }
  0x30   :  { %735 = vmatpush3.bf16.msra.mxu0 %v789_v43 }
  0x31   :  { %736 = vmatprep.subr.bf16.mxu0 %v790_v45 }
  0x34   :  { %737 = vmatpush3.bf16.msra.mxu0 %v790_v45 }
  0x35   :  { %738 = vmatprep.subr.bf16.mxu0 %v797_v46 }
  0x38   :  { %739 = vmatpush3.bf16.msra.mxu0 %v797_v46 }
  0x39   :  { %740 = vmatprep.subr.bf16.mxu0 %v798_v47 }
  0x3c   :  { %741 = vmatpush3.bf16.msra.mxu0 %v798_v47 }
  0x3d   :  { %742 = vmatprep.subr.bf16.mxu0 %v799_v48 }
  0x40   :  { %743 = vmatpush3.bf16.msra.mxu0 %v799_v48 }
  0x43   :  { %745 = vmatmul.mubr.bf16.vlgmr.msra.gmra.mxu0 %v801_v49 }
  0xe3   :  { %v678_v50 = vpop.f32.mrf.mxu0 }
  0xe4   :  { %v706_v51 = vpop.f32.mrf.mxu1 }
  0xe5   :  { %v679_v52 = vpop.f32.mrf.mxu0 }
  0xe6   :  { %v707_v53 = vpop.f32.mrf.mxu1  ;;  %v680_v4 = vadd.f32 %v679_v52, %v678_v50 }
  0xe7   :  { %v681_v54 = vpop.f32.mrf.mxu0  ;;  %v708_v5 = vadd.f32 %v707_v53, %v706_v51 }
  0xe8   :  { %v709_v55 = vpop.f32.mrf.mxu1 }
  0xe9   :  { %v682_v56 = vpop.f32.mrf.mxu0  ;;  %v498_v14 = vadd.f32 %v708_v5, %v680_v4 }
  0xea   :  { %v710_v57 = vpop.f32.mrf.mxu1  ;;  %v683_v11 = vadd.f32 %v682_v56, %v681_v54 }
  0xeb   :  { %v684_v58 = vpop.f32.mrf.mxu0  ;;  %v711_v12 = vadd.f32 %v710_v57, %v709_v55 }
  0xec   :  { %v712_v59 = vpop.f32.mrf.mxu1 }
  0xed   :  { %v685_v60 = vpop.f32.mrf.mxu0  ;;  %v501_v24 = vadd.f32 %v711_v12, %v683_v11 }
  0xee   :  { %v713_v61 = vpop.f32.mrf.mxu1  ;;  %v686_v0 = vadd.f32 %v685_v60, %v684_v58 }
  0xef   :  { %v687_v62 = vpop.f32.mrf.mxu0  ;;  %v714_v1 = vadd.f32 %v713_v61, %v712_v59 }
  0xf0   :  { %v715_v63 = vpop.f32.mrf.mxu1 }
  0xf1   :  { %v688_v2 = vpop.f32.mrf.mxu0  ;;  %v506_v8 = vadd.f32 %v714_v1, %v686_v0 }
  0xf2   :  { %v716_v3 = vpop.f32.mrf.mxu1  ;;  %v689_v6 = vadd.f32 %v688_v2, %v687_v62 }
  0xf3   :  { %v717_v7 = vadd.f32 %v716_v3, %v715_v63 }
  0xf5   :  { %v509_v19 = vadd.f32 %v717_v7, %v689_v6 }
 0x103   :  { %v746_v9 = vpop.f32.mrf.mxu0 }
 0x104   :  { %v555_v13 = vadd.f32 %v746_v9, %v506_v8 }
 0x105   :  { %v546_v16 = vpop.f32.mrf.mxu0 }
 0x106   :  { %v585_v17 = vmul.f32 %v660_v10, %v555_v13  ;;  %v547_v18 = vadd.f32 %v546_v16, %v498_v14 }
 0x107   :  { %v747_v20 = vpop.f32.mrf.mxu0 }
 0x108   :  { %v596_v21 = vadd.f32 %v661_v15, %v585_v17  ;;  %v583_v22 = vmul.f32 %v660_v10, %v547_v18  ;;  %v558_v23 = vadd.f32 %v747_v20, %v509_v19 }
 0x109   :  { %v549_v25 = vpop.f32.mrf.mxu0 }
 0x10a   :  { %v600_v26 = vmax.f32 %v596_v21, 0.0  ;;  %v594_v27 = vadd.f32 %v661_v15, %v583_v22  ;;  %v586_v28 = vmul.f32 %v660_v10, %v558_v23  ;;  %v550_v29 = vadd.f32 %v549_v25, %v501_v24 }
 0x10c   :  { %604 = vst [vmem:[%s999_s4 + $0x10] sm:$0xff] %v600_v26  ;;  %v598_v30 = vmax.f32 %v594_v27, 0.0  ;;  %v597_v31 = vadd.f32 %v661_v15, %v586_v28  ;;  %v584_v32 = vmul.f32 %v660_v10, %v550_v29 }
 0x10e   :  { %602 = vst [vmem:[%s999_s4] sm:$0xff] %v598_v30  ;;  %v601_v33 = vmax.f32 %v597_v31, 0.0  ;;  %v595_v34 = vadd.f32 %v661_v15, %v584_v32 }
 0x110   :  { %605 = vst [vmem:[%s999_s4 + $0x18] sm:$0xff] %v601_v33  ;;  %v599_v35 = vmax.f32 %v595_v34, 0.0 }
 0x112   :  { %603 = vst [vmem:[%s999_s4 + $0x8] sm:$0xff] %v599_v35 }

// kernel: pyresnet_forward.21
= control target key start
LH: loop header
LB: loop body
LE: loop exit
PB: predicated region body
PF: predicated region fallthrough
CT: control target
= control target key end

     0   :  { %s1023_s1 = inlined_call_operand.vmem [shape: bf16[640,128], index: 1, kind: input, shape index: {}]   ;;  %s1024_s0 = inlined_call_operand.vmem [shape: bf16[32,640], index: 0, kind: input, shape index: {}]   ;;  %s1025_s2 = inlined_call_operand.vmem [shape: f32[1,128], index: 2, kind: input, shape index: {}]   ;;  %s1026_s3 = inlined_call_operand.vmem [shape: f32[1,128], index: 3, kind: input, shape index: {}]   ;;  %s1027_s4 = inlined_call_operand.vmem [shape: f32[32,128], index: 4, kind: input, shape index: {}]   ;;  %s1028_s5 = inlined_call_operand.vmem [shape: f32[32,128], index: 5, kind: output, shape index: {}]  }
   0x1   :  { %v759_v0 = vld [vmem:[%s1023_s1 + $0x78] sm:$0xff]   ;;  %v763_v4 = vld [vmem:[%s1023_s1 + $0x70] sm:$0xff]   ;;  %v767_v8 = vld [vmem:[%s1023_s1 + $0x68] sm:$0xff]  }
   0x2   :  { %v760_v1 = vld [vmem:[%s1023_s1 + $0xf8] sm:$0xff]   ;;  %673 = vmatprep.subr.bf16.mxu0 %v759_v0  ;;  %v764_v5 = vld [vmem:[%s1023_s1 + $0xf0] sm:$0xff]   ;;  %v768_v9 = vld [vmem:[%s1023_s1 + $0xe8] sm:$0xff]  }
   0x3   :  { %v761_v2 = vld [vmem:[%s1023_s1 + $0x38] sm:$0xff]   ;;  %701 = vmatprep.subr.bf16.mxu1 %v760_v1  ;;  %v765_v6 = vld [vmem:[%s1023_s1 + $0x30] sm:$0xff]   ;;  %v769_v10 = vld [vmem:[%s1023_s1 + $0x28] sm:$0xff]  }
   0x4   :  { %v762_v3 = vld [vmem:[%s1023_s1 + $0xb8] sm:$0xff]   ;;  %674 = vmatpush3.bf16.msra.mxu0 %v761_v2  ;;  %v766_v7 = vld [vmem:[%s1023_s1 + $0xb0] sm:$0xff]   ;;  %v770_v11 = vld [vmem:[%s1023_s1 + $0xa8] sm:$0xff]  }
   0x5   :  { %702 = vmatpush3.bf16.msra.mxu1 %v762_v3  ;;  %675 = vmatprep.subr.bf16.mxu0 %v763_v4  ;;  %v771_v12 = vld [vmem:[%s1023_s1 + $0x60] sm:$0xff]   ;;  %v775_v16 = vld [vmem:[%s1023_s1 + $0x58] sm:$0xff]   ;;  %v779_v20 = vld [vmem:[%s1023_s1 + $0x50] sm:$0xff]  }
   0x6   :  { %703 = vmatprep.subr.bf16.mxu1 %v764_v5  ;;  %v772_v13 = vld [vmem:[%s1023_s1 + $0xe0] sm:$0xff]   ;;  %v776_v17 = vld [vmem:[%s1023_s1 + $0xd8] sm:$0xff]   ;;  %v780_v21 = vld [vmem:[%s1023_s1 + $0xd0] sm:$0xff]  }
   0x7   :  { %v773_v14 = vld [vmem:[%s1023_s1 + $0x20] sm:$0xff]   ;;  %v777_v18 = vld [vmem:[%s1023_s1 + $0x18] sm:$0xff]   ;;  %v781_v22 = vld [vmem:[%s1023_s1 + $0x10] sm:$0xff]  }
   0x8   :  { %676 = vmatpush3.bf16.msra.mxu0 %v765_v6  ;;  %v774_v15 = vld [vmem:[%s1023_s1 + $0xa0] sm:$0xff]   ;;  %v778_v19 = vld [vmem:[%s1023_s1 + $0x98] sm:$0xff]   ;;  %v782_v23 = vld [vmem:[%s1023_s1 + $0x90] sm:$0xff]  }
   0x9   :  { %704 = vmatpush3.bf16.msra.mxu1 %v766_v7  ;;  %677 = vmatprep.subr.bf16.mxu0 %v767_v8  ;;  %v783_v24 = vld [vmem:[%s1023_s1 + $0x48] sm:$0xff]   ;;  %v787_v28 = vld [vmem:[%s1023_s1 + $0x40] sm:$0xff]   ;;  %v797_v36 = vld [vmem:[%s1023_s1 + $0x138] sm:$0xff]  }
   0xa   :  { %705 = vmatprep.subr.bf16.mxu1 %v768_v9  ;;  %v784_v25 = vld [vmem:[%s1023_s1 + $0xc8] sm:$0xff]   ;;  %v788_v29 = vld [vmem:[%s1023_s1 + $0xc0] sm:$0xff]   ;;  %v798_v37 = vld [vmem:[%s1023_s1 + $0x130] sm:$0xff]  }
   0xb   :  { %v785_v26 = vld [vmem:[%s1023_s1 + $0x8] sm:$0xff]   ;;  %v789_v30 = vld [vmem:[%s1023_s1] sm:$0xff]   ;;  %v801_v45 = vld [vmem:[%s1023_s1 + $0x118] sm:$0xff]  }
   0xc   :  { %678 = vmatpush3.bf16.msra.mxu0 %v769_v10  ;;  %v786_v27 = vld [vmem:[%s1023_s1 + $0x88] sm:$0xff]   ;;  %v790_v31 = vld [vmem:[%s1023_s1 + $0x80] sm:$0xff]   ;;  %v808_v46 = vld [vmem:[%s1023_s1 + $0x110] sm:$0xff]  }
   0xd   :  { %706 = vmatpush3.bf16.msra.mxu1 %v770_v11  ;;  %679 = vmatprep.subr.bf16.mxu0 %v771_v12  ;;  %v791_v32 = vld [vmem:[%s1024_s0] ss:$20 sps:$4 sm:$0xff]   ;;  %v793_v33 = vld [vmem:[%s1024_s0 + $0x4] ss:$20 sps:$4 sm:$0xff]   ;;  %v794_v34 = vld [vmem:[%s1024_s0 + $0x8] ss:$20 sps:$4 sm:$0xff]  }
   0xe   :  { %707 = vmatprep.subr.bf16.mxu1 %v772_v13  ;;  %v796_v35 = vld [vmem:[%s1024_s0 + $0xc] ss:$20 sps:$4 sm:$0xff]   ;;  %449 = vmatprep.mubr.bf16.mxu0 %v793_v33  ;;  %v804_v40 = vld [vmem:[%s1024_s0 + $0x34] ss:$20 sps:$4 sm:$0xff]   ;;  %v807_v42 = vld [vmem:[%s1024_s0 + $0x30] ss:$20 sps:$4 sm:$0xff]  }
   0xf   :  { %498 = vmatprep.mubr.bf16.mxu1 %v796_v35  ;;  %v799_v38 = vld [vmem:[%s1023_s1 + $0x128] sm:$0xff]   ;;  %v800_v43 = vld [vmem:[%s1023_s1 + $0x120] sm:$0xff]  }
  0x10   :  { %680 = vmatpush3.bf16.msra.mxu0 %v773_v14  ;;  %v802_v39 = vld [vmem:[%s1024_s0 + $0x2c] ss:$20 sps:$4 sm:$0xff]   ;;  %v806_v41 = vld [vmem:[%s1024_s0 + $0x28] ss:$20 sps:$4 sm:$0xff]   ;;  %v811_v44 = vld [vmem:[%s1024_s0 + $0x10] ss:$20 sps:$4 sm:$0xff]  }
  0x11   :  { %708 = vmatpush3.bf16.msra.mxu1 %v774_v15  ;;  %681 = vmatprep.subr.bf16.mxu0 %v775_v16  ;;  %v809_v47 = vld [vmem:[%s1023_s1 + $0x108] sm:$0xff]   ;;  %v810_v48 = vld [vmem:[%s1023_s1 + $0x100] sm:$0xff]  }
  0x12   :  { %709 = vmatprep.subr.bf16.mxu1 %v776_v17  ;;  %v812_v49 = vld [vmem:[%s1024_s0 + $0x38] ss:$20 sps:$4 sm:$0xff]   ;;  %v671_v10 = vld [vmem:[%s1025_s2] ss:$0 sm:$0xff] }
  0x13   :  { %v672_v15 = vld [vmem:[%s1026_s3] ss:$0 sm:$0xff] }
  0x14   :  { %682 = vmatpush3.bf16.msra.mxu0 %v777_v18 }
  0x15   :  { %710 = vmatpush3.bf16.msra.mxu1 %v778_v19  ;;  %683 = vmatprep.subr.bf16.mxu0 %v779_v20  ;;  %v603_v20 = vld [vmem:[%s1027_s4 + $0x10] sm:$0xff] }
  0x16   :  { %711 = vmatprep.subr.bf16.mxu1 %v780_v21 }
  0x18   :  { %684 = vmatpush3.bf16.msra.mxu0 %v781_v22 }
  0x19   :  { %712 = vmatpush3.bf16.msra.mxu1 %v782_v23  ;;  %685 = vmatprep.subr.bf16.mxu0 %v783_v24 }
  0x1a   :  { %713 = vmatprep.subr.bf16.mxu1 %v784_v25 }
  0x1c   :  { %686 = vmatpush3.bf16.msra.mxu0 %v785_v26  ;;  %v601_v26 = vld [vmem:[%s1027_s4] sm:$0xff] }
  0x1d   :  { %714 = vmatpush3.bf16.msra.mxu1 %v786_v27  ;;  %687 = vmatprep.subr.bf16.mxu0 %v787_v28 }
  0x1e   :  { %715 = vmatprep.subr.bf16.mxu1 %v788_v29 }
  0x20   :  { %688 = vmatpush3.bf16.msra.mxu0 %v789_v30 }
  0x21   :  { %716 = vmatpush3.bf16.msra.mxu1 %v790_v31  ;;  %739 = vmatprep.subr.bf16.mxu0 %v797_v36 }
  0x23   :  { %450 = vmatmul.mubr.bf16.vlgmr.msra.gmra.mxu0 %v791_v32  ;;  %v604_v32 = vld [vmem:[%s1027_s4 + $0x18] sm:$0xff] }
  0x24   :  { %499 = vmatmul.mubr.bf16.vlgmr.msra.gmra.mxu1 %v794_v34  ;;  %740 = vmatpush3.bf16.msra.mxu0 %v797_v36 }
  0x25   :  { %741 = vmatprep.subr.bf16.mxu0 %v798_v37  ;;  %457 = vmatprep.mubr.bf16.mxu0 %v802_v39 }
  0x26   :  { %506 = vmatprep.mubr.bf16.mxu1 %v804_v40 }
  0x28   :  { %742 = vmatpush3.bf16.msra.mxu0 %v798_v37  ;;  %v602_v37 = vld [vmem:[%s1027_s4 + $0x8] sm:$0xff] }
  0x29   :  { %743 = vmatprep.subr.bf16.mxu0 %v799_v38 }
  0x2b   :  { %458 = vmatmul.mubr.bf16.gmra.mxu0 %v806_v41 }
  0x2c   :  { %507 = vmatmul.mubr.bf16.gmra.mxu1 %v807_v42  ;;  %744 = vmatpush3.bf16.msra.mxu0 %v799_v38 }
  0x2d   :  { %745 = vmatprep.subr.bf16.mxu0 %v800_v43  ;;  %755 = vmatprep.mubr.bf16.mxu0 %v811_v44 }
  0x30   :  { %746 = vmatpush3.bf16.msra.mxu0 %v800_v43 }
  0x31   :  { %747 = vmatprep.subr.bf16.mxu0 %v801_v45 }
  0x34   :  { %748 = vmatpush3.bf16.msra.mxu0 %v801_v45 }
  0x35   :  { %749 = vmatprep.subr.bf16.mxu0 %v808_v46 }
  0x38   :  { %750 = vmatpush3.bf16.msra.mxu0 %v808_v46 }
  0x39   :  { %751 = vmatprep.subr.bf16.mxu0 %v809_v47 }
  0x3c   :  { %752 = vmatpush3.bf16.msra.mxu0 %v809_v47 }
  0x3d   :  { %753 = vmatprep.subr.bf16.mxu0 %v810_v48 }
  0x40   :  { %754 = vmatpush3.bf16.msra.mxu0 %v810_v48 }
  0x43   :  { %756 = vmatmul.mubr.bf16.vlgmr.msra.gmra.mxu0 %v812_v49 }
  0xe3   :  { %v689_v50 = vpop.f32.mrf.mxu0 }
  0xe4   :  { %v717_v51 = vpop.f32.mrf.mxu1 }
  0xe5   :  { %v690_v52 = vpop.f32.mrf.mxu0 }
  0xe6   :  { %v718_v53 = vpop.f32.mrf.mxu1  ;;  %v691_v4 = vadd.f32 %v690_v52, %v689_v50 }
  0xe7   :  { %v692_v54 = vpop.f32.mrf.mxu0  ;;  %v719_v5 = vadd.f32 %v718_v53, %v717_v51 }
  0xe8   :  { %v720_v55 = vpop.f32.mrf.mxu1 }
  0xe9   :  { %v693_v56 = vpop.f32.mrf.mxu0  ;;  %v501_v14 = vadd.f32 %v719_v5, %v691_v4 }
  0xea   :  { %v721_v57 = vpop.f32.mrf.mxu1  ;;  %v694_v11 = vadd.f32 %v693_v56, %v692_v54 }
  0xeb   :  { %v695_v58 = vpop.f32.mrf.mxu0  ;;  %v722_v12 = vadd.f32 %v721_v57, %v720_v55 }
  0xec   :  { %v723_v59 = vpop.f32.mrf.mxu1 }
  0xed   :  { %v696_v60 = vpop.f32.mrf.mxu0  ;;  %v504_v25 = vadd.f32 %v722_v12, %v694_v11 }
  0xee   :  { %v724_v61 = vpop.f32.mrf.mxu1  ;;  %v697_v0 = vadd.f32 %v696_v60, %v695_v58 }
  0xef   :  { %v698_v62 = vpop.f32.mrf.mxu0  ;;  %v725_v1 = vadd.f32 %v724_v61, %v723_v59 }
  0xf0   :  { %v726_v63 = vpop.f32.mrf.mxu1 }
  0xf1   :  { %v699_v2 = vpop.f32.mrf.mxu0  ;;  %v509_v8 = vadd.f32 %v725_v1, %v697_v0 }
  0xf2   :  { %v727_v3 = vpop.f32.mrf.mxu1  ;;  %v700_v6 = vadd.f32 %v699_v2, %v698_v62 }
  0xf3   :  { %v728_v7 = vadd.f32 %v727_v3, %v726_v63 }
  0xf5   :  { %v512_v19 = vadd.f32 %v728_v7, %v700_v6 }
 0x103   :  { %v757_v9 = vpop.f32.mrf.mxu0 }
 0x104   :  { %v558_v13 = vadd.f32 %v757_v9, %v509_v8 }
 0x105   :  { %v549_v16 = vpop.f32.mrf.mxu0 }
 0x106   :  { %v588_v17 = vmul.f32 %v671_v10, %v558_v13  ;;  %v550_v18 = vadd.f32 %v549_v16, %v501_v14 }
 0x107   :  { %v758_v21 = vpop.f32.mrf.mxu0 }
 0x108   :  { %v599_v22 = vadd.f32 %v672_v15, %v588_v17  ;;  %v586_v23 = vmul.f32 %v671_v10, %v550_v18  ;;  %v561_v24 = vadd.f32 %v758_v21, %v512_v19 }
 0x109   :  { %v552_v27 = vpop.f32.mrf.mxu0 }
 0x10a   :  { %v607_v28 = vadd.f32 %v603_v20, %v599_v22  ;;  %v597_v29 = vadd.f32 %v672_v15, %v586_v23  ;;  %v589_v30 = vmul.f32 %v671_v10, %v561_v24  ;;  %v553_v31 = vadd.f32 %v552_v27, %v504_v25 }
 0x10c   :  { %v611_v33 = vmax.f32 %v607_v28, 0.0  ;;  %v605_v34 = vadd.f32 %v601_v26, %v597_v29  ;;  %v600_v35 = vadd.f32 %v672_v15, %v589_v30  ;;  %v587_v36 = vmul.f32 %v671_v10, %v553_v31 }
 0x10e   :  { %615 = vst [vmem:[%s1028_s5 + $0x10] sm:$0xff] %v611_v33  ;;  %v609_v38 = vmax.f32 %v605_v34, 0.0  ;;  %v608_v39 = vadd.f32 %v604_v32, %v600_v35  ;;  %v598_v40 = vadd.f32 %v672_v15, %v587_v36 }
 0x110   :  { %613 = vst [vmem:[%s1028_s5] sm:$0xff] %v609_v38  ;;  %v612_v41 = vmax.f32 %v608_v39, 0.0  ;;  %v606_v42 = vadd.f32 %v602_v37, %v598_v40 }
 0x112   :  { %616 = vst [vmem:[%s1028_s5 + $0x18] sm:$0xff] %v612_v41  ;;  %v610_v43 = vmax.f32 %v606_v42, 0.0 }
 0x114   :  { %614 = vst [vmem:[%s1028_s5 + $0x8] sm:$0xff] %v610_v43 }

// kernel: pyresnet_forward.23
= control target key start
LH: loop header
LB: loop body
LE: loop exit
PB: predicated region body
PF: predicated region fallthrough
CT: control target
= control target key end

     0   :  { %v705_v34 = vmov 0.0   ;;  %vm706_vm0 = vmmov 0   ;;  %s879_s1 = inlined_call_operand.vmem [shape: bf16[640,128], index: 1, kind: input, shape index: {}]   ;;  %s880_s0 = inlined_call_operand.vmem [shape: bf16[16,640], index: 0, kind: input, shape index: {}]   ;;  %s881_s2 = inlined_call_operand.vmem [shape: f32[1,128], index: 2, kind: input, shape index: {}]   ;;  %s882_s3 = inlined_call_operand.vmem [shape: f32[1,128], index: 3, kind: input, shape index: {}]   ;;  %s883_s4 = inlined_call_operand.vmem [shape: f32[16,128], index: 4, kind: output, shape index: {}]  }
   0x1   :  { %v658_v0 = vld [vmem:[%s879_s1 + $0x78] sm:$0xff]   ;;  %v662_v4 = vld [vmem:[%s879_s1 + $0x70] sm:$0xff]   ;;  %v666_v8 = vld [vmem:[%s879_s1 + $0x68] sm:$0xff]  }
   0x2   :  { %v659_v1 = vld [vmem:[%s879_s1 + $0xf8] sm:$0xff]   ;;  %583 = vmatprep.subr.bf16.mxu0 %v658_v0  ;;  %v663_v5 = vld [vmem:[%s879_s1 + $0xf0] sm:$0xff]   ;;  %v667_v9 = vld [vmem:[%s879_s1 + $0xe8] sm:$0xff]  }
   0x3   :  { %v660_v2 = vld [vmem:[%s879_s1 + $0x38] sm:$0xff]   ;;  %605 = vmatprep.subr.bf16.mxu1 %v659_v1  ;;  %v664_v6 = vld [vmem:[%s879_s1 + $0x30] sm:$0xff]   ;;  %v668_v10 = vld [vmem:[%s879_s1 + $0x28] sm:$0xff]  }
   0x4   :  { %v661_v3 = vld [vmem:[%s879_s1 + $0xb8] sm:$0xff]   ;;  %584 = vmatpush3.bf16.msra.mxu0 %v660_v2  ;;  %v665_v7 = vld [vmem:[%s879_s1 + $0xb0] sm:$0xff]   ;;  %v669_v11 = vld [vmem:[%s879_s1 + $0xa8] sm:$0xff]  }
   0x5   :  { %606 = vmatpush3.bf16.msra.mxu1 %v661_v3  ;;  %585 = vmatprep.subr.bf16.mxu0 %v662_v4  ;;  %v670_v12 = vld [vmem:[%s879_s1 + $0x60] sm:$0xff]   ;;  %v674_v16 = vld [vmem:[%s879_s1 + $0x58] sm:$0xff]   ;;  %v678_v20 = vld [vmem:[%s879_s1 + $0x50] sm:$0xff]  }
   0x6   :  { %607 = vmatprep.subr.bf16.mxu1 %v663_v5  ;;  %v671_v13 = vld [vmem:[%s879_s1 + $0xe0] sm:$0xff]   ;;  %v675_v17 = vld [vmem:[%s879_s1 + $0xd8] sm:$0xff]   ;;  %v679_v21 = vld [vmem:[%s879_s1 + $0xd0] sm:$0xff]  }
   0x7   :  { %v672_v14 = vld [vmem:[%s879_s1 + $0x20] sm:$0xff]   ;;  %v676_v18 = vld [vmem:[%s879_s1 + $0x18] sm:$0xff]   ;;  %v680_v22 = vld [vmem:[%s879_s1 + $0x10] sm:$0xff]  }
   0x8   :  { %586 = vmatpush3.bf16.msra.mxu0 %v664_v6  ;;  %v673_v15 = vld [vmem:[%s879_s1 + $0xa0] sm:$0xff]   ;;  %v677_v19 = vld [vmem:[%s879_s1 + $0x98] sm:$0xff]   ;;  %v681_v23 = vld [vmem:[%s879_s1 + $0x90] sm:$0xff]  }
   0x9   :  { %608 = vmatpush3.bf16.msra.mxu1 %v665_v7  ;;  %587 = vmatprep.subr.bf16.mxu0 %v666_v8  ;;  %v682_v24 = vld [vmem:[%s879_s1 + $0x48] sm:$0xff]   ;;  %v686_v28 = vld [vmem:[%s879_s1 + $0x40] sm:$0xff]   ;;  %v696_v37 = vld [vmem:[%s879_s1 + $0x138] sm:$0xff]  }
   0xa   :  { %609 = vmatprep.subr.bf16.mxu1 %v667_v9  ;;  %v683_v25 = vld [vmem:[%s879_s1 + $0xc8] sm:$0xff]   ;;  %v687_v29 = vld [vmem:[%s879_s1 + $0xc0] sm:$0xff]   ;;  %v697_v38 = vld [vmem:[%s879_s1 + $0x130] sm:$0xff]  }
   0xb   :  { %v684_v26 = vld [vmem:[%s879_s1 + $0x8] sm:$0xff]   ;;  %v688_v30 = vld [vmem:[%s879_s1] sm:$0xff]   ;;  %v700_v41 = vld [vmem:[%s879_s1 + $0x118] sm:$0xff]  }
   0xc   :  { %588 = vmatpush3.bf16.msra.mxu0 %v668_v10  ;;  %v685_v27 = vld [vmem:[%s879_s1 + $0x88] sm:$0xff]   ;;  %v689_v31 = vld [vmem:[%s879_s1 + $0x80] sm:$0xff]   ;;  %v701_v42 = vld [vmem:[%s879_s1 + $0x110] sm:$0xff]  }
   0xd   :  { %610 = vmatpush3.bf16.msra.mxu1 %v669_v11  ;;  %589 = vmatprep.subr.bf16.mxu0 %v670_v12  ;;  %v690_v32 = vld [vmem:[%s880_s0] ss:$20 sps:$4 sm:$0xff]   ;;  %v692_v33 = vld [vmem:[%s880_s0 + $0x4] ss:$20 sps:$4 sm:$0xff]   ;;  %v693_v35 = vld [vmem:[%s880_s0 + $0x8] ss:$20 sps:$4 sm:$0xff]  }
   0xe   :  { %611 = vmatprep.subr.bf16.mxu1 %v671_v13  ;;  %v695_v36 = vld [vmem:[%s880_s0 + $0xc] ss:$20 sps:$4 sm:$0xff]   ;;  %410 = vmatprep.mubr.bf16.mxu0 %v692_v33  ;;  %v704_v45 = vld [vmem:[%s880_s0 + $0x10] ss:$20 sps:$4 sm:$0xff]  }
   0xf   :  { %451 = vmatprep.mubr.bf16.mxu1 %v695_v36  ;;  %v698_v39 = vld [vmem:[%s879_s1 + $0x128] sm:$0xff]   ;;  %v699_v40 = vld [vmem:[%s879_s1 + $0x120] sm:$0xff]  }
  0x10   :  { %590 = vmatpush3.bf16.msra.mxu0 %v672_v14  ;;  %v702_v43 = vld [vmem:[%s879_s1 + $0x108] sm:$0xff]   ;;  %v703_v44 = vld [vmem:[%s879_s1 + $0x100] sm:$0xff]  }
  0x11   :  { %612 = vmatpush3.bf16.msra.mxu1 %v673_v15  ;;  %591 = vmatprep.subr.bf16.mxu0 %v674_v16  ;;  %v581_v60 = vld [vmem:[%s881_s2] ss:$0 sm:$0xff] }
  0x12   :  { %613 = vmatprep.subr.bf16.mxu1 %v675_v17  ;;  %v582_v62 = vld [vmem:[%s882_s3] ss:$0 sm:$0xff] }
  0x14   :  { %592 = vmatpush3.bf16.msra.mxu0 %v676_v18 }
  0x15   :  { %614 = vmatpush3.bf16.msra.mxu1 %v677_v19  ;;  %593 = vmatprep.subr.bf16.mxu0 %v678_v20 }
  0x16   :  { %615 = vmatprep.subr.bf16.mxu1 %v679_v21 }
  0x18   :  { %594 = vmatpush3.bf16.msra.mxu0 %v680_v22 }
  0x19   :  { %616 = vmatpush3.bf16.msra.mxu1 %v681_v23  ;;  %595 = vmatprep.subr.bf16.mxu0 %v682_v24 }
  0x1a   :  { %617 = vmatprep.subr.bf16.mxu1 %v683_v25 }
  0x1c   :  { %596 = vmatpush3.bf16.msra.mxu0 %v684_v26 }
  0x1d   :  { %618 = vmatpush3.bf16.msra.mxu1 %v685_v27  ;;  %597 = vmatprep.subr.bf16.mxu0 %v686_v28 }
  0x1e   :  { %619 = vmatprep.subr.bf16.mxu1 %v687_v29 }
  0x20   :  { %598 = vmatpush3.bf16.msra.mxu0 %v688_v30 }
  0x21   :  { %620 = vmatpush3.bf16.msra.mxu1 %v689_v31  ;;  %636 = vmatprep.subr.bf16.mxu0 %v705_v34 }
  0x23   :  { %411 = vmatmul.mubr.bf16.vlgmr.msra.gmra.mxu0 %v690_v32 }
  0x24   :  { %452 = vmatmul.mubr.bf16.vlgmr.msra.gmra.mxu1 %v693_v35  ;;  %637 = vmatpush3.bf16.msra.mxu0 %v696_v37 }
  0x25   :  { %638 = vmatprep.subr.bf16.mxu0 %v705_v34  ;;  %652 = vmatprep.mubr.msk.bf16.mxu0 %vm706_vm0, %v705_v34 }
  0x28   :  { %639 = vmatpush3.bf16.msra.mxu0 %v697_v38 }
  0x29   :  { %640 = vmatprep.subr.bf16.mxu0 %v705_v34 }
  0x2c   :  { %641 = vmatpush3.bf16.msra.mxu0 %v698_v39 }
  0x2d   :  { %642 = vmatprep.subr.bf16.mxu0 %v705_v34 }
  0x30   :  { %643 = vmatpush3.bf16.msra.mxu0 %v699_v40 }
  0x31   :  { %644 = vmatprep.subr.bf16.mxu0 %v705_v34 }
  0x34   :  { %645 = vmatpush3.bf16.msra.mxu0 %v700_v41 }
  0x35   :  { %646 = vmatprep.subr.bf16.mxu0 %v705_v34 }
  0x38   :  { %647 = vmatpush3.bf16.msra.mxu0 %v701_v42 }
  0x39   :  { %648 = vmatprep.subr.bf16.mxu0 %v705_v34 }
  0x3c   :  { %649 = vmatpush3.bf16.msra.mxu0 %v702_v43 }
  0x3d   :  { %650 = vmatprep.subr.bf16.mxu0 %v705_v34 }
  0x40   :  { %651 = vmatpush3.bf16.msra.mxu0 %v703_v44 }
  0x43   :  { %653 = vmatmul.mubr.bf16.vlgmr.msra.gmra.mxu0 %v704_v45 }
  0xe3   :  { %v599_v46 = vpop.f32.mrf.mxu0 }
  0xe4   :  { %v621_v47 = vpop.f32.mrf.mxu1 }
  0xe5   :  { %v600_v48 = vpop.f32.mrf.mxu0 }
  0xe6   :  { %v622_v49 = vpop.f32.mrf.mxu1  ;;  %v601_v52 = vadd.f32 %v600_v48, %v599_v46 }
  0xe7   :  { %v602_v50 = vpop.f32.mrf.mxu0  ;;  %v623_v53 = vadd.f32 %v622_v49, %v621_v47 }
  0xe8   :  { %v624_v51 = vpop.f32.mrf.mxu1 }
  0xe9   :  { %v603_v54 = vpop.f32.mrf.mxu0  ;;  %v454_v58 = vadd.f32 %v623_v53, %v601_v52 }
  0xea   :  { %v625_v55 = vpop.f32.mrf.mxu1  ;;  %v604_v56 = vadd.f32 %v603_v54, %v602_v50 }
  0xeb   :  { %v626_v57 = vadd.f32 %v625_v55, %v624_v51 }
  0xed   :  { %v457_v1 = vadd.f32 %v626_v57, %v604_v56 }
 0x103   :  { %v494_v59 = vpop.f32.mrf.mxu0 }
 0x104   :  { %v495_v61 = vadd.f32 %v494_v59, %v454_v58 }
 0x105   :  { %v654_v63 = vpop.f32.mrf.mxu0 }
 0x106   :  { %v517_v0 = vmul.f32 %v581_v60, %v495_v61 }
 0x107   :  { %v497_v2 = vpop.f32.mrf.mxu0 }
 0x108   :  { %v526_v3 = vadd.f32 %v582_v62, %v517_v0  ;;  %v498_v4 = vadd.f32 %v497_v2, %v457_v1 }
 0x109   :  { %v655_v5 = vpop.f32.mrf.mxu0 }
 0x10a   :  { %v528_v6 = vmax.f32 %v526_v3, 0.0  ;;  %v518_v7 = vmul.f32 %v581_v60, %v498_v4 }
 0x10c   :  { %530 = vst [vmem:[%s883_s4] sm:$0xff] %v528_v6  ;;  %v527_v8 = vadd.f32 %v582_v62, %v518_v7 }
 0x10e   :  { %v529_v9 = vmax.f32 %v527_v8, 0.0 }
 0x110   :  { %531 = vst [vmem:[%s883_s4 + $0x8] sm:$0xff] %v529_v9 }

// kernel: pyresnet_forward.22
= control target key start
LH: loop header
LB: loop body
LE: loop exit
PB: predicated region body
PF: predicated region fallthrough
CT: control target
= control target key end

     0   :  { %v223_v0 = vmov 0.0   ;;  %vm224_vm0 = vmmov 0   ;;  %s289_s1 = inlined_call_operand.vmem [shape: bf16[128,128], index: 1, kind: input, shape index: {}]   ;;  %s290_s0 = inlined_call_operand.vmem [shape: bf16[16,128], index: 0, kind: input, shape index: {}]   ;;  %s291_s2 = inlined_call_operand.vmem [shape: f32[1,128], index: 2, kind: input, shape index: {}]   ;;  %s292_s3 = inlined_call_operand.vmem [shape: f32[1,128], index: 3, kind: input, shape index: {}]   ;;  %s293_s4 = inlined_call_operand.vmem [shape: f32[16,128], index: 4, kind: output, shape index: {}]  }
   0x1   :  { %192 = vmatprep.subr.bf16.mxu0 %v223_v0  ;;  %v214_v1 = vld [vmem:[%s289_s1 + $0x38] sm:$0xff]   ;;  %208 = vmatprep.mubr.msk.bf16.mxu0 %vm224_vm0, %v223_v0  ;;  %v215_v2 = vld [vmem:[%s289_s1 + $0x30] sm:$0xff]   ;;  %v216_v3 = vld [vmem:[%s289_s1 + $0x28] sm:$0xff]  }
   0x2   :  { %193 = vmatpush3.bf16.msra.mxu0 %v214_v1  ;;  %v217_v4 = vld [vmem:[%s289_s1 + $0x20] sm:$0xff]   ;;  %v218_v5 = vld [vmem:[%s289_s1 + $0x18] sm:$0xff]   ;;  %v219_v6 = vld [vmem:[%s289_s1 + $0x10] sm:$0xff]  }
   0x3   :  { %194 = vmatprep.subr.bf16.mxu0 %v223_v0  ;;  %v220_v7 = vld [vmem:[%s289_s1 + $0x8] sm:$0xff]   ;;  %v221_v8 = vld [vmem:[%s289_s1] sm:$0xff]  }
   0x4   :  { %v222_v9 = vld [vmem:[%s290_s0] sm:$0xff]  }
   0x5   :  { %v181_v10 = vld [vmem:[%s291_s2] ss:$0 sm:$0xff] }
   0x6   :  { %195 = vmatpush3.bf16.msra.mxu0 %v215_v2  ;;  %v182_v12 = vld [vmem:[%s292_s3] ss:$0 sm:$0xff] }
   0x7   :  { %196 = vmatprep.subr.bf16.mxu0 %v223_v0 }
   0xa   :  { %197 = vmatpush3.bf16.msra.mxu0 %v216_v3 }
   0xb   :  { %198 = vmatprep.subr.bf16.mxu0 %v223_v0 }
   0xe   :  { %199 = vmatpush3.bf16.msra.mxu0 %v217_v4 }
   0xf   :  { %200 = vmatprep.subr.bf16.mxu0 %v223_v0 }
  0x12   :  { %201 = vmatpush3.bf16.msra.mxu0 %v218_v5 }
  0x13   :  { %202 = vmatprep.subr.bf16.mxu0 %v223_v0 }
  0x16   :  { %203 = vmatpush3.bf16.msra.mxu0 %v219_v6 }
  0x17   :  { %204 = vmatprep.subr.bf16.mxu0 %v223_v0 }
  0x1a   :  { %205 = vmatpush3.bf16.msra.mxu0 %v220_v7 }
  0x1b   :  { %206 = vmatprep.subr.bf16.mxu0 %v223_v0 }
  0x1e   :  { %207 = vmatpush3.bf16.msra.mxu0 %v221_v8 }
  0x21   :  { %209 = vmatmul.mubr.bf16.vlgmr.msra.gmra.mxu0 %v222_v9 }
  0xe1   :  { %v132_v11 = vpop.f32.mrf.mxu0 }
  0xe2   :  { %v155_v13 = vmul.f32 %v181_v10, %v132_v11 }
  0xe3   :  { %v210_v14 = vpop.f32.mrf.mxu0 }
  0xe4   :  { %v164_v15 = vadd.f32 %v182_v12, %v155_v13 }
  0xe5   :  { %v135_v16 = vpop.f32.mrf.mxu0 }
  0xe6   :  { %166 = vst [vmem:[%s293_s4] sm:$0xff] %v164_v15  ;;  %v156_v17 = vmul.f32 %v181_v10, %v135_v16 }
  0xe7   :  { %v211_v18 = vpop.f32.mrf.mxu0 }
  0xe8   :  { %v165_v19 = vadd.f32 %v182_v12, %v156_v17 }
  0xea   :  { %167 = vst [vmem:[%s293_s4 + $0x8] sm:$0xff] %v165_v19 }

// kernel: pyresnet_forward.24
= control target key start
LH: loop header
LB: loop body
LE: loop exit
PB: predicated region body
PF: predicated region fallthrough
CT: control target
= control target key end

     0   :  { %s1120_s18 = smov 0   ;;  %s1122_s19 = smov 0   ;;  %s1236_s0 = inlined_call_operand.vmem [shape: bf16[16,1152], index: 0, kind: input, shape index: {}]   ;;  %s1237_s1 = inlined_call_operand.vmem [shape: bf16[1152,128], index: 1, kind: input, shape index: {}]   ;;  %s1238_s2 = inlined_call_operand.vmem [shape: f32[1,128], index: 2, kind: input, shape index: {}]   ;;  %s1239_s3 = inlined_call_operand.vmem [shape: f32[1,128], index: 3, kind: input, shape index: {}]   ;;  %s1240_s4 = inlined_call_operand.vmem [shape: f32[16,128], index: 4, kind: input, shape index: {}]   ;;  %s1241_s5 = inlined_call_operand.vmem [shape: f32[16,128], index: 5, kind: output, shape index: {}]  }
   0x1   :  { %s1124_s20 = smov 0   ;;  %s1126_s21 = smov 0  }
   0x2   :  { %s1128_s22 = smov 0  }
   0x3 LB: > { %s27_s23 = sadd.s32 1, %s1081_s21  ;;  %p50_p1 = scmp.ne.s32.totalorder %s1073_s19, %s1069_s18  ;;  %s1085_s22 = sphi %s1128_s22, %s15_s22   ;;  %s1081_s21 = sphi %s1126_s21, %s1245_s21   ;;  %s1077_s20 = sphi %s1124_s20, %s1244_s20   ;;  %s1073_s19 = sphi %s1122_s19, %s1243_s19   ;;  %s1069_s18 = sphi %s1120_s18, %s1242_s18  }
   0x4   : > { %p28_p0 = scmp.ge.s32.totalorder %s27_s23, 3  ;;  %p51_p2 = scmp.eq.s32.totalorder %s1085_s22, 0 }
   0x5   : > { %s43_s25 = sadd.s32 1, %s1073_s19  ;;  %p879_p5 = scmp.ge.s32.totalorder %s1085_s22, 3 }
   0x6   : > { %s1247_s23 = smov (%p28_p0, %s27_s23), 0  ;;  %p52_p3 = por %p51_p2, %p50_p1 }
   0x7   : > { %s39_s24 = ssub.s32 %s1081_s21, %s1247_s23  ;;  %236 = sbr.rel (%p879_p5) target bundleno = 19 (0x13), region = 28 }
   0x8   : > { %p41_p4 = scmp.eq.s32.totalorder %s39_s24, 0 }
   0xa   : > { %s1155_s26 = scalar_select %p41_p4, %s1073_s19, %s43_s25  }
   0xc   : > { %239 = sbr.rel (!%p52_p3) target bundleno = 19 (0x13), region = 32  ;;  %s241_s27 = sand.u32 (%p52_p3), 1, %s1073_s19  }
   0xd   : > { %s922_s28 = smul.u32 (%p52_p3), 12, %s1081_s21 }
   0xe   : > { %s974_s29 = smul.u32 (%p52_p3), 24, %s241_s27 }
   0xf   : > { %s249_s7 = scalar_lea.vmem (%p52_p3), %s1236_s0, %s922_s28 }
  0x10   : > { %v264_v0 = vld [vmem:[%s249_s7] sm:$0xff] (%p52_p3)  ;;  %v881_v2 = vld [vmem:[%s249_s7 + $0x8] sm:$0xf] (%p52_p3)  ;;  %s243_s8 = scalar_lea.vmem (%p52_p3), [#allocation3], %s974_s29  ;;  %v883_v3 = vld [vmem:[%s249_s7 + $0x2c] sm:$0xf] (%p52_p3) }
  0x11   : > { %v266_v1 = vld [vmem:[%s249_s7 + $0x24] sm:$0xff]  ;;  %265 = vst [vmem:[%s243_s8] sm:$0xff] %v264_v0  ;;  %882 = vst [vmem:[%s243_s8 + $0x8] sm:$0xf] %v881_v2 }
  0x12   : > { %267 = vst [vmem:[%s243_s8 + $0xc] sm:$0xff] %v266_v1  ;;  %884 = vst [vmem:[%s243_s8 + $0x14] sm:$0xf] %v883_v3 }
  0x13 PF: > { %p885_p6 = scmp.ge.s32.totalorder %s1085_s22, 1  ;;  %p296_p7 = scmp.lt.s32.totalorder %s1085_s22, 4 }
  0x15   : > { %p297_p8 = pnand %p885_p6, %p296_p7 }
  0x16   : > { %s303_s9 = sand.u32 (!%p297_p8), 1, %s1069_s18   ;;  %s357_s10 = smul.u32 (!%p297_p8), 48, %s1077_s20 }
  0x17   : > { %300 = sbr.rel (%p297_p8) target bundleno = 291 (0x123), region = 62  ;;  %p887_p10 = scmp.ne.s32.totalorder (!%p297_p8), %s1077_s20, 0 }
  0x18   : > { %s975_s11 = smul.u32 (!%p297_p8), 24, %s303_s9  ;;  %p358_p9 = scmp.lt.s32.totalorder (!%p297_p8), %s357_s10, 143 }
  0x1a   : > { %s1172_s16 = scalar_lea.vmem (!%p297_p8), [#allocation3], %s975_s11 }
  0x1c   : > { %s1249_s10 = smov (!%p358_p9, %s357_s10), 143  ;;  %394 = sbr.rel (%p887_p10) target bundleno = 35 (0x23), region = 70 }
  0x1d   : > { %s886_s12 = sshll.u32 %s1249_s10, 2 }
  0x1e   : > { %s1170_s15 = scalar_lea.vmem %s1237_s1, %s886_s12 }
  0x21   : > { %v1087_v4 = vmov 0.0  }
  0x22   : > { %395 = vst [vmem:[#allocation2] sm:$0xff] %v1087_v4  ;;  %396 = vst [vmem:[#allocation2 + $0x8] sm:$0xff] %v1087_v4 }
  0x23 PF: > { %v1019_v5 = vld [vmem:[%s1170_s15 + $0x78] sm:$0xff]   ;;  %v1088_v6 = vmov 0.0   ;;  %vm1089_vm0 = vmmov 0   ;;  %v1022_v9 = vld [vmem:[%s1170_s15 + $0x70] sm:$0xff]   ;;  %v1025_v12 = vld [vmem:[%s1170_s15 + $0x68] sm:$0xff]   ;;  %p915_p11 = scmp.ne.s32.totalorder %s1077_s20, 2 }
  0x24   : > { %954 = vmatprep.subr.bf16.mxu1 %v1088_v6  ;;  %v1020_v7 = vld [vmem:[%s1170_s15 + $0xb8] sm:$0xff]   ;;  %923 = vmatprep.subr.bf16.mxu0 %v1019_v5  ;;  %v1023_v10 = vld [vmem:[%s1170_s15 + $0xb0] sm:$0xff]   ;;  %v1026_v13 = vld [vmem:[%s1170_s15 + $0xa8] sm:$0xff]  }
  0x25   : > { %v1021_v8 = vld [vmem:[%s1170_s15 + $0x38] sm:$0xff]   ;;  %970 = vmatprep.mubr.msk.bf16.mxu1 %vm1089_vm0, %v1088_v6  ;;  %955 = vmatpush3.bf16.msra.mxu1 %v1020_v7  ;;  %v1024_v11 = vld [vmem:[%s1170_s15 + $0x30] sm:$0xff]   ;;  %v1027_v14 = vld [vmem:[%s1170_s15 + $0x28] sm:$0xff]  }
  0x26   : > { %924 = vmatpush3.bf16.msra.mxu0 %v1021_v8  ;;  %956 = vmatprep.subr.bf16.mxu1 %v1088_v6  ;;  %v1028_v15 = vld [vmem:[%s1170_s15 + $0x60] sm:$0xff]   ;;  %v1031_v18 = vld [vmem:[%s1170_s15 + $0x58] sm:$0xff]   ;;  %v1034_v21 = vld [vmem:[%s1170_s15 + $0x50] sm:$0xff]  }
  0x27   : > { %925 = vmatprep.subr.bf16.mxu0 %v1022_v9  ;;  %v1029_v16 = vld [vmem:[%s1170_s15 + $0xa0] sm:$0xff]   ;;  %v1032_v19 = vld [vmem:[%s1170_s15 + $0x98] sm:$0xff]   ;;  %v1035_v22 = vld [vmem:[%s1170_s15 + $0x90] sm:$0xff]  }
  0x28   : > { %v1030_v17 = vld [vmem:[%s1170_s15 + $0x20] sm:$0xff]   ;;  %v1033_v20 = vld [vmem:[%s1170_s15 + $0x18] sm:$0xff]   ;;  %v1036_v23 = vld [vmem:[%s1170_s15 + $0x10] sm:$0xff]  }
  0x29   : > { %957 = vmatpush3.bf16.msra.mxu1 %v1023_v10  ;;  %v1037_v24 = vld [vmem:[%s1170_s15 + $0x48] sm:$0xff]   ;;  %v1040_v27 = vld [vmem:[%s1170_s15 + $0x40] sm:$0xff]  }
  0x2a   : > { %926 = vmatpush3.bf16.msra.mxu0 %v1024_v11  ;;  %958 = vmatprep.subr.bf16.mxu1 %v1088_v6  ;;  %v1038_v25 = vld [vmem:[%s1170_s15 + $0x88] sm:$0xff]   ;;  %v1041_v29 = vld [vmem:[%s1170_s15 + $0x80] sm:$0xff]  }
  0x2b   : > { %927 = vmatprep.subr.bf16.mxu0 %v1025_v12  ;;  %v1039_v26 = vld [vmem:[%s1170_s15 + $0x8] sm:$0xff]   ;;  %v1042_v30 = vld [vmem:[%s1170_s15] sm:$0xff]  }
  0x2c   : > { %v1045_v28 = vld [vmem:[%s1172_s16 + $0x4] ss:$12 sps:$4 sm:$0xff]   ;;  %v1046_v31 = vld [vmem:[%s1172_s16 + $0x8] ss:$12 sps:$4 sm:$0xff]   ;;  %v1043_v32 = vld [vmem:[%s1172_s16] ss:$12 sps:$4 sm:$0xff]  }
  0x2d   : > { %959 = vmatpush3.bf16.msra.mxu1 %v1026_v13  ;;  %643 = vmatprep.mubr.bf16.mxu0 %v1045_v28  ;;  %v397_v39 = vld [vmem:[#allocation2] sm:$0xff]  ;;  %v398_v46 = vld [vmem:[#allocation2 + $0x8] sm:$0xff] }
  0x2e   : > { %928 = vmatpush3.bf16.msra.mxu0 %v1027_v14  ;;  %960 = vmatprep.subr.bf16.mxu1 %v1088_v6 }
  0x2f   : > { %929 = vmatprep.subr.bf16.mxu0 %v1028_v15 }
  0x31   : > { %961 = vmatpush3.bf16.msra.mxu1 %v1029_v16 }
  0x32   : > { %930 = vmatpush3.bf16.msra.mxu0 %v1030_v17  ;;  %962 = vmatprep.subr.bf16.mxu1 %v1088_v6 }
  0x33   : > { %931 = vmatprep.subr.bf16.mxu0 %v1031_v18 }
  0x35   : > { %963 = vmatpush3.bf16.msra.mxu1 %v1032_v19 }
  0x36   : > { %932 = vmatpush3.bf16.msra.mxu0 %v1033_v20  ;;  %964 = vmatprep.subr.bf16.mxu1 %v1088_v6 }
  0x37   : > { %933 = vmatprep.subr.bf16.mxu0 %v1034_v21 }
  0x39   : > { %965 = vmatpush3.bf16.msra.mxu1 %v1035_v22 }
  0x3a   : > { %934 = vmatpush3.bf16.msra.mxu0 %v1036_v23  ;;  %966 = vmatprep.subr.bf16.mxu1 %v1088_v6 }
  0x3b   : > { %935 = vmatprep.subr.bf16.mxu0 %v1037_v24 }
  0x3d   : > { %967 = vmatpush3.bf16.msra.mxu1 %v1038_v25 }
  0x3e   : > { %936 = vmatpush3.bf16.msra.mxu0 %v1039_v26  ;;  %968 = vmatprep.subr.bf16.mxu1 %v1088_v6 }
  0x3f   : > { %937 = vmatprep.subr.bf16.mxu0 %v1040_v27 }
  0x41   : > { %969 = vmatpush3.bf16.msra.mxu1 %v1041_v29 }
  0x42   : > { %938 = vmatpush3.bf16.msra.mxu0 %v1042_v30 }
  0x44   : > { %971 = vmatmul.mubr.bf16.vlgmr.msra.gmra.mxu1 %v1046_v31 }
  0x45   : > { %644 = vmatmul.mubr.bf16.vlgmr.msra.gmra.mxu0 %v1043_v32 }
 0x104   : > { %v686_v33 = vpop.f32.mrf.mxu1 }
 0x105   : > { %v939_v34 = vpop.f32.mrf.mxu0 }
 0x106   : > { %v972_v35 = vpop.f32.mrf.mxu1 }
 0x107   : > { %v940_v36 = vpop.f32.mrf.mxu0 }
 0x108   : > { %v941_v37 = vadd.f32 %v940_v36, %v939_v34  ;;  %v689_v38 = vpop.f32.mrf.mxu1 }
 0x109   : > { %v942_v40 = vpop.f32.mrf.mxu0 }
 0x10a   : > { %v687_v41 = vadd.f32 %v941_v37, %v686_v33  ;;  %v973_v42 = vpop.f32.mrf.mxu1 }
 0x10b   : > { %v943_v43 = vpop.f32.mrf.mxu0 }
 0x10c   : > { %v693_v44 = vadd.f32 %v687_v41, %v397_v39  ;;  %v944_v45 = vadd.f32 %v943_v43, %v942_v40 }
 0x10e   : > { %695 = vst [vmem:[#allocation2] sm:$0xff] %v693_v44  ;;  %v690_v47 = vadd.f32 %v944_v45, %v689_v38  ;;  %700 = sbr.rel (%p915_p11) target bundleno = 291 (0x123), region = 74 }
 0x110   : > { %v694_v48 = vadd.f32 %v690_v47, %v398_v46 }
 0x112   : > { %696 = vst [vmem:[#allocation2 + $0x8] sm:$0xff] %v694_v48 }
 0x113   : > { %v916_v50 = vld [vmem:[%s1238_s2] ss:$0 sm:$0xff]  ;;  %v722_v57 = vld [vmem:[%s1240_s4 + $0x8] sm:$0xff] }
 0x114   : > { %v917_v51 = vld [vmem:[%s1239_s3] ss:$0 sm:$0xff] }
 0x115   : > { %v701_v49 = vld [vmem:[#allocation2] sm:$0xff] }
 0x116   : > { %v710_v52 = vmul.f32 %v916_v50, %v701_v49  ;;  %v721_v54 = vld [vmem:[%s1240_s4] sm:$0xff] }
 0x118   : > { %v719_v56 = vadd.f32 %v917_v51, %v710_v52 }
 0x119   : > { %v702_v53 = vld [vmem:[#allocation2 + $0x8] sm:$0xff] }
 0x11a   : > { %v711_v55 = vmul.f32 %v916_v50, %v702_v53  ;;  %v723_v59 = vadd.f32 %v721_v54, %v719_v56 }
 0x11c   : > { %v720_v58 = vadd.f32 %v917_v51, %v711_v55  ;;  %v725_v61 = vmax.f32 %v723_v59, 0.0 }
 0x11e   : > { %v724_v60 = vadd.f32 %v722_v57, %v720_v58  ;;  %727 = vst [vmem:[%s1241_s5] sm:$0xff] %v725_v61 }
 0x120   : > { %v726_v62 = vmax.f32 %v724_v60, 0.0 }
 0x122   : > { %728 = vst [vmem:[%s1241_s5 + $0x8] sm:$0xff] %v726_v62 }
 0x123 PF: > { %s15_s22 = sadd.s32 1, %s1085_s22   ;;  %s1242_s18 = smov %s1073_s19 }
 0x124   : > { %p12_p12 = scmp.ge.s32.totalorder %s15_s22, 5   ;;  %s1243_s19 = smov %s1155_s26 }
 0x125   : > { %s1244_s20 = smov %s1081_s21  ;;  %s1245_s21 = smov %s1247_s23 }
 0x126   :  { %14 = sbr.rel (!%p12_p12) target bundleno = 3 (0x3), region = 127 }

// kernel: pyresnet_forward.27
= control target key start
LH: loop header
LB: loop body
LE: loop exit
PB: predicated region body
PF: predicated region fallthrough
CT: control target
= control target key end

     0   :  { %s1214_s15 = smov 0   ;;  %s1216_s16 = smov 0   ;;  %s1354_s0 = inlined_call_operand.vmem [shape: bf16[16,1152], index: 0, kind: input, shape index: {}]   ;;  %s1355_s1 = inlined_call_operand.vmem [shape: bf16[1152,256], index: 1, kind: input, shape index: {}]   ;;  %s1356_s2 = inlined_call_operand.vmem [shape: f32[1,256], index: 2, kind: input, shape index: {}]   ;;  %s1357_s3 = inlined_call_operand.vmem [shape: f32[1,256], index: 3, kind: input, shape index: {}]   ;;  %s1358_s4 = inlined_call_operand.vmem [shape: f32[16,256], index: 4, kind: output, shape index: {}]  }
   0x1   :  { %s1218_s17 = smov 0   ;;  %s1220_s18 = smov 0  }
   0x2   :  { %s1222_s19 = smov 0  }
   0x3 LB: > { %s26_s20 = sadd.s32 1, %s1181_s18  ;;  %p49_p1 = scmp.ne.s32.totalorder %s1173_s16, %s1169_s15  ;;  %s1185_s19 = sphi %s1222_s19, %s14_s19   ;;  %s1181_s18 = sphi %s1220_s18, %s1362_s18   ;;  %s1177_s17 = sphi %s1218_s17, %s1361_s17   ;;  %s1173_s16 = sphi %s1216_s16, %s1360_s16   ;;  %s1169_s15 = sphi %s1214_s15, %s1359_s15  }
   0x4   : > { %p27_p0 = scmp.ge.s32.totalorder %s26_s20, 3  ;;  %p50_p2 = scmp.eq.s32.totalorder %s1185_s19, 0 }
   0x5   : > { %s42_s22 = sadd.s32 1, %s1173_s16  ;;  %p959_p5 = scmp.ge.s32.totalorder %s1185_s19, 3 }
   0x6   : > { %s1364_s20 = smov (%p27_p0, %s26_s20), 0  ;;  %p51_p3 = por %p50_p2, %p49_p1 }
   0x7   : > { %s38_s21 = ssub.s32 %s1181_s18, %s1364_s20  ;;  %199 = sbr.rel (%p959_p5) target bundleno = 19 (0x13), region = 24 }
   0x8   : > { %p40_p4 = scmp.eq.s32.totalorder %s38_s21, 0 }
   0xa   : > { %s1249_s23 = scalar_select %p40_p4, %s1173_s16, %s42_s22  }
   0xc   : > { %202 = sbr.rel (!%p51_p3) target bundleno = 19 (0x13), region = 28  ;;  %s204_s24 = sand.u32 (%p51_p3), 1, %s1173_s16  }
   0xd   : > { %s1025_s25 = smul.u32 (%p51_p3), 12, %s1181_s18 }
   0xe   : > { %s1027_s26 = smul.u32 (%p51_p3), 24, %s204_s24 }
   0xf   : > { %s212_s29 = scalar_lea.vmem (%p51_p3), %s1354_s0, %s1025_s25 }
  0x10   : > { %v227_v0 = vld [vmem:[%s212_s29] sm:$0xff] (%p51_p3)  ;;  %v961_v2 = vld [vmem:[%s212_s29 + $0x8] sm:$0xf] (%p51_p3)  ;;  %s206_s30 = scalar_lea.vmem (%p51_p3), [#allocation3], %s1027_s26  ;;  %v963_v3 = vld [vmem:[%s212_s29 + $0x2c] sm:$0xf] (%p51_p3) }
  0x11   : > { %v229_v1 = vld [vmem:[%s212_s29 + $0x24] sm:$0xff]  ;;  %228 = vst [vmem:[%s206_s30] sm:$0xff] %v227_v0  ;;  %962 = vst [vmem:[%s206_s30 + $0x8] sm:$0xf] %v961_v2 }
  0x12   : > { %230 = vst [vmem:[%s206_s30 + $0xc] sm:$0xff] %v229_v1  ;;  %964 = vst [vmem:[%s206_s30 + $0x14] sm:$0xf] %v963_v3 }
  0x13 PF: > { %p965_p6 = scmp.ge.s32.totalorder %s1185_s19, 1  ;;  %p262_p7 = scmp.lt.s32.totalorder %s1185_s19, 4 }
  0x15   : > { %p263_p8 = pnand %p965_p6, %p262_p7 }
  0x16   : > { %s269_s5 = sand.u32 (!%p263_p8), 1, %s1169_s15   ;;  %s319_s6 = smul.u32 (!%p263_p8), 48, %s1177_s17 }
  0x17   : > { %266 = sbr.rel (%p263_p8) target bundleno = 321 (0x141), region = 58  ;;  %p968_p10 = scmp.ne.s32.totalorder (!%p263_p8), %s1177_s17, 0 }
  0x18   : > { %s1028_s7 = smul.u32 (!%p263_p8), 24, %s269_s5  ;;  %p321_p9 = scmp.lt.s32.totalorder (!%p263_p8), %s319_s6, 143 }
  0x1a   : > { %s1266_s12 = scalar_lea.vmem (!%p263_p8), [#allocation3], %s1028_s7 }
  0x1c   : > { %s1366_s6 = smov (!%p321_p9, %s319_s6), 143  ;;  %357 = sbr.rel (%p968_p10) target bundleno = 36 (0x24), region = 66 }
  0x1d   : > { %s1026_s8 = sshll.u32 %s1366_s6, 3 }
  0x1e   : > { %s1264_s11 = scalar_lea.vmem %s1355_s1, %s1026_s8 }
  0x21   : > { %v1187_v4 = vmov 0.0  }
  0x22   : > { %358 = vst [vmem:[#allocation2 + $0x10] sm:$0xff] %v1187_v4  ;;  %359 = vst [vmem:[#allocation2] sm:$0xff] %v1187_v4 }
  0x23   : > { %360 = vst [vmem:[#allocation2 + $0x18] sm:$0xff] %v1187_v4  ;;  %361 = vst [vmem:[#allocation2 + $0x8] sm:$0xff] %v1187_v4 }
  0x24 PF: > { %v1071_v5 = vld [vmem:[%s1264_s11 + $0x74] ss:$8 sps:$4 sm:$0xff]   ;;  %v1073_v6 = vld [vmem:[%s1264_s11 + $0x70] ss:$8 sps:$4 sm:$0xff]   ;;  %v1188_v7 = vmov 0   ;;  %p1020_p11 = scmp.ne.s32.totalorder %s1177_s17, 2 }
  0x25   : > { %749 = vmatprep.mubr.bf16.mxu1 %v1188_v7  ;;  %674 = vmatprep.subr.bf16.mxu0 %v1071_v5  ;;  %v1074_v8 = vld [vmem:[%s1264_s11 + $0x64] ss:$8 sps:$4 sm:$0xff]   ;;  %v1076_v9 = vld [vmem:[%s1264_s11 + $0x60] ss:$8 sps:$4 sm:$0xff]   ;;  %v1077_v10 = vld [vmem:[%s1264_s11 + $0x54] ss:$8 sps:$4 sm:$0xff]  }
  0x26   : > { %675 = vmatpush1.bf16.msra.mxu0 %v1073_v6  ;;  %v1079_v11 = vld [vmem:[%s1264_s11 + $0x50] ss:$8 sps:$4 sm:$0xff]   ;;  %v1080_v12 = vld [vmem:[%s1264_s11 + $0x44] ss:$8 sps:$4 sm:$0xff]   ;;  %v1092_v13 = vld [vmem:[%s1264_s11 + $0x174] ss:$8 sps:$4 sm:$0xff]  }
  0x27   : > { %676 = vmatprep.subr.bf16.mxu0 %v1074_v8  ;;  %v1094_v14 = vld [vmem:[%s1264_s11 + $0x170] ss:$8 sps:$4 sm:$0xff]   ;;  %v1082_v15 = vld [vmem:[%s1264_s11 + $0x40] ss:$8 sps:$4 sm:$0xff]   ;;  %v1083_v16 = vld [vmem:[%s1264_s11 + $0x34] ss:$8 sps:$4 sm:$0xff]   ;;  %717 = vmatprep.subr.bf16.mxu1 %v1092_v13 }
  0x28   : > { %v1098_v17 = vld [vmem:[%s1264_s11 + $0x164] ss:$8 sps:$4 sm:$0xff]   ;;  %718 = vmatpush1.bf16.msra.mxu1 %v1094_v14  ;;  %v1100_v18 = vld [vmem:[%s1264_s11 + $0x160] ss:$8 sps:$4 sm:$0xff]   ;;  %v1085_v19 = vld [vmem:[%s1264_s11 + $0x30] ss:$8 sps:$4 sm:$0xff]  }
  0x29   : > { %719 = vmatprep.subr.bf16.mxu1 %v1098_v17  ;;  %v1104_v20 = vld [vmem:[%s1264_s11 + $0x154] ss:$8 sps:$4 sm:$0xff]   ;;  %v1086_v21 = vld [vmem:[%s1264_s11 + $0x24] ss:$8 sps:$4 sm:$0xff]   ;;  %v1106_v22 = vld [vmem:[%s1264_s11 + $0x150] ss:$8 sps:$4 sm:$0xff]  }
  0x2a   : > { %677 = vmatpush1.bf16.msra.mxu0 %v1076_v9  ;;  %v1110_v23 = vld [vmem:[%s1264_s11 + $0x144] ss:$8 sps:$4 sm:$0xff]   ;;  %v1088_v24 = vld [vmem:[%s1264_s11 + $0x20] ss:$8 sps:$4 sm:$0xff]   ;;  %v1089_v25 = vld [vmem:[%s1264_s11 + $0x14] ss:$8 sps:$4 sm:$0xff]  }
  0x2b   : > { %678 = vmatprep.subr.bf16.mxu0 %v1077_v10  ;;  %v1112_v26 = vld [vmem:[%s1264_s11 + $0x140] ss:$8 sps:$4 sm:$0xff]   ;;  %v1116_v27 = vld [vmem:[%s1264_s11 + $0x134] ss:$8 sps:$4 sm:$0xff]   ;;  %v1091_v28 = vld [vmem:[%s1264_s11 + $0x10] ss:$8 sps:$4 sm:$0xff]  }
  0x2c   : > { %720 = vmatpush1.bf16.msra.mxu1 %v1100_v18  ;;  %v1095_v29 = vld [vmem:[%s1264_s11 + $0x4] ss:$8 sps:$4 sm:$0xff]   ;;  %v1118_v30 = vld [vmem:[%s1264_s11 + $0x130] ss:$8 sps:$4 sm:$0xff]   ;;  %v1097_v32 = vld [vmem:[%s1264_s11] ss:$8 sps:$4 sm:$0xff]  }
  0x2d   : > { %721 = vmatprep.subr.bf16.mxu1 %v1104_v20  ;;  %v1122_v31 = vld [vmem:[%s1264_s11 + $0x124] ss:$8 sps:$4 sm:$0xff]   ;;  %v1101_v33 = vld [vmem:[%s1264_s11 + $0xf4] ss:$8 sps:$4 sm:$0xff]   ;;  %v1124_v34 = vld [vmem:[%s1264_s11 + $0x120] ss:$8 sps:$4 sm:$0xff]  }
  0x2e   : > { %679 = vmatpush1.bf16.msra.mxu0 %v1079_v11  ;;  %v1128_v35 = vld [vmem:[%s1264_s11 + $0x114] ss:$8 sps:$4 sm:$0xff]   ;;  %v1103_v36 = vld [vmem:[%s1264_s11 + $0xf0] ss:$8 sps:$4 sm:$0xff]   ;;  %v1107_v37 = vld [vmem:[%s1264_s11 + $0xe4] ss:$8 sps:$4 sm:$0xff]  }
  0x2f   : > { %680 = vmatprep.subr.bf16.mxu0 %v1080_v12  ;;  %v1130_v38 = vld [vmem:[%s1264_s11 + $0x110] ss:$8 sps:$4 sm:$0xff]   ;;  %v1134_v39 = vld [vmem:[%s1264_s11 + $0x104] ss:$8 sps:$4 sm:$0xff]   ;;  %v1109_v41 = vld [vmem:[%s1264_s11 + $0xe0] ss:$8 sps:$4 sm:$0xff]  }
  0x30   : > { %722 = vmatpush1.bf16.msra.mxu1 %v1106_v22  ;;  %v1146_v40 = vld [vmem:[%s1266_s12 + $0x4] ss:$12 sps:$4 sm:$0xff]   ;;  %v1140_v46 = vld [vmem:[%s1266_s12 + $0x8] ss:$12 sps:$4 sm:$0xff]   ;;  %v1144_v56 = vld [vmem:[%s1266_s12] ss:$12 sps:$4 sm:$0xff]  }
  0x31   : > { %723 = vmatprep.subr.bf16.mxu1 %v1110_v23  ;;  %v1113_v42 = vld [vmem:[%s1264_s11 + $0xd4] ss:$8 sps:$4 sm:$0xff]   ;;  %706 = vmatprep.mubr.bf16.mxu0 %v1146_v40  ;;  %v1136_v43 = vld [vmem:[%s1264_s11 + $0x100] ss:$8 sps:$4 sm:$0xff]   ;;  %v1115_v44 = vld [vmem:[%s1264_s11 + $0xd0] ss:$8 sps:$4 sm:$0xff]  }
  0x32   : > { %681 = vmatpush1.bf16.msra.mxu0 %v1082_v15  ;;  %v1119_v45 = vld [vmem:[%s1264_s11 + $0xc4] ss:$8 sps:$4 sm:$0xff]   ;;  %v1121_v47 = vld [vmem:[%s1264_s11 + $0xc0] ss:$8 sps:$4 sm:$0xff]   ;;  %v1125_v48 = vld [vmem:[%s1264_s11 + $0xb4] ss:$8 sps:$4 sm:$0xff]  }
  0x33   : > { %682 = vmatprep.subr.bf16.mxu0 %v1083_v16  ;;  %v1127_v49 = vld [vmem:[%s1264_s11 + $0xb0] ss:$8 sps:$4 sm:$0xff]   ;;  %v1131_v50 = vld [vmem:[%s1264_s11 + $0xa4] ss:$8 sps:$4 sm:$0xff]   ;;  %v1133_v51 = vld [vmem:[%s1264_s11 + $0xa0] ss:$8 sps:$4 sm:$0xff]  }
  0x34   : > { %724 = vmatpush1.bf16.msra.mxu1 %v1112_v26  ;;  %v1137_v52 = vld [vmem:[%s1264_s11 + $0x94] ss:$8 sps:$4 sm:$0xff]   ;;  %v1139_v53 = vld [vmem:[%s1264_s11 + $0x90] ss:$8 sps:$4 sm:$0xff]   ;;  %v1141_v54 = vld [vmem:[%s1264_s11 + $0x84] ss:$8 sps:$4 sm:$0xff]  }
  0x35   : > { %725 = vmatprep.subr.bf16.mxu1 %v1116_v27  ;;  %v1143_v55 = vld [vmem:[%s1264_s11 + $0x80] ss:$8 sps:$4 sm:$0xff]   ;;  %v362_v59 = vld [vmem:[#allocation2 + $0x10] sm:$0xff]  ;;  %v364_v3 = vld [vmem:[#allocation2 + $0x18] sm:$0xff] }
  0x36   : > { %683 = vmatpush1.bf16.msra.mxu0 %v1085_v19  ;;  %v363_v63 = vld [vmem:[#allocation2] sm:$0xff]  ;;  %v365_v8 = vld [vmem:[#allocation2 + $0x8] sm:$0xff] }
  0x37   : > { %684 = vmatprep.subr.bf16.mxu0 %v1086_v21 }
  0x38   : > { %726 = vmatpush1.bf16.msra.mxu1 %v1118_v30 }
  0x39   : > { %727 = vmatprep.subr.bf16.mxu1 %v1122_v31 }
  0x3a   : > { %685 = vmatpush1.bf16.msra.mxu0 %v1088_v24 }
  0x3b   : > { %686 = vmatprep.subr.bf16.mxu0 %v1089_v25 }
  0x3c   : > { %728 = vmatpush1.bf16.msra.mxu1 %v1124_v34 }
  0x3d   : > { %729 = vmatprep.subr.bf16.mxu1 %v1128_v35 }
  0x3e   : > { %687 = vmatpush1.bf16.msra.mxu0 %v1091_v28 }
  0x3f   : > { %688 = vmatprep.subr.bf16.mxu0 %v1095_v29 }
  0x40   : > { %730 = vmatpush1.bf16.msra.mxu1 %v1130_v38 }
  0x41   : > { %731 = vmatprep.subr.bf16.mxu1 %v1134_v39 }
  0x42   : > { %689 = vmatpush1.bf16.msra.mxu0 %v1097_v32 }
  0x43   : > { %690 = vmatprep.subr.bf16.mxu0 %v1101_v33 }
  0x44   : > { %732 = vmatpush1.bf16.msra.mxu1 %v1136_v43 }
  0x46   : > { %691 = vmatpush2.bf16.msra.mxu0 %v1103_v36 }
  0x47   : > { %692 = vmatprep.subr.bf16.mxu0 %v1107_v37  ;;  %750 = vmatmul.mubr.bf16.vlgmr.msra.gmra.mxu1 %v1140_v46 }
  0x4a   : > { %693 = vmatpush2.bf16.msra.mxu0 %v1109_v41 }
  0x4b   : > { %694 = vmatprep.subr.bf16.mxu0 %v1113_v42 }
  0x4e   : > { %695 = vmatpush2.bf16.msra.mxu0 %v1115_v44 }
  0x4f   : > { %696 = vmatprep.subr.bf16.mxu0 %v1119_v45 }
  0x52   : > { %697 = vmatpush2.bf16.msra.mxu0 %v1121_v47 }
  0x53   : > { %698 = vmatprep.subr.bf16.mxu0 %v1125_v48 }
  0x56   : > { %699 = vmatpush2.bf16.msra.mxu0 %v1127_v49 }
  0x57   : > { %700 = vmatprep.subr.bf16.mxu0 %v1131_v50 }
  0x5a   : > { %701 = vmatpush2.bf16.msra.mxu0 %v1133_v51 }
  0x5b   : > { %702 = vmatprep.subr.bf16.mxu0 %v1137_v52 }
  0x5e   : > { %703 = vmatpush2.bf16.msra.mxu0 %v1139_v53 }
  0x5f   : > { %704 = vmatprep.subr.bf16.mxu0 %v1141_v54 }
  0x62   : > { %705 = vmatpush2.bf16.msra.mxu0 %v1143_v55 }
  0x65   : > { %707 = vmatmul.mubr.bf16.vlgmr.msra.gmra.mxu0 %v1144_v56 }
 0x107   : > { %v751_v57 = vpop.f32.mrf.mxu1 }
 0x109   : > { %v753_v58 = vpop.f32.mrf.mxu1 }
 0x10b   : > { %v755_v62 = vpop.f32.mrf.mxu1 }
 0x10d   : > { %v757_v7 = vpop.f32.mrf.mxu1 }
 0x125   : > { %v708_v60 = vpop.f32.mrf.mxu0 }
 0x126   : > { %v752_v61 = vadd.f32 %v751_v57, %v708_v60 }
 0x127   : > { %v710_v0 = vpop.f32.mrf.mxu0 }
 0x128   : > { %v760_v1 = vadd.f32 %v752_v61, %v362_v59  ;;  %v754_v2 = vadd.f32 %v753_v58, %v710_v0 }
 0x129   : > { %v712_v4 = vpop.f32.mrf.mxu0 }
 0x12a   : > { %764 = vst [vmem:[#allocation2 + $0x10] sm:$0xff] %v760_v1  ;;  %v761_v5 = vadd.f32 %v754_v2, %v363_v63  ;;  %v756_v6 = vadd.f32 %v755_v62, %v712_v4 }
 0x12b   : > { %v714_v9 = vpop.f32.mrf.mxu0 }
 0x12c   : > { %765 = vst [vmem:[#allocation2] sm:$0xff] %v761_v5  ;;  %v762_v10 = vadd.f32 %v756_v6, %v364_v3  ;;  %v758_v11 = vadd.f32 %v757_v7, %v714_v9  ;;  %771 = sbr.rel (%p1020_p11) target bundleno = 321 (0x141), region = 70 }
 0x12e   : > { %766 = vst [vmem:[#allocation2 + $0x18] sm:$0xff] %v762_v10  ;;  %v763_v12 = vadd.f32 %v758_v11, %v365_v8 }
 0x130   : > { %767 = vst [vmem:[#allocation2 + $0x8] sm:$0xff] %v763_v12 }
 0x131   : > { %v778_v13 = vlaneseq  ;;  %v776_v15 = vld [vmem:[%s1356_s2] sm:$0x3]  ;;  %v772_v17 = vld [vmem:[#allocation2 + $0x10] sm:$0xff] }
 0x132   : > { %v792_v16 = vld [vmem:[%s1357_s3] sm:$0x3] }
 0x133   : > { %v779_v14 = vshrl.u32 %v778_v13, 7  ;;  %v773_v20 = vld [vmem:[#allocation2] sm:$0xff] }
 0x135   : > { %v780_v18 = vsub.s32 0, %v779_v14  ;;  %v784_v19 = vsub.s32 1, %v779_v14  ;;  %v774_v21 = vld [vmem:[#allocation2 + $0x18] sm:$0xff] }
 0x137   : > { %v775_v22 = vld [vmem:[#allocation2 + $0x8] sm:$0xff]  ;;  %v781_v23 = vrot.slane %v776_v15, %v780_v18  ;;  %v797_v24 = vrot.slane %v792_v16, %v780_v18  ;;  %v785_v25 = vrot.slane %v776_v15, %v784_v19  ;;  %v801_v26 = vrot.slane %v792_v16, %v784_v19 }
 0x139   : > { %v788_v27 = vmul.f32 %v781_v23, %v772_v17  ;;  %v789_v28 = vmul.f32 %v785_v25, %v773_v20  ;;  %v790_v29 = vmul.f32 %v781_v23, %v774_v21  ;;  %v791_v30 = vmul.f32 %v785_v25, %v775_v22 }
 0x13b   : > { %v804_v31 = vadd.f32 %v797_v24, %v788_v27  ;;  %v805_v32 = vadd.f32 %v801_v26, %v789_v28  ;;  %v806_v33 = vadd.f32 %v797_v24, %v790_v29  ;;  %v807_v34 = vadd.f32 %v801_v26, %v791_v30 }
 0x13d   : > { %v808_v35 = vmax.f32 %v804_v31, 0.0  ;;  %v809_v36 = vmax.f32 %v805_v32, 0.0  ;;  %v810_v37 = vmax.f32 %v806_v33, 0.0  ;;  %v811_v38 = vmax.f32 %v807_v34, 0.0 }
 0x13f   : > { %812 = vst [vmem:[%s1358_s4] sm:$0xff] %v808_v35  ;;  %813 = vst [vmem:[%s1358_s4 + $0x8] sm:$0xff] %v809_v36 }
 0x140   : > { %814 = vst [vmem:[%s1358_s4 + $0x10] sm:$0xff] %v810_v37  ;;  %815 = vst [vmem:[%s1358_s4 + $0x18] sm:$0xff] %v811_v38 }
 0x141 PF: > { %s14_s19 = sadd.s32 1, %s1185_s19   ;;  %s1359_s15 = smov %s1173_s16 }
 0x142   : > { %p11_p12 = scmp.ge.s32.totalorder %s14_s19, 5   ;;  %s1360_s16 = smov %s1249_s23 }
 0x143   : > { %s1361_s17 = smov %s1181_s18  ;;  %s1362_s18 = smov %s1364_s20 }
 0x144   :  { %13 = sbr.rel (!%p11_p12) target bundleno = 3 (0x3), region = 120 }

// kernel: pyresnet_forward.26
= control target key start
LH: loop header
LB: loop body
LE: loop exit
PB: predicated region body
PF: predicated region fallthrough
CT: control target
= control target key end

     0   :  { %v275_v1 = vmov 0   ;;  %v194_v18 = vlaneseq  ;;  %s370_s1 = inlined_call_operand.vmem [shape: bf16[128,256], index: 1, kind: input, shape index: {}]   ;;  %s371_s0 = inlined_call_operand.vmem [shape: bf16[16,128], index: 0, kind: input, shape index: {}]   ;;  %s372_s2 = inlined_call_operand.vmem [shape: f32[1,256], index: 2, kind: input, shape index: {}]   ;;  %s373_s3 = inlined_call_operand.vmem [shape: f32[1,256], index: 3, kind: input, shape index: {}]   ;;  %s374_s4 = inlined_call_operand.vmem [shape: f32[16,256], index: 4, kind: output, shape index: {}]  }
   0x1   :  { %v250_v0 = vld [vmem:[%s370_s1 + $0x74] ss:$8 sps:$4 sm:$0xff]   ;;  %166 = vmatprep.mubr.bf16.mxu0 %v275_v1  ;;  %v252_v2 = vld [vmem:[%s370_s1 + $0x70] ss:$8 sps:$4 sm:$0xff]   ;;  %v253_v3 = vld [vmem:[%s370_s1 + $0x64] ss:$8 sps:$4 sm:$0xff]  }
   0x2   :  { %134 = vmatprep.subr.bf16.mxu0 %v250_v0  ;;  %v255_v4 = vld [vmem:[%s370_s1 + $0x60] ss:$8 sps:$4 sm:$0xff]   ;;  %v256_v5 = vld [vmem:[%s370_s1 + $0x54] ss:$8 sps:$4 sm:$0xff]   ;;  %v258_v6 = vld [vmem:[%s370_s1 + $0x50] ss:$8 sps:$4 sm:$0xff]  }
   0x3   :  { %135 = vmatpush1.bf16.msra.mxu0 %v252_v2  ;;  %v259_v7 = vld [vmem:[%s370_s1 + $0x44] ss:$8 sps:$4 sm:$0xff]   ;;  %v261_v8 = vld [vmem:[%s370_s1 + $0x40] ss:$8 sps:$4 sm:$0xff]   ;;  %v262_v9 = vld [vmem:[%s370_s1 + $0x34] ss:$8 sps:$4 sm:$0xff]  }
   0x4   :  { %136 = vmatprep.subr.bf16.mxu0 %v253_v3  ;;  %v264_v10 = vld [vmem:[%s370_s1 + $0x30] ss:$8 sps:$4 sm:$0xff]   ;;  %v265_v11 = vld [vmem:[%s370_s1 + $0x24] ss:$8 sps:$4 sm:$0xff]   ;;  %v267_v12 = vld [vmem:[%s370_s1 + $0x20] ss:$8 sps:$4 sm:$0xff]  }
   0x5   :  { %v268_v13 = vld [vmem:[%s370_s1 + $0x14] ss:$8 sps:$4 sm:$0xff]   ;;  %v270_v14 = vld [vmem:[%s370_s1 + $0x10] ss:$8 sps:$4 sm:$0xff]   ;;  %v271_v15 = vld [vmem:[%s370_s1 + $0x4] ss:$8 sps:$4 sm:$0xff]  }
   0x6   :  { %v273_v16 = vld [vmem:[%s370_s1] ss:$8 sps:$4 sm:$0xff]   ;;  %v195_v19 = vshrl.u32 %v194_v18, 7 }
   0x7   :  { %137 = vmatpush1.bf16.msra.mxu0 %v255_v4  ;;  %v274_v17 = vld [vmem:[%s371_s0] sm:$0xff]  }
   0x8   :  { %138 = vmatprep.subr.bf16.mxu0 %v256_v5  ;;  %v196_v20 = vsub.s32 0, %v195_v19  ;;  %v192_v21 = vld [vmem:[%s372_s2] sm:$0x3]  ;;  %v200_v22 = vsub.s32 1, %v195_v19 }
   0x9   :  { %v208_v23 = vld [vmem:[%s373_s3] sm:$0x3] }
   0xa   :  { %v197_v24 = vrot.slane %v192_v21, %v196_v20  ;;  %v213_v25 = vrot.slane %v208_v23, %v196_v20  ;;  %v201_v26 = vrot.slane %v192_v21, %v200_v22  ;;  %v217_v29 = vrot.slane %v208_v23, %v200_v22 }
   0xb   :  { %139 = vmatpush1.bf16.msra.mxu0 %v258_v6 }
   0xc   :  { %140 = vmatprep.subr.bf16.mxu0 %v259_v7 }
   0xf   :  { %141 = vmatpush1.bf16.msra.mxu0 %v261_v8 }
  0x10   :  { %142 = vmatprep.subr.bf16.mxu0 %v262_v9 }
  0x13   :  { %143 = vmatpush1.bf16.msra.mxu0 %v264_v10 }
  0x14   :  { %144 = vmatprep.subr.bf16.mxu0 %v265_v11 }
  0x17   :  { %145 = vmatpush1.bf16.msra.mxu0 %v267_v12 }
  0x18   :  { %146 = vmatprep.subr.bf16.mxu0 %v268_v13 }
  0x1b   :  { %147 = vmatpush1.bf16.msra.mxu0 %v270_v14 }
  0x1c   :  { %148 = vmatprep.subr.bf16.mxu0 %v271_v15 }
  0x1f   :  { %149 = vmatpush1.bf16.msra.mxu0 %v273_v16 }
  0x22   :  { %167 = vmatmul.mubr.bf16.vlgmr.msra.gmra.mxu0 %v274_v17 }
  0xe2   :  { %v168_v27 = vpop.f32.mrf.mxu0 }
  0xe3   :  { %v204_v28 = vmul.f32 %v197_v24, %v168_v27 }
  0xe4   :  { %v170_v30 = vpop.f32.mrf.mxu0 }
  0xe5   :  { %v220_v31 = vadd.f32 %v213_v25, %v204_v28  ;;  %v205_v32 = vmul.f32 %v201_v26, %v170_v30 }
  0xe6   :  { %v172_v33 = vpop.f32.mrf.mxu0 }
  0xe7   :  { %224 = vst [vmem:[%s374_s4] sm:$0xff] %v220_v31  ;;  %v221_v34 = vadd.f32 %v217_v29, %v205_v32  ;;  %v206_v35 = vmul.f32 %v197_v24, %v172_v33 }
  0xe8   :  { %v174_v36 = vpop.f32.mrf.mxu0 }
  0xe9   :  { %225 = vst [vmem:[%s374_s4 + $0x8] sm:$0xff] %v221_v34  ;;  %v222_v37 = vadd.f32 %v213_v25, %v206_v35  ;;  %v207_v38 = vmul.f32 %v201_v26, %v174_v36 }
  0xeb   :  { %226 = vst [vmem:[%s374_s4 + $0x10] sm:$0xff] %v222_v37  ;;  %v223_v39 = vadd.f32 %v217_v29, %v207_v38 }
  0xed   :  { %227 = vst [vmem:[%s374_s4 + $0x18] sm:$0xff] %v223_v39 }

// kernel: pyresnet_forward.28
= control target key start
LH: loop header
LB: loop body
LE: loop exit
PB: predicated region body
PF: predicated region fallthrough
CT: control target
= control target key end

     0   :  { %s1775_s18 = smov 0   ;;  %s1777_s19 = smov 0   ;;  %s1978_s0 = inlined_call_operand.vmem [shape: bf16[16,2304], index: 0, kind: input, shape index: {}]   ;;  %s1979_s1 = inlined_call_operand.vmem [shape: bf16[2304,256], index: 1, kind: input, shape index: {}]   ;;  %s1980_s2 = inlined_call_operand.vmem [shape: f32[1,256], index: 2, kind: input, shape index: {}]   ;;  %s1981_s3 = inlined_call_operand.vmem [shape: f32[1,256], index: 3, kind: input, shape index: {}]   ;;  %s1982_s4 = inlined_call_operand.vmem [shape: f32[16,256], index: 4, kind: input, shape index: {}]   ;;  %s1983_s5 = inlined_call_operand.vmem [shape: f32[16,256], index: 5, kind: output, shape index: {}]  }
   0x1   :  { %s1779_s20 = smov 0   ;;  %s1781_s21 = smov 0  }
   0x2   :  { %s1783_s22 = smov 0  }
   0x3 LB: > { %s27_s23 = sadd.s32 1, %s1738_s21  ;;  %p50_p1 = scmp.ne.s32.totalorder %s1730_s19, %s1726_s18  ;;  %s1742_s22 = sphi %s1783_s22, %s15_s22   ;;  %s1738_s21 = sphi %s1781_s21, %s1987_s21   ;;  %s1734_s20 = sphi %s1779_s20, %s1986_s20   ;;  %s1730_s19 = sphi %s1777_s19, %s1985_s19   ;;  %s1726_s18 = sphi %s1775_s18, %s1984_s18  }
   0x4   : > { %p28_p0 = scmp.ge.s32.totalorder %s27_s23, 3  ;;  %p51_p2 = scmp.eq.s32.totalorder %s1742_s22, 0 }
   0x5   : > { %s43_s25 = sadd.s32 1, %s1730_s19  ;;  %p1393_p5 = scmp.ge.s32.totalorder %s1742_s22, 3 }
   0x6   : > { %s1989_s23 = smov (%p28_p0, %s27_s23), 0  ;;  %p52_p3 = por %p51_p2, %p50_p1 }
   0x7   : > { %s39_s24 = ssub.s32 %s1738_s21, %s1989_s23  ;;  %243 = sbr.rel (%p1393_p5) target bundleno = 20 (0x14), region = 28 }
   0x8   : > { %p41_p4 = scmp.eq.s32.totalorder %s39_s24, 0 }
   0xa   : > { %s1810_s26 = scalar_select %p41_p4, %s1730_s19, %s43_s25  }
   0xc   : > { %246 = sbr.rel (!%p52_p3) target bundleno = 20 (0x14), region = 32  ;;  %s248_s27 = sand.u32 (%p52_p3), 1, %s1730_s19  }
   0xd   : > { %s1506_s28 = smul.u32 (%p52_p3), 24, %s1738_s21 }
   0xe   : > { %s1508_s29 = smul.u32 (%p52_p3), 48, %s248_s27 }
   0xf   : > { %s256_s7 = scalar_lea.vmem (%p52_p3), %s1978_s0, %s1506_s28 }
  0x10   : > { %v269_v0 = vld [vmem:[%s256_s7] sm:$0xff] (%p52_p3)  ;;  %v271_v1 = vld [vmem:[%s256_s7 + $0x8] sm:$0xff] (%p52_p3)  ;;  %v273_v2 = vld [vmem:[%s256_s7 + $0x10] sm:$0xff] (%p52_p3)  ;;  %s250_s8 = scalar_lea.vmem (%p52_p3), [#allocation3], %s1508_s29 }
  0x11   : > { %270 = vst [vmem:[%s250_s8] sm:$0xff] %v269_v0  ;;  %272 = vst [vmem:[%s250_s8 + $0x8] sm:$0xff] %v271_v1  ;;  %v275_v3 = vld [vmem:[%s256_s7 + $0x48] sm:$0xff]  ;;  %v277_v4 = vld [vmem:[%s256_s7 + $0x50] sm:$0xff] }
  0x12   : > { %274 = vst [vmem:[%s250_s8 + $0x10] sm:$0xff] %v273_v2  ;;  %v279_v5 = vld [vmem:[%s256_s7 + $0x58] sm:$0xff]  ;;  %276 = vst [vmem:[%s250_s8 + $0x18] sm:$0xff] %v275_v3 }
  0x13   : > { %278 = vst [vmem:[%s250_s8 + $0x20] sm:$0xff] %v277_v4  ;;  %280 = vst [vmem:[%s250_s8 + $0x28] sm:$0xff] %v279_v5 }
  0x14 PF: > { %p1395_p6 = scmp.ge.s32.totalorder %s1742_s22, 1  ;;  %p300_p7 = scmp.lt.s32.totalorder %s1742_s22, 4 }
  0x16   : > { %p301_p8 = pnand %p1395_p6, %p300_p7 }
  0x17   : > { %s307_s9 = sand.u32 (!%p301_p8), 1, %s1726_s18   ;;  %s369_s10 = smul.u32 (!%p301_p8), 96, %s1734_s20 }
  0x18   : > { %304 = sbr.rel (%p301_p8) target bundleno = 388 (0x184), region = 59  ;;  %p1398_p10 = scmp.ne.s32.totalorder (!%p301_p8), %s1734_s20, 0 }
  0x19   : > { %s1509_s11 = smul.u32 (!%p301_p8), 48, %s307_s9  ;;  %p371_p9 = scmp.lt.s32.totalorder (!%p301_p8), %s369_s10, 287 }
  0x1b   : > { %s1827_s16 = scalar_lea.vmem (!%p301_p8), [#allocation3], %s1509_s11 }
  0x1d   : > { %s1991_s10 = smov (!%p371_p9, %s369_s10), 287  ;;  %418 = sbr.rel (%p1398_p10) target bundleno = 37 (0x25), region = 67 }
  0x1e   : > { %s1507_s12 = sshll.u32 %s1991_s10, 3 }
  0x1f   : > { %s1825_s15 = scalar_lea.vmem %s1979_s1, %s1507_s12 }
  0x22   : > { %v1744_v6 = vmov 0.0  }
  0x23   : > { %419 = vst [vmem:[#allocation2 + $0x10] sm:$0xff] %v1744_v6  ;;  %420 = vst [vmem:[#allocation2] sm:$0xff] %v1744_v6 }
  0x24   : > { %421 = vst [vmem:[#allocation2 + $0x18] sm:$0xff] %v1744_v6  ;;  %422 = vst [vmem:[#allocation2 + $0x8] sm:$0xff] %v1744_v6 }
  0x25 PF: > { %v1551_v7 = vld [vmem:[%s1825_s15 + $0x74] ss:$8 sps:$4 sm:$0xff]   ;;  %v1555_v9 = vld [vmem:[%s1825_s15 + $0x70] ss:$8 sps:$4 sm:$0xff]   ;;  %v1557_v11 = vld [vmem:[%s1825_s15 + $0x64] ss:$8 sps:$4 sm:$0xff]  }
  0x26   : > { %v1553_v8 = vld [vmem:[%s1825_s15 + $0x174] ss:$8 sps:$4 sm:$0xff]   ;;  %1039 = vmatprep.subr.bf16.mxu0 %v1551_v7  ;;  %v1556_v10 = vld [vmem:[%s1825_s15 + $0x170] ss:$8 sps:$4 sm:$0xff]   ;;  %v1559_v12 = vld [vmem:[%s1825_s15 + $0x164] ss:$8 sps:$4 sm:$0xff]  }
  0x27   : > { %1082 = vmatprep.subr.bf16.mxu1 %v1553_v8  ;;  %1040 = vmatpush1.bf16.msra.mxu0 %v1555_v9  ;;  %v1561_v13 = vld [vmem:[%s1825_s15 + $0x60] ss:$8 sps:$4 sm:$0xff]   ;;  %v1563_v15 = vld [vmem:[%s1825_s15 + $0x54] ss:$8 sps:$4 sm:$0xff]   ;;  %v1567_v17 = vld [vmem:[%s1825_s15 + $0x50] ss:$8 sps:$4 sm:$0xff]  }
  0x28   : > { %1083 = vmatpush1.bf16.msra.mxu1 %v1556_v10  ;;  %1041 = vmatprep.subr.bf16.mxu0 %v1557_v11  ;;  %v1562_v14 = vld [vmem:[%s1825_s15 + $0x160] ss:$8 sps:$4 sm:$0xff]   ;;  %v1565_v16 = vld [vmem:[%s1825_s15 + $0x154] ss:$8 sps:$4 sm:$0xff]   ;;  %v1568_v18 = vld [vmem:[%s1825_s15 + $0x150] ss:$8 sps:$4 sm:$0xff]  }
  0x29   : > { %1084 = vmatprep.subr.bf16.mxu1 %v1559_v12  ;;  %v1569_v19 = vld [vmem:[%s1825_s15 + $0x44] ss:$8 sps:$4 sm:$0xff]   ;;  %v1573_v21 = vld [vmem:[%s1825_s15 + $0x40] ss:$8 sps:$4 sm:$0xff]   ;;  %v1575_v23 = vld [vmem:[%s1825_s15 + $0x34] ss:$8 sps:$4 sm:$0xff]  }
  0x2a   : > { %v1571_v20 = vld [vmem:[%s1825_s15 + $0x144] ss:$8 sps:$4 sm:$0xff]   ;;  %v1574_v22 = vld [vmem:[%s1825_s15 + $0x140] ss:$8 sps:$4 sm:$0xff]   ;;  %v1577_v24 = vld [vmem:[%s1825_s15 + $0x134] ss:$8 sps:$4 sm:$0xff]  }
  0x2b   : > { %1042 = vmatpush1.bf16.msra.mxu0 %v1561_v13  ;;  %v1579_v25 = vld [vmem:[%s1825_s15 + $0x30] ss:$8 sps:$4 sm:$0xff]   ;;  %v1581_v27 = vld [vmem:[%s1825_s15 + $0x24] ss:$8 sps:$4 sm:$0xff]   ;;  %v1585_v29 = vld [vmem:[%s1825_s15 + $0x20] ss:$8 sps:$4 sm:$0xff]  }
  0x2c   : > { %1085 = vmatpush1.bf16.msra.mxu1 %v1562_v14  ;;  %1043 = vmatprep.subr.bf16.mxu0 %v1563_v15  ;;  %v1580_v26 = vld [vmem:[%s1825_s15 + $0x130] ss:$8 sps:$4 sm:$0xff]   ;;  %v1583_v28 = vld [vmem:[%s1825_s15 + $0x124] ss:$8 sps:$4 sm:$0xff]   ;;  %v1586_v30 = vld [vmem:[%s1825_s15 + $0x120] ss:$8 sps:$4 sm:$0xff]  }
  0x2d   : > { %1086 = vmatprep.subr.bf16.mxu1 %v1565_v16  ;;  %v1587_v31 = vld [vmem:[%s1825_s15 + $0x14] ss:$8 sps:$4 sm:$0xff]   ;;  %v1591_v33 = vld [vmem:[%s1825_s15 + $0x10] ss:$8 sps:$4 sm:$0xff]   ;;  %v1593_v35 = vld [vmem:[%s1825_s15 + $0x4] ss:$8 sps:$4 sm:$0xff]  }
  0x2e   : > { %v1589_v32 = vld [vmem:[%s1825_s15 + $0x114] ss:$8 sps:$4 sm:$0xff]   ;;  %v1592_v34 = vld [vmem:[%s1825_s15 + $0x110] ss:$8 sps:$4 sm:$0xff]   ;;  %v1595_v36 = vld [vmem:[%s1825_s15 + $0x104] ss:$8 sps:$4 sm:$0xff]  }
  0x2f   : > { %1044 = vmatpush1.bf16.msra.mxu0 %v1567_v17  ;;  %v1597_v37 = vld [vmem:[%s1825_s15] ss:$8 sps:$4 sm:$0xff]   ;;  %v1599_v39 = vld [vmem:[%s1825_s15 + $0xf4] ss:$8 sps:$4 sm:$0xff]   ;;  %v1603_v41 = vld [vmem:[%s1825_s15 + $0xf0] ss:$8 sps:$4 sm:$0xff]  }
  0x30   : > { %1087 = vmatpush1.bf16.msra.mxu1 %v1568_v18  ;;  %1045 = vmatprep.subr.bf16.mxu0 %v1569_v19  ;;  %v1598_v38 = vld [vmem:[%s1825_s15 + $0x100] ss:$8 sps:$4 sm:$0xff]   ;;  %v1601_v40 = vld [vmem:[%s1825_s15 + $0x1f4] ss:$8 sps:$4 sm:$0xff]   ;;  %v1604_v42 = vld [vmem:[%s1825_s15 + $0x1f0] ss:$8 sps:$4 sm:$0xff]  }
  0x31   : > { %1088 = vmatprep.subr.bf16.mxu1 %v1571_v20  ;;  %v1605_v43 = vld [vmem:[%s1825_s15 + $0xe4] ss:$8 sps:$4 sm:$0xff]   ;;  %v1609_v45 = vld [vmem:[%s1825_s15 + $0xe0] ss:$8 sps:$4 sm:$0xff]   ;;  %v1611_v47 = vld [vmem:[%s1825_s15 + $0xd4] ss:$8 sps:$4 sm:$0xff]  }
  0x32   : > { %v1607_v44 = vld [vmem:[%s1825_s15 + $0x1e4] ss:$8 sps:$4 sm:$0xff]   ;;  %v1610_v46 = vld [vmem:[%s1825_s15 + $0x1e0] ss:$8 sps:$4 sm:$0xff]   ;;  %v1613_v48 = vld [vmem:[%s1825_s15 + $0x1d4] ss:$8 sps:$4 sm:$0xff]  }
  0x33   : > { %1046 = vmatpush1.bf16.msra.mxu0 %v1573_v21  ;;  %v1615_v49 = vld [vmem:[%s1825_s15 + $0xd0] ss:$8 sps:$4 sm:$0xff]   ;;  %v1617_v51 = vld [vmem:[%s1825_s15 + $0xc4] ss:$8 sps:$4 sm:$0xff]   ;;  %v1621_v53 = vld [vmem:[%s1825_s15 + $0xc0] ss:$8 sps:$4 sm:$0xff]  }
  0x34   : > { %1089 = vmatpush1.bf16.msra.mxu1 %v1574_v22  ;;  %1047 = vmatprep.subr.bf16.mxu0 %v1575_v23  ;;  %v1616_v50 = vld [vmem:[%s1825_s15 + $0x1d0] ss:$8 sps:$4 sm:$0xff]   ;;  %v1619_v52 = vld [vmem:[%s1825_s15 + $0x1c4] ss:$8 sps:$4 sm:$0xff]   ;;  %v1622_v54 = vld [vmem:[%s1825_s15 + $0x1c0] ss:$8 sps:$4 sm:$0xff]  }
  0x35   : > { %1090 = vmatprep.subr.bf16.mxu1 %v1577_v24  ;;  %v1623_v55 = vld [vmem:[%s1825_s15 + $0xb4] ss:$8 sps:$4 sm:$0xff]   ;;  %v1627_v59 = vld [vmem:[%s1825_s15 + $0xb0] ss:$8 sps:$4 sm:$0xff]   ;;  %v1629_v61 = vld [vmem:[%s1825_s15 + $0xa4] ss:$8 sps:$4 sm:$0xff]  }
  0x36   : > { %v1649_v56 = vld [vmem:[%s1827_s16 + $0x4] ss:$24 sps:$4 sm:$0xff]   ;;  %v1628_v60 = vld [vmem:[%s1825_s15 + $0x1b0] ss:$8 sps:$4 sm:$0xff]   ;;  %v1633_v63 = vld [vmem:[%s1825_s15 + $0xa0] ss:$8 sps:$4 sm:$0xff]  }
  0x37   : > { %1048 = vmatpush1.bf16.msra.mxu0 %v1579_v25  ;;  %v1625_v57 = vld [vmem:[%s1825_s15 + $0x1b4] ss:$8 sps:$4 sm:$0xff]   ;;  %1071 = vmatprep.mubr.bf16.mxu0 %v1649_v56  ;;  %v1631_v62 = vld [vmem:[%s1825_s15 + $0x1a4] ss:$8 sps:$4 sm:$0xff]   ;;  %v1634_v0 = vld [vmem:[%s1825_s15 + $0x1a0] ss:$8 sps:$4 sm:$0xff]  }
  0x38   : > { %1091 = vmatpush1.bf16.msra.mxu1 %v1580_v26  ;;  %1049 = vmatprep.subr.bf16.mxu0 %v1581_v27  ;;  %v1652_v58 = vld [vmem:[%s1827_s16 + $0xc] ss:$24 sps:$4 sm:$0xff]   ;;  %v1639_v3 = vld [vmem:[%s1825_s15 + $0x90] ss:$8 sps:$4 sm:$0xff]   ;;  %v1645_v7 = vld [vmem:[%s1825_s15 + $0x80] ss:$8 sps:$4 sm:$0xff]  }
  0x39   : > { %1092 = vmatprep.subr.bf16.mxu1 %v1583_v28  ;;  %1114 = vmatprep.mubr.bf16.mxu1 %v1652_v58  ;;  %v1635_v1 = vld [vmem:[%s1825_s15 + $0x94] ss:$8 sps:$4 sm:$0xff]   ;;  %v1640_v4 = vld [vmem:[%s1825_s15 + $0x190] ss:$8 sps:$4 sm:$0xff]   ;;  %v1641_v5 = vld [vmem:[%s1825_s15 + $0x84] ss:$8 sps:$4 sm:$0xff]  }
  0x3a   : > { %v1637_v2 = vld [vmem:[%s1825_s15 + $0x194] ss:$8 sps:$4 sm:$0xff]   ;;  %v1643_v6 = vld [vmem:[%s1825_s15 + $0x184] ss:$8 sps:$4 sm:$0xff]   ;;  %v1646_v8 = vld [vmem:[%s1825_s15 + $0x180] ss:$8 sps:$4 sm:$0xff]  }
  0x3b   : > { %1050 = vmatpush1.bf16.msra.mxu0 %v1585_v29  ;;  %v1655_v9 = vld [vmem:[%s1825_s15 + $0x274] ss:$8 sps:$4 sm:$0xff]   ;;  %v1647_v10 = vld [vmem:[%s1827_s16] ss:$24 sps:$4 sm:$0xff]   ;;  %v1658_v13 = vld [vmem:[%s1825_s15 + $0x264] ss:$8 sps:$4 sm:$0xff]  }
  0x3c   : > { %1093 = vmatpush1.bf16.msra.mxu1 %v1586_v30  ;;  %1051 = vmatprep.subr.bf16.mxu0 %v1587_v31  ;;  %v1650_v11 = vld [vmem:[%s1827_s16 + $0x8] ss:$24 sps:$4 sm:$0xff]   ;;  %v1703_v14 = vld [vmem:[%s1827_s16 + $0x14] ss:$24 sps:$4 sm:$0xff]   ;;  %p1501_p11 = scmp.ne.s32.totalorder %s1734_s20, 2 }
  0x3d   : > { %1094 = vmatprep.subr.bf16.mxu1 %v1589_v32  ;;  %v1653_v12 = vld [vmem:[%s1825_s15 + $0x270] ss:$8 sps:$4 sm:$0xff]   ;;  %v1656_v15 = vld [vmem:[%s1825_s15 + $0x260] ss:$8 sps:$4 sm:$0xff]   ;;  %v1661_v16 = vld [vmem:[%s1825_s15 + $0x254] ss:$8 sps:$4 sm:$0xff]  }
  0x3e   : > { %v1659_v17 = vld [vmem:[%s1825_s15 + $0x250] ss:$8 sps:$4 sm:$0xff]   ;;  %v1664_v18 = vld [vmem:[%s1825_s15 + $0x244] ss:$8 sps:$4 sm:$0xff]   ;;  %v1662_v19 = vld [vmem:[%s1825_s15 + $0x240] ss:$8 sps:$4 sm:$0xff]  }
  0x3f   : > { %1052 = vmatpush1.bf16.msra.mxu0 %v1591_v33  ;;  %v1667_v20 = vld [vmem:[%s1825_s15 + $0x234] ss:$8 sps:$4 sm:$0xff]   ;;  %v1665_v21 = vld [vmem:[%s1825_s15 + $0x230] ss:$8 sps:$4 sm:$0xff]   ;;  %v1670_v22 = vld [vmem:[%s1825_s15 + $0x224] ss:$8 sps:$4 sm:$0xff]  }
  0x40   : > { %1095 = vmatpush1.bf16.msra.mxu1 %v1592_v34  ;;  %1053 = vmatprep.subr.bf16.mxu0 %v1593_v35  ;;  %v1668_v23 = vld [vmem:[%s1825_s15 + $0x220] ss:$8 sps:$4 sm:$0xff]   ;;  %v1673_v24 = vld [vmem:[%s1825_s15 + $0x214] ss:$8 sps:$4 sm:$0xff]   ;;  %v1671_v25 = vld [vmem:[%s1825_s15 + $0x210] ss:$8 sps:$4 sm:$0xff]  }
  0x41   : > { %1096 = vmatprep.subr.bf16.mxu1 %v1595_v36  ;;  %v1676_v26 = vld [vmem:[%s1825_s15 + $0x204] ss:$8 sps:$4 sm:$0xff]   ;;  %v1674_v27 = vld [vmem:[%s1825_s15 + $0x200] ss:$8 sps:$4 sm:$0xff]   ;;  %v1679_v28 = vld [vmem:[%s1825_s15 + $0x2f4] ss:$8 sps:$4 sm:$0xff]  }
  0x42   : > { %v1677_v29 = vld [vmem:[%s1825_s15 + $0x2f0] ss:$8 sps:$4 sm:$0xff]   ;;  %v1682_v30 = vld [vmem:[%s1825_s15 + $0x2e4] ss:$8 sps:$4 sm:$0xff]   ;;  %v1680_v31 = vld [vmem:[%s1825_s15 + $0x2e0] ss:$8 sps:$4 sm:$0xff]  }
  0x43   : > { %1054 = vmatpush1.bf16.msra.mxu0 %v1597_v37  ;;  %v1685_v32 = vld [vmem:[%s1825_s15 + $0x2d4] ss:$8 sps:$4 sm:$0xff]   ;;  %v1683_v33 = vld [vmem:[%s1825_s15 + $0x2d0] ss:$8 sps:$4 sm:$0xff]   ;;  %v1688_v34 = vld [vmem:[%s1825_s15 + $0x2c4] ss:$8 sps:$4 sm:$0xff]  }
  0x44   : > { %1097 = vmatpush1.bf16.msra.mxu1 %v1598_v38  ;;  %1055 = vmatprep.subr.bf16.mxu0 %v1599_v39  ;;  %v1686_v35 = vld [vmem:[%s1825_s15 + $0x2c0] ss:$8 sps:$4 sm:$0xff]   ;;  %v1691_v36 = vld [vmem:[%s1825_s15 + $0x2b4] ss:$8 sps:$4 sm:$0xff]   ;;  %v1689_v37 = vld [vmem:[%s1825_s15 + $0x2b0] ss:$8 sps:$4 sm:$0xff]  }
  0x45   : > { %1098 = vmatprep.subr.bf16.mxu1 %v1601_v40  ;;  %v1694_v38 = vld [vmem:[%s1825_s15 + $0x2a4] ss:$8 sps:$4 sm:$0xff]   ;;  %v1692_v39 = vld [vmem:[%s1825_s15 + $0x2a0] ss:$8 sps:$4 sm:$0xff]   ;;  %v1697_v40 = vld [vmem:[%s1825_s15 + $0x294] ss:$8 sps:$4 sm:$0xff]  }
  0x46   : > { %v424_v58 = vld [vmem:[#allocation2] sm:$0xff] }
  0x47   : > { %1056 = vmatpush2.bf16.msra.mxu0 %v1603_v41  ;;  %v1695_v41 = vld [vmem:[%s1825_s15 + $0x290] ss:$8 sps:$4 sm:$0xff]  }
  0x48   : > { %1099 = vmatpush2.bf16.msra.mxu1 %v1604_v42  ;;  %1057 = vmatprep.subr.bf16.mxu0 %v1605_v43  ;;  %v1700_v42 = vld [vmem:[%s1825_s15 + $0x284] ss:$8 sps:$4 sm:$0xff]   ;;  %v1698_v43 = vld [vmem:[%s1825_s15 + $0x280] ss:$8 sps:$4 sm:$0xff]  }
  0x49   : > { %1100 = vmatprep.subr.bf16.mxu1 %v1607_v44  ;;  %v1701_v44 = vld [vmem:[%s1827_s16 + $0x10] ss:$24 sps:$4 sm:$0xff]  }
  0x4b   : > { %1058 = vmatpush2.bf16.msra.mxu0 %v1609_v45 }
  0x4c   : > { %1101 = vmatpush2.bf16.msra.mxu1 %v1610_v46  ;;  %1059 = vmatprep.subr.bf16.mxu0 %v1611_v47 }
  0x4d   : > { %1102 = vmatprep.subr.bf16.mxu1 %v1613_v48 }
  0x4f   : > { %1060 = vmatpush2.bf16.msra.mxu0 %v1615_v49 }
  0x50   : > { %1103 = vmatpush2.bf16.msra.mxu1 %v1616_v50  ;;  %1061 = vmatprep.subr.bf16.mxu0 %v1617_v51 }
  0x51   : > { %1104 = vmatprep.subr.bf16.mxu1 %v1619_v52 }
  0x53   : > { %1062 = vmatpush2.bf16.msra.mxu0 %v1621_v53  ;;  %v423_v53 = vld [vmem:[#allocation2 + $0x10] sm:$0xff] }
  0x54   : > { %1105 = vmatpush2.bf16.msra.mxu1 %v1622_v54  ;;  %1063 = vmatprep.subr.bf16.mxu0 %v1623_v55 }
  0x55   : > { %1106 = vmatprep.subr.bf16.mxu1 %v1625_v57 }
  0x57   : > { %1064 = vmatpush2.bf16.msra.mxu0 %v1627_v59 }
  0x58   : > { %1107 = vmatpush2.bf16.msra.mxu1 %v1628_v60  ;;  %1065 = vmatprep.subr.bf16.mxu0 %v1629_v61 }
  0x59   : > { %1108 = vmatprep.subr.bf16.mxu1 %v1631_v62 }
  0x5b   : > { %1066 = vmatpush2.bf16.msra.mxu0 %v1633_v63  ;;  %v425_v63 = vld [vmem:[#allocation2 + $0x18] sm:$0xff] }
  0x5c   : > { %1109 = vmatpush2.bf16.msra.mxu1 %v1634_v0  ;;  %1067 = vmatprep.subr.bf16.mxu0 %v1635_v1 }
  0x5d   : > { %1110 = vmatprep.subr.bf16.mxu1 %v1637_v2 }
  0x5f   : > { %1068 = vmatpush2.bf16.msra.mxu0 %v1639_v3 }
  0x60   : > { %1111 = vmatpush2.bf16.msra.mxu1 %v1640_v4  ;;  %1069 = vmatprep.subr.bf16.mxu0 %v1641_v5  ;;  %v426_v4 = vld [vmem:[#allocation2 + $0x8] sm:$0xff] }
  0x61   : > { %1112 = vmatprep.subr.bf16.mxu1 %v1643_v6 }
  0x63   : > { %1070 = vmatpush2.bf16.msra.mxu0 %v1645_v7 }
  0x64   : > { %1113 = vmatpush2.bf16.msra.mxu1 %v1646_v8  ;;  %1125 = vmatprep.subr.bf16.mxu0 %v1655_v9 }
  0x66   : > { %1072 = vmatmul.mubr.bf16.vlgmr.msra.gmra.mxu0 %v1647_v10 }
  0x67   : > { %1115 = vmatmul.mubr.bf16.vlgmr.msra.gmra.mxu1 %v1650_v11  ;;  %1126 = vmatpush1.bf16.msra.mxu0 %v1653_v12 }
  0x68   : > { %1127 = vmatprep.subr.bf16.mxu0 %v1658_v13  ;;  %1157 = vmatprep.mubr.bf16.mxu0 %v1703_v14 }
  0x6b   : > { %1128 = vmatpush1.bf16.msra.mxu0 %v1656_v15 }
  0x6c   : > { %1129 = vmatprep.subr.bf16.mxu0 %v1661_v16 }
  0x6f   : > { %1130 = vmatpush1.bf16.msra.mxu0 %v1659_v17 }
  0x70   : > { %1131 = vmatprep.subr.bf16.mxu0 %v1664_v18 }
  0x73   : > { %1132 = vmatpush1.bf16.msra.mxu0 %v1662_v19 }
  0x74   : > { %1133 = vmatprep.subr.bf16.mxu0 %v1667_v20 }
  0x77   : > { %1134 = vmatpush1.bf16.msra.mxu0 %v1665_v21 }
  0x78   : > { %1135 = vmatprep.subr.bf16.mxu0 %v1670_v22 }
  0x7b   : > { %1136 = vmatpush1.bf16.msra.mxu0 %v1668_v23 }
  0x7c   : > { %1137 = vmatprep.subr.bf16.mxu0 %v1673_v24 }
  0x7f   : > { %1138 = vmatpush1.bf16.msra.mxu0 %v1671_v25 }
  0x80   : > { %1139 = vmatprep.subr.bf16.mxu0 %v1676_v26 }
  0x83   : > { %1140 = vmatpush1.bf16.msra.mxu0 %v1674_v27 }
  0x84   : > { %1141 = vmatprep.subr.bf16.mxu0 %v1679_v28 }
  0x87   : > { %1142 = vmatpush2.bf16.msra.mxu0 %v1677_v29 }
  0x88   : > { %1143 = vmatprep.subr.bf16.mxu0 %v1682_v30 }
  0x8b   : > { %1144 = vmatpush2.bf16.msra.mxu0 %v1680_v31 }
  0x8c   : > { %1145 = vmatprep.subr.bf16.mxu0 %v1685_v32 }
  0x8f   : > { %1146 = vmatpush2.bf16.msra.mxu0 %v1683_v33 }
  0x90   : > { %1147 = vmatprep.subr.bf16.mxu0 %v1688_v34 }
  0x93   : > { %1148 = vmatpush2.bf16.msra.mxu0 %v1686_v35 }
  0x94   : > { %1149 = vmatprep.subr.bf16.mxu0 %v1691_v36 }
  0x97   : > { %1150 = vmatpush2.bf16.msra.mxu0 %v1689_v37 }
  0x98   : > { %1151 = vmatprep.subr.bf16.mxu0 %v1694_v38 }
  0x9b   : > { %1152 = vmatpush2.bf16.msra.mxu0 %v1692_v39 }
  0x9c   : > { %1153 = vmatprep.subr.bf16.mxu0 %v1697_v40 }
  0x9f   : > { %1154 = vmatpush2.bf16.msra.mxu0 %v1695_v41 }
  0xa0   : > { %1155 = vmatprep.subr.bf16.mxu0 %v1700_v42 }
  0xa3   : > { %1156 = vmatpush2.bf16.msra.mxu0 %v1698_v43 }
  0xa6   : > { %1158 = vmatmul.mubr.bf16.vlgmr.msra.gmra.mxu0 %v1701_v44 }
 0x126   : > { %v1073_v45 = vpop.f32.mrf.mxu0 }
 0x127   : > { %v1116_v46 = vpop.f32.mrf.mxu1 }
 0x128   : > { %v1075_v47 = vpop.f32.mrf.mxu0  ;;  %v1117_v52 = vadd.f32 %v1116_v46, %v1073_v45 }
 0x129   : > { %v1118_v48 = vpop.f32.mrf.mxu1 }
 0x12a   : > { %v1077_v49 = vpop.f32.mrf.mxu0  ;;  %v1119_v55 = vadd.f32 %v1118_v48, %v1075_v47 }
 0x12b   : > { %v1120_v50 = vpop.f32.mrf.mxu1 }
 0x12c   : > { %v1079_v51 = vpop.f32.mrf.mxu0  ;;  %v1121_v60 = vadd.f32 %v1120_v50, %v1077_v49 }
 0x12d   : > { %v1122_v57 = vpop.f32.mrf.mxu1 }
 0x12e   : > { %v1123_v1 = vadd.f32 %v1122_v57, %v1079_v51 }
 0x166   : > { %v1159_v54 = vpop.f32.mrf.mxu0 }
 0x167   : > { %v1160_v56 = vadd.f32 %v1159_v54, %v1117_v52 }
 0x168   : > { %v1161_v59 = vpop.f32.mrf.mxu0 }
 0x169   : > { %v1168_v61 = vadd.f32 %v1160_v56, %v423_v53  ;;  %v1162_v62 = vadd.f32 %v1161_v59, %v1119_v55 }
 0x16a   : > { %v1163_v0 = vpop.f32.mrf.mxu0 }
 0x16b   : > { %1172 = vst [vmem:[#allocation2 + $0x10] sm:$0xff] %v1168_v61  ;;  %v1169_v2 = vadd.f32 %v1162_v62, %v424_v58  ;;  %v1164_v3 = vadd.f32 %v1163_v0, %v1121_v60 }
 0x16c   : > { %v1165_v5 = vpop.f32.mrf.mxu0 }
 0x16d   : > { %1173 = vst [vmem:[#allocation2] sm:$0xff] %v1169_v2  ;;  %v1170_v6 = vadd.f32 %v1164_v3, %v425_v63  ;;  %v1166_v7 = vadd.f32 %v1165_v5, %v1123_v1  ;;  %1179 = sbr.rel (%p1501_p11) target bundleno = 388 (0x184), region = 71 }
 0x16f   : > { %1174 = vst [vmem:[#allocation2 + $0x18] sm:$0xff] %v1170_v6  ;;  %v1171_v8 = vadd.f32 %v1166_v7, %v426_v4 }
 0x171   : > { %1175 = vst [vmem:[#allocation2 + $0x8] sm:$0xff] %v1171_v8 }
 0x172   : > { %v1186_v9 = vlaneseq  ;;  %v1184_v11 = vld [vmem:[%s1980_s2] sm:$0x3]  ;;  %v1180_v13 = vld [vmem:[#allocation2 + $0x10] sm:$0xff]  ;;  %v1217_v28 = vld [vmem:[%s1982_s4 + $0x8] sm:$0xff] }
 0x173   : > { %v1200_v12 = vld [vmem:[%s1981_s3] sm:$0x3]  ;;  %v1218_v29 = vld [vmem:[%s1982_s4 + $0x10] sm:$0xff]  ;;  %v1219_v30 = vld [vmem:[%s1982_s4 + $0x18] sm:$0xff] }
 0x174   : > { %v1187_v10 = vshrl.u32 %v1186_v9, 7  ;;  %v1181_v16 = vld [vmem:[#allocation2] sm:$0xff] }
 0x175   : > { %v1216_v24 = vld [vmem:[%s1982_s4] sm:$0xff] }
 0x176   : > { %v1188_v14 = vsub.s32 0, %v1187_v10  ;;  %v1192_v15 = vsub.s32 1, %v1187_v10  ;;  %v1182_v17 = vld [vmem:[#allocation2 + $0x18] sm:$0xff] }
 0x178   : > { %v1183_v18 = vld [vmem:[#allocation2 + $0x8] sm:$0xff]  ;;  %v1189_v19 = vrot.slane %v1184_v11, %v1188_v14  ;;  %v1205_v20 = vrot.slane %v1200_v12, %v1188_v14  ;;  %v1193_v21 = vrot.slane %v1184_v11, %v1192_v15  ;;  %v1209_v22 = vrot.slane %v1200_v12, %v1192_v15 }
 0x17a   : > { %v1196_v23 = vmul.f32 %v1189_v19, %v1180_v13  ;;  %v1197_v25 = vmul.f32 %v1193_v21, %v1181_v16  ;;  %v1198_v26 = vmul.f32 %v1189_v19, %v1182_v17  ;;  %v1199_v27 = vmul.f32 %v1193_v21, %v1183_v18 }
 0x17c   : > { %v1212_v31 = vadd.f32 %v1205_v20, %v1196_v23  ;;  %v1213_v32 = vadd.f32 %v1209_v22, %v1197_v25  ;;  %v1214_v33 = vadd.f32 %v1205_v20, %v1198_v26  ;;  %v1215_v34 = vadd.f32 %v1209_v22, %v1199_v27 }
 0x17e   : > { %v1220_v35 = vadd.f32 %v1216_v24, %v1212_v31  ;;  %v1221_v36 = vadd.f32 %v1217_v28, %v1213_v32  ;;  %v1222_v37 = vadd.f32 %v1218_v29, %v1214_v33  ;;  %v1223_v38 = vadd.f32 %v1219_v30, %v1215_v34 }
 0x180   : > { %v1224_v39 = vmax.f32 %v1220_v35, 0.0  ;;  %v1225_v40 = vmax.f32 %v1221_v36, 0.0  ;;  %v1226_v41 = vmax.f32 %v1222_v37, 0.0  ;;  %v1227_v42 = vmax.f32 %v1223_v38, 0.0 }
 0x182   : > { %1228 = vst [vmem:[%s1983_s5] sm:$0xff] %v1224_v39  ;;  %1229 = vst [vmem:[%s1983_s5 + $0x8] sm:$0xff] %v1225_v40 }
 0x183   : > { %1230 = vst [vmem:[%s1983_s5 + $0x10] sm:$0xff] %v1226_v41  ;;  %1231 = vst [vmem:[%s1983_s5 + $0x18] sm:$0xff] %v1227_v42 }
 0x184 PF: > { %s15_s22 = sadd.s32 1, %s1742_s22   ;;  %s1984_s18 = smov %s1730_s19 }
 0x185   : > { %p12_p12 = scmp.ge.s32.totalorder %s15_s22, 5   ;;  %s1985_s19 = smov %s1810_s26 }
 0x186   : > { %s1986_s20 = smov %s1738_s21  ;;  %s1987_s21 = smov %s1989_s23 }
 0x187   :  { %14 = sbr.rel (!%p12_p12) target bundleno = 3 (0x3), region = 118 }

// kernel: pyresnet_forward.31
= control target key start
LH: loop header
LB: loop body
LE: loop exit
PB: predicated region body
PF: predicated region fallthrough
CT: control target
= control target key end

     0   :  { %s2671_s0 = inlined_call_operand.vmem [shape: bf16[16,2304], index: 0, kind: input, shape index: {}]   ;;  %s2672_s1 = inlined_call_operand.vmem [shape: bf16[2304,512], index: 1, kind: input, shape index: {}]   ;;  %s2673_s2 = inlined_call_operand.vmem [shape: f32[1,512], index: 2, kind: input, shape index: {}]   ;;  %s2674_s3 = inlined_call_operand.vmem [shape: f32[1,512], index: 3, kind: input, shape index: {}]   ;;  %s2675_s4 = inlined_call_operand.vmem [shape: f32[16,512], index: 4, kind: output, shape index: {}]  }
   0x1   :  { %2678 = sst [smem:[#allocation8_spill]] %s2671_s0 }
   0x2   :  { %2679 = sst [smem:[#allocation9_spill]] %s2672_s1 }
   0x3   :  { %s2178_s15 = smov 0   ;;  %s2180_s16 = smov 0  }
   0x4   :  { %s2182_s17 = smov 0   ;;  %s2184_s18 = smov 0  }
   0x5   :  { %s2186_s19 = smov 0   ;;  %s2188_s20 = smov 0  }
   0x6   :  { %s2190_s21 = smov 0   ;;  %s2192_s22 = smov 0  }
   0x7   :  { %s2194_s23 = smov 0   ;;  %s2196_s24 = smov 0  }
   0x8   :  { %s2198_s25 = smov 0  }
   0x9 LB: > { %s1694_s26 = sadd.s32 4294967295, %s2150_s25   ;;  %s26_s27 = sadd.s32 1, %s2142_s23  ;;  %s2150_s25 = sphi %s2198_s25, %s14_s25   ;;  %s2146_s24 = sphi %s2196_s24, %s2698_s24   ;;  %s2142_s23 = sphi %s2194_s23, %s2697_s23   ;;  %s2138_s22 = sphi %s2192_s22, %s2696_s22   ;;  %s2134_s21 = sphi %s2190_s21, %s2695_s21   ;;  %s2130_s20 = sphi %s2188_s20, %s2694_s20   ;;  %s2126_s19 = sphi %s2186_s19, %s2693_s19   ;;  %s2122_s18 = sphi %s2184_s18, %s2692_s18   ;;  %s2118_s17 = sphi %s2182_s17, %s2691_s17   ;;  %s2114_s16 = sphi %s2180_s16, %s2690_s16   ;;  %s2110_s15 = sphi %s2178_s15, %s2689_s15  }
   0xa   : > { %p27_p0 = scmp.ge.s32.totalorder %s26_s27, 3  ;;  %s29_s28 = sadd.s32 1, %s2146_s24 }
   0xb   : > { %s42_s29 = sadd.s32 1, %s2130_s20  ;;  %p49_p1 = scmp.ne.s32.totalorder %s2130_s20, %s2126_s19 }
   0xc   : > { %s2700_s27 = smov (%p27_p0, %s26_s27), 0  ;;  %s2702_s28 = smov (!%p27_p0, %s29_s28), %s2146_s24 }
   0xd   : > { %2680 = sst [smem:[#allocation6_spill]] %s2700_s27  ;;  %s38_s30 = ssub.s32 %s2142_s23, %s2700_s27 }
   0xe   : > { %p50_p2 = scmp.eq.s32.totalorder %s2150_s25, 0  ;;  %p31_p3 = scmp.ge.s32.totalorder %s2702_s28, 2 }
   0xf   : > { %p40_p4 = scmp.eq.s32.totalorder %s38_s30, 0  ;;  %s70_s6 = sadd.s32 1, %s2122_s18 }
  0x10   : > { %p2245_p5 = por %p50_p2, %p49_p1  ;;  %s2704_s28 = smov (%p31_p3, %s2702_s28), 0 }
  0x11   : > { %2682 = sst [smem:[#allocation7_spill]] %s2704_s28  ;;  %s66_s8 = ssub.s32 %s2146_s24, %s2704_s28 }
  0x12   : > { %s2253_s7 = scalar_select %p40_p4, %s2130_s20, %s42_s29  }
  0x13   : > { %p77_p6 = scmp.ne.s32.totalorder %s2122_s18, %s2118_s17  ;;  %s67_s9 = sor.u32 %s66_s8, %s38_s30 }
  0x14   : > { %p148_p7 = scmp.eq.s32.totalorder %s66_s8, 0  ;;  %p68_p8 = scmp.eq.s32.totalorder %s67_s9, 0 }
  0x15   : > { %p2259_p9 = por %p77_p6, %p50_p2  ;;  %s150_s11 = sadd.s32 1, %s2114_s16 }
  0x16   : > { %p160_p10 = scmp.ne.s32.totalorder %s2114_s16, %s2110_s15  ;;  %p161_p11 = scmp.eq.s32.totalorder %s1694_s26, 5 }
  0x17   : > { %s2267_s12 = scalar_select %p68_p8, %s2122_s18, %s70_s6  }
  0x18   : > { %s2270_s13 = scalar_select %p148_p7, %s2114_s16, %s150_s11  }
  0x19   : > { %p2272_p12 = por %p161_p11, %p160_p10  ;;  %p1697_p13 = scmp.ge.s32.totalorder %s2150_s25, 6 }
  0x1b   : > { %183 = sbr.rel (%p1697_p13) target bundleno = 102 (0x66), region = 16 }
  0x20   : > { %186 = sbr.rel (!%p2245_p5) target bundleno = 44 (0x2c), region = 20  ;;  %s188_s29 = sand.u32 (%p2245_p5), 1, %s2130_s20  }
  0x21   : > { %s1815_s30 = smul.u32 (%p2245_p5), 24, %s2142_s23  ;;  %s2685_s0 = sld [smem:[#allocation8_spill]] (%p2245_p5) }
  0x22   : > { %s1818_s8 = smul.u32 (%p2245_p5), 48, %s188_s29 }
  0x24   : > { %s190_s26 = scalar_lea.vmem (%p2245_p5), [#allocation3], %s1818_s8 }
  0x27   : > { %s196_s11 = scalar_lea.vmem %s2685_s0, %s1815_s30 }
  0x28   : > { %v209_v0 = vld [vmem:[%s196_s11] sm:$0xff]  ;;  %v211_v1 = vld [vmem:[%s196_s11 + $0x8] sm:$0xff]  ;;  %v213_v2 = vld [vmem:[%s196_s11 + $0x10] sm:$0xff] }
  0x29   : > { %210 = vst [vmem:[%s190_s26] sm:$0xff] %v209_v0  ;;  %212 = vst [vmem:[%s190_s26 + $0x8] sm:$0xff] %v211_v1  ;;  %v215_v3 = vld [vmem:[%s196_s11 + $0x48] sm:$0xff]  ;;  %v217_v4 = vld [vmem:[%s196_s11 + $0x50] sm:$0xff] }
  0x2a   : > { %214 = vst [vmem:[%s190_s26 + $0x10] sm:$0xff] %v213_v2  ;;  %v219_v5 = vld [vmem:[%s196_s11 + $0x58] sm:$0xff]  ;;  %216 = vst [vmem:[%s190_s26 + $0x18] sm:$0xff] %v215_v3 }
  0x2b   : > { %218 = vst [vmem:[%s190_s26 + $0x20] sm:$0xff] %v217_v4  ;;  %220 = vst [vmem:[%s190_s26 + $0x28] sm:$0xff] %v219_v5 }
  0x2c PF: > { %226 = sbr.rel (!%p2259_p9) target bundleno = 102 (0x66), region = 43  ;;  %s228_s5 = sand.u32 (%p2259_p9), 1, %s2122_s18  }
  0x2d   : > { %s1819_s29 = smul.u32 (%p2259_p9), 768, %s228_s5  ;;  %s1699_s30 = sshll.u32 (%p2259_p9), %s2146_s24, 1 }
  0x2e   : > { %s1816_s8 = smul.u32 (%p2259_p9), 384, %s2142_s23  ;;  %s2686_s1 = sld [smem:[#allocation9_spill]] (%p2259_p9) }
  0x2f   : > { %s2297_s10 = scalar_lea.vmem (%p2259_p9), [#allocation4], %s1819_s29 }
  0x30   : > { %s234_s6 = sadd.s32 (%p2259_p9), %s1816_s8, %s1699_s30 }
  0x31   : > { %s1701_s9 = sshll.u32 %s234_s6, 2 }
  0x34   : > { %s2292_s11 = scalar_lea.vmem %s2686_s1, %s1701_s9 }
  0x35   : > { %v455_v6 = vld [vmem:[%s2292_s11] sm:$0xff]  ;;  %v457_v7 = vld [vmem:[%s2292_s11 + $0x10] sm:$0xff] }
  0x36   : > { %v459_v8 = vld [vmem:[%s2292_s11 + $0x20] sm:$0xff]  ;;  %456 = vst [vmem:[%s2297_s10] sm:$0xff] %v455_v6  ;;  %458 = vst [vmem:[%s2297_s10 + $0x8] sm:$0xff] %v457_v7  ;;  %v461_v9 = vld [vmem:[%s2292_s11 + $0x30] sm:$0xff] }
  0x37   : > { %460 = vst [vmem:[%s2297_s10 + $0x10] sm:$0xff] %v459_v8  ;;  %v463_v10 = vld [vmem:[%s2292_s11 + $0x40] sm:$0xff]  ;;  %v465_v11 = vld [vmem:[%s2292_s11 + $0x50] sm:$0xff]  ;;  %462 = vst [vmem:[%s2297_s10 + $0x18] sm:$0xff] %v461_v9 }
  0x38   : > { %464 = vst [vmem:[%s2297_s10 + $0x20] sm:$0xff] %v463_v10  ;;  %466 = vst [vmem:[%s2297_s10 + $0x28] sm:$0xff] %v465_v11  ;;  %v467_v12 = vld [vmem:[%s2292_s11 + $0x60] sm:$0xff]  ;;  %v469_v13 = vld [vmem:[%s2292_s11 + $0x70] sm:$0xff] }
  0x39   : > { %v471_v14 = vld [vmem:[%s2292_s11 + $0x80] sm:$0xff]  ;;  %468 = vst [vmem:[%s2297_s10 + $0x30] sm:$0xff] %v467_v12  ;;  %470 = vst [vmem:[%s2297_s10 + $0x38] sm:$0xff] %v469_v13  ;;  %v473_v15 = vld [vmem:[%s2292_s11 + $0x90] sm:$0xff] }
  0x3a   : > { %472 = vst [vmem:[%s2297_s10 + $0x40] sm:$0xff] %v471_v14  ;;  %v475_v16 = vld [vmem:[%s2292_s11 + $0xa0] sm:$0xff]  ;;  %v477_v17 = vld [vmem:[%s2292_s11 + $0xb0] sm:$0xff]  ;;  %474 = vst [vmem:[%s2297_s10 + $0x48] sm:$0xff] %v473_v15 }
  0x3b   : > { %476 = vst [vmem:[%s2297_s10 + $0x50] sm:$0xff] %v475_v16  ;;  %478 = vst [vmem:[%s2297_s10 + $0x58] sm:$0xff] %v477_v17  ;;  %v479_v18 = vld [vmem:[%s2292_s11 + $0xc0] sm:$0xff]  ;;  %v481_v19 = vld [vmem:[%s2292_s11 + $0xd0] sm:$0xff] }
  0x3c   : > { %v483_v20 = vld [vmem:[%s2292_s11 + $0xe0] sm:$0xff]  ;;  %480 = vst [vmem:[%s2297_s10 + $0x60] sm:$0xff] %v479_v18  ;;  %482 = vst [vmem:[%s2297_s10 + $0x68] sm:$0xff] %v481_v19  ;;  %v485_v21 = vld [vmem:[%s2292_s11 + $0xf0] sm:$0xff] }
  0x3d   : > { %484 = vst [vmem:[%s2297_s10 + $0x70] sm:$0xff] %v483_v20  ;;  %v487_v22 = vld [vmem:[%s2292_s11 + $0x100] sm:$0xff]  ;;  %v489_v23 = vld [vmem:[%s2292_s11 + $0x110] sm:$0xff]  ;;  %486 = vst [vmem:[%s2297_s10 + $0x78] sm:$0xff] %v485_v21 }
  0x3e   : > { %488 = vst [vmem:[%s2297_s10 + $0x80] sm:$0xff] %v487_v22  ;;  %490 = vst [vmem:[%s2297_s10 + $0x88] sm:$0xff] %v489_v23  ;;  %v491_v24 = vld [vmem:[%s2292_s11 + $0x120] sm:$0xff]  ;;  %v493_v25 = vld [vmem:[%s2292_s11 + $0x130] sm:$0xff] }
  0x3f   : > { %v495_v26 = vld [vmem:[%s2292_s11 + $0x140] sm:$0xff]  ;;  %492 = vst [vmem:[%s2297_s10 + $0x90] sm:$0xff] %v491_v24  ;;  %494 = vst [vmem:[%s2297_s10 + $0x98] sm:$0xff] %v493_v25  ;;  %v497_v27 = vld [vmem:[%s2292_s11 + $0x150] sm:$0xff] }
  0x40   : > { %496 = vst [vmem:[%s2297_s10 + $0xa0] sm:$0xff] %v495_v26  ;;  %v499_v28 = vld [vmem:[%s2292_s11 + $0x160] sm:$0xff]  ;;  %v501_v29 = vld [vmem:[%s2292_s11 + $0x170] sm:$0xff]  ;;  %498 = vst [vmem:[%s2297_s10 + $0xa8] sm:$0xff] %v497_v27 }
  0x41   : > { %500 = vst [vmem:[%s2297_s10 + $0xb0] sm:$0xff] %v499_v28  ;;  %502 = vst [vmem:[%s2297_s10 + $0xb8] sm:$0xff] %v501_v29  ;;  %v503_v30 = vld [vmem:[%s2292_s11 + $0x180] sm:$0xff]  ;;  %v505_v31 = vld [vmem:[%s2292_s11 + $0x190] sm:$0xff] }
  0x42   : > { %v507_v32 = vld [vmem:[%s2292_s11 + $0x1a0] sm:$0xff]  ;;  %504 = vst [vmem:[%s2297_s10 + $0xc0] sm:$0xff] %v503_v30  ;;  %506 = vst [vmem:[%s2297_s10 + $0xc8] sm:$0xff] %v505_v31  ;;  %v509_v33 = vld [vmem:[%s2292_s11 + $0x1b0] sm:$0xff] }
  0x43   : > { %508 = vst [vmem:[%s2297_s10 + $0xd0] sm:$0xff] %v507_v32  ;;  %v511_v34 = vld [vmem:[%s2292_s11 + $0x1c0] sm:$0xff]  ;;  %v513_v35 = vld [vmem:[%s2292_s11 + $0x1d0] sm:$0xff]  ;;  %510 = vst [vmem:[%s2297_s10 + $0xd8] sm:$0xff] %v509_v33 }
  0x44   : > { %512 = vst [vmem:[%s2297_s10 + $0xe0] sm:$0xff] %v511_v34  ;;  %514 = vst [vmem:[%s2297_s10 + $0xe8] sm:$0xff] %v513_v35  ;;  %v515_v36 = vld [vmem:[%s2292_s11 + $0x1e0] sm:$0xff]  ;;  %v517_v37 = vld [vmem:[%s2292_s11 + $0x1f0] sm:$0xff] }
  0x45   : > { %v519_v38 = vld [vmem:[%s2292_s11 + $0x200] sm:$0xff]  ;;  %516 = vst [vmem:[%s2297_s10 + $0xf0] sm:$0xff] %v515_v36  ;;  %518 = vst [vmem:[%s2297_s10 + $0xf8] sm:$0xff] %v517_v37  ;;  %v521_v39 = vld [vmem:[%s2292_s11 + $0x210] sm:$0xff] }
  0x46   : > { %520 = vst [vmem:[%s2297_s10 + $0x100] sm:$0xff] %v519_v38  ;;  %v523_v40 = vld [vmem:[%s2292_s11 + $0x220] sm:$0xff]  ;;  %v525_v41 = vld [vmem:[%s2292_s11 + $0x230] sm:$0xff]  ;;  %522 = vst [vmem:[%s2297_s10 + $0x108] sm:$0xff] %v521_v39 }
  0x47   : > { %524 = vst [vmem:[%s2297_s10 + $0x110] sm:$0xff] %v523_v40  ;;  %526 = vst [vmem:[%s2297_s10 + $0x118] sm:$0xff] %v525_v41  ;;  %v527_v42 = vld [vmem:[%s2292_s11 + $0x240] sm:$0xff]  ;;  %v529_v43 = vld [vmem:[%s2292_s11 + $0x250] sm:$0xff] }
  0x48   : > { %v531_v44 = vld [vmem:[%s2292_s11 + $0x260] sm:$0xff]  ;;  %528 = vst [vmem:[%s2297_s10 + $0x120] sm:$0xff] %v527_v42  ;;  %530 = vst [vmem:[%s2297_s10 + $0x128] sm:$0xff] %v529_v43  ;;  %v533_v45 = vld [vmem:[%s2292_s11 + $0x270] sm:$0xff] }
  0x49   : > { %532 = vst [vmem:[%s2297_s10 + $0x130] sm:$0xff] %v531_v44  ;;  %v535_v46 = vld [vmem:[%s2292_s11 + $0x280] sm:$0xff]  ;;  %v537_v47 = vld [vmem:[%s2292_s11 + $0x290] sm:$0xff]  ;;  %534 = vst [vmem:[%s2297_s10 + $0x138] sm:$0xff] %v533_v45 }
  0x4a   : > { %536 = vst [vmem:[%s2297_s10 + $0x140] sm:$0xff] %v535_v46  ;;  %538 = vst [vmem:[%s2297_s10 + $0x148] sm:$0xff] %v537_v47  ;;  %v539_v48 = vld [vmem:[%s2292_s11 + $0x2a0] sm:$0xff]  ;;  %v541_v49 = vld [vmem:[%s2292_s11 + $0x2b0] sm:$0xff] }
  0x4b   : > { %v543_v50 = vld [vmem:[%s2292_s11 + $0x2c0] sm:$0xff]  ;;  %540 = vst [vmem:[%s2297_s10 + $0x150] sm:$0xff] %v539_v48  ;;  %542 = vst [vmem:[%s2297_s10 + $0x158] sm:$0xff] %v541_v49  ;;  %v545_v51 = vld [vmem:[%s2292_s11 + $0x2d0] sm:$0xff] }
  0x4c   : > { %544 = vst [vmem:[%s2297_s10 + $0x160] sm:$0xff] %v543_v50  ;;  %v547_v52 = vld [vmem:[%s2292_s11 + $0x2e0] sm:$0xff]  ;;  %v549_v53 = vld [vmem:[%s2292_s11 + $0x2f0] sm:$0xff]  ;;  %546 = vst [vmem:[%s2297_s10 + $0x168] sm:$0xff] %v545_v51 }
  0x4d   : > { %548 = vst [vmem:[%s2297_s10 + $0x170] sm:$0xff] %v547_v52  ;;  %550 = vst [vmem:[%s2297_s10 + $0x178] sm:$0xff] %v549_v53  ;;  %v551_v54 = vld [vmem:[%s2292_s11 + $0x300] sm:$0xff]  ;;  %v553_v55 = vld [vmem:[%s2292_s11 + $0x310] sm:$0xff] }
  0x4e   : > { %v555_v56 = vld [vmem:[%s2292_s11 + $0x320] sm:$0xff]  ;;  %552 = vst [vmem:[%s2297_s10 + $0x180] sm:$0xff] %v551_v54  ;;  %554 = vst [vmem:[%s2297_s10 + $0x188] sm:$0xff] %v553_v55  ;;  %v557_v57 = vld [vmem:[%s2292_s11 + $0x330] sm:$0xff] }
  0x4f   : > { %556 = vst [vmem:[%s2297_s10 + $0x190] sm:$0xff] %v555_v56  ;;  %v559_v58 = vld [vmem:[%s2292_s11 + $0x340] sm:$0xff]  ;;  %v561_v59 = vld [vmem:[%s2292_s11 + $0x350] sm:$0xff]  ;;  %558 = vst [vmem:[%s2297_s10 + $0x198] sm:$0xff] %v557_v57 }
  0x50   : > { %560 = vst [vmem:[%s2297_s10 + $0x1a0] sm:$0xff] %v559_v58  ;;  %562 = vst [vmem:[%s2297_s10 + $0x1a8] sm:$0xff] %v561_v59  ;;  %v563_v60 = vld [vmem:[%s2292_s11 + $0x360] sm:$0xff]  ;;  %v565_v61 = vld [vmem:[%s2292_s11 + $0x370] sm:$0xff] }
  0x51   : > { %v567_v62 = vld [vmem:[%s2292_s11 + $0x380] sm:$0xff]  ;;  %564 = vst [vmem:[%s2297_s10 + $0x1b0] sm:$0xff] %v563_v60  ;;  %566 = vst [vmem:[%s2297_s10 + $0x1b8] sm:$0xff] %v565_v61  ;;  %v569_v63 = vld [vmem:[%s2292_s11 + $0x390] sm:$0xff] }
  0x52   : > { %568 = vst [vmem:[%s2297_s10 + $0x1c0] sm:$0xff] %v567_v62  ;;  %v571_v0 = vld [vmem:[%s2292_s11 + $0x3a0] sm:$0xff]  ;;  %v573_v1 = vld [vmem:[%s2292_s11 + $0x3b0] sm:$0xff]  ;;  %570 = vst [vmem:[%s2297_s10 + $0x1c8] sm:$0xff] %v569_v63 }
  0x53   : > { %572 = vst [vmem:[%s2297_s10 + $0x1d0] sm:$0xff] %v571_v0  ;;  %574 = vst [vmem:[%s2297_s10 + $0x1d8] sm:$0xff] %v573_v1  ;;  %v575_v2 = vld [vmem:[%s2292_s11 + $0x3c0] sm:$0xff]  ;;  %v577_v3 = vld [vmem:[%s2292_s11 + $0x3d0] sm:$0xff] }
  0x54   : > { %v579_v4 = vld [vmem:[%s2292_s11 + $0x3e0] sm:$0xff]  ;;  %576 = vst [vmem:[%s2297_s10 + $0x1e0] sm:$0xff] %v575_v2  ;;  %578 = vst [vmem:[%s2297_s10 + $0x1e8] sm:$0xff] %v577_v3  ;;  %v581_v5 = vld [vmem:[%s2292_s11 + $0x3f0] sm:$0xff] }
  0x55   : > { %580 = vst [vmem:[%s2297_s10 + $0x1f0] sm:$0xff] %v579_v4  ;;  %v583_v6 = vld [vmem:[%s2292_s11 + $0x400] sm:$0xff]  ;;  %v585_v7 = vld [vmem:[%s2292_s11 + $0x410] sm:$0xff]  ;;  %582 = vst [vmem:[%s2297_s10 + $0x1f8] sm:$0xff] %v581_v5 }
  0x56   : > { %584 = vst [vmem:[%s2297_s10 + $0x200] sm:$0xff] %v583_v6  ;;  %586 = vst [vmem:[%s2297_s10 + $0x208] sm:$0xff] %v585_v7  ;;  %v587_v8 = vld [vmem:[%s2292_s11 + $0x420] sm:$0xff]  ;;  %v589_v9 = vld [vmem:[%s2292_s11 + $0x430] sm:$0xff] }
  0x57   : > { %v591_v10 = vld [vmem:[%s2292_s11 + $0x440] sm:$0xff]  ;;  %588 = vst [vmem:[%s2297_s10 + $0x210] sm:$0xff] %v587_v8  ;;  %590 = vst [vmem:[%s2297_s10 + $0x218] sm:$0xff] %v589_v9  ;;  %v593_v11 = vld [vmem:[%s2292_s11 + $0x450] sm:$0xff] }
  0x58   : > { %592 = vst [vmem:[%s2297_s10 + $0x220] sm:$0xff] %v591_v10  ;;  %v595_v12 = vld [vmem:[%s2292_s11 + $0x460] sm:$0xff]  ;;  %v597_v13 = vld [vmem:[%s2292_s11 + $0x470] sm:$0xff]  ;;  %594 = vst [vmem:[%s2297_s10 + $0x228] sm:$0xff] %v593_v11 }
  0x59   : > { %596 = vst [vmem:[%s2297_s10 + $0x230] sm:$0xff] %v595_v12  ;;  %598 = vst [vmem:[%s2297_s10 + $0x238] sm:$0xff] %v597_v13  ;;  %v599_v14 = vld [vmem:[%s2292_s11 + $0x480] sm:$0xff]  ;;  %v601_v15 = vld [vmem:[%s2292_s11 + $0x490] sm:$0xff] }
  0x5a   : > { %v603_v16 = vld [vmem:[%s2292_s11 + $0x4a0] sm:$0xff]  ;;  %600 = vst [vmem:[%s2297_s10 + $0x240] sm:$0xff] %v599_v14  ;;  %602 = vst [vmem:[%s2297_s10 + $0x248] sm:$0xff] %v601_v15  ;;  %v605_v17 = vld [vmem:[%s2292_s11 + $0x4b0] sm:$0xff] }
  0x5b   : > { %604 = vst [vmem:[%s2297_s10 + $0x250] sm:$0xff] %v603_v16  ;;  %v607_v18 = vld [vmem:[%s2292_s11 + $0x4c0] sm:$0xff]  ;;  %v609_v19 = vld [vmem:[%s2292_s11 + $0x4d0] sm:$0xff]  ;;  %606 = vst [vmem:[%s2297_s10 + $0x258] sm:$0xff] %v605_v17 }
  0x5c   : > { %608 = vst [vmem:[%s2297_s10 + $0x260] sm:$0xff] %v607_v18  ;;  %610 = vst [vmem:[%s2297_s10 + $0x268] sm:$0xff] %v609_v19  ;;  %v611_v20 = vld [vmem:[%s2292_s11 + $0x4e0] sm:$0xff]  ;;  %v613_v21 = vld [vmem:[%s2292_s11 + $0x4f0] sm:$0xff] }
  0x5d   : > { %v615_v22 = vld [vmem:[%s2292_s11 + $0x500] sm:$0xff]  ;;  %612 = vst [vmem:[%s2297_s10 + $0x270] sm:$0xff] %v611_v20  ;;  %614 = vst [vmem:[%s2297_s10 + $0x278] sm:$0xff] %v613_v21  ;;  %v617_v23 = vld [vmem:[%s2292_s11 + $0x510] sm:$0xff] }
  0x5e   : > { %616 = vst [vmem:[%s2297_s10 + $0x280] sm:$0xff] %v615_v22  ;;  %v619_v24 = vld [vmem:[%s2292_s11 + $0x520] sm:$0xff]  ;;  %v621_v25 = vld [vmem:[%s2292_s11 + $0x530] sm:$0xff]  ;;  %618 = vst [vmem:[%s2297_s10 + $0x288] sm:$0xff] %v617_v23 }
  0x5f   : > { %620 = vst [vmem:[%s2297_s10 + $0x290] sm:$0xff] %v619_v24  ;;  %622 = vst [vmem:[%s2297_s10 + $0x298] sm:$0xff] %v621_v25  ;;  %v623_v26 = vld [vmem:[%s2292_s11 + $0x540] sm:$0xff]  ;;  %v625_v27 = vld [vmem:[%s2292_s11 + $0x550] sm:$0xff] }
  0x60   : > { %v627_v28 = vld [vmem:[%s2292_s11 + $0x560] sm:$0xff]  ;;  %624 = vst [vmem:[%s2297_s10 + $0x2a0] sm:$0xff] %v623_v26  ;;  %626 = vst [vmem:[%s2297_s10 + $0x2a8] sm:$0xff] %v625_v27  ;;  %v629_v29 = vld [vmem:[%s2292_s11 + $0x570] sm:$0xff] }
  0x61   : > { %628 = vst [vmem:[%s2297_s10 + $0x2b0] sm:$0xff] %v627_v28  ;;  %v631_v30 = vld [vmem:[%s2292_s11 + $0x580] sm:$0xff]  ;;  %v633_v31 = vld [vmem:[%s2292_s11 + $0x590] sm:$0xff]  ;;  %630 = vst [vmem:[%s2297_s10 + $0x2b8] sm:$0xff] %v629_v29 }
  0x62   : > { %632 = vst [vmem:[%s2297_s10 + $0x2c0] sm:$0xff] %v631_v30  ;;  %634 = vst [vmem:[%s2297_s10 + $0x2c8] sm:$0xff] %v633_v31  ;;  %v635_v32 = vld [vmem:[%s2292_s11 + $0x5a0] sm:$0xff]  ;;  %v637_v33 = vld [vmem:[%s2292_s11 + $0x5b0] sm:$0xff] }
  0x63   : > { %v639_v34 = vld [vmem:[%s2292_s11 + $0x5c0] sm:$0xff]  ;;  %636 = vst [vmem:[%s2297_s10 + $0x2d0] sm:$0xff] %v635_v32  ;;  %638 = vst [vmem:[%s2297_s10 + $0x2d8] sm:$0xff] %v637_v33  ;;  %v641_v35 = vld [vmem:[%s2292_s11 + $0x5d0] sm:$0xff] }
  0x64   : > { %640 = vst [vmem:[%s2297_s10 + $0x2e0] sm:$0xff] %v639_v34  ;;  %v643_v36 = vld [vmem:[%s2292_s11 + $0x5e0] sm:$0xff]  ;;  %v645_v37 = vld [vmem:[%s2292_s11 + $0x5f0] sm:$0xff]  ;;  %642 = vst [vmem:[%s2297_s10 + $0x2e8] sm:$0xff] %v641_v35 }
  0x65   : > { %644 = vst [vmem:[%s2297_s10 + $0x2f0] sm:$0xff] %v643_v36  ;;  %646 = vst [vmem:[%s2297_s10 + $0x2f8] sm:$0xff] %v645_v37 }
  0x66 PF: > { %p1702_p0 = scmp.ge.s32.totalorder %s2150_s25, 1  ;;  %p667_p1 = scmp.lt.s32.totalorder %s2150_s25, 7 }
  0x68   : > { %p668_p2 = pnand %p1702_p0, %p667_p1 }
  0x69   : > { %s674_s0 = sand.u32 (!%p668_p2), 1, %s2126_s19   ;;  %s681_s28 = sand.u32 (!%p668_p2), 1, %s2118_s17  }
  0x6a   : > { %671 = sbr.rel (%p668_p2) target bundleno = 478 (0x1de), region = 89  ;;  %s714_s5 = sand.u32 (!%p668_p2), 1, %s2110_s15  }
  0x6b   : > { %s1820_s26 = smul.u32 (!%p668_p2), 48, %s674_s0  ;;  %s1703_s30 = sshll.u32 (!%p668_p2), %s714_s5, 5 }
  0x6c   : > { %s1821_s29 = smul.u32 (!%p668_p2), 768, %s681_s28  ;;  %s1704_s8 = sshll.u32 (!%p668_p2), %s2138_s22, 1 }
  0x6d   : > { %p722_p3 = scmp.lt.s32.totalorder (!%p668_p2), %s1704_s8, 3  ;;  %s2504_s19 = scalar_lea.vmem (!%p668_p2), [#allocation3], %s1820_s26 }
  0x6e   : > { %s2506_s17 = scalar_lea.vmem (!%p668_p2), [#allocation4], %s1821_s29  ;;  %s2508_s15 = scalar_lea.vmem (!%p668_p2), [#allocation5], %s1703_s30 }
  0x6f   : > { %s2706_s8 = smov (!%p722_p3, %s1704_s8), 3  ;;  %p1706_p4 = scmp.ne.s32.totalorder %s2134_s21, 0 }
  0x70   : > { %s724_s11 = scalar_lea.vmem %s2673_s2, %s2706_s8  ;;  %s729_s27 = scalar_lea.vmem %s2674_s3, %s2706_s8 }
  0x71   : > { %736 = sbr.rel (%p1706_p4) target bundleno = 121 (0x79), region = 101 }
  0x76   : > { %v2152_v38 = vmov 0.0  }
  0x77   : > { %737 = vst [vmem:[#allocation2 + $0x10] sm:$0xff] %v2152_v38  ;;  %738 = vst [vmem:[#allocation2] sm:$0xff] %v2152_v38 }
  0x78   : > { %739 = vst [vmem:[#allocation2 + $0x18] sm:$0xff] %v2152_v38  ;;  %740 = vst [vmem:[#allocation2 + $0x8] sm:$0xff] %v2152_v38 }
  0x79 PF: > { %v1911_v39 = vld [vmem:[%s2506_s17 + $0x74] ss:$8 sps:$4 sm:$0xff]   ;;  %v1915_v41 = vld [vmem:[%s2506_s17 + $0x70] ss:$8 sps:$4 sm:$0xff]   ;;  %v1917_v43 = vld [vmem:[%s2506_s17 + $0x64] ss:$8 sps:$4 sm:$0xff]  }
  0x7a   : > { %v1913_v40 = vld [vmem:[%s2506_s17 + $0x174] ss:$8 sps:$4 sm:$0xff]   ;;  %1357 = vmatprep.subr.bf16.mxu0 %v1911_v39  ;;  %v1916_v42 = vld [vmem:[%s2506_s17 + $0x170] ss:$8 sps:$4 sm:$0xff]   ;;  %v1919_v44 = vld [vmem:[%s2506_s17 + $0x164] ss:$8 sps:$4 sm:$0xff]  }
  0x7b   : > { %1400 = vmatprep.subr.bf16.mxu1 %v1913_v40  ;;  %1358 = vmatpush1.bf16.msra.mxu0 %v1915_v41  ;;  %v1921_v45 = vld [vmem:[%s2506_s17 + $0x60] ss:$8 sps:$4 sm:$0xff]   ;;  %v1923_v47 = vld [vmem:[%s2506_s17 + $0x54] ss:$8 sps:$4 sm:$0xff]   ;;  %v1927_v49 = vld [vmem:[%s2506_s17 + $0x50] ss:$8 sps:$4 sm:$0xff]  }
  0x7c   : > { %1401 = vmatpush1.bf16.msra.mxu1 %v1916_v42  ;;  %1359 = vmatprep.subr.bf16.mxu0 %v1917_v43  ;;  %v1922_v46 = vld [vmem:[%s2506_s17 + $0x160] ss:$8 sps:$4 sm:$0xff]   ;;  %v1925_v48 = vld [vmem:[%s2506_s17 + $0x154] ss:$8 sps:$4 sm:$0xff]   ;;  %v1928_v50 = vld [vmem:[%s2506_s17 + $0x150] ss:$8 sps:$4 sm:$0xff]  }
  0x7d   : > { %1402 = vmatprep.subr.bf16.mxu1 %v1919_v44  ;;  %v1929_v51 = vld [vmem:[%s2506_s17 + $0x44] ss:$8 sps:$4 sm:$0xff]   ;;  %v1933_v53 = vld [vmem:[%s2506_s17 + $0x40] ss:$8 sps:$4 sm:$0xff]   ;;  %v1935_v55 = vld [vmem:[%s2506_s17 + $0x34] ss:$8 sps:$4 sm:$0xff]  }
  0x7e   : > { %v1931_v52 = vld [vmem:[%s2506_s17 + $0x144] ss:$8 sps:$4 sm:$0xff]   ;;  %v1934_v54 = vld [vmem:[%s2506_s17 + $0x140] ss:$8 sps:$4 sm:$0xff]   ;;  %v1937_v56 = vld [vmem:[%s2506_s17 + $0x134] ss:$8 sps:$4 sm:$0xff]  }
  0x7f   : > { %1360 = vmatpush1.bf16.msra.mxu0 %v1921_v45  ;;  %v1939_v57 = vld [vmem:[%s2506_s17 + $0x30] ss:$8 sps:$4 sm:$0xff]   ;;  %v1941_v59 = vld [vmem:[%s2506_s17 + $0x24] ss:$8 sps:$4 sm:$0xff]   ;;  %v1945_v61 = vld [vmem:[%s2506_s17 + $0x20] ss:$8 sps:$4 sm:$0xff]  }
  0x80   : > { %1403 = vmatpush1.bf16.msra.mxu1 %v1922_v46  ;;  %1361 = vmatprep.subr.bf16.mxu0 %v1923_v47  ;;  %v1940_v58 = vld [vmem:[%s2506_s17 + $0x130] ss:$8 sps:$4 sm:$0xff]   ;;  %v1943_v60 = vld [vmem:[%s2506_s17 + $0x124] ss:$8 sps:$4 sm:$0xff]   ;;  %v1946_v62 = vld [vmem:[%s2506_s17 + $0x120] ss:$8 sps:$4 sm:$0xff]  }
  0x81   : > { %1404 = vmatprep.subr.bf16.mxu1 %v1925_v48  ;;  %v1947_v63 = vld [vmem:[%s2506_s17 + $0x14] ss:$8 sps:$4 sm:$0xff]   ;;  %v1951_v1 = vld [vmem:[%s2506_s17 + $0x10] ss:$8 sps:$4 sm:$0xff]   ;;  %v1953_v3 = vld [vmem:[%s2506_s17 + $0x4] ss:$8 sps:$4 sm:$0xff]  }
  0x82   : > { %v1949_v0 = vld [vmem:[%s2506_s17 + $0x114] ss:$8 sps:$4 sm:$0xff]   ;;  %v1952_v2 = vld [vmem:[%s2506_s17 + $0x110] ss:$8 sps:$4 sm:$0xff]   ;;  %v1955_v4 = vld [vmem:[%s2506_s17 + $0x104] ss:$8 sps:$4 sm:$0xff]  }
  0x83   : > { %1362 = vmatpush1.bf16.msra.mxu0 %v1927_v49  ;;  %v1957_v5 = vld [vmem:[%s2506_s17] ss:$8 sps:$4 sm:$0xff]   ;;  %v1959_v7 = vld [vmem:[%s2506_s17 + $0xf4] ss:$8 sps:$4 sm:$0xff]   ;;  %v1963_v9 = vld [vmem:[%s2506_s17 + $0xf0] ss:$8 sps:$4 sm:$0xff]  }
  0x84   : > { %1405 = vmatpush1.bf16.msra.mxu1 %v1928_v50  ;;  %1363 = vmatprep.subr.bf16.mxu0 %v1929_v51  ;;  %v1958_v6 = vld [vmem:[%s2506_s17 + $0x100] ss:$8 sps:$4 sm:$0xff]   ;;  %v1961_v8 = vld [vmem:[%s2506_s17 + $0x1f4] ss:$8 sps:$4 sm:$0xff]   ;;  %v1964_v10 = vld [vmem:[%s2506_s17 + $0x1f0] ss:$8 sps:$4 sm:$0xff]  }
  0x85   : > { %1406 = vmatprep.subr.bf16.mxu1 %v1931_v52  ;;  %v1965_v11 = vld [vmem:[%s2506_s17 + $0xe4] ss:$8 sps:$4 sm:$0xff]   ;;  %v1969_v13 = vld [vmem:[%s2506_s17 + $0xe0] ss:$8 sps:$4 sm:$0xff]   ;;  %v1971_v15 = vld [vmem:[%s2506_s17 + $0xd4] ss:$8 sps:$4 sm:$0xff]  }
  0x86   : > { %v1967_v12 = vld [vmem:[%s2506_s17 + $0x1e4] ss:$8 sps:$4 sm:$0xff]   ;;  %v1970_v14 = vld [vmem:[%s2506_s17 + $0x1e0] ss:$8 sps:$4 sm:$0xff]   ;;  %v1973_v16 = vld [vmem:[%s2506_s17 + $0x1d4] ss:$8 sps:$4 sm:$0xff]  }
  0x87   : > { %1364 = vmatpush1.bf16.msra.mxu0 %v1933_v53  ;;  %v1975_v17 = vld [vmem:[%s2506_s17 + $0xd0] ss:$8 sps:$4 sm:$0xff]   ;;  %v1977_v19 = vld [vmem:[%s2506_s17 + $0xc4] ss:$8 sps:$4 sm:$0xff]   ;;  %v1981_v21 = vld [vmem:[%s2506_s17 + $0xc0] ss:$8 sps:$4 sm:$0xff]  }
  0x88   : > { %1407 = vmatpush1.bf16.msra.mxu1 %v1934_v54  ;;  %1365 = vmatprep.subr.bf16.mxu0 %v1935_v55  ;;  %v1976_v18 = vld [vmem:[%s2506_s17 + $0x1d0] ss:$8 sps:$4 sm:$0xff]   ;;  %v1979_v20 = vld [vmem:[%s2506_s17 + $0x1c4] ss:$8 sps:$4 sm:$0xff]   ;;  %v1982_v22 = vld [vmem:[%s2506_s17 + $0x1c0] ss:$8 sps:$4 sm:$0xff]  }
  0x89   : > { %1408 = vmatprep.subr.bf16.mxu1 %v1937_v56  ;;  %v1983_v23 = vld [vmem:[%s2506_s17 + $0xb4] ss:$8 sps:$4 sm:$0xff]   ;;  %v1987_v27 = vld [vmem:[%s2506_s17 + $0xb0] ss:$8 sps:$4 sm:$0xff]   ;;  %v1989_v29 = vld [vmem:[%s2506_s17 + $0xa4] ss:$8 sps:$4 sm:$0xff]  }
  0x8a   : > { %v2009_v24 = vld [vmem:[%s2504_s19 + $0x4] ss:$24 sps:$4 sm:$0xff]   ;;  %v1988_v28 = vld [vmem:[%s2506_s17 + $0x1b0] ss:$8 sps:$4 sm:$0xff]   ;;  %v1993_v31 = vld [vmem:[%s2506_s17 + $0xa0] ss:$8 sps:$4 sm:$0xff]  }
  0x8b   : > { %1366 = vmatpush1.bf16.msra.mxu0 %v1939_v57  ;;  %v1985_v25 = vld [vmem:[%s2506_s17 + $0x1b4] ss:$8 sps:$4 sm:$0xff]   ;;  %1389 = vmatprep.mubr.bf16.mxu0 %v2009_v24  ;;  %v1991_v30 = vld [vmem:[%s2506_s17 + $0x1a4] ss:$8 sps:$4 sm:$0xff]   ;;  %v1994_v32 = vld [vmem:[%s2506_s17 + $0x1a0] ss:$8 sps:$4 sm:$0xff]  }
  0x8c   : > { %1409 = vmatpush1.bf16.msra.mxu1 %v1940_v58  ;;  %1367 = vmatprep.subr.bf16.mxu0 %v1941_v59  ;;  %v2012_v26 = vld [vmem:[%s2504_s19 + $0xc] ss:$24 sps:$4 sm:$0xff]   ;;  %v1999_v35 = vld [vmem:[%s2506_s17 + $0x90] ss:$8 sps:$4 sm:$0xff]   ;;  %v2005_v39 = vld [vmem:[%s2506_s17 + $0x80] ss:$8 sps:$4 sm:$0xff]  }
  0x8d   : > { %1410 = vmatprep.subr.bf16.mxu1 %v1943_v60  ;;  %1432 = vmatprep.mubr.bf16.mxu1 %v2012_v26  ;;  %v1995_v33 = vld [vmem:[%s2506_s17 + $0x94] ss:$8 sps:$4 sm:$0xff]   ;;  %v2000_v36 = vld [vmem:[%s2506_s17 + $0x190] ss:$8 sps:$4 sm:$0xff]   ;;  %v2001_v37 = vld [vmem:[%s2506_s17 + $0x84] ss:$8 sps:$4 sm:$0xff]  }
  0x8e   : > { %v1997_v34 = vld [vmem:[%s2506_s17 + $0x194] ss:$8 sps:$4 sm:$0xff]   ;;  %v2003_v38 = vld [vmem:[%s2506_s17 + $0x184] ss:$8 sps:$4 sm:$0xff]   ;;  %v2006_v40 = vld [vmem:[%s2506_s17 + $0x180] ss:$8 sps:$4 sm:$0xff]  }
  0x8f   : > { %1368 = vmatpush1.bf16.msra.mxu0 %v1945_v61  ;;  %v2015_v41 = vld [vmem:[%s2506_s17 + $0x274] ss:$8 sps:$4 sm:$0xff]   ;;  %v2007_v42 = vld [vmem:[%s2504_s19] ss:$24 sps:$4 sm:$0xff]   ;;  %v2018_v45 = vld [vmem:[%s2506_s17 + $0x264] ss:$8 sps:$4 sm:$0xff]  }
  0x90   : > { %1411 = vmatpush1.bf16.msra.mxu1 %v1946_v62  ;;  %1369 = vmatprep.subr.bf16.mxu0 %v1947_v63  ;;  %v2010_v43 = vld [vmem:[%s2504_s19 + $0x8] ss:$24 sps:$4 sm:$0xff]   ;;  %v2063_v46 = vld [vmem:[%s2504_s19 + $0x14] ss:$24 sps:$4 sm:$0xff]   ;;  %p1809_p5 = scmp.ne.s32.totalorder %s2134_s21, 2 }
  0x91   : > { %1412 = vmatprep.subr.bf16.mxu1 %v1949_v0  ;;  %v2013_v44 = vld [vmem:[%s2506_s17 + $0x270] ss:$8 sps:$4 sm:$0xff]   ;;  %v2016_v47 = vld [vmem:[%s2506_s17 + $0x260] ss:$8 sps:$4 sm:$0xff]   ;;  %v2021_v48 = vld [vmem:[%s2506_s17 + $0x254] ss:$8 sps:$4 sm:$0xff]  }
  0x92   : > { %v2019_v49 = vld [vmem:[%s2506_s17 + $0x250] ss:$8 sps:$4 sm:$0xff]   ;;  %v2024_v50 = vld [vmem:[%s2506_s17 + $0x244] ss:$8 sps:$4 sm:$0xff]   ;;  %v2022_v51 = vld [vmem:[%s2506_s17 + $0x240] ss:$8 sps:$4 sm:$0xff]  }
  0x93   : > { %1370 = vmatpush1.bf16.msra.mxu0 %v1951_v1  ;;  %v2027_v52 = vld [vmem:[%s2506_s17 + $0x234] ss:$8 sps:$4 sm:$0xff]   ;;  %v2025_v53 = vld [vmem:[%s2506_s17 + $0x230] ss:$8 sps:$4 sm:$0xff]   ;;  %v2030_v54 = vld [vmem:[%s2506_s17 + $0x224] ss:$8 sps:$4 sm:$0xff]  }
  0x94   : > { %1413 = vmatpush1.bf16.msra.mxu1 %v1952_v2  ;;  %1371 = vmatprep.subr.bf16.mxu0 %v1953_v3  ;;  %v2028_v55 = vld [vmem:[%s2506_s17 + $0x220] ss:$8 sps:$4 sm:$0xff]   ;;  %v2033_v56 = vld [vmem:[%s2506_s17 + $0x214] ss:$8 sps:$4 sm:$0xff]   ;;  %v2031_v57 = vld [vmem:[%s2506_s17 + $0x210] ss:$8 sps:$4 sm:$0xff]  }
  0x95   : > { %1414 = vmatprep.subr.bf16.mxu1 %v1955_v4  ;;  %v2036_v58 = vld [vmem:[%s2506_s17 + $0x204] ss:$8 sps:$4 sm:$0xff]   ;;  %v2034_v59 = vld [vmem:[%s2506_s17 + $0x200] ss:$8 sps:$4 sm:$0xff]   ;;  %v2039_v60 = vld [vmem:[%s2506_s17 + $0x2f4] ss:$8 sps:$4 sm:$0xff]  }
  0x96   : > { %v2037_v61 = vld [vmem:[%s2506_s17 + $0x2f0] ss:$8 sps:$4 sm:$0xff]   ;;  %v2042_v62 = vld [vmem:[%s2506_s17 + $0x2e4] ss:$8 sps:$4 sm:$0xff]   ;;  %v2040_v63 = vld [vmem:[%s2506_s17 + $0x2e0] ss:$8 sps:$4 sm:$0xff]  }
  0x97   : > { %1372 = vmatpush1.bf16.msra.mxu0 %v1957_v5  ;;  %v2045_v0 = vld [vmem:[%s2506_s17 + $0x2d4] ss:$8 sps:$4 sm:$0xff]   ;;  %v2043_v1 = vld [vmem:[%s2506_s17 + $0x2d0] ss:$8 sps:$4 sm:$0xff]   ;;  %v2048_v2 = vld [vmem:[%s2506_s17 + $0x2c4] ss:$8 sps:$4 sm:$0xff]  }
  0x98   : > { %1415 = vmatpush1.bf16.msra.mxu1 %v1958_v6  ;;  %1373 = vmatprep.subr.bf16.mxu0 %v1959_v7  ;;  %v2046_v3 = vld [vmem:[%s2506_s17 + $0x2c0] ss:$8 sps:$4 sm:$0xff]   ;;  %v2051_v4 = vld [vmem:[%s2506_s17 + $0x2b4] ss:$8 sps:$4 sm:$0xff]   ;;  %v2049_v5 = vld [vmem:[%s2506_s17 + $0x2b0] ss:$8 sps:$4 sm:$0xff]  }
  0x99   : > { %1416 = vmatprep.subr.bf16.mxu1 %v1961_v8  ;;  %v2054_v6 = vld [vmem:[%s2506_s17 + $0x2a4] ss:$8 sps:$4 sm:$0xff]   ;;  %v2052_v7 = vld [vmem:[%s2506_s17 + $0x2a0] ss:$8 sps:$4 sm:$0xff]   ;;  %v2057_v8 = vld [vmem:[%s2506_s17 + $0x294] ss:$8 sps:$4 sm:$0xff]  }
  0x9a   : > { %v742_v26 = vld [vmem:[#allocation2] sm:$0xff] }
  0x9b   : > { %1374 = vmatpush2.bf16.msra.mxu0 %v1963_v9  ;;  %v2055_v9 = vld [vmem:[%s2506_s17 + $0x290] ss:$8 sps:$4 sm:$0xff]  }
  0x9c   : > { %1417 = vmatpush2.bf16.msra.mxu1 %v1964_v10  ;;  %1375 = vmatprep.subr.bf16.mxu0 %v1965_v11  ;;  %v2060_v10 = vld [vmem:[%s2506_s17 + $0x284] ss:$8 sps:$4 sm:$0xff]   ;;  %v2058_v11 = vld [vmem:[%s2506_s17 + $0x280] ss:$8 sps:$4 sm:$0xff]  }
  0x9d   : > { %1418 = vmatprep.subr.bf16.mxu1 %v1967_v12  ;;  %v2061_v12 = vld [vmem:[%s2504_s19 + $0x10] ss:$24 sps:$4 sm:$0xff]  }
  0x9f   : > { %1376 = vmatpush2.bf16.msra.mxu0 %v1969_v13 }
  0xa0   : > { %1419 = vmatpush2.bf16.msra.mxu1 %v1970_v14  ;;  %1377 = vmatprep.subr.bf16.mxu0 %v1971_v15 }
  0xa1   : > { %1420 = vmatprep.subr.bf16.mxu1 %v1973_v16 }
  0xa3   : > { %1378 = vmatpush2.bf16.msra.mxu0 %v1975_v17 }
  0xa4   : > { %1421 = vmatpush2.bf16.msra.mxu1 %v1976_v18  ;;  %1379 = vmatprep.subr.bf16.mxu0 %v1977_v19 }
  0xa5   : > { %1422 = vmatprep.subr.bf16.mxu1 %v1979_v20 }
  0xa7   : > { %1380 = vmatpush2.bf16.msra.mxu0 %v1981_v21  ;;  %v741_v21 = vld [vmem:[#allocation2 + $0x10] sm:$0xff] }
  0xa8   : > { %1423 = vmatpush2.bf16.msra.mxu1 %v1982_v22  ;;  %1381 = vmatprep.subr.bf16.mxu0 %v1983_v23 }
  0xa9   : > { %1424 = vmatprep.subr.bf16.mxu1 %v1985_v25 }
  0xab   : > { %1382 = vmatpush2.bf16.msra.mxu0 %v1987_v27 }
  0xac   : > { %1425 = vmatpush2.bf16.msra.mxu1 %v1988_v28  ;;  %1383 = vmatprep.subr.bf16.mxu0 %v1989_v29 }
  0xad   : > { %1426 = vmatprep.subr.bf16.mxu1 %v1991_v30 }
  0xaf   : > { %1384 = vmatpush2.bf16.msra.mxu0 %v1993_v31  ;;  %v743_v31 = vld [vmem:[#allocation2 + $0x18] sm:$0xff] }
  0xb0   : > { %1427 = vmatpush2.bf16.msra.mxu1 %v1994_v32  ;;  %1385 = vmatprep.subr.bf16.mxu0 %v1995_v33 }
  0xb1   : > { %1428 = vmatprep.subr.bf16.mxu1 %v1997_v34 }
  0xb3   : > { %1386 = vmatpush2.bf16.msra.mxu0 %v1999_v35 }
  0xb4   : > { %1429 = vmatpush2.bf16.msra.mxu1 %v2000_v36  ;;  %1387 = vmatprep.subr.bf16.mxu0 %v2001_v37  ;;  %v744_v36 = vld [vmem:[#allocation2 + $0x8] sm:$0xff] }
  0xb5   : > { %1430 = vmatprep.subr.bf16.mxu1 %v2003_v38 }
  0xb7   : > { %1388 = vmatpush2.bf16.msra.mxu0 %v2005_v39 }
  0xb8   : > { %1431 = vmatpush2.bf16.msra.mxu1 %v2006_v40  ;;  %1443 = vmatprep.subr.bf16.mxu0 %v2015_v41 }
  0xba   : > { %1390 = vmatmul.mubr.bf16.vlgmr.msra.gmra.mxu0 %v2007_v42 }
  0xbb   : > { %1433 = vmatmul.mubr.bf16.vlgmr.msra.gmra.mxu1 %v2010_v43  ;;  %1444 = vmatpush1.bf16.msra.mxu0 %v2013_v44 }
  0xbc   : > { %1445 = vmatprep.subr.bf16.mxu0 %v2018_v45  ;;  %1475 = vmatprep.mubr.bf16.mxu0 %v2063_v46 }
  0xbf   : > { %1446 = vmatpush1.bf16.msra.mxu0 %v2016_v47 }
  0xc0   : > { %1447 = vmatprep.subr.bf16.mxu0 %v2021_v48 }
  0xc3   : > { %1448 = vmatpush1.bf16.msra.mxu0 %v2019_v49 }
  0xc4   : > { %1449 = vmatprep.subr.bf16.mxu0 %v2024_v50 }
  0xc7   : > { %1450 = vmatpush1.bf16.msra.mxu0 %v2022_v51 }
  0xc8   : > { %1451 = vmatprep.subr.bf16.mxu0 %v2027_v52 }
  0xcb   : > { %1452 = vmatpush1.bf16.msra.mxu0 %v2025_v53 }
  0xcc   : > { %1453 = vmatprep.subr.bf16.mxu0 %v2030_v54 }
  0xcf   : > { %1454 = vmatpush1.bf16.msra.mxu0 %v2028_v55 }
  0xd0   : > { %1455 = vmatprep.subr.bf16.mxu0 %v2033_v56 }
  0xd3   : > { %1456 = vmatpush1.bf16.msra.mxu0 %v2031_v57 }
  0xd4   : > { %1457 = vmatprep.subr.bf16.mxu0 %v2036_v58 }
  0xd7   : > { %1458 = vmatpush1.bf16.msra.mxu0 %v2034_v59 }
  0xd8   : > { %1459 = vmatprep.subr.bf16.mxu0 %v2039_v60 }
  0xdb   : > { %1460 = vmatpush2.bf16.msra.mxu0 %v2037_v61 }
  0xdc   : > { %1461 = vmatprep.subr.bf16.mxu0 %v2042_v62 }
  0xdf   : > { %1462 = vmatpush2.bf16.msra.mxu0 %v2040_v63 }
  0xe0   : > { %1463 = vmatprep.subr.bf16.mxu0 %v2045_v0 }
  0xe3   : > { %1464 = vmatpush2.bf16.msra.mxu0 %v2043_v1 }
  0xe4   : > { %1465 = vmatprep.subr.bf16.mxu0 %v2048_v2 }
  0xe7   : > { %1466 = vmatpush2.bf16.msra.mxu0 %v2046_v3 }
  0xe8   : > { %1467 = vmatprep.subr.bf16.mxu0 %v2051_v4 }
  0xeb   : > { %1468 = vmatpush2.bf16.msra.mxu0 %v2049_v5 }
  0xec   : > { %1469 = vmatprep.subr.bf16.mxu0 %v2054_v6 }
  0xef   : > { %1470 = vmatpush2.bf16.msra.mxu0 %v2052_v7 }
  0xf0   : > { %1471 = vmatprep.subr.bf16.mxu0 %v2057_v8 }
  0xf3   : > { %1472 = vmatpush2.bf16.msra.mxu0 %v2055_v9 }
  0xf4   : > { %1473 = vmatprep.subr.bf16.mxu0 %v2060_v10 }
  0xf7   : > { %1474 = vmatpush2.bf16.msra.mxu0 %v2058_v11 }
  0xfa   : > { %1476 = vmatmul.mubr.bf16.vlgmr.msra.gmra.mxu0 %v2061_v12 }
 0x17a   : > { %v1391_v13 = vpop.f32.mrf.mxu0 }
 0x17b   : > { %v1434_v14 = vpop.f32.mrf.mxu1 }
 0x17c   : > { %v1393_v15 = vpop.f32.mrf.mxu0  ;;  %v1435_v20 = vadd.f32 %v1434_v14, %v1391_v13 }
 0x17d   : > { %v1436_v16 = vpop.f32.mrf.mxu1 }
 0x17e   : > { %v1395_v17 = vpop.f32.mrf.mxu0  ;;  %v1437_v23 = vadd.f32 %v1436_v16, %v1393_v15 }
 0x17f   : > { %v1438_v18 = vpop.f32.mrf.mxu1 }
 0x180   : > { %v1397_v19 = vpop.f32.mrf.mxu0  ;;  %v1439_v28 = vadd.f32 %v1438_v18, %v1395_v17 }
 0x181   : > { %v1440_v25 = vpop.f32.mrf.mxu1 }
 0x182   : > { %v1441_v33 = vadd.f32 %v1440_v25, %v1397_v19 }
 0x1ba   : > { %v1477_v22 = vpop.f32.mrf.mxu0 }
 0x1bb   : > { %v1478_v24 = vadd.f32 %v1477_v22, %v1435_v20 }
 0x1bc   : > { %v1479_v27 = vpop.f32.mrf.mxu0 }
 0x1bd   : > { %v1486_v29 = vadd.f32 %v1478_v24, %v741_v21  ;;  %v1480_v30 = vadd.f32 %v1479_v27, %v1437_v23 }
 0x1be   : > { %v1481_v32 = vpop.f32.mrf.mxu0 }
 0x1bf   : > { %1490 = vst [vmem:[#allocation2 + $0x10] sm:$0xff] %v1486_v29  ;;  %v1487_v34 = vadd.f32 %v1480_v30, %v742_v26  ;;  %v1482_v35 = vadd.f32 %v1481_v32, %v1439_v28 }
 0x1c0   : > { %v1483_v37 = vpop.f32.mrf.mxu0 }
 0x1c1   : > { %1491 = vst [vmem:[#allocation2] sm:$0xff] %v1487_v34  ;;  %v1488_v38 = vadd.f32 %v1482_v35, %v743_v31  ;;  %v1484_v39 = vadd.f32 %v1483_v37, %v1441_v33  ;;  %1497 = sbr.rel (%p1809_p5) target bundleno = 470 (0x1d6), region = 105 }
 0x1c3   : > { %1492 = vst [vmem:[#allocation2 + $0x18] sm:$0xff] %v1488_v38  ;;  %v1489_v40 = vadd.f32 %v1484_v39, %v744_v36 }
 0x1c5   : > { %1493 = vst [vmem:[#allocation2 + $0x8] sm:$0xff] %v1489_v40 }
 0x1c6   : > { %v1504_v41 = vlaneseq  ;;  %v1502_v43 = vld [vmem:[%s724_s11] sm:$0x3]  ;;  %v1498_v45 = vld [vmem:[#allocation2 + $0x10] sm:$0xff] }
 0x1c7   : > { %v1518_v44 = vld [vmem:[%s729_s27] sm:$0x3] }
 0x1c8   : > { %v1505_v42 = vshrl.u32 %v1504_v41, 7  ;;  %v1499_v48 = vld [vmem:[#allocation2] sm:$0xff] }
 0x1ca   : > { %v1506_v46 = vsub.s32 0, %v1505_v42  ;;  %v1510_v47 = vsub.s32 1, %v1505_v42  ;;  %v1500_v49 = vld [vmem:[#allocation2 + $0x18] sm:$0xff] }
 0x1cc   : > { %v1501_v50 = vld [vmem:[#allocation2 + $0x8] sm:$0xff]  ;;  %v1507_v51 = vrot.slane %v1502_v43, %v1506_v46  ;;  %v1523_v52 = vrot.slane %v1518_v44, %v1506_v46  ;;  %v1511_v53 = vrot.slane %v1502_v43, %v1510_v47  ;;  %v1527_v54 = vrot.slane %v1518_v44, %v1510_v47 }
 0x1ce   : > { %v1514_v55 = vmul.f32 %v1507_v51, %v1498_v45  ;;  %v1515_v56 = vmul.f32 %v1511_v53, %v1499_v48  ;;  %v1516_v57 = vmul.f32 %v1507_v51, %v1500_v49  ;;  %v1517_v58 = vmul.f32 %v1511_v53, %v1501_v50 }
 0x1d0   : > { %v1530_v59 = vadd.f32 %v1523_v52, %v1514_v55  ;;  %v1531_v60 = vadd.f32 %v1527_v54, %v1515_v56  ;;  %v1532_v61 = vadd.f32 %v1523_v52, %v1516_v57  ;;  %v1533_v62 = vadd.f32 %v1527_v54, %v1517_v58 }
 0x1d2   : > { %v1534_v63 = vmax.f32 %v1530_v59, 0.0  ;;  %v1535_v0 = vmax.f32 %v1531_v60, 0.0  ;;  %v1536_v1 = vmax.f32 %v1532_v61, 0.0  ;;  %v1537_v2 = vmax.f32 %v1533_v62, 0.0 }
 0x1d4   : > { %1538 = vst [vmem:[%s2508_s15] sm:$0xff] %v1534_v63  ;;  %1539 = vst [vmem:[%s2508_s15 + $0x8] sm:$0xff] %v1535_v0 }
 0x1d5   : > { %1540 = vst [vmem:[%s2508_s15 + $0x10] sm:$0xff] %v1536_v1  ;;  %1541 = vst [vmem:[%s2508_s15 + $0x18] sm:$0xff] %v1537_v2 }
 0x1d6 PF: > { %1548 = sbr.rel (!%p2272_p12) target bundleno = 478 (0x1de), region = 109  ;;  %s1817_s21 = sshll.u32 (%p2272_p12), %s2138_s22, 4 }
 0x1d7   : > { %s1554_s29 = scalar_lea.vmem (%p2272_p12), %s2675_s4, %s1817_s21 }
 0x1db   : > { %v1567_v3 = vld [vmem:[%s2508_s15] sm:$0xff]  ;;  %v1569_v4 = vld [vmem:[%s2508_s15 + $0x8] sm:$0xff] }
 0x1dc   : > { %v1571_v5 = vld [vmem:[%s2508_s15 + $0x10] sm:$0xff]  ;;  %v1573_v6 = vld [vmem:[%s2508_s15 + $0x18] sm:$0xff]  ;;  %1568 = vst [vmem:[%s1554_s29] sm:$0xff] %v1567_v3  ;;  %1570 = vst [vmem:[%s1554_s29 + $0x8] sm:$0xff] %v1569_v4 }
 0x1dd   : > { %1572 = vst [vmem:[%s1554_s29 + $0x20] sm:$0xff] %v1571_v5  ;;  %1574 = vst [vmem:[%s1554_s29 + $0x28] sm:$0xff] %v1573_v6 }
 0x1de PF: > { %s14_s25 = sadd.s32 1, %s2150_s25   ;;  %s2687_s14 = sld [smem:[#allocation6_spill]] }
 0x1df   : > { %p11_p6 = scmp.ge.s32.totalorder %s14_s25, 8   ;;  %s2688_s30 = sld [smem:[#allocation7_spill]] }
 0x1e0   : > { %s2689_s15 = smov %s2114_s16  ;;  %s2690_s16 = smov %s2270_s13 }
 0x1e1   : > { %s2691_s17 = smov %s2122_s18  ;;  %s2692_s18 = smov %s2267_s12 }
 0x1e2   : > { %s2693_s19 = smov %s2130_s20  ;;  %s2694_s20 = smov %s2253_s7 }
 0x1e3   : > { %s2695_s21 = smov %s2142_s23  ;;  %s2696_s22 = smov %s2146_s24 }
 0x1e4   : > { %s2697_s23 = smov %s2687_s14  ;;  %13 = sbr.rel (!%p11_p6) target bundleno = 9 (0x9), region = 177 }
 0x1e5   : > { %s2698_s24 = smov %s2688_s30 }

// kernel: pyresnet_forward.30
= control target key start
LH: loop header
LB: loop body
LE: loop exit
PB: predicated region body
PF: predicated region fallthrough
CT: control target
= control target key end

     0   :  { %s1130_s15 = smov 0   ;;  %s1132_s16 = smov 0   ;;  %s1321_s0 = inlined_call_operand.vmem [shape: bf16[16,256], index: 0, kind: input, shape index: {}]   ;;  %s1322_s1 = inlined_call_operand.vmem [shape: bf16[256,512], index: 1, kind: input, shape index: {}]   ;;  %s1323_s2 = inlined_call_operand.vmem [shape: f32[1,512], index: 2, kind: input, shape index: {}]   ;;  %s1324_s3 = inlined_call_operand.vmem [shape: f32[1,512], index: 3, kind: input, shape index: {}]   ;;  %s1325_s4 = inlined_call_operand.vmem [shape: f32[16,512], index: 4, kind: output, shape index: {}]  }
   0x1   :  { %s1134_s17 = smov 0   ;;  %s1136_s18 = smov 0  }
   0x2   :  { %s1138_s19 = smov 0  }
   0x3 LB: > { %s29_s20 = sadd.s32 1, %s1099_s18  ;;  %s920_s21 = sadd.s32 4294967295, %s1103_s19   ;;  %s1103_s19 = sphi %s1138_s19, %s14_s19   ;;  %s1099_s18 = sphi %s1136_s18, %s1330_s18   ;;  %s1095_s17 = sphi %s1134_s17, %s1329_s17   ;;  %s1091_s16 = sphi %s1132_s16, %s1328_s16   ;;  %s1087_s15 = sphi %s1130_s15, %s1327_s15  }
   0x4   : > { %p31_p0 = scmp.ge.s32.totalorder %s29_s20, 2  ;;  %p77_p1 = scmp.ne.s32.totalorder %s1091_s16, %s1087_s15 }
   0x5   : > { %p78_p2 = scmp.eq.s32.totalorder %s1103_s19, 0  ;;  %p161_p4 = scmp.eq.s32.totalorder %s920_s21, 1 }
   0x6   : > { %s1332_s20 = smov (%p31_p0, %s29_s20), 0  ;;  %s70_s23 = sadd.s32 1, %s1091_s16 }
   0x7   : > { %p79_p3 = por %p78_p2, %p77_p1  ;;  %s66_s22 = ssub.s32 %s1099_s18, %s1332_s20 }
   0x8   : > { %p68_p5 = scmp.eq.s32.totalorder %s66_s22, 0  ;;  %p1165_p6 = por %p161_p4, %p77_p1 }
   0x9   : > { %p924_p7 = scmp.ge.s32.totalorder %s1103_s19, 2 }
   0xa   : > { %s1170_s25 = scalar_select %p68_p5, %s1091_s16, %s70_s23  }
   0xb   : > { %198 = sbr.rel (%p924_p7) target bundleno = 36 (0x24), region = 20 }
  0x10   : > { %201 = sbr.rel (!%p79_p3) target bundleno = 36 (0x24), region = 24  ;;  %s203_s26 = sand.u32 (%p79_p3), 1, %s1091_s16  }
  0x11   : > { %s972_s27 = sshll.u32 (%p79_p3), %s1099_s18, 3  ;;  %s925_s28 = sshll.u32 (%p79_p3), %s203_s26, 8 }
  0x12   : > { %s1178_s5 = scalar_lea.vmem (%p79_p3), %s1322_s1, %s972_s27  ;;  %s1183_s6 = scalar_lea.vmem (%p79_p3), [#allocation3], %s925_s28 }
  0x13   : > { %v302_v0 = vld [vmem:[%s1178_s5] sm:$0xff] (%p79_p3)  ;;  %v304_v1 = vld [vmem:[%s1178_s5 + $0x10] sm:$0xff] (%p79_p3) }
  0x14   : > { %v306_v2 = vld [vmem:[%s1178_s5 + $0x20] sm:$0xff] (%p79_p3)  ;;  %303 = vst [vmem:[%s1183_s6] sm:$0xff] (%p79_p3), %v302_v0  ;;  %305 = vst [vmem:[%s1183_s6 + $0x8] sm:$0xff] (%p79_p3), %v304_v1  ;;  %v308_v3 = vld [vmem:[%s1178_s5 + $0x30] sm:$0xff] (%p79_p3) }
  0x15   : > { %307 = vst [vmem:[%s1183_s6 + $0x10] sm:$0xff] %v306_v2  ;;  %v310_v4 = vld [vmem:[%s1178_s5 + $0x40] sm:$0xff]  ;;  %v312_v5 = vld [vmem:[%s1178_s5 + $0x50] sm:$0xff]  ;;  %309 = vst [vmem:[%s1183_s6 + $0x18] sm:$0xff] %v308_v3 }
  0x16   : > { %311 = vst [vmem:[%s1183_s6 + $0x20] sm:$0xff] %v310_v4  ;;  %313 = vst [vmem:[%s1183_s6 + $0x28] sm:$0xff] %v312_v5  ;;  %v314_v6 = vld [vmem:[%s1178_s5 + $0x60] sm:$0xff]  ;;  %v316_v7 = vld [vmem:[%s1178_s5 + $0x70] sm:$0xff] }
  0x17   : > { %v318_v8 = vld [vmem:[%s1178_s5 + $0x80] sm:$0xff]  ;;  %315 = vst [vmem:[%s1183_s6 + $0x30] sm:$0xff] %v314_v6  ;;  %317 = vst [vmem:[%s1183_s6 + $0x38] sm:$0xff] %v316_v7  ;;  %v320_v9 = vld [vmem:[%s1178_s5 + $0x90] sm:$0xff] }
  0x18   : > { %319 = vst [vmem:[%s1183_s6 + $0x40] sm:$0xff] %v318_v8  ;;  %v322_v10 = vld [vmem:[%s1178_s5 + $0xa0] sm:$0xff]  ;;  %v324_v11 = vld [vmem:[%s1178_s5 + $0xb0] sm:$0xff]  ;;  %321 = vst [vmem:[%s1183_s6 + $0x48] sm:$0xff] %v320_v9 }
  0x19   : > { %323 = vst [vmem:[%s1183_s6 + $0x50] sm:$0xff] %v322_v10  ;;  %325 = vst [vmem:[%s1183_s6 + $0x58] sm:$0xff] %v324_v11  ;;  %v326_v12 = vld [vmem:[%s1178_s5 + $0xc0] sm:$0xff]  ;;  %v328_v13 = vld [vmem:[%s1178_s5 + $0xd0] sm:$0xff] }
  0x1a   : > { %v330_v14 = vld [vmem:[%s1178_s5 + $0xe0] sm:$0xff]  ;;  %327 = vst [vmem:[%s1183_s6 + $0x60] sm:$0xff] %v326_v12  ;;  %329 = vst [vmem:[%s1183_s6 + $0x68] sm:$0xff] %v328_v13  ;;  %v332_v15 = vld [vmem:[%s1178_s5 + $0xf0] sm:$0xff] }
  0x1b   : > { %331 = vst [vmem:[%s1183_s6 + $0x70] sm:$0xff] %v330_v14  ;;  %v334_v16 = vld [vmem:[%s1178_s5 + $0x100] sm:$0xff]  ;;  %v336_v17 = vld [vmem:[%s1178_s5 + $0x110] sm:$0xff]  ;;  %333 = vst [vmem:[%s1183_s6 + $0x78] sm:$0xff] %v332_v15 }
  0x1c   : > { %335 = vst [vmem:[%s1183_s6 + $0x80] sm:$0xff] %v334_v16  ;;  %337 = vst [vmem:[%s1183_s6 + $0x88] sm:$0xff] %v336_v17  ;;  %v338_v18 = vld [vmem:[%s1178_s5 + $0x120] sm:$0xff]  ;;  %v340_v19 = vld [vmem:[%s1178_s5 + $0x130] sm:$0xff] }
  0x1d   : > { %v342_v20 = vld [vmem:[%s1178_s5 + $0x140] sm:$0xff]  ;;  %339 = vst [vmem:[%s1183_s6 + $0x90] sm:$0xff] %v338_v18  ;;  %341 = vst [vmem:[%s1183_s6 + $0x98] sm:$0xff] %v340_v19  ;;  %v344_v21 = vld [vmem:[%s1178_s5 + $0x150] sm:$0xff] }
  0x1e   : > { %343 = vst [vmem:[%s1183_s6 + $0xa0] sm:$0xff] %v342_v20  ;;  %v346_v22 = vld [vmem:[%s1178_s5 + $0x160] sm:$0xff]  ;;  %v348_v23 = vld [vmem:[%s1178_s5 + $0x170] sm:$0xff]  ;;  %345 = vst [vmem:[%s1183_s6 + $0xa8] sm:$0xff] %v344_v21 }
  0x1f   : > { %347 = vst [vmem:[%s1183_s6 + $0xb0] sm:$0xff] %v346_v22  ;;  %349 = vst [vmem:[%s1183_s6 + $0xb8] sm:$0xff] %v348_v23  ;;  %v350_v24 = vld [vmem:[%s1178_s5 + $0x180] sm:$0xff]  ;;  %v352_v25 = vld [vmem:[%s1178_s5 + $0x190] sm:$0xff] }
  0x20   : > { %v354_v26 = vld [vmem:[%s1178_s5 + $0x1a0] sm:$0xff]  ;;  %351 = vst [vmem:[%s1183_s6 + $0xc0] sm:$0xff] %v350_v24  ;;  %353 = vst [vmem:[%s1183_s6 + $0xc8] sm:$0xff] %v352_v25  ;;  %v356_v27 = vld [vmem:[%s1178_s5 + $0x1b0] sm:$0xff] }
  0x21   : > { %355 = vst [vmem:[%s1183_s6 + $0xd0] sm:$0xff] %v354_v26  ;;  %v358_v28 = vld [vmem:[%s1178_s5 + $0x1c0] sm:$0xff]  ;;  %v360_v29 = vld [vmem:[%s1178_s5 + $0x1d0] sm:$0xff]  ;;  %357 = vst [vmem:[%s1183_s6 + $0xd8] sm:$0xff] %v356_v27 }
  0x22   : > { %359 = vst [vmem:[%s1183_s6 + $0xe0] sm:$0xff] %v358_v28  ;;  %361 = vst [vmem:[%s1183_s6 + $0xe8] sm:$0xff] %v360_v29  ;;  %v362_v30 = vld [vmem:[%s1178_s5 + $0x1e0] sm:$0xff]  ;;  %v364_v31 = vld [vmem:[%s1178_s5 + $0x1f0] sm:$0xff] }
  0x23   : > { %363 = vst [vmem:[%s1183_s6 + $0xf0] sm:$0xff] %v362_v30  ;;  %365 = vst [vmem:[%s1183_s6 + $0xf8] sm:$0xff] %v364_v31 }
  0x24 PF: > { %p928_p8 = scmp.ge.s32.totalorder %s1103_s19, 1  ;;  %p386_p9 = scmp.lt.s32.totalorder %s1103_s19, 3 }
  0x26   : > { %p387_p10 = pnand %p928_p8, %p386_p9 }
  0x27   : > { %s393_s7 = sand.u32 (!%p387_p10), 1, %s1087_s15   ;;  %s931_s14 = sshll.u32 (!%p387_p10), %s1095_s17, 1 }
  0x28   : > { %390 = sbr.rel (%p387_p10) target bundleno = 322 (0x142), region = 70  ;;  %s929_s8 = sshll.u32 (!%p387_p10), %s393_s7, 8 }
  0x29   : > { %s1254_s11 = scalar_lea.vmem (!%p387_p10), [#allocation3], %s929_s8  ;;  %p450_p11 = scmp.lt.s32.totalorder (!%p387_p10), %s931_s14, 3 }
  0x2a   : > { %s930_s29 = sshll.u32 (!%p387_p10), %s393_s7, 5 }
  0x2b   : > { %s434_s30 = scalar_lea.vmem (!%p387_p10), [#allocation4], %s930_s29 }
  0x2d   : > { %v1064_v32 = vld [vmem:[%s1321_s0 + $0x4] ss:$8 sps:$4 sm:$0xff]   ;;  %v1014_v33 = vld [vmem:[%s1254_s11 + $0x74] ss:$8 sps:$4 sm:$0xff]   ;;  %v1016_v34 = vld [vmem:[%s1254_s11 + $0x70] ss:$8 sps:$4 sm:$0xff]   ;;  %v737_v2 = vlaneseq }
  0x2e   : > { %709 = vmatprep.mubr.bf16.mxu0 %v1064_v32  ;;  %677 = vmatprep.subr.bf16.mxu0 %v1014_v33  ;;  %v1017_v35 = vld [vmem:[%s1254_s11 + $0x64] ss:$8 sps:$4 sm:$0xff]   ;;  %v1019_v36 = vld [vmem:[%s1254_s11 + $0x60] ss:$8 sps:$4 sm:$0xff]   ;;  %v1020_v37 = vld [vmem:[%s1254_s11 + $0x54] ss:$8 sps:$4 sm:$0xff]  }
  0x2f   : > { %678 = vmatpush1.bf16.msra.mxu0 %v1016_v34  ;;  %v1022_v38 = vld [vmem:[%s1254_s11 + $0x50] ss:$8 sps:$4 sm:$0xff]   ;;  %v1023_v39 = vld [vmem:[%s1254_s11 + $0x44] ss:$8 sps:$4 sm:$0xff]   ;;  %v1025_v40 = vld [vmem:[%s1254_s11 + $0x40] ss:$8 sps:$4 sm:$0xff]  }
  0x30   : > { %679 = vmatprep.subr.bf16.mxu0 %v1017_v35  ;;  %v1026_v41 = vld [vmem:[%s1254_s11 + $0x34] ss:$8 sps:$4 sm:$0xff]   ;;  %v1028_v42 = vld [vmem:[%s1254_s11 + $0x30] ss:$8 sps:$4 sm:$0xff]   ;;  %v1029_v43 = vld [vmem:[%s1254_s11 + $0x24] ss:$8 sps:$4 sm:$0xff]  }
  0x31   : > { %v1031_v44 = vld [vmem:[%s1254_s11 + $0x20] ss:$8 sps:$4 sm:$0xff]   ;;  %v1032_v45 = vld [vmem:[%s1254_s11 + $0x14] ss:$8 sps:$4 sm:$0xff]   ;;  %v1034_v46 = vld [vmem:[%s1254_s11 + $0x10] ss:$8 sps:$4 sm:$0xff]  }
  0x32   : > { %v1035_v47 = vld [vmem:[%s1254_s11 + $0x4] ss:$8 sps:$4 sm:$0xff]   ;;  %v1037_v48 = vld [vmem:[%s1254_s11] ss:$8 sps:$4 sm:$0xff]   ;;  %v1038_v49 = vld [vmem:[%s1254_s11 + $0xf4] ss:$8 sps:$4 sm:$0xff]  }
  0x33   : > { %680 = vmatpush1.bf16.msra.mxu0 %v1019_v36  ;;  %v1040_v50 = vld [vmem:[%s1254_s11 + $0xf0] ss:$8 sps:$4 sm:$0xff]   ;;  %v1041_v51 = vld [vmem:[%s1254_s11 + $0xe4] ss:$8 sps:$4 sm:$0xff]   ;;  %v1043_v52 = vld [vmem:[%s1254_s11 + $0xe0] ss:$8 sps:$4 sm:$0xff]  }
  0x34   : > { %681 = vmatprep.subr.bf16.mxu0 %v1020_v37  ;;  %v1044_v53 = vld [vmem:[%s1254_s11 + $0xd4] ss:$8 sps:$4 sm:$0xff]   ;;  %v1046_v54 = vld [vmem:[%s1254_s11 + $0xd0] ss:$8 sps:$4 sm:$0xff]   ;;  %v1047_v55 = vld [vmem:[%s1254_s11 + $0xc4] ss:$8 sps:$4 sm:$0xff]  }
  0x35   : > { %v1049_v56 = vld [vmem:[%s1254_s11 + $0xc0] ss:$8 sps:$4 sm:$0xff]   ;;  %v1050_v57 = vld [vmem:[%s1254_s11 + $0xb4] ss:$8 sps:$4 sm:$0xff]   ;;  %v1052_v58 = vld [vmem:[%s1254_s11 + $0xb0] ss:$8 sps:$4 sm:$0xff]  }
  0x36   : > { %v1053_v59 = vld [vmem:[%s1254_s11 + $0xa4] ss:$8 sps:$4 sm:$0xff]   ;;  %v1055_v60 = vld [vmem:[%s1254_s11 + $0xa0] ss:$8 sps:$4 sm:$0xff]   ;;  %v1056_v61 = vld [vmem:[%s1254_s11 + $0x94] ss:$8 sps:$4 sm:$0xff]  }
  0x37   : > { %682 = vmatpush1.bf16.msra.mxu0 %v1022_v38  ;;  %v1058_v62 = vld [vmem:[%s1254_s11 + $0x90] ss:$8 sps:$4 sm:$0xff]   ;;  %v1059_v63 = vld [vmem:[%s1254_s11 + $0x84] ss:$8 sps:$4 sm:$0xff]   ;;  %v1061_v0 = vld [vmem:[%s1254_s11 + $0x80] ss:$8 sps:$4 sm:$0xff]  }
  0x38   : > { %683 = vmatprep.subr.bf16.mxu0 %v1023_v39  ;;  %v1062_v1 = vld [vmem:[%s1321_s0] ss:$8 sps:$4 sm:$0xff]   ;;  %s1334_s14 = smov (!%p450_p11, %s931_s14), 3  ;;  %v738_v3 = vshrl.u32 %v737_v2, 7  ;;  %s973_s15 = sshll.u32 (%p1165_p6), %s1095_s17, 4 }
  0x39   : > { %s452_s23 = scalar_lea.vmem %s1323_s2, %s1334_s14  ;;  %s457_s28 = scalar_lea.vmem %s1324_s3, %s1334_s14 }
  0x3a   : > { %v739_v4 = vsub.s32 0, %v738_v3  ;;  %v735_v5 = vld [vmem:[%s452_s23] sm:$0x3]  ;;  %v743_v6 = vsub.s32 1, %v738_v3  ;;  %s783_s7 = scalar_lea.vmem (%p1165_p6), %s1325_s4, %s973_s15 }
  0x3b   : > { %684 = vmatpush1.bf16.msra.mxu0 %v1025_v40  ;;  %v751_v7 = vld [vmem:[%s457_s28] sm:$0x3] }
  0x3c   : > { %685 = vmatprep.subr.bf16.mxu0 %v1026_v41  ;;  %v740_v8 = vrot.slane %v735_v5, %v739_v4  ;;  %v756_v9 = vrot.slane %v751_v7, %v739_v4  ;;  %v744_v10 = vrot.slane %v735_v5, %v743_v6  ;;  %v760_v13 = vrot.slane %v751_v7, %v743_v6 }
  0x3f   : > { %686 = vmatpush1.bf16.msra.mxu0 %v1028_v42 }
  0x40   : > { %687 = vmatprep.subr.bf16.mxu0 %v1029_v43 }
  0x43   : > { %688 = vmatpush1.bf16.msra.mxu0 %v1031_v44 }
  0x44   : > { %689 = vmatprep.subr.bf16.mxu0 %v1032_v45 }
  0x47   : > { %690 = vmatpush1.bf16.msra.mxu0 %v1034_v46 }
  0x48   : > { %691 = vmatprep.subr.bf16.mxu0 %v1035_v47 }
  0x4b   : > { %692 = vmatpush1.bf16.msra.mxu0 %v1037_v48 }
  0x4c   : > { %693 = vmatprep.subr.bf16.mxu0 %v1038_v49 }
  0x4f   : > { %694 = vmatpush2.bf16.msra.mxu0 %v1040_v50 }
  0x50   : > { %695 = vmatprep.subr.bf16.mxu0 %v1041_v51 }
  0x53   : > { %696 = vmatpush2.bf16.msra.mxu0 %v1043_v52 }
  0x54   : > { %697 = vmatprep.subr.bf16.mxu0 %v1044_v53 }
  0x57   : > { %698 = vmatpush2.bf16.msra.mxu0 %v1046_v54 }
  0x58   : > { %699 = vmatprep.subr.bf16.mxu0 %v1047_v55 }
  0x5b   : > { %700 = vmatpush2.bf16.msra.mxu0 %v1049_v56 }
  0x5c   : > { %701 = vmatprep.subr.bf16.mxu0 %v1050_v57 }
  0x5f   : > { %702 = vmatpush2.bf16.msra.mxu0 %v1052_v58 }
  0x60   : > { %703 = vmatprep.subr.bf16.mxu0 %v1053_v59 }
  0x63   : > { %704 = vmatpush2.bf16.msra.mxu0 %v1055_v60 }
  0x64   : > { %705 = vmatprep.subr.bf16.mxu0 %v1056_v61 }
  0x67   : > { %706 = vmatpush2.bf16.msra.mxu0 %v1058_v62 }
  0x68   : > { %707 = vmatprep.subr.bf16.mxu0 %v1059_v63 }
  0x6b   : > { %708 = vmatpush2.bf16.msra.mxu0 %v1061_v0 }
  0x6e   : > { %710 = vmatmul.mubr.bf16.vlgmr.msra.gmra.mxu0 %v1062_v1 }
 0x12e   : > { %v711_v11 = vpop.f32.mrf.mxu0 }
 0x12f   : > { %v747_v12 = vmul.f32 %v740_v8, %v711_v11 }
 0x130   : > { %v713_v14 = vpop.f32.mrf.mxu0 }
 0x131   : > { %v763_v15 = vadd.f32 %v756_v9, %v747_v12  ;;  %v748_v16 = vmul.f32 %v744_v10, %v713_v14 }
 0x132   : > { %v715_v17 = vpop.f32.mrf.mxu0 }
 0x133   : > { %767 = vst [vmem:[%s434_s30] sm:$0xff] %v763_v15  ;;  %v764_v18 = vadd.f32 %v760_v13, %v748_v16  ;;  %v749_v19 = vmul.f32 %v740_v8, %v715_v17 }
 0x134   : > { %v717_v20 = vpop.f32.mrf.mxu0 }
 0x135   : > { %768 = vst [vmem:[%s434_s30 + $0x8] sm:$0xff] %v764_v18  ;;  %v765_v21 = vadd.f32 %v756_v9, %v749_v19  ;;  %v750_v22 = vmul.f32 %v744_v10, %v717_v20  ;;  %777 = sbr.rel (!%p1165_p6) target bundleno = 322 (0x142), region = 86 }
 0x137   : > { %769 = vst [vmem:[%s434_s30 + $0x10] sm:$0xff] %v765_v21  ;;  %v766_v23 = vadd.f32 %v760_v13, %v750_v22 }
 0x139   : > { %770 = vst [vmem:[%s434_s30 + $0x18] sm:$0xff] %v766_v23 }
 0x13a   : > { %v796_v24 = vld [vmem:[%s434_s30] sm:$0xff] }
 0x13b   : > { %797 = vst [vmem:[%s783_s7] sm:$0xff] %v796_v24 }
 0x13c   : > { %v798_v25 = vld [vmem:[%s434_s30 + $0x8] sm:$0xff] }
 0x13d   : > { %799 = vst [vmem:[%s783_s7 + $0x8] sm:$0xff] %v798_v25 }
 0x13e   : > { %v800_v26 = vld [vmem:[%s434_s30 + $0x10] sm:$0xff] }
 0x13f   : > { %801 = vst [vmem:[%s783_s7 + $0x20] sm:$0xff] %v800_v26 }
 0x140   : > { %v802_v27 = vld [vmem:[%s434_s30 + $0x18] sm:$0xff] }
 0x141   : > { %803 = vst [vmem:[%s783_s7 + $0x28] sm:$0xff] %v802_v27 }
 0x142 PF: > { %s14_s19 = sadd.s32 1, %s1103_s19   ;;  %s1327_s15 = smov %s1091_s16 }
 0x143   : > { %p11_p12 = scmp.ge.s32.totalorder %s14_s19, 4   ;;  %s1328_s16 = smov %s1170_s25 }
 0x144   : > { %s1329_s17 = smov %s1099_s18  ;;  %s1330_s18 = smov %s1332_s20 }
 0x145   :  { %13 = sbr.rel (!%p11_p12) target bundleno = 3 (0x3), region = 149 }

// kernel: pyresnet_forward.33
= control target key start
LH: loop header
LB: loop body
LE: loop exit
PB: predicated region body
PF: predicated region fallthrough
CT: control target
= control target key end

     0   :  { %s44_s0 = inlined_call_operand.vmem [shape: f32[2,1,512], index: 0, kind: input, shape index: {}]   ;;  %s45_s1 = inlined_call_operand.vmem [shape: f32[2,512], index: 1, kind: output, shape index: {}]  }
   0x1   :  { %v27_v0 = vld [vmem:[%s44_s0] sm:$0xff]  }
   0x2   :  { %26 = vst.sshfl [vmem:[%s45_s1] sm:$0xff pattern:$0x75316420] %v27_v0 }

// kernel: pyresnet_forward.32
= control target key start
LH: loop header
LB: loop body
LE: loop exit
PB: predicated region body
PF: predicated region fallthrough
CT: control target
= control target key end

     0   :  { %s2813_s0 = inlined_call_operand.vmem [shape: bf16[16,4608], index: 0, kind: input, shape index: {}]   ;;  %s2814_s1 = inlined_call_operand.vmem [shape: bf16[4608,512], index: 1, kind: input, shape index: {}]   ;;  %s2815_s2 = inlined_call_operand.vmem [shape: f32[1,512], index: 2, kind: input, shape index: {}]   ;;  %s2816_s3 = inlined_call_operand.vmem [shape: f32[1,512], index: 3, kind: input, shape index: {}]   ;;  %s2817_s4 = inlined_call_operand.vmem [shape: f32[16,512], index: 4, kind: input, shape index: {}]   ;;  %s2818_s5 = inlined_call_operand.vmem [shape: f32[16,512], index: 5, kind: output, shape index: {}]  }
   0x1   :  { %2821 = sst [smem:[#allocation10_spill]] %s2813_s0 }
   0x2   :  { %2822 = sst [smem:[#allocation11_spill]] %s2814_s1 }
   0x3   :  { %s2297_s18 = smov 0   ;;  %s2299_s19 = smov 0  }
   0x4   :  { %s2301_s20 = smov 0   ;;  %s2303_s21 = smov 0  }
   0x5   :  { %s2305_s22 = smov 0   ;;  %s2307_s23 = smov 0  }
   0x6   :  { %s2309_s24 = smov 0   ;;  %s2311_s25 = smov 0  }
   0x7   :  { %s2313_s26 = smov 0   ;;  %s2315_s27 = smov 0  }
   0x8   :  { %s2317_s28 = smov 0  }
   0x9 LB: > { %s1803_s29 = sadd.s32 4294967295, %s2264_s28   ;;  %s27_s30 = sadd.s32 1, %s2256_s26  ;;  %s2264_s28 = sphi %s2317_s28, %s15_s28   ;;  %s2260_s27 = sphi %s2315_s27, %s2844_s27   ;;  %s2256_s26 = sphi %s2313_s26, %s2843_s26   ;;  %s2252_s25 = sphi %s2311_s25, %s2842_s25   ;;  %s2248_s24 = sphi %s2309_s24, %s2841_s24   ;;  %s2244_s23 = sphi %s2307_s23, %s2840_s23   ;;  %s2240_s22 = sphi %s2305_s22, %s2839_s22   ;;  %s2236_s21 = sphi %s2303_s21, %s2838_s21   ;;  %s2232_s20 = sphi %s2301_s20, %s2837_s20   ;;  %s2228_s19 = sphi %s2299_s19, %s2836_s19   ;;  %s2224_s18 = sphi %s2297_s18, %s2835_s18  }
   0xa   : > { %p28_p0 = scmp.ge.s32.totalorder %s27_s30, 6  ;;  %s30_s6 = sadd.s32 1, %s2260_s27 }
   0xb   : > { %s43_s7 = sadd.s32 1, %s2244_s23  ;;  %p50_p1 = scmp.ne.s32.totalorder %s2244_s23, %s2240_s22 }
   0xc   : > { %s2846_s30 = smov (%p28_p0, %s27_s30), 0  ;;  %s2848_s6 = smov (!%p28_p0, %s30_s6), %s2260_s27 }
   0xd   : > { %2823 = sst [smem:[#allocation7_spill]] %s2846_s30  ;;  %s39_s8 = ssub.s32 %s2256_s26, %s2846_s30 }
   0xe   : > { %p51_p2 = scmp.eq.s32.totalorder %s2264_s28, 0  ;;  %p32_p3 = scmp.ge.s32.totalorder %s2848_s6, 2 }
   0xf   : > { %p41_p4 = scmp.eq.s32.totalorder %s39_s8, 0  ;;  %s71_s10 = sadd.s32 1, %s2236_s21 }
  0x10   : > { %p2366_p5 = por %p51_p2, %p50_p1  ;;  %s2850_s6 = smov (%p32_p3, %s2848_s6), 0 }
  0x11   : > { %2825 = sst [smem:[#allocation8_spill]] %s2850_s6  ;;  %s67_s12 = ssub.s32 %s2260_s27, %s2850_s6 }
  0x12   : > { %s2374_s11 = scalar_select %p41_p4, %s2244_s23, %s43_s7  }
  0x13   : > { %p78_p6 = scmp.ne.s32.totalorder %s2236_s21, %s2232_s20  ;;  %s68_s13 = sor.u32 %s67_s12, %s39_s8 }
  0x14   : > { %2826 = sst [smem:[#allocation9_spill]] %s2374_s11  ;;  %p149_p7 = scmp.eq.s32.totalorder %s67_s12, 0 }
  0x15   : > { %p69_p8 = scmp.eq.s32.totalorder %s68_s13, 0  ;;  %p2382_p9 = por %p78_p6, %p51_p2 }
  0x16   : > { %s151_s15 = sadd.s32 1, %s2228_s19  ;;  %p158_p10 = scmp.ne.s32.totalorder %s2228_s19, %s2224_s18 }
  0x17   : > { %s2390_s16 = scalar_select %p69_p8, %s2236_s21, %s71_s10  }
  0x18   : > { %s2393_s17 = scalar_select %p149_p7, %s2228_s19, %s151_s15  }
  0x19   : > { %p2397_p11 = por %p158_p10, %p51_p2  ;;  %p190_p12 = scmp.eq.s32.totalorder %s1803_s29, 11 }
  0x1a   : > { %p1806_p0 = scmp.ge.s32.totalorder %s2264_s28, 12 }
  0x1b   : > { %p2401_p13 = por %p190_p12, %p158_p10 }
  0x1c   : > { %212 = sbr.rel (%p1806_p0) target bundleno = 109 (0x6d), region = 16 }
  0x21   : > { %215 = sbr.rel (!%p2366_p5) target bundleno = 45 (0x2d), region = 20  ;;  %s217_s10 = sand.u32 (%p2366_p5), 1, %s2244_s23  }
  0x22   : > { %s1928_s12 = smul.u32 (%p2366_p5), 24, %s2256_s26  ;;  %s2830_s0 = sld [smem:[#allocation10_spill]] (%p2366_p5) }
  0x23   : > { %s1932_s13 = smul.u32 (%p2366_p5), 48, %s217_s10 }
  0x25   : > { %s219_s29 = scalar_lea.vmem (%p2366_p5), [#allocation3], %s1932_s13 }
  0x28   : > { %s225_s30 = scalar_lea.vmem %s2830_s0, %s1928_s12 }
  0x29   : > { %v238_v0 = vld [vmem:[%s225_s30] sm:$0xff]  ;;  %v240_v1 = vld [vmem:[%s225_s30 + $0x8] sm:$0xff]  ;;  %v242_v2 = vld [vmem:[%s225_s30 + $0x10] sm:$0xff] }
  0x2a   : > { %239 = vst [vmem:[%s219_s29] sm:$0xff] %v238_v0  ;;  %241 = vst [vmem:[%s219_s29 + $0x8] sm:$0xff] %v240_v1  ;;  %v244_v3 = vld [vmem:[%s225_s30 + $0x90] sm:$0xff]  ;;  %v246_v4 = vld [vmem:[%s225_s30 + $0x98] sm:$0xff] }
  0x2b   : > { %243 = vst [vmem:[%s219_s29 + $0x10] sm:$0xff] %v242_v2  ;;  %v248_v5 = vld [vmem:[%s225_s30 + $0xa0] sm:$0xff]  ;;  %245 = vst [vmem:[%s219_s29 + $0x18] sm:$0xff] %v244_v3 }
  0x2c   : > { %247 = vst [vmem:[%s219_s29 + $0x20] sm:$0xff] %v246_v4  ;;  %249 = vst [vmem:[%s219_s29 + $0x28] sm:$0xff] %v248_v5 }
  0x2d PF: > { %255 = sbr.rel (!%p2382_p9) target bundleno = 103 (0x67), region = 43  ;;  %s257_s6 = sand.u32 (%p2382_p9), 1, %s2236_s21  }
  0x2e   : > { %s1933_s9 = smul.u32 (%p2382_p9), 768, %s257_s6  ;;  %s1808_s10 = sshll.u32 (%p2382_p9), %s2260_s27, 1 }
  0x2f   : > { %s1929_s12 = smul.u32 (%p2382_p9), 384, %s2256_s26  ;;  %s2831_s1 = sld [smem:[#allocation11_spill]] (%p2382_p9) }
  0x30   : > { %s2426_s14 = scalar_lea.vmem (%p2382_p9), [#allocation4], %s1933_s9 }
  0x31   : > { %s263_s13 = sadd.s32 (%p2382_p9), %s1929_s12, %s1808_s10 }
  0x32   : > { %s1810_s15 = sshll.u32 %s263_s13, 2 }
  0x35   : > { %s2421_s30 = scalar_lea.vmem %s2831_s1, %s1810_s15 }
  0x36   : > { %v484_v6 = vld [vmem:[%s2421_s30] sm:$0xff]  ;;  %v486_v7 = vld [vmem:[%s2421_s30 + $0x10] sm:$0xff] }
  0x37   : > { %v488_v8 = vld [vmem:[%s2421_s30 + $0x20] sm:$0xff]  ;;  %485 = vst [vmem:[%s2426_s14] sm:$0xff] %v484_v6  ;;  %487 = vst [vmem:[%s2426_s14 + $0x8] sm:$0xff] %v486_v7  ;;  %v490_v9 = vld [vmem:[%s2421_s30 + $0x30] sm:$0xff] }
  0x38   : > { %489 = vst [vmem:[%s2426_s14 + $0x10] sm:$0xff] %v488_v8  ;;  %v492_v10 = vld [vmem:[%s2421_s30 + $0x40] sm:$0xff]  ;;  %v494_v11 = vld [vmem:[%s2421_s30 + $0x50] sm:$0xff]  ;;  %491 = vst [vmem:[%s2426_s14 + $0x18] sm:$0xff] %v490_v9 }
  0x39   : > { %493 = vst [vmem:[%s2426_s14 + $0x20] sm:$0xff] %v492_v10  ;;  %495 = vst [vmem:[%s2426_s14 + $0x28] sm:$0xff] %v494_v11  ;;  %v496_v12 = vld [vmem:[%s2421_s30 + $0x60] sm:$0xff]  ;;  %v498_v13 = vld [vmem:[%s2421_s30 + $0x70] sm:$0xff] }
  0x3a   : > { %v500_v14 = vld [vmem:[%s2421_s30 + $0x80] sm:$0xff]  ;;  %497 = vst [vmem:[%s2426_s14 + $0x30] sm:$0xff] %v496_v12  ;;  %499 = vst [vmem:[%s2426_s14 + $0x38] sm:$0xff] %v498_v13  ;;  %v502_v15 = vld [vmem:[%s2421_s30 + $0x90] sm:$0xff] }
  0x3b   : > { %501 = vst [vmem:[%s2426_s14 + $0x40] sm:$0xff] %v500_v14  ;;  %v504_v16 = vld [vmem:[%s2421_s30 + $0xa0] sm:$0xff]  ;;  %v506_v17 = vld [vmem:[%s2421_s30 + $0xb0] sm:$0xff]  ;;  %503 = vst [vmem:[%s2426_s14 + $0x48] sm:$0xff] %v502_v15 }
  0x3c   : > { %505 = vst [vmem:[%s2426_s14 + $0x50] sm:$0xff] %v504_v16  ;;  %507 = vst [vmem:[%s2426_s14 + $0x58] sm:$0xff] %v506_v17  ;;  %v508_v18 = vld [vmem:[%s2421_s30 + $0xc0] sm:$0xff]  ;;  %v510_v19 = vld [vmem:[%s2421_s30 + $0xd0] sm:$0xff] }
  0x3d   : > { %v512_v20 = vld [vmem:[%s2421_s30 + $0xe0] sm:$0xff]  ;;  %509 = vst [vmem:[%s2426_s14 + $0x60] sm:$0xff] %v508_v18  ;;  %511 = vst [vmem:[%s2426_s14 + $0x68] sm:$0xff] %v510_v19  ;;  %v514_v21 = vld [vmem:[%s2421_s30 + $0xf0] sm:$0xff] }
  0x3e   : > { %513 = vst [vmem:[%s2426_s14 + $0x70] sm:$0xff] %v512_v20  ;;  %v516_v22 = vld [vmem:[%s2421_s30 + $0x100] sm:$0xff]  ;;  %v518_v23 = vld [vmem:[%s2421_s30 + $0x110] sm:$0xff]  ;;  %515 = vst [vmem:[%s2426_s14 + $0x78] sm:$0xff] %v514_v21 }
  0x3f   : > { %517 = vst [vmem:[%s2426_s14 + $0x80] sm:$0xff] %v516_v22  ;;  %519 = vst [vmem:[%s2426_s14 + $0x88] sm:$0xff] %v518_v23  ;;  %v520_v24 = vld [vmem:[%s2421_s30 + $0x120] sm:$0xff]  ;;  %v522_v25 = vld [vmem:[%s2421_s30 + $0x130] sm:$0xff] }
  0x40   : > { %v524_v26 = vld [vmem:[%s2421_s30 + $0x140] sm:$0xff]  ;;  %521 = vst [vmem:[%s2426_s14 + $0x90] sm:$0xff] %v520_v24  ;;  %523 = vst [vmem:[%s2426_s14 + $0x98] sm:$0xff] %v522_v25  ;;  %v526_v27 = vld [vmem:[%s2421_s30 + $0x150] sm:$0xff] }
  0x41   : > { %525 = vst [vmem:[%s2426_s14 + $0xa0] sm:$0xff] %v524_v26  ;;  %v528_v28 = vld [vmem:[%s2421_s30 + $0x160] sm:$0xff]  ;;  %v530_v29 = vld [vmem:[%s2421_s30 + $0x170] sm:$0xff]  ;;  %527 = vst [vmem:[%s2426_s14 + $0xa8] sm:$0xff] %v526_v27 }
  0x42   : > { %529 = vst [vmem:[%s2426_s14 + $0xb0] sm:$0xff] %v528_v28  ;;  %531 = vst [vmem:[%s2426_s14 + $0xb8] sm:$0xff] %v530_v29  ;;  %v532_v30 = vld [vmem:[%s2421_s30 + $0x180] sm:$0xff]  ;;  %v534_v31 = vld [vmem:[%s2421_s30 + $0x190] sm:$0xff] }
  0x43   : > { %v536_v32 = vld [vmem:[%s2421_s30 + $0x1a0] sm:$0xff]  ;;  %533 = vst [vmem:[%s2426_s14 + $0xc0] sm:$0xff] %v532_v30  ;;  %535 = vst [vmem:[%s2426_s14 + $0xc8] sm:$0xff] %v534_v31  ;;  %v538_v33 = vld [vmem:[%s2421_s30 + $0x1b0] sm:$0xff] }
  0x44   : > { %537 = vst [vmem:[%s2426_s14 + $0xd0] sm:$0xff] %v536_v32  ;;  %v540_v34 = vld [vmem:[%s2421_s30 + $0x1c0] sm:$0xff]  ;;  %v542_v35 = vld [vmem:[%s2421_s30 + $0x1d0] sm:$0xff]  ;;  %539 = vst [vmem:[%s2426_s14 + $0xd8] sm:$0xff] %v538_v33 }
  0x45   : > { %541 = vst [vmem:[%s2426_s14 + $0xe0] sm:$0xff] %v540_v34  ;;  %543 = vst [vmem:[%s2426_s14 + $0xe8] sm:$0xff] %v542_v35  ;;  %v544_v36 = vld [vmem:[%s2421_s30 + $0x1e0] sm:$0xff]  ;;  %v546_v37 = vld [vmem:[%s2421_s30 + $0x1f0] sm:$0xff] }
  0x46   : > { %v548_v38 = vld [vmem:[%s2421_s30 + $0x200] sm:$0xff]  ;;  %545 = vst [vmem:[%s2426_s14 + $0xf0] sm:$0xff] %v544_v36  ;;  %547 = vst [vmem:[%s2426_s14 + $0xf8] sm:$0xff] %v546_v37  ;;  %v550_v39 = vld [vmem:[%s2421_s30 + $0x210] sm:$0xff] }
  0x47   : > { %549 = vst [vmem:[%s2426_s14 + $0x100] sm:$0xff] %v548_v38  ;;  %v552_v40 = vld [vmem:[%s2421_s30 + $0x220] sm:$0xff]  ;;  %v554_v41 = vld [vmem:[%s2421_s30 + $0x230] sm:$0xff]  ;;  %551 = vst [vmem:[%s2426_s14 + $0x108] sm:$0xff] %v550_v39 }
  0x48   : > { %553 = vst [vmem:[%s2426_s14 + $0x110] sm:$0xff] %v552_v40  ;;  %555 = vst [vmem:[%s2426_s14 + $0x118] sm:$0xff] %v554_v41  ;;  %v556_v42 = vld [vmem:[%s2421_s30 + $0x240] sm:$0xff]  ;;  %v558_v43 = vld [vmem:[%s2421_s30 + $0x250] sm:$0xff] }
  0x49   : > { %v560_v44 = vld [vmem:[%s2421_s30 + $0x260] sm:$0xff]  ;;  %557 = vst [vmem:[%s2426_s14 + $0x120] sm:$0xff] %v556_v42  ;;  %559 = vst [vmem:[%s2426_s14 + $0x128] sm:$0xff] %v558_v43  ;;  %v562_v45 = vld [vmem:[%s2421_s30 + $0x270] sm:$0xff] }
  0x4a   : > { %561 = vst [vmem:[%s2426_s14 + $0x130] sm:$0xff] %v560_v44  ;;  %v564_v46 = vld [vmem:[%s2421_s30 + $0x280] sm:$0xff]  ;;  %v566_v47 = vld [vmem:[%s2421_s30 + $0x290] sm:$0xff]  ;;  %563 = vst [vmem:[%s2426_s14 + $0x138] sm:$0xff] %v562_v45 }
  0x4b   : > { %565 = vst [vmem:[%s2426_s14 + $0x140] sm:$0xff] %v564_v46  ;;  %567 = vst [vmem:[%s2426_s14 + $0x148] sm:$0xff] %v566_v47  ;;  %v568_v48 = vld [vmem:[%s2421_s30 + $0x2a0] sm:$0xff]  ;;  %v570_v49 = vld [vmem:[%s2421_s30 + $0x2b0] sm:$0xff] }
  0x4c   : > { %v572_v50 = vld [vmem:[%s2421_s30 + $0x2c0] sm:$0xff]  ;;  %569 = vst [vmem:[%s2426_s14 + $0x150] sm:$0xff] %v568_v48  ;;  %571 = vst [vmem:[%s2426_s14 + $0x158] sm:$0xff] %v570_v49  ;;  %v574_v51 = vld [vmem:[%s2421_s30 + $0x2d0] sm:$0xff] }
  0x4d   : > { %573 = vst [vmem:[%s2426_s14 + $0x160] sm:$0xff] %v572_v50  ;;  %v576_v52 = vld [vmem:[%s2421_s30 + $0x2e0] sm:$0xff]  ;;  %v578_v53 = vld [vmem:[%s2421_s30 + $0x2f0] sm:$0xff]  ;;  %575 = vst [vmem:[%s2426_s14 + $0x168] sm:$0xff] %v574_v51 }
  0x4e   : > { %577 = vst [vmem:[%s2426_s14 + $0x170] sm:$0xff] %v576_v52  ;;  %579 = vst [vmem:[%s2426_s14 + $0x178] sm:$0xff] %v578_v53  ;;  %v580_v54 = vld [vmem:[%s2421_s30 + $0x300] sm:$0xff]  ;;  %v582_v55 = vld [vmem:[%s2421_s30 + $0x310] sm:$0xff] }
  0x4f   : > { %v584_v56 = vld [vmem:[%s2421_s30 + $0x320] sm:$0xff]  ;;  %581 = vst [vmem:[%s2426_s14 + $0x180] sm:$0xff] %v580_v54  ;;  %583 = vst [vmem:[%s2426_s14 + $0x188] sm:$0xff] %v582_v55  ;;  %v586_v57 = vld [vmem:[%s2421_s30 + $0x330] sm:$0xff] }
  0x50   : > { %585 = vst [vmem:[%s2426_s14 + $0x190] sm:$0xff] %v584_v56  ;;  %v588_v58 = vld [vmem:[%s2421_s30 + $0x340] sm:$0xff]  ;;  %v590_v59 = vld [vmem:[%s2421_s30 + $0x350] sm:$0xff]  ;;  %587 = vst [vmem:[%s2426_s14 + $0x198] sm:$0xff] %v586_v57 }
  0x51   : > { %589 = vst [vmem:[%s2426_s14 + $0x1a0] sm:$0xff] %v588_v58  ;;  %591 = vst [vmem:[%s2426_s14 + $0x1a8] sm:$0xff] %v590_v59  ;;  %v592_v60 = vld [vmem:[%s2421_s30 + $0x360] sm:$0xff]  ;;  %v594_v61 = vld [vmem:[%s2421_s30 + $0x370] sm:$0xff] }
  0x52   : > { %v596_v62 = vld [vmem:[%s2421_s30 + $0x380] sm:$0xff]  ;;  %593 = vst [vmem:[%s2426_s14 + $0x1b0] sm:$0xff] %v592_v60  ;;  %595 = vst [vmem:[%s2426_s14 + $0x1b8] sm:$0xff] %v594_v61  ;;  %v598_v63 = vld [vmem:[%s2421_s30 + $0x390] sm:$0xff] }
  0x53   : > { %597 = vst [vmem:[%s2426_s14 + $0x1c0] sm:$0xff] %v596_v62  ;;  %v600_v0 = vld [vmem:[%s2421_s30 + $0x3a0] sm:$0xff]  ;;  %v602_v1 = vld [vmem:[%s2421_s30 + $0x3b0] sm:$0xff]  ;;  %599 = vst [vmem:[%s2426_s14 + $0x1c8] sm:$0xff] %v598_v63 }
  0x54   : > { %601 = vst [vmem:[%s2426_s14 + $0x1d0] sm:$0xff] %v600_v0  ;;  %603 = vst [vmem:[%s2426_s14 + $0x1d8] sm:$0xff] %v602_v1  ;;  %v604_v2 = vld [vmem:[%s2421_s30 + $0x3c0] sm:$0xff]  ;;  %v606_v3 = vld [vmem:[%s2421_s30 + $0x3d0] sm:$0xff] }
  0x55   : > { %v608_v4 = vld [vmem:[%s2421_s30 + $0x3e0] sm:$0xff]  ;;  %605 = vst [vmem:[%s2426_s14 + $0x1e0] sm:$0xff] %v604_v2  ;;  %607 = vst [vmem:[%s2426_s14 + $0x1e8] sm:$0xff] %v606_v3  ;;  %v610_v5 = vld [vmem:[%s2421_s30 + $0x3f0] sm:$0xff] }
  0x56   : > { %609 = vst [vmem:[%s2426_s14 + $0x1f0] sm:$0xff] %v608_v4  ;;  %v612_v6 = vld [vmem:[%s2421_s30 + $0x400] sm:$0xff]  ;;  %v614_v7 = vld [vmem:[%s2421_s30 + $0x410] sm:$0xff]  ;;  %611 = vst [vmem:[%s2426_s14 + $0x1f8] sm:$0xff] %v610_v5 }
  0x57   : > { %613 = vst [vmem:[%s2426_s14 + $0x200] sm:$0xff] %v612_v6  ;;  %615 = vst [vmem:[%s2426_s14 + $0x208] sm:$0xff] %v614_v7  ;;  %v616_v8 = vld [vmem:[%s2421_s30 + $0x420] sm:$0xff]  ;;  %v618_v9 = vld [vmem:[%s2421_s30 + $0x430] sm:$0xff] }
  0x58   : > { %v620_v10 = vld [vmem:[%s2421_s30 + $0x440] sm:$0xff]  ;;  %617 = vst [vmem:[%s2426_s14 + $0x210] sm:$0xff] %v616_v8  ;;  %619 = vst [vmem:[%s2426_s14 + $0x218] sm:$0xff] %v618_v9  ;;  %v622_v11 = vld [vmem:[%s2421_s30 + $0x450] sm:$0xff] }
  0x59   : > { %621 = vst [vmem:[%s2426_s14 + $0x220] sm:$0xff] %v620_v10  ;;  %v624_v12 = vld [vmem:[%s2421_s30 + $0x460] sm:$0xff]  ;;  %v626_v13 = vld [vmem:[%s2421_s30 + $0x470] sm:$0xff]  ;;  %623 = vst [vmem:[%s2426_s14 + $0x228] sm:$0xff] %v622_v11 }
  0x5a   : > { %625 = vst [vmem:[%s2426_s14 + $0x230] sm:$0xff] %v624_v12  ;;  %627 = vst [vmem:[%s2426_s14 + $0x238] sm:$0xff] %v626_v13  ;;  %v628_v14 = vld [vmem:[%s2421_s30 + $0x480] sm:$0xff]  ;;  %v630_v15 = vld [vmem:[%s2421_s30 + $0x490] sm:$0xff] }
  0x5b   : > { %v632_v16 = vld [vmem:[%s2421_s30 + $0x4a0] sm:$0xff]  ;;  %629 = vst [vmem:[%s2426_s14 + $0x240] sm:$0xff] %v628_v14  ;;  %631 = vst [vmem:[%s2426_s14 + $0x248] sm:$0xff] %v630_v15  ;;  %v634_v17 = vld [vmem:[%s2421_s30 + $0x4b0] sm:$0xff] }
  0x5c   : > { %633 = vst [vmem:[%s2426_s14 + $0x250] sm:$0xff] %v632_v16  ;;  %v636_v18 = vld [vmem:[%s2421_s30 + $0x4c0] sm:$0xff]  ;;  %v638_v19 = vld [vmem:[%s2421_s30 + $0x4d0] sm:$0xff]  ;;  %635 = vst [vmem:[%s2426_s14 + $0x258] sm:$0xff] %v634_v17 }
  0x5d   : > { %637 = vst [vmem:[%s2426_s14 + $0x260] sm:$0xff] %v636_v18  ;;  %639 = vst [vmem:[%s2426_s14 + $0x268] sm:$0xff] %v638_v19  ;;  %v640_v20 = vld [vmem:[%s2421_s30 + $0x4e0] sm:$0xff]  ;;  %v642_v21 = vld [vmem:[%s2421_s30 + $0x4f0] sm:$0xff] }
  0x5e   : > { %v644_v22 = vld [vmem:[%s2421_s30 + $0x500] sm:$0xff]  ;;  %641 = vst [vmem:[%s2426_s14 + $0x270] sm:$0xff] %v640_v20  ;;  %643 = vst [vmem:[%s2426_s14 + $0x278] sm:$0xff] %v642_v21  ;;  %v646_v23 = vld [vmem:[%s2421_s30 + $0x510] sm:$0xff] }
  0x5f   : > { %645 = vst [vmem:[%s2426_s14 + $0x280] sm:$0xff] %v644_v22  ;;  %v648_v24 = vld [vmem:[%s2421_s30 + $0x520] sm:$0xff]  ;;  %v650_v25 = vld [vmem:[%s2421_s30 + $0x530] sm:$0xff]  ;;  %647 = vst [vmem:[%s2426_s14 + $0x288] sm:$0xff] %v646_v23 }
  0x60   : > { %649 = vst [vmem:[%s2426_s14 + $0x290] sm:$0xff] %v648_v24  ;;  %651 = vst [vmem:[%s2426_s14 + $0x298] sm:$0xff] %v650_v25  ;;  %v652_v26 = vld [vmem:[%s2421_s30 + $0x540] sm:$0xff]  ;;  %v654_v27 = vld [vmem:[%s2421_s30 + $0x550] sm:$0xff] }
  0x61   : > { %v656_v28 = vld [vmem:[%s2421_s30 + $0x560] sm:$0xff]  ;;  %653 = vst [vmem:[%s2426_s14 + $0x2a0] sm:$0xff] %v652_v26  ;;  %655 = vst [vmem:[%s2426_s14 + $0x2a8] sm:$0xff] %v654_v27  ;;  %v658_v29 = vld [vmem:[%s2421_s30 + $0x570] sm:$0xff] }
  0x62   : > { %657 = vst [vmem:[%s2426_s14 + $0x2b0] sm:$0xff] %v656_v28  ;;  %v660_v30 = vld [vmem:[%s2421_s30 + $0x580] sm:$0xff]  ;;  %v662_v31 = vld [vmem:[%s2421_s30 + $0x590] sm:$0xff]  ;;  %659 = vst [vmem:[%s2426_s14 + $0x2b8] sm:$0xff] %v658_v29 }
  0x63   : > { %661 = vst [vmem:[%s2426_s14 + $0x2c0] sm:$0xff] %v660_v30  ;;  %663 = vst [vmem:[%s2426_s14 + $0x2c8] sm:$0xff] %v662_v31  ;;  %v664_v32 = vld [vmem:[%s2421_s30 + $0x5a0] sm:$0xff]  ;;  %v666_v33 = vld [vmem:[%s2421_s30 + $0x5b0] sm:$0xff] }
  0x64   : > { %v668_v34 = vld [vmem:[%s2421_s30 + $0x5c0] sm:$0xff]  ;;  %665 = vst [vmem:[%s2426_s14 + $0x2d0] sm:$0xff] %v664_v32  ;;  %667 = vst [vmem:[%s2426_s14 + $0x2d8] sm:$0xff] %v666_v33  ;;  %v670_v35 = vld [vmem:[%s2421_s30 + $0x5d0] sm:$0xff] }
  0x65   : > { %669 = vst [vmem:[%s2426_s14 + $0x2e0] sm:$0xff] %v668_v34  ;;  %v672_v36 = vld [vmem:[%s2421_s30 + $0x5e0] sm:$0xff]  ;;  %v674_v37 = vld [vmem:[%s2421_s30 + $0x5f0] sm:$0xff]  ;;  %671 = vst [vmem:[%s2426_s14 + $0x2e8] sm:$0xff] %v670_v35 }
  0x66   : > { %673 = vst [vmem:[%s2426_s14 + $0x2f0] sm:$0xff] %v672_v36  ;;  %675 = vst [vmem:[%s2426_s14 + $0x2f8] sm:$0xff] %v674_v37 }
  0x67 PF: > { %697 = sbr.rel (!%p2397_p11) target bundleno = 109 (0x6d), region = 89  ;;  %s699_s0 = sand.u32 (%p2397_p11), 1, %s2228_s19  }
  0x68   : > { %s1930_s11 = sshll.u32 (%p2397_p11), %s2260_s27, 4  ;;  %s1811_s29 = sshll.u32 (%p2397_p11), %s699_s0, 5 }
  0x69   : > { %s707_s10 = scalar_lea.vmem (%p2397_p11), %s2817_s4, %s1930_s11  ;;  %s701_s12 = scalar_lea.vmem (%p2397_p11), [#allocation5], %s1811_s29 }
  0x6a   : > { %v720_v38 = vld [vmem:[%s707_s10] sm:$0xff] (%p2397_p11)  ;;  %v722_v39 = vld [vmem:[%s707_s10 + $0x8] sm:$0xff] (%p2397_p11) }
  0x6b   : > { %v724_v40 = vld [vmem:[%s707_s10 + $0x20] sm:$0xff] (%p2397_p11)  ;;  %721 = vst [vmem:[%s701_s12] sm:$0xff] (%p2397_p11), %v720_v38  ;;  %723 = vst [vmem:[%s701_s12 + $0x8] sm:$0xff] (%p2397_p11), %v722_v39  ;;  %v726_v41 = vld [vmem:[%s707_s10 + $0x28] sm:$0xff] (%p2397_p11) }
  0x6c   : > { %725 = vst [vmem:[%s701_s12 + $0x10] sm:$0xff] %v724_v40  ;;  %727 = vst [vmem:[%s701_s12 + $0x18] sm:$0xff] %v726_v41 }
  0x6d PF: > { %p1814_p1 = scmp.ge.s32.totalorder %s2264_s28, 1  ;;  %p732_p2 = scmp.lt.s32.totalorder %s2264_s28, 13 }
  0x6f   : > { %p733_p3 = pnand %p1814_p1, %p732_p2 }
  0x70   : > { %s739_s7 = sand.u32 (!%p733_p3), 1, %s2240_s22   ;;  %s746_s13 = sand.u32 (!%p733_p3), 1, %s2232_s20  }
  0x71   : > { %736 = sbr.rel (%p733_p3) target bundleno = 489 (0x1e9), region = 112  ;;  %s753_s30 = sand.u32 (!%p733_p3), 1, %s2224_s18  }
  0x72   : > { %s1934_s15 = smul.u32 (!%p733_p3), 48, %s739_s7  ;;  %s1815_s0 = sshll.u32 (!%p733_p3), %s753_s30, 5 }
  0x73   : > { %s1935_s14 = smul.u32 (!%p733_p3), 768, %s746_s13  ;;  %s1817_s11 = sshll.u32 (!%p733_p3), %s2252_s25, 1 }
  0x74   : > { %p800_p4 = scmp.lt.s32.totalorder (!%p733_p3), %s1817_s11, 3  ;;  %s2640_s22 = scalar_lea.vmem (!%p733_p3), [#allocation3], %s1934_s15 }
  0x75   : > { %s2642_s20 = scalar_lea.vmem (!%p733_p3), [#allocation4], %s1935_s14  ;;  %s2644_s18 = scalar_lea.vmem (!%p733_p3), [#allocation5], %s1815_s0 }
  0x76   : > { %s2852_s11 = smov (!%p800_p4, %s1817_s11), 3  ;;  %s2646_s7 = scalar_lea.vmem [#allocation6], %s1815_s0 }
  0x77   : > { %s802_s9 = scalar_lea.vmem %s2815_s2, %s2852_s11  ;;  %s807_s1 = scalar_lea.vmem %s2816_s3, %s2852_s11 }
  0x78   : > { %p1819_p5 = scmp.ne.s32.totalorder %s2248_s24, 0 }
  0x7a   : > { %816 = sbr.rel (%p1819_p5) target bundleno = 130 (0x82), region = 128 }
  0x7f   : > { %v2266_v42 = vmov 0.0  }
  0x80   : > { %817 = vst [vmem:[#allocation2 + $0x10] sm:$0xff] %v2266_v42  ;;  %818 = vst [vmem:[#allocation2] sm:$0xff] %v2266_v42 }
  0x81   : > { %819 = vst [vmem:[#allocation2 + $0x18] sm:$0xff] %v2266_v42  ;;  %820 = vst [vmem:[#allocation2 + $0x8] sm:$0xff] %v2266_v42 }
  0x82 PF: > { %v2025_v43 = vld [vmem:[%s2642_s20 + $0x74] ss:$8 sps:$4 sm:$0xff]   ;;  %v2029_v45 = vld [vmem:[%s2642_s20 + $0x70] ss:$8 sps:$4 sm:$0xff]   ;;  %v2031_v47 = vld [vmem:[%s2642_s20 + $0x64] ss:$8 sps:$4 sm:$0xff]  }
  0x83   : > { %v2027_v44 = vld [vmem:[%s2642_s20 + $0x174] ss:$8 sps:$4 sm:$0xff]   ;;  %1437 = vmatprep.subr.bf16.mxu0 %v2025_v43  ;;  %v2030_v46 = vld [vmem:[%s2642_s20 + $0x170] ss:$8 sps:$4 sm:$0xff]   ;;  %v2033_v48 = vld [vmem:[%s2642_s20 + $0x164] ss:$8 sps:$4 sm:$0xff]  }
  0x84   : > { %1480 = vmatprep.subr.bf16.mxu1 %v2027_v44  ;;  %1438 = vmatpush1.bf16.msra.mxu0 %v2029_v45  ;;  %v2035_v49 = vld [vmem:[%s2642_s20 + $0x60] ss:$8 sps:$4 sm:$0xff]   ;;  %v2037_v51 = vld [vmem:[%s2642_s20 + $0x54] ss:$8 sps:$4 sm:$0xff]   ;;  %v2041_v53 = vld [vmem:[%s2642_s20 + $0x50] ss:$8 sps:$4 sm:$0xff]  }
  0x85   : > { %1481 = vmatpush1.bf16.msra.mxu1 %v2030_v46  ;;  %1439 = vmatprep.subr.bf16.mxu0 %v2031_v47  ;;  %v2036_v50 = vld [vmem:[%s2642_s20 + $0x160] ss:$8 sps:$4 sm:$0xff]   ;;  %v2039_v52 = vld [vmem:[%s2642_s20 + $0x154] ss:$8 sps:$4 sm:$0xff]   ;;  %v2042_v54 = vld [vmem:[%s2642_s20 + $0x150] ss:$8 sps:$4 sm:$0xff]  }
  0x86   : > { %1482 = vmatprep.subr.bf16.mxu1 %v2033_v48  ;;  %v2043_v55 = vld [vmem:[%s2642_s20 + $0x44] ss:$8 sps:$4 sm:$0xff]   ;;  %v2047_v57 = vld [vmem:[%s2642_s20 + $0x40] ss:$8 sps:$4 sm:$0xff]   ;;  %v2049_v59 = vld [vmem:[%s2642_s20 + $0x34] ss:$8 sps:$4 sm:$0xff]  }
  0x87   : > { %v2045_v56 = vld [vmem:[%s2642_s20 + $0x144] ss:$8 sps:$4 sm:$0xff]   ;;  %v2048_v58 = vld [vmem:[%s2642_s20 + $0x140] ss:$8 sps:$4 sm:$0xff]   ;;  %v2051_v60 = vld [vmem:[%s2642_s20 + $0x134] ss:$8 sps:$4 sm:$0xff]  }
  0x88   : > { %1440 = vmatpush1.bf16.msra.mxu0 %v2035_v49  ;;  %v2053_v61 = vld [vmem:[%s2642_s20 + $0x30] ss:$8 sps:$4 sm:$0xff]   ;;  %v2055_v63 = vld [vmem:[%s2642_s20 + $0x24] ss:$8 sps:$4 sm:$0xff]   ;;  %v2059_v1 = vld [vmem:[%s2642_s20 + $0x20] ss:$8 sps:$4 sm:$0xff]  }
  0x89   : > { %1483 = vmatpush1.bf16.msra.mxu1 %v2036_v50  ;;  %1441 = vmatprep.subr.bf16.mxu0 %v2037_v51  ;;  %v2054_v62 = vld [vmem:[%s2642_s20 + $0x130] ss:$8 sps:$4 sm:$0xff]   ;;  %v2057_v0 = vld [vmem:[%s2642_s20 + $0x124] ss:$8 sps:$4 sm:$0xff]   ;;  %v2060_v2 = vld [vmem:[%s2642_s20 + $0x120] ss:$8 sps:$4 sm:$0xff]  }
  0x8a   : > { %1484 = vmatprep.subr.bf16.mxu1 %v2039_v52  ;;  %v2061_v3 = vld [vmem:[%s2642_s20 + $0x14] ss:$8 sps:$4 sm:$0xff]   ;;  %v2065_v5 = vld [vmem:[%s2642_s20 + $0x10] ss:$8 sps:$4 sm:$0xff]   ;;  %v2067_v7 = vld [vmem:[%s2642_s20 + $0x4] ss:$8 sps:$4 sm:$0xff]  }
  0x8b   : > { %v2063_v4 = vld [vmem:[%s2642_s20 + $0x114] ss:$8 sps:$4 sm:$0xff]   ;;  %v2066_v6 = vld [vmem:[%s2642_s20 + $0x110] ss:$8 sps:$4 sm:$0xff]   ;;  %v2069_v8 = vld [vmem:[%s2642_s20 + $0x104] ss:$8 sps:$4 sm:$0xff]  }
  0x8c   : > { %1442 = vmatpush1.bf16.msra.mxu0 %v2041_v53  ;;  %v2071_v9 = vld [vmem:[%s2642_s20] ss:$8 sps:$4 sm:$0xff]   ;;  %v2073_v11 = vld [vmem:[%s2642_s20 + $0xf4] ss:$8 sps:$4 sm:$0xff]   ;;  %v2077_v13 = vld [vmem:[%s2642_s20 + $0xf0] ss:$8 sps:$4 sm:$0xff]  }
  0x8d   : > { %1485 = vmatpush1.bf16.msra.mxu1 %v2042_v54  ;;  %1443 = vmatprep.subr.bf16.mxu0 %v2043_v55  ;;  %v2072_v10 = vld [vmem:[%s2642_s20 + $0x100] ss:$8 sps:$4 sm:$0xff]   ;;  %v2075_v12 = vld [vmem:[%s2642_s20 + $0x1f4] ss:$8 sps:$4 sm:$0xff]   ;;  %v2078_v14 = vld [vmem:[%s2642_s20 + $0x1f0] ss:$8 sps:$4 sm:$0xff]  }
  0x8e   : > { %1486 = vmatprep.subr.bf16.mxu1 %v2045_v56  ;;  %v2079_v15 = vld [vmem:[%s2642_s20 + $0xe4] ss:$8 sps:$4 sm:$0xff]   ;;  %v2083_v17 = vld [vmem:[%s2642_s20 + $0xe0] ss:$8 sps:$4 sm:$0xff]   ;;  %v2085_v19 = vld [vmem:[%s2642_s20 + $0xd4] ss:$8 sps:$4 sm:$0xff]  }
  0x8f   : > { %v2081_v16 = vld [vmem:[%s2642_s20 + $0x1e4] ss:$8 sps:$4 sm:$0xff]   ;;  %v2084_v18 = vld [vmem:[%s2642_s20 + $0x1e0] ss:$8 sps:$4 sm:$0xff]   ;;  %v2087_v20 = vld [vmem:[%s2642_s20 + $0x1d4] ss:$8 sps:$4 sm:$0xff]  }
  0x90   : > { %1444 = vmatpush1.bf16.msra.mxu0 %v2047_v57  ;;  %v2089_v21 = vld [vmem:[%s2642_s20 + $0xd0] ss:$8 sps:$4 sm:$0xff]   ;;  %v2091_v23 = vld [vmem:[%s2642_s20 + $0xc4] ss:$8 sps:$4 sm:$0xff]   ;;  %v2095_v25 = vld [vmem:[%s2642_s20 + $0xc0] ss:$8 sps:$4 sm:$0xff]  }
  0x91   : > { %1487 = vmatpush1.bf16.msra.mxu1 %v2048_v58  ;;  %1445 = vmatprep.subr.bf16.mxu0 %v2049_v59  ;;  %v2090_v22 = vld [vmem:[%s2642_s20 + $0x1d0] ss:$8 sps:$4 sm:$0xff]   ;;  %v2093_v24 = vld [vmem:[%s2642_s20 + $0x1c4] ss:$8 sps:$4 sm:$0xff]   ;;  %v2096_v26 = vld [vmem:[%s2642_s20 + $0x1c0] ss:$8 sps:$4 sm:$0xff]  }
  0x92   : > { %1488 = vmatprep.subr.bf16.mxu1 %v2051_v60  ;;  %v2097_v27 = vld [vmem:[%s2642_s20 + $0xb4] ss:$8 sps:$4 sm:$0xff]   ;;  %v2101_v31 = vld [vmem:[%s2642_s20 + $0xb0] ss:$8 sps:$4 sm:$0xff]   ;;  %v2103_v33 = vld [vmem:[%s2642_s20 + $0xa4] ss:$8 sps:$4 sm:$0xff]  }
  0x93   : > { %v2123_v28 = vld [vmem:[%s2640_s22 + $0x4] ss:$24 sps:$4 sm:$0xff]   ;;  %v2102_v32 = vld [vmem:[%s2642_s20 + $0x1b0] ss:$8 sps:$4 sm:$0xff]   ;;  %v2107_v35 = vld [vmem:[%s2642_s20 + $0xa0] ss:$8 sps:$4 sm:$0xff]  }
  0x94   : > { %1446 = vmatpush1.bf16.msra.mxu0 %v2053_v61  ;;  %v2099_v29 = vld [vmem:[%s2642_s20 + $0x1b4] ss:$8 sps:$4 sm:$0xff]   ;;  %1469 = vmatprep.mubr.bf16.mxu0 %v2123_v28  ;;  %v2105_v34 = vld [vmem:[%s2642_s20 + $0x1a4] ss:$8 sps:$4 sm:$0xff]   ;;  %v2108_v36 = vld [vmem:[%s2642_s20 + $0x1a0] ss:$8 sps:$4 sm:$0xff]  }
  0x95   : > { %1489 = vmatpush1.bf16.msra.mxu1 %v2054_v62  ;;  %1447 = vmatprep.subr.bf16.mxu0 %v2055_v63  ;;  %v2126_v30 = vld [vmem:[%s2640_s22 + $0xc] ss:$24 sps:$4 sm:$0xff]   ;;  %v2113_v39 = vld [vmem:[%s2642_s20 + $0x90] ss:$8 sps:$4 sm:$0xff]   ;;  %v2119_v43 = vld [vmem:[%s2642_s20 + $0x80] ss:$8 sps:$4 sm:$0xff]  }
  0x96   : > { %1490 = vmatprep.subr.bf16.mxu1 %v2057_v0  ;;  %1512 = vmatprep.mubr.bf16.mxu1 %v2126_v30  ;;  %v2109_v37 = vld [vmem:[%s2642_s20 + $0x94] ss:$8 sps:$4 sm:$0xff]   ;;  %v2114_v40 = vld [vmem:[%s2642_s20 + $0x190] ss:$8 sps:$4 sm:$0xff]   ;;  %v2115_v41 = vld [vmem:[%s2642_s20 + $0x84] ss:$8 sps:$4 sm:$0xff]  }
  0x97   : > { %v2111_v38 = vld [vmem:[%s2642_s20 + $0x194] ss:$8 sps:$4 sm:$0xff]   ;;  %v2117_v42 = vld [vmem:[%s2642_s20 + $0x184] ss:$8 sps:$4 sm:$0xff]   ;;  %v2120_v44 = vld [vmem:[%s2642_s20 + $0x180] ss:$8 sps:$4 sm:$0xff]  }
  0x98   : > { %1448 = vmatpush1.bf16.msra.mxu0 %v2059_v1  ;;  %v2129_v45 = vld [vmem:[%s2642_s20 + $0x274] ss:$8 sps:$4 sm:$0xff]   ;;  %v2121_v46 = vld [vmem:[%s2640_s22] ss:$24 sps:$4 sm:$0xff]   ;;  %v2132_v49 = vld [vmem:[%s2642_s20 + $0x264] ss:$8 sps:$4 sm:$0xff]  }
  0x99   : > { %1491 = vmatpush1.bf16.msra.mxu1 %v2060_v2  ;;  %1449 = vmatprep.subr.bf16.mxu0 %v2061_v3  ;;  %v2124_v47 = vld [vmem:[%s2640_s22 + $0x8] ss:$24 sps:$4 sm:$0xff]   ;;  %v2177_v50 = vld [vmem:[%s2640_s22 + $0x14] ss:$24 sps:$4 sm:$0xff]   ;;  %p1922_p6 = scmp.ne.s32.totalorder %s2248_s24, 5 }
  0x9a   : > { %1492 = vmatprep.subr.bf16.mxu1 %v2063_v4  ;;  %v2127_v48 = vld [vmem:[%s2642_s20 + $0x270] ss:$8 sps:$4 sm:$0xff]   ;;  %v2130_v51 = vld [vmem:[%s2642_s20 + $0x260] ss:$8 sps:$4 sm:$0xff]   ;;  %v2135_v52 = vld [vmem:[%s2642_s20 + $0x254] ss:$8 sps:$4 sm:$0xff]  }
  0x9b   : > { %v2133_v53 = vld [vmem:[%s2642_s20 + $0x250] ss:$8 sps:$4 sm:$0xff]   ;;  %v2138_v54 = vld [vmem:[%s2642_s20 + $0x244] ss:$8 sps:$4 sm:$0xff]   ;;  %v2136_v55 = vld [vmem:[%s2642_s20 + $0x240] ss:$8 sps:$4 sm:$0xff]  }
  0x9c   : > { %1450 = vmatpush1.bf16.msra.mxu0 %v2065_v5  ;;  %v2141_v56 = vld [vmem:[%s2642_s20 + $0x234] ss:$8 sps:$4 sm:$0xff]   ;;  %v2139_v57 = vld [vmem:[%s2642_s20 + $0x230] ss:$8 sps:$4 sm:$0xff]   ;;  %v2144_v58 = vld [vmem:[%s2642_s20 + $0x224] ss:$8 sps:$4 sm:$0xff]  }
  0x9d   : > { %1493 = vmatpush1.bf16.msra.mxu1 %v2066_v6  ;;  %1451 = vmatprep.subr.bf16.mxu0 %v2067_v7  ;;  %v2142_v59 = vld [vmem:[%s2642_s20 + $0x220] ss:$8 sps:$4 sm:$0xff]   ;;  %v2147_v60 = vld [vmem:[%s2642_s20 + $0x214] ss:$8 sps:$4 sm:$0xff]   ;;  %v2145_v61 = vld [vmem:[%s2642_s20 + $0x210] ss:$8 sps:$4 sm:$0xff]  }
  0x9e   : > { %1494 = vmatprep.subr.bf16.mxu1 %v2069_v8  ;;  %v2150_v62 = vld [vmem:[%s2642_s20 + $0x204] ss:$8 sps:$4 sm:$0xff]   ;;  %v2148_v63 = vld [vmem:[%s2642_s20 + $0x200] ss:$8 sps:$4 sm:$0xff]   ;;  %v2153_v0 = vld [vmem:[%s2642_s20 + $0x2f4] ss:$8 sps:$4 sm:$0xff]  }
  0x9f   : > { %v2151_v1 = vld [vmem:[%s2642_s20 + $0x2f0] ss:$8 sps:$4 sm:$0xff]   ;;  %v2156_v2 = vld [vmem:[%s2642_s20 + $0x2e4] ss:$8 sps:$4 sm:$0xff]   ;;  %v2154_v3 = vld [vmem:[%s2642_s20 + $0x2e0] ss:$8 sps:$4 sm:$0xff]  }
  0xa0   : > { %1452 = vmatpush1.bf16.msra.mxu0 %v2071_v9  ;;  %v2159_v4 = vld [vmem:[%s2642_s20 + $0x2d4] ss:$8 sps:$4 sm:$0xff]   ;;  %v2157_v5 = vld [vmem:[%s2642_s20 + $0x2d0] ss:$8 sps:$4 sm:$0xff]   ;;  %v2162_v6 = vld [vmem:[%s2642_s20 + $0x2c4] ss:$8 sps:$4 sm:$0xff]  }
  0xa1   : > { %1495 = vmatpush1.bf16.msra.mxu1 %v2072_v10  ;;  %1453 = vmatprep.subr.bf16.mxu0 %v2073_v11  ;;  %v2160_v7 = vld [vmem:[%s2642_s20 + $0x2c0] ss:$8 sps:$4 sm:$0xff]   ;;  %v2165_v8 = vld [vmem:[%s2642_s20 + $0x2b4] ss:$8 sps:$4 sm:$0xff]   ;;  %v2163_v9 = vld [vmem:[%s2642_s20 + $0x2b0] ss:$8 sps:$4 sm:$0xff]  }
  0xa2   : > { %1496 = vmatprep.subr.bf16.mxu1 %v2075_v12  ;;  %v2168_v10 = vld [vmem:[%s2642_s20 + $0x2a4] ss:$8 sps:$4 sm:$0xff]   ;;  %v2166_v11 = vld [vmem:[%s2642_s20 + $0x2a0] ss:$8 sps:$4 sm:$0xff]   ;;  %v2171_v12 = vld [vmem:[%s2642_s20 + $0x294] ss:$8 sps:$4 sm:$0xff]  }
  0xa3   : > { %v822_v30 = vld [vmem:[#allocation2] sm:$0xff] }
  0xa4   : > { %1454 = vmatpush2.bf16.msra.mxu0 %v2077_v13  ;;  %v2169_v13 = vld [vmem:[%s2642_s20 + $0x290] ss:$8 sps:$4 sm:$0xff]  }
  0xa5   : > { %1497 = vmatpush2.bf16.msra.mxu1 %v2078_v14  ;;  %1455 = vmatprep.subr.bf16.mxu0 %v2079_v15  ;;  %v2174_v14 = vld [vmem:[%s2642_s20 + $0x284] ss:$8 sps:$4 sm:$0xff]   ;;  %v2172_v15 = vld [vmem:[%s2642_s20 + $0x280] ss:$8 sps:$4 sm:$0xff]  }
  0xa6   : > { %1498 = vmatprep.subr.bf16.mxu1 %v2081_v16  ;;  %v2175_v16 = vld [vmem:[%s2640_s22 + $0x10] ss:$24 sps:$4 sm:$0xff]  }
  0xa8   : > { %1456 = vmatpush2.bf16.msra.mxu0 %v2083_v17 }
  0xa9   : > { %1499 = vmatpush2.bf16.msra.mxu1 %v2084_v18  ;;  %1457 = vmatprep.subr.bf16.mxu0 %v2085_v19 }
  0xaa   : > { %1500 = vmatprep.subr.bf16.mxu1 %v2087_v20 }
  0xac   : > { %1458 = vmatpush2.bf16.msra.mxu0 %v2089_v21 }
  0xad   : > { %1501 = vmatpush2.bf16.msra.mxu1 %v2090_v22  ;;  %1459 = vmatprep.subr.bf16.mxu0 %v2091_v23 }
  0xae   : > { %1502 = vmatprep.subr.bf16.mxu1 %v2093_v24 }
  0xb0   : > { %1460 = vmatpush2.bf16.msra.mxu0 %v2095_v25  ;;  %v821_v25 = vld [vmem:[#allocation2 + $0x10] sm:$0xff] }
  0xb1   : > { %1503 = vmatpush2.bf16.msra.mxu1 %v2096_v26  ;;  %1461 = vmatprep.subr.bf16.mxu0 %v2097_v27 }
  0xb2   : > { %1504 = vmatprep.subr.bf16.mxu1 %v2099_v29 }
  0xb4   : > { %1462 = vmatpush2.bf16.msra.mxu0 %v2101_v31 }
  0xb5   : > { %1505 = vmatpush2.bf16.msra.mxu1 %v2102_v32  ;;  %1463 = vmatprep.subr.bf16.mxu0 %v2103_v33 }
  0xb6   : > { %1506 = vmatprep.subr.bf16.mxu1 %v2105_v34 }
  0xb8   : > { %1464 = vmatpush2.bf16.msra.mxu0 %v2107_v35  ;;  %v823_v35 = vld [vmem:[#allocation2 + $0x18] sm:$0xff] }
  0xb9   : > { %1507 = vmatpush2.bf16.msra.mxu1 %v2108_v36  ;;  %1465 = vmatprep.subr.bf16.mxu0 %v2109_v37 }
  0xba   : > { %1508 = vmatprep.subr.bf16.mxu1 %v2111_v38 }
  0xbc   : > { %1466 = vmatpush2.bf16.msra.mxu0 %v2113_v39 }
  0xbd   : > { %1509 = vmatpush2.bf16.msra.mxu1 %v2114_v40  ;;  %1467 = vmatprep.subr.bf16.mxu0 %v2115_v41  ;;  %v824_v40 = vld [vmem:[#allocation2 + $0x8] sm:$0xff] }
  0xbe   : > { %1510 = vmatprep.subr.bf16.mxu1 %v2117_v42 }
  0xc0   : > { %1468 = vmatpush2.bf16.msra.mxu0 %v2119_v43 }
  0xc1   : > { %1511 = vmatpush2.bf16.msra.mxu1 %v2120_v44  ;;  %1523 = vmatprep.subr.bf16.mxu0 %v2129_v45 }
  0xc3   : > { %1470 = vmatmul.mubr.bf16.vlgmr.msra.gmra.mxu0 %v2121_v46 }
  0xc4   : > { %1513 = vmatmul.mubr.bf16.vlgmr.msra.gmra.mxu1 %v2124_v47  ;;  %1524 = vmatpush1.bf16.msra.mxu0 %v2127_v48 }
  0xc5   : > { %1525 = vmatprep.subr.bf16.mxu0 %v2132_v49  ;;  %1555 = vmatprep.mubr.bf16.mxu0 %v2177_v50 }
  0xc8   : > { %1526 = vmatpush1.bf16.msra.mxu0 %v2130_v51 }
  0xc9   : > { %1527 = vmatprep.subr.bf16.mxu0 %v2135_v52 }
  0xcc   : > { %1528 = vmatpush1.bf16.msra.mxu0 %v2133_v53 }
  0xcd   : > { %1529 = vmatprep.subr.bf16.mxu0 %v2138_v54 }
  0xd0   : > { %1530 = vmatpush1.bf16.msra.mxu0 %v2136_v55 }
  0xd1   : > { %1531 = vmatprep.subr.bf16.mxu0 %v2141_v56 }
  0xd4   : > { %1532 = vmatpush1.bf16.msra.mxu0 %v2139_v57 }
  0xd5   : > { %1533 = vmatprep.subr.bf16.mxu0 %v2144_v58 }
  0xd8   : > { %1534 = vmatpush1.bf16.msra.mxu0 %v2142_v59 }
  0xd9   : > { %1535 = vmatprep.subr.bf16.mxu0 %v2147_v60 }
  0xdc   : > { %1536 = vmatpush1.bf16.msra.mxu0 %v2145_v61 }
  0xdd   : > { %1537 = vmatprep.subr.bf16.mxu0 %v2150_v62 }
  0xe0   : > { %1538 = vmatpush1.bf16.msra.mxu0 %v2148_v63 }
  0xe1   : > { %1539 = vmatprep.subr.bf16.mxu0 %v2153_v0 }
  0xe4   : > { %1540 = vmatpush2.bf16.msra.mxu0 %v2151_v1 }
  0xe5   : > { %1541 = vmatprep.subr.bf16.mxu0 %v2156_v2 }
  0xe8   : > { %1542 = vmatpush2.bf16.msra.mxu0 %v2154_v3 }
  0xe9   : > { %1543 = vmatprep.subr.bf16.mxu0 %v2159_v4 }
  0xec   : > { %1544 = vmatpush2.bf16.msra.mxu0 %v2157_v5 }
  0xed   : > { %1545 = vmatprep.subr.bf16.mxu0 %v2162_v6 }
  0xf0   : > { %1546 = vmatpush2.bf16.msra.mxu0 %v2160_v7 }
  0xf1   : > { %1547 = vmatprep.subr.bf16.mxu0 %v2165_v8 }
  0xf4   : > { %1548 = vmatpush2.bf16.msra.mxu0 %v2163_v9 }
  0xf5   : > { %1549 = vmatprep.subr.bf16.mxu0 %v2168_v10 }
  0xf8   : > { %1550 = vmatpush2.bf16.msra.mxu0 %v2166_v11 }
  0xf9   : > { %1551 = vmatprep.subr.bf16.mxu0 %v2171_v12 }
  0xfc   : > { %1552 = vmatpush2.bf16.msra.mxu0 %v2169_v13 }
  0xfd   : > { %1553 = vmatprep.subr.bf16.mxu0 %v2174_v14 }
 0x100   : > { %1554 = vmatpush2.bf16.msra.mxu0 %v2172_v15 }
 0x103   : > { %1556 = vmatmul.mubr.bf16.vlgmr.msra.gmra.mxu0 %v2175_v16 }
 0x183   : > { %v1471_v17 = vpop.f32.mrf.mxu0 }
 0x184   : > { %v1514_v18 = vpop.f32.mrf.mxu1 }
 0x185   : > { %v1473_v19 = vpop.f32.mrf.mxu0  ;;  %v1515_v24 = vadd.f32 %v1514_v18, %v1471_v17 }
 0x186   : > { %v1516_v20 = vpop.f32.mrf.mxu1 }
 0x187   : > { %v1475_v21 = vpop.f32.mrf.mxu0  ;;  %v1517_v27 = vadd.f32 %v1516_v20, %v1473_v19 }
 0x188   : > { %v1518_v22 = vpop.f32.mrf.mxu1 }
 0x189   : > { %v1477_v23 = vpop.f32.mrf.mxu0  ;;  %v1519_v32 = vadd.f32 %v1518_v22, %v1475_v21 }
 0x18a   : > { %v1520_v29 = vpop.f32.mrf.mxu1 }
 0x18b   : > { %v1521_v37 = vadd.f32 %v1520_v29, %v1477_v23 }
 0x1c3   : > { %v1557_v26 = vpop.f32.mrf.mxu0 }
 0x1c4   : > { %v1558_v28 = vadd.f32 %v1557_v26, %v1515_v24 }
 0x1c5   : > { %v1559_v31 = vpop.f32.mrf.mxu0 }
 0x1c6   : > { %v1566_v33 = vadd.f32 %v1558_v28, %v821_v25  ;;  %v1560_v34 = vadd.f32 %v1559_v31, %v1517_v27 }
 0x1c7   : > { %v1561_v36 = vpop.f32.mrf.mxu0 }
 0x1c8   : > { %1570 = vst [vmem:[#allocation2 + $0x10] sm:$0xff] %v1566_v33  ;;  %v1567_v38 = vadd.f32 %v1560_v34, %v822_v30  ;;  %v1562_v39 = vadd.f32 %v1561_v36, %v1519_v32 }
 0x1c9   : > { %v1563_v41 = vpop.f32.mrf.mxu0 }
 0x1ca   : > { %1571 = vst [vmem:[#allocation2] sm:$0xff] %v1567_v38  ;;  %v1568_v42 = vadd.f32 %v1562_v39, %v823_v35  ;;  %v1564_v43 = vadd.f32 %v1563_v41, %v1521_v37  ;;  %1577 = sbr.rel (%p1922_p6) target bundleno = 481 (0x1e1), region = 132 }
 0x1cc   : > { %1572 = vst [vmem:[#allocation2 + $0x18] sm:$0xff] %v1568_v42  ;;  %v1569_v44 = vadd.f32 %v1564_v43, %v824_v40 }
 0x1ce   : > { %1573 = vst [vmem:[#allocation2 + $0x8] sm:$0xff] %v1569_v44 }
 0x1cf   : > { %v1584_v45 = vlaneseq  ;;  %v1582_v47 = vld [vmem:[%s802_s9] sm:$0x3]  ;;  %v1578_v49 = vld [vmem:[#allocation2 + $0x10] sm:$0xff]  ;;  %v1615_v0 = vld [vmem:[%s2644_s18 + $0x8] sm:$0xff] }
 0x1d0   : > { %v1598_v48 = vld [vmem:[%s807_s1] sm:$0x3]  ;;  %v1616_v1 = vld [vmem:[%s2644_s18 + $0x10] sm:$0xff]  ;;  %v1617_v2 = vld [vmem:[%s2644_s18 + $0x18] sm:$0xff] }
 0x1d1   : > { %v1585_v46 = vshrl.u32 %v1584_v45, 7  ;;  %v1579_v52 = vld [vmem:[#allocation2] sm:$0xff] }
 0x1d2   : > { %v1614_v60 = vld [vmem:[%s2644_s18] sm:$0xff] }
 0x1d3   : > { %v1586_v50 = vsub.s32 0, %v1585_v46  ;;  %v1590_v51 = vsub.s32 1, %v1585_v46  ;;  %v1580_v53 = vld [vmem:[#allocation2 + $0x18] sm:$0xff] }
 0x1d5   : > { %v1581_v54 = vld [vmem:[#allocation2 + $0x8] sm:$0xff]  ;;  %v1587_v55 = vrot.slane %v1582_v47, %v1586_v50  ;;  %v1603_v56 = vrot.slane %v1598_v48, %v1586_v50  ;;  %v1591_v57 = vrot.slane %v1582_v47, %v1590_v51  ;;  %v1607_v58 = vrot.slane %v1598_v48, %v1590_v51 }
 0x1d7   : > { %v1594_v59 = vmul.f32 %v1587_v55, %v1578_v49  ;;  %v1595_v61 = vmul.f32 %v1591_v57, %v1579_v52  ;;  %v1596_v62 = vmul.f32 %v1587_v55, %v1580_v53  ;;  %v1597_v63 = vmul.f32 %v1591_v57, %v1581_v54 }
 0x1d9   : > { %v1610_v3 = vadd.f32 %v1603_v56, %v1594_v59  ;;  %v1611_v4 = vadd.f32 %v1607_v58, %v1595_v61  ;;  %v1612_v5 = vadd.f32 %v1603_v56, %v1596_v62  ;;  %v1613_v6 = vadd.f32 %v1607_v58, %v1597_v63 }
 0x1db   : > { %v1618_v7 = vadd.f32 %v1614_v60, %v1610_v3  ;;  %v1619_v8 = vadd.f32 %v1615_v0, %v1611_v4  ;;  %v1620_v9 = vadd.f32 %v1616_v1, %v1612_v5  ;;  %v1621_v10 = vadd.f32 %v1617_v2, %v1613_v6 }
 0x1dd   : > { %v1622_v11 = vmax.f32 %v1618_v7, 0.0  ;;  %v1623_v12 = vmax.f32 %v1619_v8, 0.0  ;;  %v1624_v13 = vmax.f32 %v1620_v9, 0.0  ;;  %v1625_v14 = vmax.f32 %v1621_v10, 0.0 }
 0x1df   : > { %1626 = vst [vmem:[%s2646_s7] sm:$0xff] %v1622_v11  ;;  %1627 = vst [vmem:[%s2646_s7 + $0x8] sm:$0xff] %v1623_v12 }
 0x1e0   : > { %1628 = vst [vmem:[%s2646_s7 + $0x10] sm:$0xff] %v1624_v13  ;;  %1629 = vst [vmem:[%s2646_s7 + $0x18] sm:$0xff] %v1625_v14 }
 0x1e1 PF: > { %1636 = sbr.rel (!%p2401_p13) target bundleno = 489 (0x1e9), region = 136  ;;  %s1931_s1 = sshll.u32 (%p2401_p13), %s2252_s25, 4 }
 0x1e2   : > { %s1642_s11 = scalar_lea.vmem (%p2401_p13), %s2818_s5, %s1931_s1 }
 0x1e6   : > { %v1655_v15 = vld [vmem:[%s2646_s7] sm:$0xff]  ;;  %v1657_v16 = vld [vmem:[%s2646_s7 + $0x8] sm:$0xff] }
 0x1e7   : > { %v1659_v17 = vld [vmem:[%s2646_s7 + $0x10] sm:$0xff]  ;;  %v1661_v18 = vld [vmem:[%s2646_s7 + $0x18] sm:$0xff]  ;;  %1656 = vst [vmem:[%s1642_s11] sm:$0xff] %v1655_v15  ;;  %1658 = vst [vmem:[%s1642_s11 + $0x8] sm:$0xff] %v1657_v16 }
 0x1e8   : > { %1660 = vst [vmem:[%s1642_s11 + $0x20] sm:$0xff] %v1659_v17  ;;  %1662 = vst [vmem:[%s1642_s11 + $0x28] sm:$0xff] %v1661_v18 }
 0x1e9 PF: > { %s15_s28 = sadd.s32 1, %s2264_s28   ;;  %s2832_s25 = sld [smem:[#allocation9_spill]] }
 0x1ea   : > { %p12_p7 = scmp.ge.s32.totalorder %s15_s28, 14   ;;  %s2833_s8 = sld [smem:[#allocation7_spill]] }
 0x1eb   : > { %s2834_s29 = sld [smem:[#allocation8_spill]]  ;;  %s2835_s18 = smov %s2228_s19 }
 0x1ec   : > { %s2836_s19 = smov %s2393_s17  ;;  %s2837_s20 = smov %s2236_s21 }
 0x1ed   : > { %s2838_s21 = smov %s2390_s16  ;;  %s2839_s22 = smov %s2244_s23 }
 0x1ee   : > { %s2841_s24 = smov %s2256_s26  ;;  %14 = sbr.rel (!%p12_p7) target bundleno = 9 (0x9), region = 212 }
 0x1ef   : > { %s2840_s23 = smov %s2832_s25  ;;  %s2842_s25 = smov %s2260_s27 }
 0x1f0   : > { %s2843_s26 = smov %s2833_s8 }
 0x1f1   : > { %s2844_s27 = smov %s2834_s29 }

// kernel: pyresnet_forward.29
= control target key start
LH: loop header
LB: loop body
LE: loop exit
PB: predicated region body
PF: predicated region fallthrough
CT: control target
= control target key end

     0   :  { %s46_s0 = inlined_call_operand.vmem [shape: f32[2,1,256], index: 0, kind: input, shape index: {}]   ;;  %s47_s1 = inlined_call_operand.vmem [shape: f32[2,256], index: 1, kind: output, shape index: {}]  }
   0x1   :  { %v8_v0 = vld [vmem:[%s46_s0] sm:$0x3]  ;;  %v9_v1 = vld [vmem:[%s46_s0 + $0x2] sm:$0x3] }
   0x2   :  { %v12_v2 = vcombine.low %v8_v0, %v9_v1 }
   0x4   :  { %26 = vst.sshfl [vmem:[%s47_s1] sm:$0x33 pattern:$0x75316420] %v12_v2 }

// kernel: pyresnet_forward.25
= control target key start
LH: loop header
LB: loop body
LE: loop exit
PB: predicated region body
PF: predicated region fallthrough
CT: control target
= control target key end

     0   :  { %vm10_vm0 = vcmask 1043456   ;;  %vm27_vm1 = vcmask 1041409   ;;  %s54_s0 = inlined_call_operand.vmem [shape: f32[2,4,128], index: 0, kind: input, shape index: {}]   ;;  %s55_s1 = inlined_call_operand.vmem [shape: f32[2,128], index: 1, kind: output, shape index: {}]  }
   0x1   :  { %v8_v0 = vld [vmem:[%s54_s0] sm:$0xf]  ;;  %v9_v1 = vld [vmem:[%s54_s0 + $0x4] sm:$0xf] }
   0x2   :  { %v11_v2 = vsel %vm10_vm0, %v8_v0, -inf  ;;  %v18_v3 = vsel %vm10_vm0, %v9_v1, -inf }
   0x3   :  { %v12_v4 = vrot.slane %v11_v2, 4  ;;  %v19_v5 = vrot.slane %v18_v3, 4 }
   0x5   :  { %v13_v6 = vmax.f32 %v11_v2, %v12_v4  ;;  %v20_v7 = vmax.f32 %v18_v3, %v19_v5 }
   0x7   :  { %v14_v8 = vrot.slane %v13_v6, 2  ;;  %v21_v9 = vrot.slane %v20_v7, 2 }
   0x9   :  { %v15_v10 = vmax.f32 %v13_v6, %v14_v8  ;;  %v22_v11 = vmax.f32 %v20_v7, %v21_v9 }
   0xb   :  { %v16_v12 = vrot.slane %v15_v10, 1  ;;  %v23_v13 = vrot.slane %v22_v11, 1 }
   0xd   :  { %v17_v14 = vmax.f32 %v15_v10, %v16_v12  ;;  %v24_v15 = vmax.f32 %v22_v11, %v23_v13 }
   0xf   :  { %v28_v16 = vsel %vm27_vm1, %v24_v15, %v17_v14 }
  0x10   :  { %30 = vst [vmem:[%s55_s1] sm:$0x3] %v28_v16 }

// kernel: pyresnet_forward.34
= control target key start
LH: loop header
LB: loop body
LE: loop exit
PB: predicated region body
PF: predicated region fallthrough
CT: control target
= control target key end

     0   :  { %s2310_s15 = smov 0   ;;  %s2312_s16 = smov 0   ;;  %s2756_s0 = inlined_call_operand.vmem [shape: bf16[16,896], index: 0, kind: input, shape index: {}]   ;;  %s2757_s1 = inlined_call_operand.vmem [shape: bf16[896,1536], index: 1, kind: input, shape index: {}]   ;;  %s2758_s2 = inlined_call_operand.vmem [shape: f32[1,1536], index: 2, kind: input, shape index: {}]   ;;  %s2759_s3 = inlined_call_operand.vmem [shape: f32[1,1536], index: 3, kind: input, shape index: {}]   ;;  %s2760_s4 = inlined_call_operand.vmem [shape: f32[16,1536], index: 4, kind: output, shape index: {}]  }
   0x1   :  { %s2314_s17 = smov 0   ;;  %s2316_s18 = smov 0  }
   0x2   :  { %s2318_s19 = smov 0  }
   0x3 LB: > { %s29_s20 = sadd.s32 1, %s2278_s18  ;;  %s1886_s21 = sadd.s32 4294967295, %s2282_s19   ;;  %s2282_s19 = sphi %s2318_s19, %s14_s19   ;;  %s2278_s18 = sphi %s2316_s18, %s2765_s18   ;;  %s2274_s17 = sphi %s2314_s17, %s2764_s17   ;;  %s2270_s16 = sphi %s2312_s16, %s2763_s16   ;;  %s2266_s15 = sphi %s2310_s15, %s2762_s15  }
   0x4   : > { %p31_p0 = scmp.ge.s32.totalorder %s29_s20, 6  ;;  %p77_p1 = scmp.ne.s32.totalorder %s2270_s16, %s2266_s15 }
   0x5   : > { %p78_p2 = scmp.eq.s32.totalorder %s2282_s19, 0  ;;  %p161_p4 = scmp.eq.s32.totalorder %s1886_s21, 5 }
   0x6   : > { %s2767_s20 = smov (%p31_p0, %s29_s20), 0  ;;  %s70_s23 = sadd.s32 1, %s2270_s16 }
   0x7   : > { %p79_p3 = por %p78_p2, %p77_p1  ;;  %s66_s22 = ssub.s32 %s2278_s18, %s2767_s20 }
   0x8   : > { %p68_p5 = scmp.eq.s32.totalorder %s66_s22, 0  ;;  %p2345_p6 = por %p161_p4, %p77_p1 }
   0x9   : > { %p1890_p7 = scmp.ge.s32.totalorder %s2282_s19, 6 }
   0xa   : > { %s2350_s25 = scalar_select %p68_p5, %s2270_s16, %s70_s23  }
   0xb   : > { %198 = sbr.rel (%p1890_p7) target bundleno = 76 (0x4c), region = 20 }
  0x10   : > { %201 = sbr.rel (!%p79_p3) target bundleno = 76 (0x4c), region = 24  ;;  %s203_s26 = sand.u32 (%p79_p3), 1, %s2270_s16  }
  0x11   : > { %s2021_s27 = sshll.u32 (%p79_p3), %s2278_s18, 3  ;;  %s2023_s28 = smul.u32 (%p79_p3), 896, %s203_s26 }
  0x12   : > { %s2358_s5 = scalar_lea.vmem (%p79_p3), %s2757_s1, %s2021_s27 }
  0x13   : > { %v462_v0 = vld [vmem:[%s2358_s5] sm:$0xff] (%p79_p3)  ;;  %v464_v1 = vld [vmem:[%s2358_s5 + $0x30] sm:$0xff] (%p79_p3)  ;;  %s2366_s6 = scalar_lea.vmem (%p79_p3), [#allocation3], %s2023_s28 }
  0x14   : > { %v466_v2 = vld [vmem:[%s2358_s5 + $0x60] sm:$0xff] (%p79_p3)  ;;  %v468_v3 = vld [vmem:[%s2358_s5 + $0x90] sm:$0xff] (%p79_p3)  ;;  %463 = vst [vmem:[%s2366_s6] sm:$0xff] (%p79_p3), %v462_v0  ;;  %465 = vst [vmem:[%s2366_s6 + $0x8] sm:$0xff] (%p79_p3), %v464_v1 }
  0x15   : > { %v470_v4 = vld [vmem:[%s2358_s5 + $0xc0] sm:$0xff]  ;;  %v472_v5 = vld [vmem:[%s2358_s5 + $0xf0] sm:$0xff]  ;;  %467 = vst [vmem:[%s2366_s6 + $0x10] sm:$0xff] %v466_v2  ;;  %469 = vst [vmem:[%s2366_s6 + $0x18] sm:$0xff] %v468_v3 }
  0x16   : > { %471 = vst [vmem:[%s2366_s6 + $0x20] sm:$0xff] %v470_v4  ;;  %473 = vst [vmem:[%s2366_s6 + $0x28] sm:$0xff] %v472_v5  ;;  %v474_v6 = vld [vmem:[%s2358_s5 + $0x120] sm:$0xff]  ;;  %v476_v7 = vld [vmem:[%s2358_s5 + $0x150] sm:$0xff] }
  0x17   : > { %v478_v8 = vld [vmem:[%s2358_s5 + $0x180] sm:$0xff]  ;;  %475 = vst [vmem:[%s2366_s6 + $0x30] sm:$0xff] %v474_v6  ;;  %477 = vst [vmem:[%s2366_s6 + $0x38] sm:$0xff] %v476_v7  ;;  %v480_v9 = vld [vmem:[%s2358_s5 + $0x1b0] sm:$0xff] }
  0x18   : > { %479 = vst [vmem:[%s2366_s6 + $0x40] sm:$0xff] %v478_v8  ;;  %v482_v10 = vld [vmem:[%s2358_s5 + $0x1e0] sm:$0xff]  ;;  %v484_v11 = vld [vmem:[%s2358_s5 + $0x210] sm:$0xff]  ;;  %481 = vst [vmem:[%s2366_s6 + $0x48] sm:$0xff] %v480_v9 }
  0x19   : > { %483 = vst [vmem:[%s2366_s6 + $0x50] sm:$0xff] %v482_v10  ;;  %485 = vst [vmem:[%s2366_s6 + $0x58] sm:$0xff] %v484_v11  ;;  %v486_v12 = vld [vmem:[%s2358_s5 + $0x240] sm:$0xff]  ;;  %v488_v13 = vld [vmem:[%s2358_s5 + $0x270] sm:$0xff] }
  0x1a   : > { %v490_v14 = vld [vmem:[%s2358_s5 + $0x2a0] sm:$0xff]  ;;  %487 = vst [vmem:[%s2366_s6 + $0x60] sm:$0xff] %v486_v12  ;;  %489 = vst [vmem:[%s2366_s6 + $0x68] sm:$0xff] %v488_v13  ;;  %v492_v15 = vld [vmem:[%s2358_s5 + $0x2d0] sm:$0xff] }
  0x1b   : > { %491 = vst [vmem:[%s2366_s6 + $0x70] sm:$0xff] %v490_v14  ;;  %v494_v16 = vld [vmem:[%s2358_s5 + $0x300] sm:$0xff]  ;;  %v496_v17 = vld [vmem:[%s2358_s5 + $0x330] sm:$0xff]  ;;  %493 = vst [vmem:[%s2366_s6 + $0x78] sm:$0xff] %v492_v15 }
  0x1c   : > { %495 = vst [vmem:[%s2366_s6 + $0x80] sm:$0xff] %v494_v16  ;;  %497 = vst [vmem:[%s2366_s6 + $0x88] sm:$0xff] %v496_v17  ;;  %v498_v18 = vld [vmem:[%s2358_s5 + $0x360] sm:$0xff]  ;;  %v500_v19 = vld [vmem:[%s2358_s5 + $0x390] sm:$0xff] }
  0x1d   : > { %v502_v20 = vld [vmem:[%s2358_s5 + $0x3c0] sm:$0xff]  ;;  %499 = vst [vmem:[%s2366_s6 + $0x90] sm:$0xff] %v498_v18  ;;  %501 = vst [vmem:[%s2366_s6 + $0x98] sm:$0xff] %v500_v19  ;;  %v504_v21 = vld [vmem:[%s2358_s5 + $0x3f0] sm:$0xff] }
  0x1e   : > { %503 = vst [vmem:[%s2366_s6 + $0xa0] sm:$0xff] %v502_v20  ;;  %v506_v22 = vld [vmem:[%s2358_s5 + $0x420] sm:$0xff]  ;;  %v508_v23 = vld [vmem:[%s2358_s5 + $0x450] sm:$0xff]  ;;  %505 = vst [vmem:[%s2366_s6 + $0xa8] sm:$0xff] %v504_v21 }
  0x1f   : > { %507 = vst [vmem:[%s2366_s6 + $0xb0] sm:$0xff] %v506_v22  ;;  %509 = vst [vmem:[%s2366_s6 + $0xb8] sm:$0xff] %v508_v23  ;;  %v510_v24 = vld [vmem:[%s2358_s5 + $0x480] sm:$0xff]  ;;  %v512_v25 = vld [vmem:[%s2358_s5 + $0x4b0] sm:$0xff] }
  0x20   : > { %v514_v26 = vld [vmem:[%s2358_s5 + $0x4e0] sm:$0xff]  ;;  %511 = vst [vmem:[%s2366_s6 + $0xc0] sm:$0xff] %v510_v24  ;;  %513 = vst [vmem:[%s2366_s6 + $0xc8] sm:$0xff] %v512_v25  ;;  %v516_v27 = vld [vmem:[%s2358_s5 + $0x510] sm:$0xff] }
  0x21   : > { %515 = vst [vmem:[%s2366_s6 + $0xd0] sm:$0xff] %v514_v26  ;;  %v518_v28 = vld [vmem:[%s2358_s5 + $0x540] sm:$0xff]  ;;  %v520_v29 = vld [vmem:[%s2358_s5 + $0x570] sm:$0xff]  ;;  %517 = vst [vmem:[%s2366_s6 + $0xd8] sm:$0xff] %v516_v27 }
  0x22   : > { %519 = vst [vmem:[%s2366_s6 + $0xe0] sm:$0xff] %v518_v28  ;;  %521 = vst [vmem:[%s2366_s6 + $0xe8] sm:$0xff] %v520_v29  ;;  %v522_v30 = vld [vmem:[%s2358_s5 + $0x5a0] sm:$0xff]  ;;  %v524_v31 = vld [vmem:[%s2358_s5 + $0x5d0] sm:$0xff] }
  0x23   : > { %v526_v32 = vld [vmem:[%s2358_s5 + $0x600] sm:$0xff]  ;;  %523 = vst [vmem:[%s2366_s6 + $0xf0] sm:$0xff] %v522_v30  ;;  %525 = vst [vmem:[%s2366_s6 + $0xf8] sm:$0xff] %v524_v31  ;;  %v528_v33 = vld [vmem:[%s2358_s5 + $0x630] sm:$0xff] }
  0x24   : > { %527 = vst [vmem:[%s2366_s6 + $0x100] sm:$0xff] %v526_v32  ;;  %v530_v34 = vld [vmem:[%s2358_s5 + $0x660] sm:$0xff]  ;;  %v532_v35 = vld [vmem:[%s2358_s5 + $0x690] sm:$0xff]  ;;  %529 = vst [vmem:[%s2366_s6 + $0x108] sm:$0xff] %v528_v33 }
  0x25   : > { %531 = vst [vmem:[%s2366_s6 + $0x110] sm:$0xff] %v530_v34  ;;  %533 = vst [vmem:[%s2366_s6 + $0x118] sm:$0xff] %v532_v35  ;;  %v534_v36 = vld [vmem:[%s2358_s5 + $0x6c0] sm:$0xff]  ;;  %v536_v37 = vld [vmem:[%s2358_s5 + $0x6f0] sm:$0xff] }
  0x26   : > { %v538_v38 = vld [vmem:[%s2358_s5 + $0x720] sm:$0xff]  ;;  %535 = vst [vmem:[%s2366_s6 + $0x120] sm:$0xff] %v534_v36  ;;  %537 = vst [vmem:[%s2366_s6 + $0x128] sm:$0xff] %v536_v37  ;;  %v540_v39 = vld [vmem:[%s2358_s5 + $0x750] sm:$0xff] }
  0x27   : > { %539 = vst [vmem:[%s2366_s6 + $0x130] sm:$0xff] %v538_v38  ;;  %v542_v40 = vld [vmem:[%s2358_s5 + $0x780] sm:$0xff]  ;;  %v544_v41 = vld [vmem:[%s2358_s5 + $0x7b0] sm:$0xff]  ;;  %541 = vst [vmem:[%s2366_s6 + $0x138] sm:$0xff] %v540_v39 }
  0x28   : > { %543 = vst [vmem:[%s2366_s6 + $0x140] sm:$0xff] %v542_v40  ;;  %545 = vst [vmem:[%s2366_s6 + $0x148] sm:$0xff] %v544_v41  ;;  %v546_v42 = vld [vmem:[%s2358_s5 + $0x7e0] sm:$0xff]  ;;  %v548_v43 = vld [vmem:[%s2358_s5 + $0x810] sm:$0xff] }
  0x29   : > { %v550_v44 = vld [vmem:[%s2358_s5 + $0x840] sm:$0xff]  ;;  %547 = vst [vmem:[%s2366_s6 + $0x150] sm:$0xff] %v546_v42  ;;  %549 = vst [vmem:[%s2366_s6 + $0x158] sm:$0xff] %v548_v43  ;;  %v552_v45 = vld [vmem:[%s2358_s5 + $0x870] sm:$0xff] }
  0x2a   : > { %551 = vst [vmem:[%s2366_s6 + $0x160] sm:$0xff] %v550_v44  ;;  %v554_v46 = vld [vmem:[%s2358_s5 + $0x8a0] sm:$0xff]  ;;  %v556_v47 = vld [vmem:[%s2358_s5 + $0x8d0] sm:$0xff]  ;;  %553 = vst [vmem:[%s2366_s6 + $0x168] sm:$0xff] %v552_v45 }
  0x2b   : > { %555 = vst [vmem:[%s2366_s6 + $0x170] sm:$0xff] %v554_v46  ;;  %557 = vst [vmem:[%s2366_s6 + $0x178] sm:$0xff] %v556_v47  ;;  %v558_v48 = vld [vmem:[%s2358_s5 + $0x900] sm:$0xff]  ;;  %v560_v49 = vld [vmem:[%s2358_s5 + $0x930] sm:$0xff] }
  0x2c   : > { %v562_v50 = vld [vmem:[%s2358_s5 + $0x960] sm:$0xff]  ;;  %559 = vst [vmem:[%s2366_s6 + $0x180] sm:$0xff] %v558_v48  ;;  %561 = vst [vmem:[%s2366_s6 + $0x188] sm:$0xff] %v560_v49  ;;  %v564_v51 = vld [vmem:[%s2358_s5 + $0x990] sm:$0xff] }
  0x2d   : > { %563 = vst [vmem:[%s2366_s6 + $0x190] sm:$0xff] %v562_v50  ;;  %v566_v52 = vld [vmem:[%s2358_s5 + $0x9c0] sm:$0xff]  ;;  %v568_v53 = vld [vmem:[%s2358_s5 + $0x9f0] sm:$0xff]  ;;  %565 = vst [vmem:[%s2366_s6 + $0x198] sm:$0xff] %v564_v51 }
  0x2e   : > { %567 = vst [vmem:[%s2366_s6 + $0x1a0] sm:$0xff] %v566_v52  ;;  %569 = vst [vmem:[%s2366_s6 + $0x1a8] sm:$0xff] %v568_v53  ;;  %v570_v54 = vld [vmem:[%s2358_s5 + $0xa20] sm:$0xff]  ;;  %v572_v55 = vld [vmem:[%s2358_s5 + $0xa50] sm:$0xff] }
  0x2f   : > { %v574_v56 = vld [vmem:[%s2358_s5 + $0xa80] sm:$0xff]  ;;  %571 = vst [vmem:[%s2366_s6 + $0x1b0] sm:$0xff] %v570_v54  ;;  %573 = vst [vmem:[%s2366_s6 + $0x1b8] sm:$0xff] %v572_v55  ;;  %v576_v57 = vld [vmem:[%s2358_s5 + $0xab0] sm:$0xff] }
  0x30   : > { %575 = vst [vmem:[%s2366_s6 + $0x1c0] sm:$0xff] %v574_v56  ;;  %v578_v58 = vld [vmem:[%s2358_s5 + $0xae0] sm:$0xff]  ;;  %v580_v59 = vld [vmem:[%s2358_s5 + $0xb10] sm:$0xff]  ;;  %577 = vst [vmem:[%s2366_s6 + $0x1c8] sm:$0xff] %v576_v57 }
  0x31   : > { %579 = vst [vmem:[%s2366_s6 + $0x1d0] sm:$0xff] %v578_v58  ;;  %581 = vst [vmem:[%s2366_s6 + $0x1d8] sm:$0xff] %v580_v59  ;;  %v582_v60 = vld [vmem:[%s2358_s5 + $0xb40] sm:$0xff]  ;;  %v584_v61 = vld [vmem:[%s2358_s5 + $0xb70] sm:$0xff] }
  0x32   : > { %v586_v62 = vld [vmem:[%s2358_s5 + $0xba0] sm:$0xff]  ;;  %583 = vst [vmem:[%s2366_s6 + $0x1e0] sm:$0xff] %v582_v60  ;;  %585 = vst [vmem:[%s2366_s6 + $0x1e8] sm:$0xff] %v584_v61  ;;  %v588_v63 = vld [vmem:[%s2358_s5 + $0xbd0] sm:$0xff] }
  0x33   : > { %587 = vst [vmem:[%s2366_s6 + $0x1f0] sm:$0xff] %v586_v62  ;;  %v590_v0 = vld [vmem:[%s2358_s5 + $0xc00] sm:$0xff]  ;;  %v592_v1 = vld [vmem:[%s2358_s5 + $0xc30] sm:$0xff]  ;;  %589 = vst [vmem:[%s2366_s6 + $0x1f8] sm:$0xff] %v588_v63 }
  0x34   : > { %591 = vst [vmem:[%s2366_s6 + $0x200] sm:$0xff] %v590_v0  ;;  %593 = vst [vmem:[%s2366_s6 + $0x208] sm:$0xff] %v592_v1  ;;  %v594_v2 = vld [vmem:[%s2358_s5 + $0xc60] sm:$0xff]  ;;  %v596_v3 = vld [vmem:[%s2358_s5 + $0xc90] sm:$0xff] }
  0x35   : > { %v598_v4 = vld [vmem:[%s2358_s5 + $0xcc0] sm:$0xff]  ;;  %595 = vst [vmem:[%s2366_s6 + $0x210] sm:$0xff] %v594_v2  ;;  %597 = vst [vmem:[%s2366_s6 + $0x218] sm:$0xff] %v596_v3  ;;  %v600_v5 = vld [vmem:[%s2358_s5 + $0xcf0] sm:$0xff] }
  0x36   : > { %599 = vst [vmem:[%s2366_s6 + $0x220] sm:$0xff] %v598_v4  ;;  %v602_v6 = vld [vmem:[%s2358_s5 + $0xd20] sm:$0xff]  ;;  %v604_v7 = vld [vmem:[%s2358_s5 + $0xd50] sm:$0xff]  ;;  %601 = vst [vmem:[%s2366_s6 + $0x228] sm:$0xff] %v600_v5 }
  0x37   : > { %603 = vst [vmem:[%s2366_s6 + $0x230] sm:$0xff] %v602_v6  ;;  %605 = vst [vmem:[%s2366_s6 + $0x238] sm:$0xff] %v604_v7  ;;  %v606_v8 = vld [vmem:[%s2358_s5 + $0xd80] sm:$0xff]  ;;  %v608_v9 = vld [vmem:[%s2358_s5 + $0xdb0] sm:$0xff] }
  0x38   : > { %v610_v10 = vld [vmem:[%s2358_s5 + $0xde0] sm:$0xff]  ;;  %607 = vst [vmem:[%s2366_s6 + $0x240] sm:$0xff] %v606_v8  ;;  %609 = vst [vmem:[%s2366_s6 + $0x248] sm:$0xff] %v608_v9  ;;  %v612_v11 = vld [vmem:[%s2358_s5 + $0xe10] sm:$0xff] }
  0x39   : > { %611 = vst [vmem:[%s2366_s6 + $0x250] sm:$0xff] %v610_v10  ;;  %v614_v12 = vld [vmem:[%s2358_s5 + $0xe40] sm:$0xff]  ;;  %v616_v13 = vld [vmem:[%s2358_s5 + $0xe70] sm:$0xff]  ;;  %613 = vst [vmem:[%s2366_s6 + $0x258] sm:$0xff] %v612_v11 }
  0x3a   : > { %615 = vst [vmem:[%s2366_s6 + $0x260] sm:$0xff] %v614_v12  ;;  %617 = vst [vmem:[%s2366_s6 + $0x268] sm:$0xff] %v616_v13  ;;  %v618_v14 = vld [vmem:[%s2358_s5 + $0xea0] sm:$0xff]  ;;  %v620_v15 = vld [vmem:[%s2358_s5 + $0xed0] sm:$0xff] }
  0x3b   : > { %v622_v16 = vld [vmem:[%s2358_s5 + $0xf00] sm:$0xff]  ;;  %619 = vst [vmem:[%s2366_s6 + $0x270] sm:$0xff] %v618_v14  ;;  %621 = vst [vmem:[%s2366_s6 + $0x278] sm:$0xff] %v620_v15  ;;  %v624_v17 = vld [vmem:[%s2358_s5 + $0xf30] sm:$0xff] }
  0x3c   : > { %623 = vst [vmem:[%s2366_s6 + $0x280] sm:$0xff] %v622_v16  ;;  %v626_v18 = vld [vmem:[%s2358_s5 + $0xf60] sm:$0xff]  ;;  %v628_v19 = vld [vmem:[%s2358_s5 + $0xf90] sm:$0xff]  ;;  %625 = vst [vmem:[%s2366_s6 + $0x288] sm:$0xff] %v624_v17 }
  0x3d   : > { %627 = vst [vmem:[%s2366_s6 + $0x290] sm:$0xff] %v626_v18  ;;  %629 = vst [vmem:[%s2366_s6 + $0x298] sm:$0xff] %v628_v19  ;;  %v630_v20 = vld [vmem:[%s2358_s5 + $0xfc0] sm:$0xff]  ;;  %v632_v21 = vld [vmem:[%s2358_s5 + $0xff0] sm:$0xff] }
  0x3e   : > { %v634_v22 = vld [vmem:[%s2358_s5 + $0x1020] sm:$0xff]  ;;  %631 = vst [vmem:[%s2366_s6 + $0x2a0] sm:$0xff] %v630_v20  ;;  %633 = vst [vmem:[%s2366_s6 + $0x2a8] sm:$0xff] %v632_v21  ;;  %v636_v23 = vld [vmem:[%s2358_s5 + $0x1050] sm:$0xff] }
  0x3f   : > { %635 = vst [vmem:[%s2366_s6 + $0x2b0] sm:$0xff] %v634_v22  ;;  %v638_v24 = vld [vmem:[%s2358_s5 + $0x1080] sm:$0xff]  ;;  %v640_v25 = vld [vmem:[%s2358_s5 + $0x10b0] sm:$0xff]  ;;  %637 = vst [vmem:[%s2366_s6 + $0x2b8] sm:$0xff] %v636_v23 }
  0x40   : > { %639 = vst [vmem:[%s2366_s6 + $0x2c0] sm:$0xff] %v638_v24  ;;  %641 = vst [vmem:[%s2366_s6 + $0x2c8] sm:$0xff] %v640_v25  ;;  %v642_v26 = vld [vmem:[%s2358_s5 + $0x10e0] sm:$0xff]  ;;  %v644_v27 = vld [vmem:[%s2358_s5 + $0x1110] sm:$0xff] }
  0x41   : > { %v646_v28 = vld [vmem:[%s2358_s5 + $0x1140] sm:$0xff]  ;;  %643 = vst [vmem:[%s2366_s6 + $0x2d0] sm:$0xff] %v642_v26  ;;  %645 = vst [vmem:[%s2366_s6 + $0x2d8] sm:$0xff] %v644_v27  ;;  %v648_v29 = vld [vmem:[%s2358_s5 + $0x1170] sm:$0xff] }
  0x42   : > { %647 = vst [vmem:[%s2366_s6 + $0x2e0] sm:$0xff] %v646_v28  ;;  %v650_v30 = vld [vmem:[%s2358_s5 + $0x11a0] sm:$0xff]  ;;  %v652_v31 = vld [vmem:[%s2358_s5 + $0x11d0] sm:$0xff]  ;;  %649 = vst [vmem:[%s2366_s6 + $0x2e8] sm:$0xff] %v648_v29 }
  0x43   : > { %651 = vst [vmem:[%s2366_s6 + $0x2f0] sm:$0xff] %v650_v30  ;;  %653 = vst [vmem:[%s2366_s6 + $0x2f8] sm:$0xff] %v652_v31  ;;  %v654_v32 = vld [vmem:[%s2358_s5 + $0x1200] sm:$0xff]  ;;  %v656_v33 = vld [vmem:[%s2358_s5 + $0x1230] sm:$0xff] }
  0x44   : > { %v658_v34 = vld [vmem:[%s2358_s5 + $0x1260] sm:$0xff]  ;;  %655 = vst [vmem:[%s2366_s6 + $0x300] sm:$0xff] %v654_v32  ;;  %657 = vst [vmem:[%s2366_s6 + $0x308] sm:$0xff] %v656_v33  ;;  %v660_v35 = vld [vmem:[%s2358_s5 + $0x1290] sm:$0xff] }
  0x45   : > { %659 = vst [vmem:[%s2366_s6 + $0x310] sm:$0xff] %v658_v34  ;;  %v662_v36 = vld [vmem:[%s2358_s5 + $0x12c0] sm:$0xff]  ;;  %v664_v37 = vld [vmem:[%s2358_s5 + $0x12f0] sm:$0xff]  ;;  %661 = vst [vmem:[%s2366_s6 + $0x318] sm:$0xff] %v660_v35 }
  0x46   : > { %663 = vst [vmem:[%s2366_s6 + $0x320] sm:$0xff] %v662_v36  ;;  %665 = vst [vmem:[%s2366_s6 + $0x328] sm:$0xff] %v664_v37  ;;  %v666_v38 = vld [vmem:[%s2358_s5 + $0x1320] sm:$0xff]  ;;  %v668_v39 = vld [vmem:[%s2358_s5 + $0x1350] sm:$0xff] }
  0x47   : > { %v670_v40 = vld [vmem:[%s2358_s5 + $0x1380] sm:$0xff]  ;;  %667 = vst [vmem:[%s2366_s6 + $0x330] sm:$0xff] %v666_v38  ;;  %669 = vst [vmem:[%s2366_s6 + $0x338] sm:$0xff] %v668_v39  ;;  %v672_v41 = vld [vmem:[%s2358_s5 + $0x13b0] sm:$0xff] }
  0x48   : > { %671 = vst [vmem:[%s2366_s6 + $0x340] sm:$0xff] %v670_v40  ;;  %v674_v42 = vld [vmem:[%s2358_s5 + $0x13e0] sm:$0xff]  ;;  %v676_v43 = vld [vmem:[%s2358_s5 + $0x1410] sm:$0xff]  ;;  %673 = vst [vmem:[%s2366_s6 + $0x348] sm:$0xff] %v672_v41 }
  0x49   : > { %675 = vst [vmem:[%s2366_s6 + $0x350] sm:$0xff] %v674_v42  ;;  %677 = vst [vmem:[%s2366_s6 + $0x358] sm:$0xff] %v676_v43  ;;  %v678_v44 = vld [vmem:[%s2358_s5 + $0x1440] sm:$0xff]  ;;  %v680_v45 = vld [vmem:[%s2358_s5 + $0x1470] sm:$0xff] }
  0x4a   : > { %v682_v46 = vld [vmem:[%s2358_s5 + $0x14a0] sm:$0xff]  ;;  %679 = vst [vmem:[%s2366_s6 + $0x360] sm:$0xff] %v678_v44  ;;  %681 = vst [vmem:[%s2366_s6 + $0x368] sm:$0xff] %v680_v45  ;;  %v684_v47 = vld [vmem:[%s2358_s5 + $0x14d0] sm:$0xff] }
  0x4b   : > { %683 = vst [vmem:[%s2366_s6 + $0x370] sm:$0xff] %v682_v46  ;;  %685 = vst [vmem:[%s2366_s6 + $0x378] sm:$0xff] %v684_v47 }
  0x4c PF: > { %p1893_p8 = scmp.ge.s32.totalorder %s2282_s19, 1  ;;  %p706_p9 = scmp.lt.s32.totalorder %s2282_s19, 7 }
  0x4e   : > { %p707_p10 = pnand %p1893_p8, %p706_p9 }
  0x4f   : > { %s713_s7 = sand.u32 (!%p707_p10), 1, %s2266_s15   ;;  %s1895_s6 = sshll.u32 (!%p707_p10), %s2274_s17, 1 }
  0x50   : > { %710 = sbr.rel (%p707_p10) target bundleno = 433 (0x1b1), region = 70  ;;  %p770_p11 = scmp.lt.s32.totalorder (!%p707_p10), %s1895_s6, 11 }
  0x51   : > { %s2024_s8 = smul.u32 (!%p707_p10), 896, %s713_s7  ;;  %s1894_s14 = sshll.u32 (!%p707_p10), %s713_s7, 5 }
  0x52   : > { %s754_s21 = scalar_lea.vmem (!%p707_p10), [#allocation4], %s1894_s14 }
  0x53   : > { %s2597_s13 = scalar_lea.vmem (!%p707_p10), [#allocation3], %s2024_s8 }
  0x55   : > { %v2164_v48 = vld [vmem:[%s2756_s0 + $0x4] ss:$28 sps:$4 sm:$0xff]   ;;  %v2167_v49 = vld [vmem:[%s2756_s0 + $0xc] ss:$28 sps:$4 sm:$0xff]   ;;  %v2066_v50 = vld [vmem:[%s2597_s13 + $0x74] ss:$8 sps:$4 sm:$0xff]  }
  0x56   : > { %1542 = vmatprep.mubr.bf16.mxu0 %v2164_v48  ;;  %1585 = vmatprep.mubr.bf16.mxu1 %v2167_v49  ;;  %v2068_v51 = vld [vmem:[%s2597_s13 + $0x174] ss:$8 sps:$4 sm:$0xff]   ;;  %v2070_v52 = vld [vmem:[%s2597_s13 + $0x70] ss:$8 sps:$4 sm:$0xff]   ;;  %v2072_v54 = vld [vmem:[%s2597_s13 + $0x64] ss:$8 sps:$4 sm:$0xff]  }
  0x57   : > { %1510 = vmatprep.subr.bf16.mxu0 %v2066_v50  ;;  %v2071_v53 = vld [vmem:[%s2597_s13 + $0x170] ss:$8 sps:$4 sm:$0xff]   ;;  %1553 = vmatprep.subr.bf16.mxu1 %v2068_v51  ;;  %v2074_v55 = vld [vmem:[%s2597_s13 + $0x164] ss:$8 sps:$4 sm:$0xff]   ;;  %v2076_v56 = vld [vmem:[%s2597_s13 + $0x60] ss:$8 sps:$4 sm:$0xff]  }
  0x58   : > { %1511 = vmatpush1.bf16.msra.mxu0 %v2070_v52  ;;  %1554 = vmatpush1.bf16.msra.mxu1 %v2071_v53  ;;  %v2077_v57 = vld [vmem:[%s2597_s13 + $0x160] ss:$8 sps:$4 sm:$0xff]   ;;  %v2078_v58 = vld [vmem:[%s2597_s13 + $0x54] ss:$8 sps:$4 sm:$0xff]   ;;  %v2082_v60 = vld [vmem:[%s2597_s13 + $0x50] ss:$8 sps:$4 sm:$0xff]  }
  0x59   : > { %1512 = vmatprep.subr.bf16.mxu0 %v2072_v54  ;;  %1555 = vmatprep.subr.bf16.mxu1 %v2074_v55  ;;  %v2080_v59 = vld [vmem:[%s2597_s13 + $0x154] ss:$8 sps:$4 sm:$0xff]   ;;  %v2083_v61 = vld [vmem:[%s2597_s13 + $0x150] ss:$8 sps:$4 sm:$0xff]   ;;  %v2084_v62 = vld [vmem:[%s2597_s13 + $0x44] ss:$8 sps:$4 sm:$0xff]  }
  0x5a   : > { %v2086_v63 = vld [vmem:[%s2597_s13 + $0x144] ss:$8 sps:$4 sm:$0xff]   ;;  %v2088_v0 = vld [vmem:[%s2597_s13 + $0x40] ss:$8 sps:$4 sm:$0xff]   ;;  %v2090_v2 = vld [vmem:[%s2597_s13 + $0x34] ss:$8 sps:$4 sm:$0xff]  }
  0x5b   : > { %v2089_v1 = vld [vmem:[%s2597_s13 + $0x140] ss:$8 sps:$4 sm:$0xff]   ;;  %v2092_v3 = vld [vmem:[%s2597_s13 + $0x134] ss:$8 sps:$4 sm:$0xff]   ;;  %v2094_v4 = vld [vmem:[%s2597_s13 + $0x30] ss:$8 sps:$4 sm:$0xff]  }
  0x5c   : > { %1513 = vmatpush1.bf16.msra.mxu0 %v2076_v56  ;;  %1556 = vmatpush1.bf16.msra.mxu1 %v2077_v57  ;;  %v2095_v5 = vld [vmem:[%s2597_s13 + $0x130] ss:$8 sps:$4 sm:$0xff]   ;;  %v2096_v6 = vld [vmem:[%s2597_s13 + $0x24] ss:$8 sps:$4 sm:$0xff]   ;;  %v2100_v8 = vld [vmem:[%s2597_s13 + $0x20] ss:$8 sps:$4 sm:$0xff]  }
  0x5d   : > { %1514 = vmatprep.subr.bf16.mxu0 %v2078_v58  ;;  %1557 = vmatprep.subr.bf16.mxu1 %v2080_v59  ;;  %v2098_v7 = vld [vmem:[%s2597_s13 + $0x124] ss:$8 sps:$4 sm:$0xff]   ;;  %v2101_v9 = vld [vmem:[%s2597_s13 + $0x120] ss:$8 sps:$4 sm:$0xff]   ;;  %v2102_v10 = vld [vmem:[%s2597_s13 + $0x14] ss:$8 sps:$4 sm:$0xff]  }
  0x5e   : > { %v2104_v11 = vld [vmem:[%s2597_s13 + $0x114] ss:$8 sps:$4 sm:$0xff]   ;;  %v2106_v12 = vld [vmem:[%s2597_s13 + $0x10] ss:$8 sps:$4 sm:$0xff]   ;;  %v2108_v14 = vld [vmem:[%s2597_s13 + $0x4] ss:$8 sps:$4 sm:$0xff]  }
  0x5f   : > { %v2107_v13 = vld [vmem:[%s2597_s13 + $0x110] ss:$8 sps:$4 sm:$0xff]   ;;  %v2110_v15 = vld [vmem:[%s2597_s13 + $0x104] ss:$8 sps:$4 sm:$0xff]   ;;  %v2112_v16 = vld [vmem:[%s2597_s13] ss:$8 sps:$4 sm:$0xff]  }
  0x60   : > { %1515 = vmatpush1.bf16.msra.mxu0 %v2082_v60  ;;  %1558 = vmatpush1.bf16.msra.mxu1 %v2083_v61  ;;  %v2113_v17 = vld [vmem:[%s2597_s13 + $0x100] ss:$8 sps:$4 sm:$0xff]   ;;  %v2114_v18 = vld [vmem:[%s2597_s13 + $0xf4] ss:$8 sps:$4 sm:$0xff]   ;;  %v2118_v20 = vld [vmem:[%s2597_s13 + $0xf0] ss:$8 sps:$4 sm:$0xff]  }
  0x61   : > { %1516 = vmatprep.subr.bf16.mxu0 %v2084_v62  ;;  %1559 = vmatprep.subr.bf16.mxu1 %v2086_v63  ;;  %v2116_v19 = vld [vmem:[%s2597_s13 + $0x1f4] ss:$8 sps:$4 sm:$0xff]   ;;  %v2119_v21 = vld [vmem:[%s2597_s13 + $0x1f0] ss:$8 sps:$4 sm:$0xff]   ;;  %v2120_v22 = vld [vmem:[%s2597_s13 + $0xe4] ss:$8 sps:$4 sm:$0xff]  }
  0x62   : > { %v2122_v23 = vld [vmem:[%s2597_s13 + $0x1e4] ss:$8 sps:$4 sm:$0xff]   ;;  %v2124_v24 = vld [vmem:[%s2597_s13 + $0xe0] ss:$8 sps:$4 sm:$0xff]   ;;  %v2126_v26 = vld [vmem:[%s2597_s13 + $0xd4] ss:$8 sps:$4 sm:$0xff]  }
  0x63   : > { %v2125_v25 = vld [vmem:[%s2597_s13 + $0x1e0] ss:$8 sps:$4 sm:$0xff]   ;;  %v2128_v27 = vld [vmem:[%s2597_s13 + $0x1d4] ss:$8 sps:$4 sm:$0xff]   ;;  %v2130_v28 = vld [vmem:[%s2597_s13 + $0xd0] ss:$8 sps:$4 sm:$0xff]  }
  0x64   : > { %1517 = vmatpush1.bf16.msra.mxu0 %v2088_v0  ;;  %1560 = vmatpush1.bf16.msra.mxu1 %v2089_v1  ;;  %v2131_v29 = vld [vmem:[%s2597_s13 + $0x1d0] ss:$8 sps:$4 sm:$0xff]   ;;  %v2132_v30 = vld [vmem:[%s2597_s13 + $0xc4] ss:$8 sps:$4 sm:$0xff]   ;;  %v2136_v32 = vld [vmem:[%s2597_s13 + $0xc0] ss:$8 sps:$4 sm:$0xff]  }
  0x65   : > { %1518 = vmatprep.subr.bf16.mxu0 %v2090_v2  ;;  %1561 = vmatprep.subr.bf16.mxu1 %v2092_v3  ;;  %v2134_v31 = vld [vmem:[%s2597_s13 + $0x1c4] ss:$8 sps:$4 sm:$0xff]   ;;  %v2137_v33 = vld [vmem:[%s2597_s13 + $0x1c0] ss:$8 sps:$4 sm:$0xff]   ;;  %v2138_v34 = vld [vmem:[%s2597_s13 + $0xb4] ss:$8 sps:$4 sm:$0xff]  }
  0x66   : > { %v2140_v35 = vld [vmem:[%s2597_s13 + $0x1b4] ss:$8 sps:$4 sm:$0xff]   ;;  %v2142_v36 = vld [vmem:[%s2597_s13 + $0xb0] ss:$8 sps:$4 sm:$0xff]   ;;  %v2144_v38 = vld [vmem:[%s2597_s13 + $0xa4] ss:$8 sps:$4 sm:$0xff]  }
  0x67   : > { %v2143_v37 = vld [vmem:[%s2597_s13 + $0x1b0] ss:$8 sps:$4 sm:$0xff]   ;;  %v2146_v39 = vld [vmem:[%s2597_s13 + $0x1a4] ss:$8 sps:$4 sm:$0xff]   ;;  %v2148_v40 = vld [vmem:[%s2597_s13 + $0xa0] ss:$8 sps:$4 sm:$0xff]  }
  0x68   : > { %1519 = vmatpush1.bf16.msra.mxu0 %v2094_v4  ;;  %1562 = vmatpush1.bf16.msra.mxu1 %v2095_v5  ;;  %v2149_v41 = vld [vmem:[%s2597_s13 + $0x1a0] ss:$8 sps:$4 sm:$0xff]   ;;  %v2150_v42 = vld [vmem:[%s2597_s13 + $0x94] ss:$8 sps:$4 sm:$0xff]   ;;  %v2154_v44 = vld [vmem:[%s2597_s13 + $0x90] ss:$8 sps:$4 sm:$0xff]  }
  0x69   : > { %1520 = vmatprep.subr.bf16.mxu0 %v2096_v6  ;;  %1563 = vmatprep.subr.bf16.mxu1 %v2098_v7  ;;  %v2152_v43 = vld [vmem:[%s2597_s13 + $0x194] ss:$8 sps:$4 sm:$0xff]   ;;  %v2155_v45 = vld [vmem:[%s2597_s13 + $0x190] ss:$8 sps:$4 sm:$0xff]   ;;  %v2156_v46 = vld [vmem:[%s2597_s13 + $0x84] ss:$8 sps:$4 sm:$0xff]  }
  0x6a   : > { %v2158_v47 = vld [vmem:[%s2597_s13 + $0x184] ss:$8 sps:$4 sm:$0xff]   ;;  %v2160_v48 = vld [vmem:[%s2597_s13 + $0x80] ss:$8 sps:$4 sm:$0xff]   ;;  %v2170_v50 = vld [vmem:[%s2597_s13 + $0x274] ss:$8 sps:$4 sm:$0xff]  }
  0x6b   : > { %v2161_v49 = vld [vmem:[%s2597_s13 + $0x180] ss:$8 sps:$4 sm:$0xff]   ;;  %v2194_v51 = vld [vmem:[%s2597_s13 + $0x374] ss:$8 sps:$4 sm:$0xff]   ;;  %v2168_v54 = vld [vmem:[%s2597_s13 + $0x270] ss:$8 sps:$4 sm:$0xff]  }
  0x6c   : > { %1521 = vmatpush1.bf16.msra.mxu0 %v2100_v8  ;;  %1564 = vmatpush1.bf16.msra.mxu1 %v2101_v9  ;;  %v2162_v52 = vld [vmem:[%s2756_s0] ss:$28 sps:$4 sm:$0xff]   ;;  %v2165_v53 = vld [vmem:[%s2756_s0 + $0x8] ss:$28 sps:$4 sm:$0xff]   ;;  %v2192_v56 = vld [vmem:[%s2597_s13 + $0x370] ss:$8 sps:$4 sm:$0xff]  }
  0x6d   : > { %1522 = vmatprep.subr.bf16.mxu0 %v2102_v10  ;;  %1565 = vmatprep.subr.bf16.mxu1 %v2104_v11  ;;  %v2173_v55 = vld [vmem:[%s2597_s13 + $0x264] ss:$8 sps:$4 sm:$0xff]   ;;  %v2171_v58 = vld [vmem:[%s2597_s13 + $0x260] ss:$8 sps:$4 sm:$0xff]   ;;  %v2176_v59 = vld [vmem:[%s2597_s13 + $0x254] ss:$8 sps:$4 sm:$0xff]  }
  0x6e   : > { %v2200_v57 = vld [vmem:[%s2597_s13 + $0x364] ss:$8 sps:$4 sm:$0xff]   ;;  %v2198_v60 = vld [vmem:[%s2597_s13 + $0x360] ss:$8 sps:$4 sm:$0xff]   ;;  %v2206_v61 = vld [vmem:[%s2597_s13 + $0x354] ss:$8 sps:$4 sm:$0xff]  }
  0x6f   : > { %v2284_v62 = vmov 0   ;;  %v2174_v63 = vld [vmem:[%s2597_s13 + $0x250] ss:$8 sps:$4 sm:$0xff]   ;;  %v2179_v0 = vld [vmem:[%s2597_s13 + $0x244] ss:$8 sps:$4 sm:$0xff]   ;;  %s2769_s6 = smov (!%p770_p11, %s1895_s6), 11 }
  0x70   : > { %1523 = vmatpush1.bf16.msra.mxu0 %v2106_v12  ;;  %1566 = vmatpush1.bf16.msra.mxu1 %v2107_v13  ;;  %v2204_v1 = vld [vmem:[%s2597_s13 + $0x350] ss:$8 sps:$4 sm:$0xff]   ;;  %v2212_v2 = vld [vmem:[%s2597_s13 + $0x344] ss:$8 sps:$4 sm:$0xff]   ;;  %v2177_v4 = vld [vmem:[%s2597_s13 + $0x240] ss:$8 sps:$4 sm:$0xff]   ;;  %s772_s10 = scalar_lea.vmem %s2758_s2, %s2769_s6 }
  0x71   : > { %1524 = vmatprep.subr.bf16.mxu0 %v2108_v14  ;;  %1567 = vmatprep.subr.bf16.mxu1 %v2110_v15  ;;  %v2243_v3 = vld [vmem:[%s2756_s0 + $0x14] ss:$28 sps:$4 sm:$0xff]   ;;  %v2210_v5 = vld [vmem:[%s2597_s13 + $0x340] ss:$8 sps:$4 sm:$0xff]   ;;  %v2185_v10 = vld [vmem:[%s2597_s13 + $0x224] ss:$8 sps:$4 sm:$0xff]  }
  0x72   : > { %v2182_v6 = vld [vmem:[%s2597_s13 + $0x234] ss:$8 sps:$4 sm:$0xff]   ;;  %v2180_v8 = vld [vmem:[%s2597_s13 + $0x230] ss:$8 sps:$4 sm:$0xff]   ;;  %v2224_v11 = vld [vmem:[%s2597_s13 + $0x324] ss:$8 sps:$4 sm:$0xff]  }
  0x73   : > { %v2218_v7 = vld [vmem:[%s2597_s13 + $0x334] ss:$8 sps:$4 sm:$0xff]   ;;  %v2216_v9 = vld [vmem:[%s2597_s13 + $0x330] ss:$8 sps:$4 sm:$0xff]   ;;  %v2183_v12 = vld [vmem:[%s2597_s13 + $0x220] ss:$8 sps:$4 sm:$0xff]  }
  0x74   : > { %1525 = vmatpush1.bf16.msra.mxu0 %v2112_v16  ;;  %1568 = vmatpush1.bf16.msra.mxu1 %v2113_v17  ;;  %v2222_v13 = vld [vmem:[%s2597_s13 + $0x320] ss:$8 sps:$4 sm:$0xff]   ;;  %v2188_v14 = vld [vmem:[%s2597_s13 + $0x214] ss:$8 sps:$4 sm:$0xff]   ;;  %v2186_v16 = vld [vmem:[%s2597_s13 + $0x210] ss:$8 sps:$4 sm:$0xff]  }
  0x75   : > { %1526 = vmatprep.subr.bf16.mxu0 %v2114_v18  ;;  %1569 = vmatprep.subr.bf16.mxu1 %v2116_v19  ;;  %v2230_v15 = vld [vmem:[%s2597_s13 + $0x314] ss:$8 sps:$4 sm:$0xff]   ;;  %v2228_v17 = vld [vmem:[%s2597_s13 + $0x310] ss:$8 sps:$4 sm:$0xff]   ;;  %v2191_v18 = vld [vmem:[%s2597_s13 + $0x204] ss:$8 sps:$4 sm:$0xff]  }
  0x76   : > { %v2236_v19 = vld [vmem:[%s2597_s13 + $0x304] ss:$8 sps:$4 sm:$0xff]   ;;  %s2022_s15 = sshll.u32 (%p2345_p6), %s2274_s17, 4 }
  0x77   : > { %s1749_s23 = scalar_lea.vmem (%p2345_p6), %s2760_s4, %s2022_s15 }
  0x78   : > { %1527 = vmatpush2.bf16.msra.mxu0 %v2118_v20  ;;  %1570 = vmatpush2.bf16.msra.mxu1 %v2119_v21  ;;  %v2189_v20 = vld [vmem:[%s2597_s13 + $0x200] ss:$8 sps:$4 sm:$0xff]  }
  0x79   : > { %1528 = vmatprep.subr.bf16.mxu0 %v2120_v22  ;;  %1571 = vmatprep.subr.bf16.mxu1 %v2122_v23  ;;  %v2234_v21 = vld [vmem:[%s2597_s13 + $0x300] ss:$8 sps:$4 sm:$0xff]   ;;  %v2197_v22 = vld [vmem:[%s2597_s13 + $0x2f4] ss:$8 sps:$4 sm:$0xff]  }
  0x7a   : > { %v2240_v23 = vld [vmem:[%s2756_s0 + $0x18] ss:$28 sps:$4 sm:$0xff]  }
  0x7c   : > { %1529 = vmatpush2.bf16.msra.mxu0 %v2124_v24  ;;  %1572 = vmatpush2.bf16.msra.mxu1 %v2125_v25  ;;  %v2195_v24 = vld [vmem:[%s2597_s13 + $0x2f0] ss:$8 sps:$4 sm:$0xff]   ;;  %v2203_v25 = vld [vmem:[%s2597_s13 + $0x2e4] ss:$8 sps:$4 sm:$0xff]  }
  0x7d   : > { %1530 = vmatprep.subr.bf16.mxu0 %v2126_v26  ;;  %1573 = vmatprep.subr.bf16.mxu1 %v2128_v27  ;;  %v2201_v26 = vld [vmem:[%s2597_s13 + $0x2e0] ss:$8 sps:$4 sm:$0xff]   ;;  %v2209_v27 = vld [vmem:[%s2597_s13 + $0x2d4] ss:$8 sps:$4 sm:$0xff]  }
  0x80   : > { %1531 = vmatpush2.bf16.msra.mxu0 %v2130_v28  ;;  %1574 = vmatpush2.bf16.msra.mxu1 %v2131_v29  ;;  %v2207_v28 = vld [vmem:[%s2597_s13 + $0x2d0] ss:$8 sps:$4 sm:$0xff]   ;;  %v2215_v29 = vld [vmem:[%s2597_s13 + $0x2c4] ss:$8 sps:$4 sm:$0xff]  }
  0x81   : > { %1532 = vmatprep.subr.bf16.mxu0 %v2132_v30  ;;  %1575 = vmatprep.subr.bf16.mxu1 %v2134_v31  ;;  %v2213_v30 = vld [vmem:[%s2597_s13 + $0x2c0] ss:$8 sps:$4 sm:$0xff]   ;;  %v2221_v31 = vld [vmem:[%s2597_s13 + $0x2b4] ss:$8 sps:$4 sm:$0xff]  }
  0x84   : > { %1533 = vmatpush2.bf16.msra.mxu0 %v2136_v32  ;;  %1576 = vmatpush2.bf16.msra.mxu1 %v2137_v33  ;;  %v2219_v32 = vld [vmem:[%s2597_s13 + $0x2b0] ss:$8 sps:$4 sm:$0xff]   ;;  %v2227_v33 = vld [vmem:[%s2597_s13 + $0x2a4] ss:$8 sps:$4 sm:$0xff]  }
  0x85   : > { %1534 = vmatprep.subr.bf16.mxu0 %v2138_v34  ;;  %1577 = vmatprep.subr.bf16.mxu1 %v2140_v35  ;;  %v2225_v34 = vld [vmem:[%s2597_s13 + $0x2a0] ss:$8 sps:$4 sm:$0xff]   ;;  %v2233_v35 = vld [vmem:[%s2597_s13 + $0x294] ss:$8 sps:$4 sm:$0xff]  }
  0x88   : > { %1535 = vmatpush2.bf16.msra.mxu0 %v2142_v36  ;;  %1578 = vmatpush2.bf16.msra.mxu1 %v2143_v37  ;;  %v2231_v36 = vld [vmem:[%s2597_s13 + $0x290] ss:$8 sps:$4 sm:$0xff]   ;;  %v2239_v37 = vld [vmem:[%s2597_s13 + $0x284] ss:$8 sps:$4 sm:$0xff]  }
  0x89   : > { %1536 = vmatprep.subr.bf16.mxu0 %v2144_v38  ;;  %1579 = vmatprep.subr.bf16.mxu1 %v2146_v39  ;;  %v2237_v38 = vld [vmem:[%s2597_s13 + $0x280] ss:$8 sps:$4 sm:$0xff]   ;;  %v2241_v39 = vld [vmem:[%s2756_s0 + $0x10] ss:$28 sps:$4 sm:$0xff]   ;;  %s777_s13 = scalar_lea.vmem %s2759_s3, %s2769_s6 }
  0x8c   : > { %1537 = vmatpush2.bf16.msra.mxu0 %v2148_v40  ;;  %1580 = vmatpush2.bf16.msra.mxu1 %v2149_v41 }
  0x8d   : > { %1538 = vmatprep.subr.bf16.mxu0 %v2150_v42  ;;  %1581 = vmatprep.subr.bf16.mxu1 %v2152_v43  ;;  %v1699_v43 = vlaneseq }
  0x90   : > { %1539 = vmatpush2.bf16.msra.mxu0 %v2154_v44  ;;  %1582 = vmatpush2.bf16.msra.mxu1 %v2155_v45 }
  0x91   : > { %1540 = vmatprep.subr.bf16.mxu0 %v2156_v46  ;;  %1583 = vmatprep.subr.bf16.mxu1 %v2158_v47  ;;  %v1700_v46 = vshrl.u32 %v1699_v43, 7 }
  0x94   : > { %1541 = vmatpush2.bf16.msra.mxu0 %v2160_v48  ;;  %1584 = vmatpush2.bf16.msra.mxu1 %v2161_v49 }
  0x95   : > { %1596 = vmatprep.subr.bf16.mxu0 %v2170_v50  ;;  %1639 = vmatprep.subr.bf16.mxu1 %v2194_v51  ;;  %v1701_v50 = vsub.s32 0, %v1700_v46 }
  0x97   : > { %1543 = vmatmul.mubr.bf16.vlgmr.msra.gmra.mxu0 %v2162_v52  ;;  %1586 = vmatmul.mubr.bf16.vlgmr.msra.gmra.mxu1 %v2165_v53  ;;  %v1697_v52 = vld [vmem:[%s772_s10] sm:$0x3] }
  0x98   : > { %1597 = vmatpush1.bf16.msra.mxu0 %v2168_v54  ;;  %1640 = vmatpush1.bf16.msra.mxu1 %v2192_v56  ;;  %v1713_v54 = vld [vmem:[%s777_s13] sm:$0x3] }
  0x99   : > { %1598 = vmatprep.subr.bf16.mxu0 %v2173_v55  ;;  %1641 = vmatprep.subr.bf16.mxu1 %v2200_v57  ;;  %v1705_v55 = vsub.s32 1, %v1700_v46 }
  0x9a   : > { %1671 = vmatprep.mubr.bf16.mxu1 %v2284_v62  ;;  %1628 = vmatprep.mubr.bf16.mxu0 %v2243_v3 }
  0x9c   : > { %1599 = vmatpush1.bf16.msra.mxu0 %v2171_v58  ;;  %1642 = vmatpush1.bf16.msra.mxu1 %v2198_v60  ;;  %v1702_v60 = vrot.slane %v1697_v52, %v1701_v50 }
  0x9d   : > { %1600 = vmatprep.subr.bf16.mxu0 %v2176_v59  ;;  %1643 = vmatprep.subr.bf16.mxu1 %v2206_v61  ;;  %v1718_v61 = vrot.slane %v1713_v54, %v1701_v50 }
  0xa0   : > { %1601 = vmatpush1.bf16.msra.mxu0 %v2174_v63  ;;  %1644 = vmatpush1.bf16.msra.mxu1 %v2204_v1 }
  0xa1   : > { %1602 = vmatprep.subr.bf16.mxu0 %v2179_v0  ;;  %1645 = vmatprep.subr.bf16.mxu1 %v2212_v2  ;;  %v1706_v2 = vrot.slane %v1697_v52, %v1705_v55 }
  0xa4   : > { %1603 = vmatpush1.bf16.msra.mxu0 %v2177_v4  ;;  %1646 = vmatpush1.bf16.msra.mxu1 %v2210_v5  ;;  %v1722_v4 = vrot.slane %v1713_v54, %v1705_v55 }
  0xa5   : > { %1604 = vmatprep.subr.bf16.mxu0 %v2182_v6  ;;  %1647 = vmatprep.subr.bf16.mxu1 %v2218_v7 }
  0xa8   : > { %1605 = vmatpush1.bf16.msra.mxu0 %v2180_v8  ;;  %1648 = vmatpush1.bf16.msra.mxu1 %v2216_v9 }
  0xa9   : > { %1606 = vmatprep.subr.bf16.mxu0 %v2185_v10  ;;  %1649 = vmatprep.subr.bf16.mxu1 %v2224_v11 }
  0xac   : > { %1607 = vmatpush1.bf16.msra.mxu0 %v2183_v12  ;;  %1650 = vmatpush1.bf16.msra.mxu1 %v2222_v13 }
  0xad   : > { %1608 = vmatprep.subr.bf16.mxu0 %v2188_v14  ;;  %1651 = vmatprep.subr.bf16.mxu1 %v2230_v15 }
  0xb0   : > { %1609 = vmatpush1.bf16.msra.mxu0 %v2186_v16  ;;  %1652 = vmatpush1.bf16.msra.mxu1 %v2228_v17 }
  0xb1   : > { %1610 = vmatprep.subr.bf16.mxu0 %v2191_v18  ;;  %1653 = vmatprep.subr.bf16.mxu1 %v2236_v19 }
  0xb4   : > { %1611 = vmatpush1.bf16.msra.mxu0 %v2189_v20  ;;  %1654 = vmatpush1.bf16.msra.mxu1 %v2234_v21 }
  0xb5   : > { %1612 = vmatprep.subr.bf16.mxu0 %v2197_v22 }
  0xb7   : > { %1672 = vmatmul.mubr.bf16.vlgmr.msra.gmra.mxu1 %v2240_v23 }
  0xb8   : > { %1613 = vmatpush2.bf16.msra.mxu0 %v2195_v24 }
  0xb9   : > { %1614 = vmatprep.subr.bf16.mxu0 %v2203_v25 }
  0xbc   : > { %1615 = vmatpush2.bf16.msra.mxu0 %v2201_v26 }
  0xbd   : > { %1616 = vmatprep.subr.bf16.mxu0 %v2209_v27 }
  0xc0   : > { %1617 = vmatpush2.bf16.msra.mxu0 %v2207_v28 }
  0xc1   : > { %1618 = vmatprep.subr.bf16.mxu0 %v2215_v29 }
  0xc4   : > { %1619 = vmatpush2.bf16.msra.mxu0 %v2213_v30 }
  0xc5   : > { %1620 = vmatprep.subr.bf16.mxu0 %v2221_v31 }
  0xc8   : > { %1621 = vmatpush2.bf16.msra.mxu0 %v2219_v32 }
  0xc9   : > { %1622 = vmatprep.subr.bf16.mxu0 %v2227_v33 }
  0xcc   : > { %1623 = vmatpush2.bf16.msra.mxu0 %v2225_v34 }
  0xcd   : > { %1624 = vmatprep.subr.bf16.mxu0 %v2233_v35 }
  0xd0   : > { %1625 = vmatpush2.bf16.msra.mxu0 %v2231_v36 }
  0xd1   : > { %1626 = vmatprep.subr.bf16.mxu0 %v2239_v37 }
  0xd4   : > { %1627 = vmatpush2.bf16.msra.mxu0 %v2237_v38 }
  0xd7   : > { %1629 = vmatmul.mubr.bf16.vlgmr.msra.gmra.mxu0 %v2241_v39 }
 0x157   : > { %v1587_v40 = vpop.f32.mrf.mxu1  ;;  %v1544_v41 = vpop.f32.mrf.mxu0 }
 0x158   : > { %v1588_v53 = vadd.f32 %v1587_v40, %v1544_v41 }
 0x159   : > { %v1589_v42 = vpop.f32.mrf.mxu1  ;;  %v1546_v44 = vpop.f32.mrf.mxu0 }
 0x15a   : > { %v1590_v58 = vadd.f32 %v1589_v42, %v1546_v44 }
 0x15b   : > { %v1591_v45 = vpop.f32.mrf.mxu1  ;;  %v1548_v47 = vpop.f32.mrf.mxu0 }
 0x15c   : > { %v1592_v63 = vadd.f32 %v1591_v45, %v1548_v47 }
 0x15d   : > { %v1593_v48 = vpop.f32.mrf.mxu1  ;;  %v1550_v51 = vpop.f32.mrf.mxu0 }
 0x15e   : > { %v1594_v6 = vadd.f32 %v1593_v48, %v1550_v51 }
 0x177   : > { %v1673_v49 = vpop.f32.mrf.mxu1 }
 0x179   : > { %v1675_v56 = vpop.f32.mrf.mxu1 }
 0x17b   : > { %v1677_v3 = vpop.f32.mrf.mxu1 }
 0x17d   : > { %v1679_v15 = vpop.f32.mrf.mxu1 }
 0x197   : > { %v1630_v57 = vpop.f32.mrf.mxu0 }
 0x198   : > { %v1631_v59 = vadd.f32 %v1630_v57, %v1588_v53 }
 0x199   : > { %v1632_v62 = vpop.f32.mrf.mxu0 }
 0x19a   : > { %v1674_v0 = vadd.f32 %v1673_v49, %v1631_v59  ;;  %v1633_v1 = vadd.f32 %v1632_v62, %v1590_v58 }
 0x19b   : > { %v1634_v5 = vpop.f32.mrf.mxu0 }
 0x19c   : > { %v1709_v7 = vmul.f32 %v1702_v60, %v1674_v0  ;;  %v1676_v8 = vadd.f32 %v1675_v56, %v1633_v1  ;;  %v1635_v9 = vadd.f32 %v1634_v5, %v1592_v63 }
 0x19d   : > { %v1636_v10 = vpop.f32.mrf.mxu0 }
 0x19e   : > { %v1725_v11 = vadd.f32 %v1718_v61, %v1709_v7  ;;  %v1710_v12 = vmul.f32 %v1706_v2, %v1676_v8  ;;  %v1678_v13 = vadd.f32 %v1677_v3, %v1635_v9  ;;  %v1637_v14 = vadd.f32 %v1636_v10, %v1594_v6 }
 0x1a0   : > { %v1729_v16 = vmax.f32 %v1725_v11, 0.0  ;;  %v1726_v17 = vadd.f32 %v1722_v4, %v1710_v12  ;;  %v1711_v18 = vmul.f32 %v1702_v60, %v1678_v13  ;;  %v1680_v19 = vadd.f32 %v1679_v15, %v1637_v14 }
 0x1a2   : > { %1733 = vst [vmem:[%s754_s21] sm:$0xff] %v1729_v16  ;;  %v1730_v20 = vmax.f32 %v1726_v17, 0.0  ;;  %v1727_v21 = vadd.f32 %v1718_v61, %v1711_v18  ;;  %v1712_v22 = vmul.f32 %v1706_v2, %v1680_v19 }
 0x1a4   : > { %1734 = vst [vmem:[%s754_s21 + $0x8] sm:$0xff] %v1730_v20  ;;  %v1731_v23 = vmax.f32 %v1727_v21, 0.0  ;;  %v1728_v24 = vadd.f32 %v1722_v4, %v1712_v22  ;;  %1743 = sbr.rel (!%p2345_p6) target bundleno = 433 (0x1b1), region = 86 }
 0x1a6   : > { %1735 = vst [vmem:[%s754_s21 + $0x10] sm:$0xff] %v1731_v23  ;;  %v1732_v25 = vmax.f32 %v1728_v24, 0.0 }
 0x1a8   : > { %1736 = vst [vmem:[%s754_s21 + $0x18] sm:$0xff] %v1732_v25 }
 0x1a9   : > { %v1762_v26 = vld [vmem:[%s754_s21] sm:$0xff] }
 0x1aa   : > { %1763 = vst [vmem:[%s1749_s23] sm:$0xff] %v1762_v26 }
 0x1ab   : > { %v1764_v27 = vld [vmem:[%s754_s21 + $0x8] sm:$0xff] }
 0x1ac   : > { %1765 = vst [vmem:[%s1749_s23 + $0x8] sm:$0xff] %v1764_v27 }
 0x1ad   : > { %v1766_v28 = vld [vmem:[%s754_s21 + $0x10] sm:$0xff] }
 0x1ae   : > { %1767 = vst [vmem:[%s1749_s23 + $0x60] sm:$0xff] %v1766_v28 }
 0x1af   : > { %v1768_v29 = vld [vmem:[%s754_s21 + $0x18] sm:$0xff] }
 0x1b0   : > { %1769 = vst [vmem:[%s1749_s23 + $0x68] sm:$0xff] %v1768_v29 }
 0x1b1 PF: > { %s14_s19 = sadd.s32 1, %s2282_s19   ;;  %s2762_s15 = smov %s2270_s16 }
 0x1b2   : > { %p11_p12 = scmp.ge.s32.totalorder %s14_s19, 8   ;;  %s2763_s16 = smov %s2350_s25 }
 0x1b3   : > { %s2764_s17 = smov %s2278_s18  ;;  %s2765_s18 = smov %s2767_s20 }
 0x1b4   :  { %13 = sbr.rel (!%p11_p12) target bundleno = 3 (0x3), region = 149 }

// kernel: pyresnet_forward.35
= control target key start
LH: loop header
LB: loop body
LE: loop exit
PB: predicated region body
PF: predicated region fallthrough
CT: control target
= control target key end

     0   :  { %s1332_s15 = smov 0   ;;  %s1334_s16 = smov 0   ;;  %s1469_s0 = inlined_call_operand.vmem [shape: bf16[16,1536], index: 0, kind: input, shape index: {}]   ;;  %s1470_s1 = inlined_call_operand.vmem [shape: bf16[1536,128], index: 1, kind: input, shape index: {}]   ;;  %s1471_s2 = inlined_call_operand.vmem [shape: f32[1,128], index: 2, kind: input, shape index: {}]   ;;  %s1472_s3 = inlined_call_operand.vmem [shape: f32[1,128], index: 3, kind: input, shape index: {}]   ;;  %s1473_s4 = inlined_call_operand.vmem [shape: f32[16,128], index: 4, kind: output, shape index: {}]  }
   0x1   :  { %s1336_s17 = smov 0   ;;  %s1338_s18 = smov 0  }
   0x2   :  { %s1340_s19 = smov 0  }
   0x3 LB: > { %s26_s20 = sadd.s32 1, %s1300_s18  ;;  %p49_p1 = scmp.ne.s32.totalorder %s1292_s16, %s1288_s15  ;;  %s1304_s19 = sphi %s1340_s19, %s14_s19   ;;  %s1300_s18 = sphi %s1338_s18, %s1477_s18   ;;  %s1296_s17 = sphi %s1336_s17, %s1476_s17   ;;  %s1292_s16 = sphi %s1334_s16, %s1475_s16   ;;  %s1288_s15 = sphi %s1332_s15, %s1474_s15  }
   0x4   : > { %p27_p0 = scmp.ge.s32.totalorder %s26_s20, 2  ;;  %p50_p2 = scmp.eq.s32.totalorder %s1304_s19, 0 }
   0x5   : > { %s42_s22 = sadd.s32 1, %s1292_s16  ;;  %p1033_p5 = scmp.ge.s32.totalorder %s1304_s19, 2 }
   0x6   : > { %s1479_s20 = smov (%p27_p0, %s26_s20), 0  ;;  %p51_p3 = por %p50_p2, %p49_p1 }
   0x7   : > { %s38_s21 = ssub.s32 %s1300_s18, %s1479_s20  ;;  %195 = sbr.rel (%p1033_p5) target bundleno = 20 (0x14), region = 24 }
   0x8   : > { %p40_p4 = scmp.eq.s32.totalorder %s38_s21, 0 }
   0xa   : > { %s1367_s23 = scalar_select %p40_p4, %s1292_s16, %s42_s22  }
   0xc   : > { %198 = sbr.rel (!%p51_p3) target bundleno = 20 (0x14), region = 28  ;;  %s200_s24 = sand.u32 (%p51_p3), 1, %s1292_s16  }
   0xd   : > { %s1099_s25 = smul.u32 (%p51_p3), 24, %s1300_s18 }
   0xe   : > { %s1166_s26 = smul.u32 (%p51_p3), 48, %s200_s24 }
   0xf   : > { %s208_s29 = scalar_lea.vmem (%p51_p3), %s1469_s0, %s1099_s25 }
  0x10   : > { %v221_v0 = vld [vmem:[%s208_s29] sm:$0xff] (%p51_p3)  ;;  %v223_v1 = vld [vmem:[%s208_s29 + $0x8] sm:$0xff] (%p51_p3)  ;;  %v225_v2 = vld [vmem:[%s208_s29 + $0x10] sm:$0xff] (%p51_p3)  ;;  %s202_s30 = scalar_lea.vmem (%p51_p3), [#allocation3], %s1166_s26 }
  0x11   : > { %222 = vst [vmem:[%s202_s30] sm:$0xff] %v221_v0  ;;  %224 = vst [vmem:[%s202_s30 + $0x8] sm:$0xff] %v223_v1  ;;  %v227_v3 = vld [vmem:[%s208_s29 + $0x30] sm:$0xff]  ;;  %v229_v4 = vld [vmem:[%s208_s29 + $0x38] sm:$0xff] }
  0x12   : > { %226 = vst [vmem:[%s202_s30 + $0x10] sm:$0xff] %v225_v2  ;;  %v231_v5 = vld [vmem:[%s208_s29 + $0x40] sm:$0xff]  ;;  %228 = vst [vmem:[%s202_s30 + $0x18] sm:$0xff] %v227_v3 }
  0x13   : > { %230 = vst [vmem:[%s202_s30 + $0x20] sm:$0xff] %v229_v4  ;;  %232 = vst [vmem:[%s202_s30 + $0x28] sm:$0xff] %v231_v5 }
  0x14 PF: > { %p1035_p6 = scmp.ge.s32.totalorder %s1304_s19, 1  ;;  %p249_p7 = scmp.lt.s32.totalorder %s1304_s19, 3 }
  0x16   : > { %p250_p8 = pnand %p1035_p6, %p249_p7 }
  0x17   : > { %s256_s5 = sand.u32 (!%p250_p8), 1, %s1288_s15   ;;  %s300_s6 = smul.u32 (!%p250_p8), 96, %s1296_s17 }
  0x18   : > { %253 = sbr.rel (%p250_p8) target bundleno = 320 (0x140), region = 55  ;;  %p1037_p10 = scmp.ne.s32.totalorder (!%p250_p8), %s1296_s17, 0 }
  0x19   : > { %s1167_s7 = smul.u32 (!%p250_p8), 48, %s256_s5  ;;  %p301_p9 = scmp.lt.s32.totalorder (!%p250_p8), %s300_s6, 191 }
  0x1b   : > { %s1384_s12 = scalar_lea.vmem (!%p250_p8), [#allocation3], %s1167_s7 }
  0x1d   : > { %s1481_s6 = smov (!%p301_p9, %s300_s6), 191  ;;  %328 = sbr.rel (%p1037_p10) target bundleno = 36 (0x24), region = 63 }
  0x1e   : > { %s1036_s8 = sshll.u32 %s1481_s6, 2 }
  0x1f   : > { %s1382_s11 = scalar_lea.vmem %s1470_s1, %s1036_s8 }
  0x22   : > { %v1306_v6 = vmov 0.0  }
  0x23   : > { %329 = vst [vmem:[#allocation2] sm:$0xff] %v1306_v6  ;;  %330 = vst [vmem:[#allocation2 + $0x8] sm:$0xff] %v1306_v6 }
  0x24 PF: > { %v1209_v7 = vld [vmem:[%s1382_s11 + $0x78] sm:$0xff]   ;;  %v1213_v11 = vld [vmem:[%s1382_s11 + $0x70] sm:$0xff]   ;;  %v1217_v15 = vld [vmem:[%s1382_s11 + $0x68] sm:$0xff]   ;;  %p1092_p11 = scmp.ne.s32.totalorder %s1296_s17, 1 }
  0x25   : > { %v1210_v8 = vld [vmem:[%s1382_s11 + $0xf8] sm:$0xff]   ;;  %1100 = vmatprep.subr.bf16.mxu0 %v1209_v7  ;;  %v1214_v12 = vld [vmem:[%s1382_s11 + $0xf0] sm:$0xff]   ;;  %v1218_v16 = vld [vmem:[%s1382_s11 + $0xe8] sm:$0xff]  }
  0x26   : > { %v1211_v9 = vld [vmem:[%s1382_s11 + $0x38] sm:$0xff]   ;;  %1122 = vmatprep.subr.bf16.mxu1 %v1210_v8  ;;  %v1215_v13 = vld [vmem:[%s1382_s11 + $0x30] sm:$0xff]   ;;  %v1219_v17 = vld [vmem:[%s1382_s11 + $0x28] sm:$0xff]  }
  0x27   : > { %v1212_v10 = vld [vmem:[%s1382_s11 + $0xb8] sm:$0xff]   ;;  %1101 = vmatpush3.bf16.msra.mxu0 %v1211_v9  ;;  %v1216_v14 = vld [vmem:[%s1382_s11 + $0xb0] sm:$0xff]   ;;  %v1220_v18 = vld [vmem:[%s1382_s11 + $0xa8] sm:$0xff]  }
  0x28   : > { %1123 = vmatpush3.bf16.msra.mxu1 %v1212_v10  ;;  %1102 = vmatprep.subr.bf16.mxu0 %v1213_v11  ;;  %v1221_v19 = vld [vmem:[%s1382_s11 + $0x60] sm:$0xff]   ;;  %v1225_v23 = vld [vmem:[%s1382_s11 + $0x58] sm:$0xff]   ;;  %v1229_v27 = vld [vmem:[%s1382_s11 + $0x50] sm:$0xff]  }
  0x29   : > { %1124 = vmatprep.subr.bf16.mxu1 %v1214_v12  ;;  %v1222_v20 = vld [vmem:[%s1382_s11 + $0xe0] sm:$0xff]   ;;  %v1226_v24 = vld [vmem:[%s1382_s11 + $0xd8] sm:$0xff]   ;;  %v1230_v28 = vld [vmem:[%s1382_s11 + $0xd0] sm:$0xff]  }
  0x2a   : > { %v1223_v21 = vld [vmem:[%s1382_s11 + $0x20] sm:$0xff]   ;;  %v1227_v25 = vld [vmem:[%s1382_s11 + $0x18] sm:$0xff]   ;;  %v1231_v29 = vld [vmem:[%s1382_s11 + $0x10] sm:$0xff]  }
  0x2b   : > { %1103 = vmatpush3.bf16.msra.mxu0 %v1215_v13  ;;  %v1224_v22 = vld [vmem:[%s1382_s11 + $0xa0] sm:$0xff]   ;;  %v1228_v26 = vld [vmem:[%s1382_s11 + $0x98] sm:$0xff]   ;;  %v1232_v30 = vld [vmem:[%s1382_s11 + $0x90] sm:$0xff]  }
  0x2c   : > { %1125 = vmatpush3.bf16.msra.mxu1 %v1216_v14  ;;  %1104 = vmatprep.subr.bf16.mxu0 %v1217_v15  ;;  %v1233_v31 = vld [vmem:[%s1382_s11 + $0x48] sm:$0xff]   ;;  %v1237_v35 = vld [vmem:[%s1382_s11 + $0x40] sm:$0xff]   ;;  %v1247_v43 = vld [vmem:[%s1382_s11 + $0x178] sm:$0xff]  }
  0x2d   : > { %1126 = vmatprep.subr.bf16.mxu1 %v1218_v16  ;;  %v1234_v32 = vld [vmem:[%s1382_s11 + $0xc8] sm:$0xff]   ;;  %v1238_v36 = vld [vmem:[%s1382_s11 + $0xc0] sm:$0xff]   ;;  %v1248_v44 = vld [vmem:[%s1382_s11 + $0x138] sm:$0xff]  }
  0x2e   : > { %v1235_v33 = vld [vmem:[%s1382_s11 + $0x8] sm:$0xff]   ;;  %v1239_v37 = vld [vmem:[%s1382_s11] sm:$0xff]   ;;  %v1249_v45 = vld [vmem:[%s1382_s11 + $0x170] sm:$0xff]  }
  0x2f   : > { %1105 = vmatpush3.bf16.msra.mxu0 %v1219_v17  ;;  %v1236_v34 = vld [vmem:[%s1382_s11 + $0x88] sm:$0xff]   ;;  %v1240_v38 = vld [vmem:[%s1382_s11 + $0x80] sm:$0xff]   ;;  %v1250_v46 = vld [vmem:[%s1382_s11 + $0x130] sm:$0xff]  }
  0x30   : > { %1127 = vmatpush3.bf16.msra.mxu1 %v1220_v18  ;;  %1106 = vmatprep.subr.bf16.mxu0 %v1221_v19  ;;  %v1241_v39 = vld [vmem:[%s1384_s12] ss:$24 sps:$4 sm:$0xff]   ;;  %v1243_v40 = vld [vmem:[%s1384_s12 + $0x4] ss:$24 sps:$4 sm:$0xff]   ;;  %v1265_v54 = vld [vmem:[%s1384_s12 + $0x14] ss:$24 sps:$4 sm:$0xff]  }
  0x31   : > { %1128 = vmatprep.subr.bf16.mxu1 %v1222_v20  ;;  %v1244_v41 = vld [vmem:[%s1384_s12 + $0x8] ss:$24 sps:$4 sm:$0xff]   ;;  %v1246_v42 = vld [vmem:[%s1384_s12 + $0xc] ss:$24 sps:$4 sm:$0xff]   ;;  %785 = vmatprep.mubr.bf16.mxu0 %v1243_v40 }
  0x32   : > { %826 = vmatprep.mubr.bf16.mxu1 %v1246_v42  ;;  %v1251_v47 = vld [vmem:[%s1382_s11 + $0x168] sm:$0xff]   ;;  %v1253_v49 = vld [vmem:[%s1382_s11 + $0x160] sm:$0xff]   ;;  %v1255_v51 = vld [vmem:[%s1382_s11 + $0x158] sm:$0xff]  }
  0x33   : > { %1107 = vmatpush3.bf16.msra.mxu0 %v1223_v21  ;;  %v1252_v48 = vld [vmem:[%s1382_s11 + $0x128] sm:$0xff]   ;;  %v1254_v50 = vld [vmem:[%s1382_s11 + $0x120] sm:$0xff]   ;;  %v1256_v52 = vld [vmem:[%s1382_s11 + $0x118] sm:$0xff]  }
  0x34   : > { %1129 = vmatpush3.bf16.msra.mxu1 %v1224_v22  ;;  %1108 = vmatprep.subr.bf16.mxu0 %v1225_v23  ;;  %v1257_v53 = vld [vmem:[%s1382_s11 + $0x150] sm:$0xff]   ;;  %v1259_v56 = vld [vmem:[%s1382_s11 + $0x148] sm:$0xff]   ;;  %v1261_v58 = vld [vmem:[%s1382_s11 + $0x140] sm:$0xff]  }
  0x35   : > { %1130 = vmatprep.subr.bf16.mxu1 %v1226_v24  ;;  %v1258_v55 = vld [vmem:[%s1382_s11 + $0x110] sm:$0xff]   ;;  %v1260_v57 = vld [vmem:[%s1382_s11 + $0x108] sm:$0xff]   ;;  %v1262_v59 = vld [vmem:[%s1382_s11 + $0x100] sm:$0xff]  }
  0x36   : > { %v1263_v60 = vld [vmem:[%s1384_s12 + $0x10] ss:$24 sps:$4 sm:$0xff]  }
  0x37   : > { %1109 = vmatpush3.bf16.msra.mxu0 %v1227_v25  ;;  %v331_v13 = vld [vmem:[#allocation2] sm:$0xff]  ;;  %v332_v20 = vld [vmem:[#allocation2 + $0x8] sm:$0xff] }
  0x38   : > { %1131 = vmatpush3.bf16.msra.mxu1 %v1228_v26  ;;  %1110 = vmatprep.subr.bf16.mxu0 %v1229_v27 }
  0x39   : > { %1132 = vmatprep.subr.bf16.mxu1 %v1230_v28 }
  0x3b   : > { %1111 = vmatpush3.bf16.msra.mxu0 %v1231_v29 }
  0x3c   : > { %1133 = vmatpush3.bf16.msra.mxu1 %v1232_v30  ;;  %1112 = vmatprep.subr.bf16.mxu0 %v1233_v31 }
  0x3d   : > { %1134 = vmatprep.subr.bf16.mxu1 %v1234_v32 }
  0x3f   : > { %1113 = vmatpush3.bf16.msra.mxu0 %v1235_v33 }
  0x40   : > { %1135 = vmatpush3.bf16.msra.mxu1 %v1236_v34  ;;  %1114 = vmatprep.subr.bf16.mxu0 %v1237_v35 }
  0x41   : > { %1136 = vmatprep.subr.bf16.mxu1 %v1238_v36 }
  0x43   : > { %1115 = vmatpush3.bf16.msra.mxu0 %v1239_v37 }
  0x44   : > { %1137 = vmatpush3.bf16.msra.mxu1 %v1240_v38  ;;  %1144 = vmatprep.subr.bf16.mxu0 %v1247_v43 }
  0x46   : > { %786 = vmatmul.mubr.bf16.vlgmr.msra.gmra.mxu0 %v1241_v39 }
  0x47   : > { %827 = vmatmul.mubr.bf16.vlgmr.msra.gmra.mxu1 %v1244_v41  ;;  %1145 = vmatpush3.bf16.msra.mxu0 %v1248_v44 }
  0x48   : > { %1146 = vmatprep.subr.bf16.mxu0 %v1249_v45  ;;  %867 = vmatprep.mubr.bf16.mxu0 %v1265_v54 }
  0x4b   : > { %1147 = vmatpush3.bf16.msra.mxu0 %v1250_v46 }
  0x4c   : > { %1148 = vmatprep.subr.bf16.mxu0 %v1251_v47 }
  0x4f   : > { %1149 = vmatpush3.bf16.msra.mxu0 %v1252_v48 }
  0x50   : > { %1150 = vmatprep.subr.bf16.mxu0 %v1253_v49 }
  0x53   : > { %1151 = vmatpush3.bf16.msra.mxu0 %v1254_v50 }
  0x54   : > { %1152 = vmatprep.subr.bf16.mxu0 %v1255_v51 }
  0x57   : > { %1153 = vmatpush3.bf16.msra.mxu0 %v1256_v52 }
  0x58   : > { %1154 = vmatprep.subr.bf16.mxu0 %v1257_v53 }
  0x5b   : > { %1155 = vmatpush3.bf16.msra.mxu0 %v1258_v55 }
  0x5c   : > { %1156 = vmatprep.subr.bf16.mxu0 %v1259_v56 }
  0x5f   : > { %1157 = vmatpush3.bf16.msra.mxu0 %v1260_v57 }
  0x60   : > { %1158 = vmatprep.subr.bf16.mxu0 %v1261_v58 }
  0x63   : > { %1159 = vmatpush3.bf16.msra.mxu0 %v1262_v59 }
  0x66   : > { %868 = vmatmul.mubr.bf16.vlgmr.msra.gmra.mxu0 %v1263_v60 }
 0x106   : > { %v1116_v61 = vpop.f32.mrf.mxu0 }
 0x107   : > { %v1138_v62 = vpop.f32.mrf.mxu1 }
 0x108   : > { %v1117_v63 = vpop.f32.mrf.mxu0 }
 0x109   : > { %v1139_v0 = vpop.f32.mrf.mxu1  ;;  %v1118_v4 = vadd.f32 %v1117_v63, %v1116_v61 }
 0x10a   : > { %v1119_v1 = vpop.f32.mrf.mxu0  ;;  %v1140_v5 = vadd.f32 %v1139_v0, %v1138_v62 }
 0x10b   : > { %v1141_v2 = vpop.f32.mrf.mxu1 }
 0x10c   : > { %v1120_v3 = vpop.f32.mrf.mxu0  ;;  %v829_v9 = vadd.f32 %v1140_v5, %v1118_v4 }
 0x10d   : > { %v1142_v6 = vpop.f32.mrf.mxu1  ;;  %v1121_v10 = vadd.f32 %v1120_v3, %v1119_v1 }
 0x10e   : > { %v1143_v11 = vadd.f32 %v1142_v6, %v1141_v2 }
 0x110   : > { %v832_v17 = vadd.f32 %v1143_v11, %v1121_v10 }
 0x126   : > { %v1160_v7 = vpop.f32.mrf.mxu0 }
 0x128   : > { %v1161_v8 = vpop.f32.mrf.mxu0 }
 0x129   : > { %v1162_v12 = vadd.f32 %v1161_v8, %v1160_v7 }
 0x12a   : > { %v1163_v14 = vpop.f32.mrf.mxu0 }
 0x12b   : > { %v870_v15 = vadd.f32 %v1162_v12, %v829_v9 }
 0x12c   : > { %v1164_v16 = vpop.f32.mrf.mxu0 }
 0x12d   : > { %v876_v18 = vadd.f32 %v870_v15, %v331_v13  ;;  %v1165_v19 = vadd.f32 %v1164_v16, %v1163_v14 }
 0x12f   : > { %878 = vst [vmem:[#allocation2] sm:$0xff] %v876_v18  ;;  %v873_v21 = vadd.f32 %v1165_v19, %v832_v17  ;;  %883 = sbr.rel (%p1092_p11) target bundleno = 320 (0x140), region = 67 }
 0x131   : > { %v877_v22 = vadd.f32 %v873_v21, %v332_v20 }
 0x133   : > { %879 = vst [vmem:[#allocation2 + $0x8] sm:$0xff] %v877_v22 }
 0x134   : > { %v1093_v24 = vld [vmem:[%s1471_s2] ss:$0 sm:$0xff] }
 0x135   : > { %v1094_v25 = vld [vmem:[%s1472_s3] ss:$0 sm:$0xff] }
 0x136   : > { %v884_v23 = vld [vmem:[#allocation2] sm:$0xff] }
 0x137   : > { %v893_v26 = vmul.f32 %v1093_v24, %v884_v23 }
 0x139   : > { %v902_v29 = vadd.f32 %v1094_v25, %v893_v26 }
 0x13a   : > { %v885_v27 = vld [vmem:[#allocation2 + $0x8] sm:$0xff] }
 0x13b   : > { %v894_v28 = vmul.f32 %v1093_v24, %v885_v27  ;;  %904 = vst [vmem:[%s1473_s4] sm:$0xff] %v902_v29 }
 0x13d   : > { %v903_v30 = vadd.f32 %v1094_v25, %v894_v28 }
 0x13f   : > { %905 = vst [vmem:[%s1473_s4 + $0x8] sm:$0xff] %v903_v30 }
 0x140 PF: > { %s14_s19 = sadd.s32 1, %s1304_s19   ;;  %s1474_s15 = smov %s1292_s16 }
 0x141   : > { %p11_p12 = scmp.ge.s32.totalorder %s14_s19, 4   ;;  %s1475_s16 = smov %s1367_s23 }
 0x142   : > { %s1476_s17 = smov %s1300_s18  ;;  %s1477_s18 = smov %s1479_s20 }
 0x143   :  { %13 = sbr.rel (!%p11_p12) target bundleno = 3 (0x3), region = 111 }

</bundles_post_ra>
